<compile_context>
chip_gen: v7x
topology: tpu7x:2x2x1
jax: 0.10.0
libtpu: 0.0.40
codegen_flags: <defaults>
</compile_context>

<pallas_src>
import functools
import math

import jax
import jax.numpy as jnp
from jax.experimental import pallas as pl
from jax.experimental.pallas import tpu as pltpu


_MXU_DTYPE = jnp.bfloat16  # MXU operand dtype (f32 accumulation everywhere)


def _gelu_tanh(x):
    # GPT-2 "approximate" (tanh) GELU, matching ops.gelu(..., approximate=True).
    c = math.sqrt(2.0 / math.pi)
    return 0.5 * x * (1.0 + jnp.tanh(c * (x + 0.044715 * x * x * x)))


def _device_kind():
    try:
        return jax.devices()[0].device_kind.lower()
    except Exception:
        return ""


def _vmem_capacity_bytes():
    """Physical VMEM per core; conservative 64 MiB fallback if unqueryable."""
    try:
        info = pltpu.get_tpu_info()
        for attr in ("vmem_capacity_bytes", "vmem_bytes", "vmem_size_bytes"):
            v = getattr(info, attr, None)
            if isinstance(v, int) and v > 0:
                return v
    except Exception:
        pass
    return 64 * 1024 * 1024


def _select_gelu_dtype():
    # bf16 VPU/EUP exist on v6e/v7x; v5e (and older) keep the GELU in f32.
    kind = _device_kind()
    if ("v6" in kind) or ("v7" in kind):
        return jnp.bfloat16
    return jnp.float32


def _has_two_tensorcores():
    kind = _device_kind()
    return ("v7" in kind) or ("v5p" in kind) or ("v4" in kind)


def _divisor_tiles(m, max_tm):
    """Multiples of 8 that divide m (descending), capped at max_tm; else [m]."""
    cands = [d for d in range(8, min(m, max_tm) + 1, 8) if m % d == 0]
    cands.sort(reverse=True)
    return cands or [m]


# ----------------------------------------------------------------------------
# Kernels
# ----------------------------------------------------------------------------
def _mlp_kernel_resident(x_ref, w1_ref, b1_ref, w2_ref, b2_ref, o_ref, *,
                         gelu_dtype):
    """1-D grid over M tiles; full weights are VMEM-resident (constant index)."""
    x = x_ref[...].astype(_MXU_DTYPE)
    w1 = w1_ref[...].astype(_MXU_DTYPE)      # no-op if caller passed bf16 weights
    h = jnp.dot(x, w1, preferred_element_type=jnp.float32)
    h = (h + b1_ref[...]).astype(gelu_dtype)  # bias add in f32, GELU in gelu_dtype
    g = _gelu_tanh(h).astype(_MXU_DTYPE)
    w2 = w2_ref[...].astype(_MXU_DTYPE)
    out = jnp.dot(g, w2, preferred_element_type=jnp.float32) + b2_ref[...]
    o_ref[...] = out.astype(o_ref.dtype)


def _mlp_kernel_tiled(x_ref, w1_ref, b1_ref, w2_ref, b2_ref, o_ref, acc_ref, *,
                      gelu_dtype):
    """2-D grid (M tiles, FF tiles); FF is the reduction axis of the 2nd matmul."""
    j = pl.program_id(1)

    @pl.when(j == 0)
    def _():
        # Fold the output bias into the accumulator init.
        acc_ref[...] = jnp.broadcast_to(b2_ref[...], acc_ref.shape)

    x = x_ref[...].astype(_MXU_DTYPE)
    w1 = w1_ref[...].astype(_MXU_DTYPE)
    h = jnp.dot(x, w1, preferred_element_type=jnp.float32)
    h = (h + b1_ref[...]).astype(gelu_dtype)
    g = _gelu_tanh(h).astype(_MXU_DTYPE)
    w2 = w2_ref[...].astype(_MXU_DTYPE)
    acc_ref[...] += jnp.dot(g, w2, preferred_element_type=jnp.float32)

    @pl.when(j == pl.num_programs(1) - 1)
    def _():
        o_ref[...] = acc_ref[...].astype(o_ref.dtype)


# ----------------------------------------------------------------------------
# Wrapper
# ----------------------------------------------------------------------------
def gpt2_mlp(hidden_states, w_fc, b_fc, w_proj, b_proj, *,
             max_tm=512, gelu_dtype=None,
             vmem_budget_bytes=None, vmem_limit_bytes=None):
    """hidden_states: [B,S,H]; w_fc: [H,FF]; b_fc: [FF]; w_proj: [FF,H]; b_proj: [H].

    Weights may be f32 or (preferably, caller-cached) bf16; they are passed to
    the kernel untouched and cast on-chip if needed.
    """
    B, S, H = hidden_states.shape
    FF = w_fc.shape[1]
    assert w_fc.shape == (H, FF) and w_proj.shape == (FF, H)
    assert b_fc.shape == (FF,) and b_proj.shape == (H,)
    M = B * S
    out_dtype = hidden_states.dtype

    gdt = _select_gelu_dtype() if gelu_dtype is None else gelu_dtype

    vmem_cap = _vmem_capacity_bytes()
    if vmem_budget_bytes is None:
        vmem_budget_bytes = int(vmem_cap * 0.72)   # headroom for Mosaic scratch
    if vmem_limit_bytes is None:
        vmem_limit_bytes = int(vmem_cap * 0.85)

    x_isz = jnp.dtype(hidden_states.dtype).itemsize
    w_isz = jnp.dtype(w_fc.dtype).itemsize
    out_isz = jnp.dtype(out_dtype).itemsize
    g_isz = jnp.dtype(gdt).itemsize
    mxu_isz = jnp.dtype(_MXU_DTYPE).itemsize
    w_cast_extra = (2 * H * mxu_isz) if w_isz != mxu_isz else 0  # per-FF-column cast copy

    def resident_fp(tm):
        wt = 2 * H * FF * w_isz + FF * w_cast_extra   # W1+W2 single-buffered (+cast copy)
        bias = (FF + H) * 4
        xin = 2 * tm * H * x_isz                      # double-buffered x tile
        out = 2 * tm * H * out_isz                    # double-buffered out tile
        inter = tm * FF * (4 + g_isz + mxu_isz)       # f32 dot result + GELU slab + bf16 g
        return wt + bias + xin + out + inter

    def tiled_fp(tm, tf):
        wt = 2 * 2 * H * tf * w_isz + tf * w_cast_extra   # W slices, double-buffered
        bias = 2 * (tf + H) * 4
        xin = 2 * tm * H * x_isz
        out = 2 * tm * H * out_isz
        acc = tm * H * 4
        inter = tm * tf * (4 + g_isz + mxu_isz)
        return wt + bias + xin + out + acc + inter

    # --- tile selection ------------------------------------------------------
    tm_cands = _divisor_tiles(M, max_tm)
    if _has_two_tensorcores():
        # Prefer >= 2 M tiles so both TensorCores get work (v7x).
        pref = [t for t in tm_cands if M // t >= 2]
        if pref:
            tm_cands = pref + [t for t in tm_cands if t not in pref]

    tm = tf = None
    resident = False
    for cand in tm_cands:
        if resident_fp(cand) <= vmem_budget_bytes:
            tm, tf, resident = cand, FF, True
            break
    if tm is None:
        tf_cands = [c for c in (2048, 1536, 1024, 768, 512, 384, 256, 128)
                    if FF % c == 0] or [FF]
        for tmc in tm_cands:              # maximize tm first (weight re-reads ~ n_m)
            for tfc in tf_cands:          # then the largest feasible FF slice
                if tiled_fp(tmc, tfc) <= vmem_budget_bytes:
                    tm, tf = tmc, tfc
                    break
            if tm is not None:
                break
        if tm is None:
            # TODO(synk): pad M / FF to friendlier sizes instead of tiny last-resort tiles.
            tm, tf = tm_cands[-1], tf_cands[-1]

    n_m = M // tm
    n_f = FF // tf

    # --- operands (no wrapper-side bf16 materialization of x / weights) -----
    x2d = hidden_states.reshape(M, H)
    b1 = b_fc.reshape(1, FF).astype(jnp.float32)
    b2 = b_proj.reshape(1, H).astype(jnp.float32)

    weight_streams = 1 if resident else n_m
    cost = pl.CostEstimate(
        flops=4 * M * H * FF,
        transcendentals=M * FF,
        bytes_accessed=(M * H * x_isz + M * H * out_isz
                        + weight_streams * 2 * H * FF * w_isz
                        + (FF + H) * 4),
    )
    cparams = pltpu.CompilerParams(
        dimension_semantics=("parallel",) if resident else ("parallel", "arbitrary"),
        vmem_limit_bytes=vmem_limit_bytes,
    )

    if resident:
        kernel = functools.partial(_mlp_kernel_resident, gelu_dtype=gdt)

        def run(single_buffer_weights):
            def wspec(shape):
                if single_buffer_weights:
                    # Constant index map -> second buffer is dead weight; reclaim it.
                    return pl.BlockSpec(shape, lambda i: (0, 0),
                                        pipeline_mode=pl.Buffered(1))
                return pl.BlockSpec(shape, lambda i: (0, 0))

            call = pl.pallas_call(
                kernel,
                out_shape=jax.ShapeDtypeStruct((M, H), out_dtype),
                grid_spec=pltpu.PrefetchScalarGridSpec(
                    num_scalar_prefetch=0,
                    grid=(n_m,),
                    in_specs=[
                        pl.BlockSpec((tm, H), lambda i: (i, 0)),   # x tile
                        wspec((H, FF)),                            # W1 (resident)
                        wspec((1, FF)),                            # b1 (resident)
                        wspec((FF, H)),                            # W2 (resident)
                        wspec((1, H)),                             # b2 (resident)
                    ],
                    out_specs=pl.BlockSpec((tm, H), lambda i: (i, 0)),
                ),
                compiler_params=cparams,
                cost_estimate=cost,
            )
            return jax.block_until_ready(call(x2d, w_fc, b1, w_proj, b2))

        try:
            out2d = run(True)
        except Exception:
            # pl.Buffered(1) unsupported on this jax/Mosaic -> default double buffering.
            out2d = run(False)
    else:
        kernel = functools.partial(_mlp_kernel_tiled, gelu_dtype=gdt)
        out2d = pl.pallas_call(
            kernel,
            out_shape=jax.ShapeDtypeStruct((M, H), out_dtype),
            grid_spec=pltpu.PrefetchScalarGridSpec(
                num_scalar_prefetch=0,
                grid=(n_m, n_f),
                in_specs=[
                    pl.BlockSpec((tm, H), lambda i, j: (i, 0)),   # x tile (reused over j)
                    pl.BlockSpec((H, tf), lambda i, j: (0, j)),   # W1 slice
                    pl.BlockSpec((1, tf), lambda i, j: (0, j)),   # b1 slice
                    pl.BlockSpec((tf, H), lambda i, j: (j, 0)),   # W2 slice
                    pl.BlockSpec((1, H), lambda i, j: (0, 0)),    # b2 (resident)
                ],
                out_specs=pl.BlockSpec((tm, H), lambda i, j: (i, 0)),
                scratch_shapes=[pltpu.VMEM((tm, H), jnp.float32)],
            ),
            compiler_params=cparams,
            cost_estimate=cost,
        )(x2d, w_fc, b1, w_proj, b2)

    return out2d.reshape(B, S, H)


if __name__ == "__main__":
    # Small, TPU-tile-friendly stand-ins for GPT2Config (hidden=768, ffn=3072).
    B, S, H, FF = 2, 64, 256, 1024  # M = B*S = 128

    key = jax.random.PRNGKey(0)
    k_x, k_w1, k_b1, k_w2, k_b2 = jax.random.split(key, 5)

    x = jax.random.normal(k_x, (B, S, H), dtype=jnp.float32)
    # Caller-cached bf16 weights (one-time conversion outside the per-call path).
    # nn.LinearTransposed stores W as [in_features, out_features].
    w_fc = (jax.random.normal(k_w1, (H, FF), dtype=jnp.float32) * 0.02).astype(jnp.bfloat16)
    b_fc = jax.random.normal(k_b1, (FF,), dtype=jnp.float32) * 0.02
    w_proj = (jax.random.normal(k_w2, (FF, H), dtype=jnp.float32) * 0.02).astype(jnp.bfloat16)
    b_proj = jax.random.normal(k_b2, (H,), dtype=jnp.float32) * 0.02

    out = gpt2_mlp(x, w_fc, b_fc, w_proj, b_proj)
    out = jax.block_until_ready(out)
    assert out.shape == (B, S, H)

    # Plain-JAX reference mirroring the kernel's bf16-operand / f32-accum math.
    gdt = _select_gelu_dtype()
    f32 = jnp.float32
    x2d_ref = x.reshape(B * S, H).astype(jnp.bfloat16).astype(f32)
    h_ref = x2d_ref @ w_fc.astype(f32) + b_fc
    g_ref = _gelu_tanh(h_ref.astype(gdt)).astype(jnp.bfloat16).astype(f32)
    ref = (g_ref @ w_proj.astype(f32) + b_proj).reshape(B, S, H)

    assert jnp.allclose(out, ref.astype(out.dtype), atol=1e-2, rtol=1e-2), \
        "mismatch vs reference"

    print("KERNEL_OK")
</pallas_src>

<mosaic_0001>
module attributes {stable_mosaic.version = 11 : i64} {
  func.func @_mlp_kernel_resident(%arg0: i32, %arg1: memref<128x256xf32, #tpu.memory_space<vmem>>, %arg2: memref<256x1024xbf16, #tpu.memory_space<vmem>>, %arg3: memref<1x1024xf32, #tpu.memory_space<vmem>>, %arg4: memref<1024x256xbf16, #tpu.memory_space<vmem>>, %arg5: memref<1x256xf32, #tpu.memory_space<vmem>>, %arg6: memref<128x256xf32, #tpu.memory_space<vmem>>) attributes {dimension_semantics = [#tpu.dimension_semantics<parallel>], iteration_bounds = array<i64: 1>, scalar_prefetch = 0 : i64, scratch_operands = 0 : i64, tpu.core_type = #tpu.core_type<tc>, window_params = [{transform_indices = @transform_0, window_bounds = array<i64: 128, 256>}, {pipeline_mode = #tpu.pipeline_mode<synchronous>, transform_indices = @transform_1, window_bounds = array<i64: 256, 1024>}, {pipeline_mode = #tpu.pipeline_mode<synchronous>, transform_indices = @transform_2, window_bounds = array<i64: 1, 1024>}, {pipeline_mode = #tpu.pipeline_mode<synchronous>, transform_indices = @transform_3, window_bounds = array<i64: 1024, 256>}, {pipeline_mode = #tpu.pipeline_mode<synchronous>, transform_indices = @transform_4, window_bounds = array<i64: 1, 256>}, {transform_indices = @transform_5, window_bounds = array<i64: 128, 256>}]} {
    %c0 = arith.constant 0 : index
    %c0_0 = arith.constant 0 : index
    %0 = vector.load %arg1[%c0, %c0_0] : memref<128x256xf32, #tpu.memory_space<vmem>>, vector<128x256xf32>
    %1 = arith.truncf %0 : vector<128x256xf32> to vector<128x256xbf16>
    %c0_1 = arith.constant 0 : index
    %c0_2 = arith.constant 0 : index
    %2 = vector.load %arg2[%c0_1, %c0_2] : memref<256x1024xbf16, #tpu.memory_space<vmem>>, vector<256x1024xbf16>
    %cst = arith.constant dense<0.000000e+00> : vector<128x1024xf32>
    %3 = tpu.matmul %1, %2, %cst {dimension_numbers = #tpu.dot_dimension_numbers<[1], [0], [0], [1], [0, 0, 1, 1], [], []>} : vector<128x256xbf16>, vector<256x1024xbf16>, vector<128x1024xf32> -> vector<128x1024xf32>
    %c0_3 = arith.constant 0 : index
    %c0_4 = arith.constant 0 : index
    %4 = vector.load %arg3[%c0_3, %c0_4] : memref<1x1024xf32, #tpu.memory_space<vmem>>, vector<1x1024xf32>
    %5 = vector.broadcast %4 : vector<1x1024xf32> to vector<128x1024xf32>
    %6 = arith.addf %3, %5 : vector<128x1024xf32>
    %cst_5 = arith.constant 5.000000e-01 : f32
    %7 = vector.broadcast %cst_5 : f32 to vector<128x1024xf32>
    %8 = arith.mulf %7, %6 : vector<128x1024xf32>
    %cst_6 = arith.constant 4.471500e-02 : f32
    %9 = vector.broadcast %cst_6 : f32 to vector<128x1024xf32>
    %10 = arith.mulf %9, %6 : vector<128x1024xf32>
    %11 = arith.mulf %10, %6 : vector<128x1024xf32>
    %12 = arith.mulf %11, %6 : vector<128x1024xf32>
    %13 = arith.addf %6, %12 : vector<128x1024xf32>
    %cst_7 = arith.constant 0.797884583 : f32
    %14 = vector.broadcast %cst_7 : f32 to vector<128x1024xf32>
    %15 = arith.mulf %14, %13 : vector<128x1024xf32>
    %16 = math.tanh %15 : vector<128x1024xf32>
    %cst_8 = arith.constant 1.000000e+00 : f32
    %17 = vector.broadcast %cst_8 : f32 to vector<128x1024xf32>
    %18 = arith.addf %17, %16 : vector<128x1024xf32>
    %19 = arith.mulf %8, %18 : vector<128x1024xf32>
    %20 = arith.truncf %19 : vector<128x1024xf32> to vector<128x1024xbf16>
    %c0_9 = arith.constant 0 : index
    %c0_10 = arith.constant 0 : index
    %21 = vector.load %arg4[%c0_9, %c0_10] : memref<1024x256xbf16, #tpu.memory_space<vmem>>, vector<1024x256xbf16>
    %cst_11 = arith.constant dense<0.000000e+00> : vector<128x256xf32>
    %22 = tpu.matmul %20, %21, %cst_11 {dimension_numbers = #tpu.dot_dimension_numbers<[1], [0], [0], [1], [0, 0, 1, 1], [], []>} : vector<128x1024xbf16>, vector<1024x256xbf16>, vector<128x256xf32> -> vector<128x256xf32>
    %c0_12 = arith.constant 0 : index
    %c0_13 = arith.constant 0 : index
    %23 = vector.load %arg5[%c0_12, %c0_13] : memref<1x256xf32, #tpu.memory_space<vmem>>, vector<1x256xf32>
    %24 = vector.broadcast %23 : vector<1x256xf32> to vector<128x256xf32>
    %25 = arith.addf %22, %24 : vector<128x256xf32>
    %c0_14 = arith.constant 0 : index
    %c0_15 = arith.constant 0 : index
    %26 = vector.load %arg6[%c0_14, %c0_15] : memref<128x256xf32, #tpu.memory_space<vmem>>, vector<128x256xf32>
    tpu.vector_store %arg6[%c0_14, %c0_15], %25 {strides = array<i32>} : memref<128x256xf32, #tpu.memory_space<vmem>>, vector<128x256xf32>,
    return
  }
  func.func @transform_0(%arg0: i32) -> (i32, i32) {
    %c0_i32 = arith.constant 0 : i32
    %c0_i32_0 = arith.constant 0 : i32
    return %arg0, %c0_i32 : i32, i32
  }
  func.func @transform_1(%arg0: i32) -> (i32, i32) {
    %c0_i32 = arith.constant 0 : i32
    %c0_i32_0 = arith.constant 0 : i32
    %c0_i32_1 = arith.constant 0 : i32
    return %c0_i32, %c0_i32_0 : i32, i32
  }
  func.func @transform_2(%arg0: i32) -> (i32, i32) {
    %c0_i32 = arith.constant 0 : i32
    %c0_i32_0 = arith.constant 0 : i32
    %c0_i32_1 = arith.constant 0 : i32
    return %c0_i32, %c0_i32_0 : i32, i32
  }
  func.func @transform_3(%arg0: i32) -> (i32, i32) {
    %c0_i32 = arith.constant 0 : i32
    %c0_i32_0 = arith.constant 0 : i32
    %c0_i32_1 = arith.constant 0 : i32
    return %c0_i32, %c0_i32_0 : i32, i32
  }
  func.func @transform_4(%arg0: i32) -> (i32, i32) {
    %c0_i32 = arith.constant 0 : i32
    %c0_i32_0 = arith.constant 0 : i32
    %c0_i32_1 = arith.constant 0 : i32
    return %c0_i32, %c0_i32_0 : i32, i32
  }
  func.func @transform_5(%arg0: i32) -> (i32, i32) {
    %c0_i32 = arith.constant 0 : i32
    %c0_i32_0 = arith.constant 0 : i32
    return %arg0, %c0_i32 : i32, i32
  }
}

module attributes {stable_mosaic.version = 11 : i64} {
  func.func @_mlp_kernel_resident(%arg0: i32, %arg1: memref<128x256xf32, #tpu.memory_space<vmem>>, %arg2: memref<256x1024xbf16, #tpu.memory_space<vmem>>, %arg3: memref<1x1024xf32, #tpu.memory_space<vmem>>, %arg4: memref<1024x256xbf16, #tpu.memory_space<vmem>>, %arg5: memref<1x256xf32, #tpu.memory_space<vmem>>, %arg6: memref<128x256xf32, #tpu.memory_space<vmem>>) attributes {dimension_semantics = [#tpu.dimension_semantics<parallel>], iteration_bounds = array<i64: 1>, scalar_prefetch = 0 : i64, scratch_operands = 0 : i64, tpu.core_type = #tpu.core_type<tc>, window_params = [{transform_indices = @transform_0, window_bounds = array<i64: 128, 256>}, {pipeline_mode = #tpu.pipeline_mode<synchronous>, transform_indices = @transform_1, window_bounds = array<i64: 256, 1024>}, {pipeline_mode = #tpu.pipeline_mode<synchronous>, transform_indices = @transform_2, window_bounds = array<i64: 1, 1024>}, {pipeline_mode = #tpu.pipeline_mode<synchronous>, transform_indices = @transform_3, window_bounds = array<i64: 1024, 256>}, {pipeline_mode = #tpu.pipeline_mode<synchronous>, transform_indices = @transform_4, window_bounds = array<i64: 1, 256>}, {transform_indices = @transform_5, window_bounds = array<i64: 128, 256>}]} {
    %c0 = arith.constant 0 : index
    %c0_0 = arith.constant 0 : index
    %0 = vector.load %arg1[%c0, %c0_0] : memref<128x256xf32, #tpu.memory_space<vmem>>, vector<128x256xf32>
    %1 = arith.truncf %0 : vector<128x256xf32> to vector<128x256xbf16>
    %c0_1 = arith.constant 0 : index
    %c0_2 = arith.constant 0 : index
    %2 = vector.load %arg2[%c0_1, %c0_2] : memref<256x1024xbf16, #tpu.memory_space<vmem>>, vector<256x1024xbf16>
    %cst = arith.constant dense<0.000000e+00> : vector<128x1024xf32>
    %3 = tpu.matmul %1, %2, %cst {dimension_numbers = #tpu.dot_dimension_numbers<[1], [0], [0], [1], [0, 0, 1, 1], [], []>} : vector<128x256xbf16>, vector<256x1024xbf16>, vector<128x1024xf32> -> vector<128x1024xf32>
    %c0_3 = arith.constant 0 : index
    %c0_4 = arith.constant 0 : index
    %4 = vector.load %arg3[%c0_3, %c0_4] : memref<1x1024xf32, #tpu.memory_space<vmem>>, vector<1x1024xf32>
    %5 = vector.broadcast %4 : vector<1x1024xf32> to vector<128x1024xf32>
    %6 = arith.addf %3, %5 : vector<128x1024xf32>
    %cst_5 = arith.constant 5.000000e-01 : f32
    %7 = vector.broadcast %cst_5 : f32 to vector<128x1024xf32>
    %8 = arith.mulf %7, %6 : vector<128x1024xf32>
    %cst_6 = arith.constant 4.471500e-02 : f32
    %9 = vector.broadcast %cst_6 : f32 to vector<128x1024xf32>
    %10 = arith.mulf %9, %6 : vector<128x1024xf32>
    %11 = arith.mulf %10, %6 : vector<128x1024xf32>
    %12 = arith.mulf %11, %6 : vector<128x1024xf32>
    %13 = arith.addf %6, %12 : vector<128x1024xf32>
    %cst_7 = arith.constant 0.797884583 : f32
    %14 = vector.broadcast %cst_7 : f32 to vector<128x1024xf32>
    %15 = arith.mulf %14, %13 : vector<128x1024xf32>
    %16 = math.tanh %15 : vector<128x1024xf32>
    %cst_8 = arith.constant 1.000000e+00 : f32
    %17 = vector.broadcast %cst_8 : f32 to vector<128x1024xf32>
    %18 = arith.addf %17, %16 : vector<128x1024xf32>
    %19 = arith.mulf %8, %18 : vector<128x1024xf32>
    %20 = arith.truncf %19 : vector<128x1024xf32> to vector<128x1024xbf16>
    %c0_9 = arith.constant 0 : index
    %c0_10 = arith.constant 0 : index
    %21 = vector.load %arg4[%c0_9, %c0_10] : memref<1024x256xbf16, #tpu.memory_space<vmem>>, vector<1024x256xbf16>
    %cst_11 = arith.constant dense<0.000000e+00> : vector<128x256xf32>
    %22 = tpu.matmul %20, %21, %cst_11 {dimension_numbers = #tpu.dot_dimension_numbers<[1], [0], [0], [1], [0, 0, 1, 1], [], []>} : vector<128x1024xbf16>, vector<1024x256xbf16>, vector<128x256xf32> -> vector<128x256xf32>
    %c0_12 = arith.constant 0 : index
    %c0_13 = arith.constant 0 : index
    %23 = vector.load %arg5[%c0_12, %c0_13] : memref<1x256xf32, #tpu.memory_space<vmem>>, vector<1x256xf32>
    %24 = vector.broadcast %23 : vector<1x256xf32> to vector<128x256xf32>
    %25 = arith.addf %22, %24 : vector<128x256xf32>
    %c0_14 = arith.constant 0 : index
    %c0_15 = arith.constant 0 : index
    %26 = vector.load %arg6[%c0_14, %c0_15] : memref<128x256xf32, #tpu.memory_space<vmem>>, vector<128x256xf32>
    tpu.vector_store %arg6[%c0_14, %c0_15], %25 {strides = array<i32>} : memref<128x256xf32, #tpu.memory_space<vmem>>, vector<128x256xf32>,
    return
  }
  func.func @transform_0(%arg0: i32) -> (i32, i32) {
    %c0_i32 = arith.constant 0 : i32
    %c0_i32_0 = arith.constant 0 : i32
    return %arg0, %c0_i32 : i32, i32
  }
  func.func @transform_1(%arg0: i32) -> (i32, i32) {
    %c0_i32 = arith.constant 0 : i32
    %c0_i32_0 = arith.constant 0 : i32
    %c0_i32_1 = arith.constant 0 : i32
    return %c0_i32, %c0_i32_0 : i32, i32
  }
  func.func @transform_2(%arg0: i32) -> (i32, i32) {
    %c0_i32 = arith.constant 0 : i32
    %c0_i32_0 = arith.constant 0 : i32
    %c0_i32_1 = arith.constant 0 : i32
    return %c0_i32, %c0_i32_0 : i32, i32
  }
  func.func @transform_3(%arg0: i32) -> (i32, i32) {
    %c0_i32 = arith.constant 0 : i32
    %c0_i32_0 = arith.constant 0 : i32
    %c0_i32_1 = arith.constant 0 : i32
    return %c0_i32, %c0_i32_0 : i32, i32
  }
  func.func @transform_4(%arg0: i32) -> (i32, i32) {
    %c0_i32 = arith.constant 0 : i32
    %c0_i32_0 = arith.constant 0 : i32
    %c0_i32_1 = arith.constant 0 : i32
    return %c0_i32, %c0_i32_0 : i32, i32
  }
  func.func @transform_5(%arg0: i32) -> (i32, i32) {
    %c0_i32 = arith.constant 0 : i32
    %c0_i32_0 = arith.constant 0 : i32
    return %arg0, %c0_i32 : i32, i32
  }
}

</mosaic_0001>

<bundles_post_ra>
// kernel: tpu_custom_call.1
= control target key start
LH: loop header
LB: loop body
LE: loop exit
PB: predicated region body
PF: predicated region fallthrough
CT: control target
= control target key end

     0   :  { %10 = vsyncpa [#allocation3], 0  ;;  %s6850_s0 = inlined_call_operand.hbm [shape: f32[128,256], index: 0, kind: input, shape index: {}]   ;;  %s6851_s1 = inlined_call_operand.hbm [shape: bf16[256,1024], index: 1, kind: input, shape index: {}]   ;;  %s6852_s2 = inlined_call_operand.hbm [shape: f32[1,1024], index: 2, kind: input, shape index: {}]   ;;  %s6853_s3 = inlined_call_operand.hbm [shape: bf16[1024,256], index: 3, kind: input, shape index: {}]   ;;  %s6854_s4 = inlined_call_operand.vmem [shape: f32[1,256], index: 4, kind: input, shape index: {}]   ;;  %s6855_s5 = inlined_call_operand.hbm [shape: f32[128,256], index: 5, kind: output, shape index: {}]  }
   0x1   :  { %11 = vsyncpa [#allocation6], 0 }
   0x2   :  { %12 = vsyncpa [#allocation9], 0 }
   0x3   :  { %13 = vsyncpa [#allocation4], 0  ;;  %s4846_s18 = smov [#allocation5]   ;;  %s4728_s22 = scalar_lea.hbm %s6851_s1, 16384 }
   0x4   :  { %s31_s19 = sshll.u32 %s4846_s18, 4  ;;  %p4729_p0 = scmp.ne.s32.totalorder %s6851_s1, %s4728_s22  ;;  %s32_s19 = int_to_ptr.vmem [resolvable:$true] %s31_s19 }
   0x5   :  { %p4732_p1 = scmp.lt.u32.totalorder %s4728_s22, %s6851_s1 }
   0x7   :  { %p4734_p2 = pnand %p4732_p1, %p4729_p0 }
   0x9   :  { %4737 = shalt.err (!%p4734_p2)
}
   0xa   :  { %s4738_s27 = scalar_lea.vmem %s32_s19, 16384  ;;  %p4743_p4 = scmp.lt.s32.totalorder %s32_s19, %s32_s19 }
   0xb   :  { %p4739_p3 = scmp.ne.s32.totalorder %s32_s19, %s4738_s27  ;;  %p4744_p5 = scmp.lt.s32.totalorder %s4738_s27, %s4738_s27 }
   0xd   :  { %p4745_p6 = por %p4744_p5, %p4743_p4 }
   0xf   :  { %p4746_p7 = pnand %p4745_p6, %p4739_p3 }
  0x11   :  { %4749 = shalt.err (!%p4746_p7)
}
  0x12   :  { %s4847_s28 = smov 512   ;;  %s4848_s29 = smov 32  }
  0x13   :  { %37 = dma.hbm_to_vmem [thread:$0]  %s6851_s1, 16384, %s32_s19, [#allocation6], %s4847_s28, %s4847_s28, %s4848_s29  }
  0x14   :  { %s4849_s7 = smov [#allocation2]   ;;  %s4750_s11 = scalar_lea.hbm %s6850_s0, 4096 }
  0x15   :  { %s19_s8 = sshll.u32 %s4849_s7, 4  ;;  %p4751_p8 = scmp.ne.s32.totalorder %s6850_s0, %s4750_s11  ;;  %s20_s8 = int_to_ptr.vmem [resolvable:$true] %s19_s8 }
  0x16   :  { %p4754_p9 = scmp.lt.u32.totalorder %s4750_s11, %s6850_s0 }
  0x18   :  { %p4756_p10 = pnand %p4754_p9, %p4751_p8 }
  0x1a   :  { %4759 = shalt.err (!%p4756_p10)
}
  0x1b   :  { %s4760_s16 = scalar_lea.vmem %s20_s8, 4096  ;;  %p4765_p12 = scmp.lt.s32.totalorder %s20_s8, %s20_s8 }
  0x1c   :  { %p4761_p11 = scmp.ne.s32.totalorder %s20_s8, %s4760_s16  ;;  %p4766_p13 = scmp.lt.s32.totalorder %s4760_s16, %s4760_s16 }
  0x1e   :  { %p4767_p0 = por %p4766_p13, %p4765_p12 }
  0x20   :  { %p4768_p1 = pnand %p4767_p0, %p4761_p11 }
  0x22   :  { %4771 = shalt.err (!%p4768_p1)
}
  0x23   :  { %s4850_s1 = smov 256   ;;  %s4851_s17 = smov 16  }
  0x24   :  { %25 = dma.hbm_to_vmem [thread:$0]  %s6850_s0, 4096, %s20_s8, [#allocation3], %s4850_s1, %s4850_s1, %s4851_s17  }
  0x25   :  { %s4852_s20 = smov [#allocation7]   ;;  %s4853_s22 = smov [#allocation8]  }
  0x26   :  { %s44_s21 = sshll.u32 %s4852_s20, 4  ;;  %s53_s23 = sshll.u32 %s4853_s22, 4  ;;  %s45_s21 = int_to_ptr.vmem [resolvable:$true] %s44_s21  ;;  %s4914_s23 = int_to_ptr.vmem [resolvable:$true] %s53_s23 }
  0x27   :  { %s4772_s26 = scalar_lea.hbm %s6852_s2, 128 }
  0x28   :  { %p4773_p2 = scmp.ne.s32.totalorder %s6852_s2, %s4772_s26  ;;  %p4776_p3 = scmp.lt.u32.totalorder %s4772_s26, %s6852_s2 }
  0x2a   :  { %p4778_p4 = pnand %p4776_p3, %p4773_p2 }
  0x2c   :  { %4781 = shalt.err (!%p4778_p4)
}
  0x2d   :  { %s4782_s0 = scalar_lea.vmem %s45_s21, 128  ;;  %p4787_p6 = scmp.lt.s32.totalorder %s45_s21, %s45_s21 }
  0x2e   :  { %p4783_p5 = scmp.ne.s32.totalorder %s45_s21, %s4782_s0  ;;  %p4788_p7 = scmp.lt.s32.totalorder %s4782_s0, %s4782_s0 }
  0x30   :  { %p4789_p8 = por %p4788_p7, %p4787_p6 }
  0x32   :  { %p4790_p9 = pnand %p4789_p8, %p4783_p5 }
  0x34   :  { %4793 = shalt.err (!%p4790_p9)
}
  0x35   :  { %47 = dma.hbm_to_vmem [thread:$0]  %s6852_s2, 128, %s45_s21, [#allocation6]  }
  0x36   :  { %s4794_s10 = scalar_lea.hbm %s6853_s3, 16384 }
  0x37   :  { %p4795_p10 = scmp.ne.s32.totalorder %s6853_s3, %s4794_s10  ;;  %p4798_p11 = scmp.lt.u32.totalorder %s4794_s10, %s6853_s3 }
  0x39   :  { %p4800_p12 = pnand %p4798_p11, %p4795_p10 }
  0x3b   :  { %4803 = shalt.err (!%p4800_p12)
}
  0x3c   :  { %s4804_s15 = scalar_lea.vmem %s4914_s23, 16384  ;;  %p4809_p0 = scmp.lt.s32.totalorder %s4914_s23, %s4914_s23 }
  0x3d   :  { %p4805_p13 = scmp.ne.s32.totalorder %s4914_s23, %s4804_s15  ;;  %p4810_p1 = scmp.lt.s32.totalorder %s4804_s15, %s4804_s15 }
  0x3f   :  { %p4811_p2 = por %p4810_p1, %p4809_p0 }
  0x41   :  { %p4812_p3 = pnand %p4811_p2, %p4805_p13 }
  0x43   :  { %4815 = shalt.err (!%p4812_p3)
}
  0x44   :  { %s4854_s2 = smov 128   ;;  %s4855_s16 = smov 8  }
  0x45   :  { %59 = dma.hbm_to_vmem [thread:$0]  %s6853_s3, 16384, %s4914_s23, [#allocation9], %s4854_s2, %s4854_s2, %s4855_s16  }
  0x46   :  { %4838 = dma.done.wait [#allocation3], 4096  }
  0x47   :  { %4839 = vsyncadd [#allocation3], 4294963200 }
  0x48   :  { %4840 = dma.done.wait [#allocation6], 16512  }
  0x49   :  { %4841 = vsyncadd [#allocation6], 4294950784 }
  0x4a   :  { %4842 = dma.done.wait [#allocation9], 16384  }
  0x4b   :  { %4843 = vsyncadd [#allocation9], 4294950912  ;;  %v122_v0 = vld [vmem:[#allocation5] sm:$0xff]  ;;  %v75_v17 = vld [vmem:[#allocation2 + $0x8] sm:$0xff] }
  0x4c   :  { %v126_v1 = vld [vmem:[#allocation5 + $0x20] sm:$0xff]  ;;  %v77_v18 = vld [vmem:[#allocation2 + $0x18] sm:$0xff] }
  0x4d   :  { %v130_v2 = vld [vmem:[#allocation5 + $0x40] sm:$0xff]  ;;  %v3884_v3 = vcombine.high %v122_v0, %v126_v1  ;;  %v3883_v4 = vcombine.low %v122_v0, %v126_v1  ;;  %v4945_v20 = vpack.c.bf16 %v77_v18, %v75_v17  ;;  %v123_v1 = vld [vmem:[#allocation5 + $0x8] sm:$0xff] }
  0x4e   :  { %v134_v5 = vld [vmem:[#allocation5 + $0x60] sm:$0xff] }
  0x4f   :  { %v3892_v6 = vcombine.high %v130_v2, %v134_v5  ;;  %v138_v7 = vld [vmem:[#allocation5 + $0x80] sm:$0xff]  ;;  %932 = vmatprep.subr.bf16.mxu1 %v3884_v3  ;;  %v3891_v9 = vcombine.low %v130_v2, %v134_v5  ;;  %964 = vmatprep.mubr.bf16.mxu1 %v4945_v20  ;;  %v127_v2 = vld [vmem:[#allocation5 + $0x28] sm:$0xff]  ;;  %v76_v5 = vld [vmem:[#allocation2 + $0x10] sm:$0xff] }
  0x50   :  { %v142_v8 = vld [vmem:[#allocation5 + $0xa0] sm:$0xff]  ;;  %933 = vmatpush1.bf16.msra.mxu1 %v3883_v4 }
  0x51   :  { %934 = vmatprep.subr.bf16.mxu1 %v3892_v6  ;;  %v3900_v10 = vcombine.high %v138_v7, %v142_v8  ;;  %v146_v11 = vld [vmem:[#allocation5 + $0xc0] sm:$0xff]  ;;  %v3899_v13 = vcombine.low %v138_v7, %v142_v8  ;;  %v131_v7 = vld [vmem:[#allocation5 + $0x48] sm:$0xff] }
  0x52   :  { %v150_v12 = vld [vmem:[#allocation5 + $0xe0] sm:$0xff]  ;;  %v135_v8 = vld [vmem:[#allocation5 + $0x68] sm:$0xff] }
  0x53   :  { %v3908_v14 = vcombine.high %v146_v11, %v150_v12  ;;  %v154_v15 = vld [vmem:[#allocation5 + $0x100] sm:$0xff]  ;;  %v3907_v19 = vcombine.low %v146_v11, %v150_v12  ;;  %v3886_v11 = vcombine.high %v123_v1, %v127_v2  ;;  %v3894_v17 = vcombine.high %v131_v7, %v135_v8 }
  0x54   :  { %935 = vmatpush1.bf16.msra.mxu1 %v3891_v9  ;;  %v158_v16 = vld [vmem:[#allocation5 + $0x120] sm:$0xff]  ;;  %v79_v9 = vld [vmem:[#allocation2 + $0x28] sm:$0xff] }
  0x55   :  { %936 = vmatprep.subr.bf16.mxu1 %v3900_v10  ;;  %v3916_v21 = vcombine.high %v154_v15, %v158_v16  ;;  %v162_v22 = vld [vmem:[#allocation5 + $0x140] sm:$0xff]  ;;  %v3915_v24 = vcombine.low %v154_v15, %v158_v16  ;;  %v81_v10 = vld [vmem:[#allocation2 + $0x38] sm:$0xff]  ;;  %v139_v15 = vld [vmem:[#allocation5 + $0x88] sm:$0xff] }
  0x56   :  { %v166_v23 = vld [vmem:[#allocation5 + $0x160] sm:$0xff]  ;;  %v143_v16 = vld [vmem:[#allocation5 + $0xa8] sm:$0xff] }
  0x57   :  { %v3924_v25 = vcombine.high %v162_v22, %v166_v23  ;;  %v170_v26 = vld [vmem:[#allocation5 + $0x180] sm:$0xff]  ;;  %v3923_v28 = vcombine.low %v162_v22, %v166_v23  ;;  %v147_v22 = vld [vmem:[#allocation5 + $0xc8] sm:$0xff] }
  0x58   :  { %937 = vmatpush1.bf16.msra.mxu1 %v3899_v13  ;;  %v174_v27 = vld [vmem:[#allocation5 + $0x1a0] sm:$0xff]  ;;  %v3885_v13 = vcombine.low %v123_v1, %v127_v2  ;;  %v151_v23 = vld [vmem:[#allocation5 + $0xe8] sm:$0xff]  ;;  %v97_v2 = vld [vmem:[#allocation2 + $0xb8] sm:$0xff] }
  0x59   :  { %938 = vmatprep.subr.bf16.mxu1 %v3908_v14  ;;  %v3932_v29 = vcombine.high %v170_v26, %v174_v27  ;;  %v178_v30 = vld [vmem:[#allocation5 + $0x1c0] sm:$0xff]  ;;  %v3931_v32 = vcombine.low %v170_v26, %v174_v27  ;;  %v4950_v14 = vpack.c.bf16 %v81_v10, %v79_v9  ;;  %v3902_v26 = vcombine.high %v139_v15, %v143_v16  ;;  %v95_v1 = vld [vmem:[#allocation2 + $0xa8] sm:$0xff] }
  0x5a   :  { %v182_v31 = vld [vmem:[#allocation5 + $0x1e0] sm:$0xff]  ;;  %v203_v9 = vld [vmem:[#allocation5 + $0x288] sm:$0xff] }
  0x5b   :  { %v3940_v33 = vcombine.high %v178_v30, %v182_v31  ;;  %v186_v34 = vld [vmem:[#allocation5 + $0x200] sm:$0xff]  ;;  %v3939_v36 = vcombine.low %v178_v30, %v182_v31  ;;  %v155_v30 = vld [vmem:[#allocation5 + $0x108] sm:$0xff] }
  0x5c   :  { %939 = vmatpush1.bf16.msra.mxu1 %v3907_v19  ;;  %v190_v35 = vld [vmem:[#allocation5 + $0x220] sm:$0xff]  ;;  %v80_v19 = vld [vmem:[#allocation2 + $0x30] sm:$0xff]  ;;  %v159_v31 = vld [vmem:[#allocation5 + $0x128] sm:$0xff] }
  0x5d   :  { %940 = vmatprep.subr.bf16.mxu1 %v3916_v21  ;;  %v3948_v37 = vcombine.high %v186_v34, %v190_v35  ;;  %v194_v38 = vld [vmem:[#allocation5 + $0x240] sm:$0xff]  ;;  %v3947_v40 = vcombine.low %v186_v34, %v190_v35  ;;  %v3893_v21 = vcombine.low %v131_v7, %v135_v8  ;;  %v84_v34 = vld [vmem:[#allocation2 + $0x50] sm:$0xff]  ;;  %v3909_v35 = vcombine.low %v147_v22, %v151_v23  ;;  %v207_v10 = vld [vmem:[#allocation5 + $0x2a8] sm:$0xff] }
  0x5e   :  { %v198_v39 = vld [vmem:[#allocation5 + $0x260] sm:$0xff]  ;;  %v4974_v7 = vpack.c.bf16 %v97_v2, %v95_v1  ;;  %v132_v1 = vld [vmem:[#allocation5 + $0x50] sm:$0xff] }
  0x5f   :  { %v3956_v41 = vcombine.high %v194_v38, %v198_v39  ;;  %v202_v42 = vld [vmem:[#allocation5 + $0x280] sm:$0xff]  ;;  %v3955_v44 = vcombine.low %v194_v38, %v198_v39  ;;  %v87_v38 = vld [vmem:[#allocation2 + $0x68] sm:$0xff]  ;;  %v89_v39 = vld [vmem:[#allocation2 + $0x78] sm:$0xff] }
  0x60   :  { %941 = vmatpush1.bf16.msra.mxu1 %v3915_v24  ;;  %v206_v43 = vld [vmem:[#allocation5 + $0x2a0] sm:$0xff]  ;;  %v83_v24 = vld [vmem:[#allocation2 + $0x48] sm:$0xff]  ;;  %v136_v2 = vld [vmem:[#allocation5 + $0x70] sm:$0xff] }
  0x61   :  { %942 = vmatprep.subr.bf16.mxu1 %v3924_v25  ;;  %v3964_v45 = vcombine.high %v202_v42, %v206_v43  ;;  %v210_v46 = vld [vmem:[#allocation5 + $0x2c0] sm:$0xff]  ;;  %v3963_v48 = vcombine.low %v202_v42, %v206_v43  ;;  %v85_v25 = vld [vmem:[#allocation2 + $0x58] sm:$0xff]  ;;  %v3917_v42 = vcombine.low %v155_v30, %v159_v31  ;;  %v4962_v43 = vpack.c.bf16 %v89_v39, %v87_v38 }
  0x62   :  { %v214_v47 = vld [vmem:[#allocation5 + $0x2e0] sm:$0xff] }
  0x63   :  { %v218_v49 = vld [vmem:[#allocation5 + $0x300] sm:$0xff]  ;;  %v3972_v51 = vcombine.high %v210_v46, %v214_v47  ;;  %v3971_v52 = vcombine.low %v210_v46, %v214_v47 }
  0x64   :  { %943 = vmatpush1.bf16.msra.mxu1 %v3923_v28  ;;  %v222_v50 = vld [vmem:[#allocation5 + $0x320] sm:$0xff]  ;;  %v3901_v28 = vcombine.low %v139_v15, %v143_v16  ;;  %v96_v15 = vld [vmem:[#allocation2 + $0xb0] sm:$0xff]  ;;  %v3966_v16 = vcombine.high %v203_v9, %v207_v10 }
  0x65   :  { %944 = vmatprep.subr.bf16.mxu1 %v3932_v29  ;;  %v226_v53 = vld [vmem:[#allocation5 + $0x340] sm:$0xff]  ;;  %v3980_v55 = vcombine.high %v218_v49, %v222_v50  ;;  %v3979_v56 = vcombine.low %v218_v49, %v222_v50  ;;  %v4956_v29 = vpack.c.bf16 %v85_v25, %v83_v24  ;;  %v179_v50 = vld [vmem:[#allocation5 + $0x1c8] sm:$0xff] }
  0x66   :  { %v230_v54 = vld [vmem:[#allocation5 + $0x360] sm:$0xff] }
  0x67   :  { %v234_v57 = vld [vmem:[#allocation5 + $0x380] sm:$0xff]  ;;  %v3988_v59 = vcombine.high %v226_v53, %v230_v54  ;;  %v3987_v60 = vcombine.low %v226_v53, %v230_v54  ;;  %v93_v53 = vld [vmem:[#allocation2 + $0x98] sm:$0xff] }
  0x68   :  { %945 = vmatpush1.bf16.msra.mxu1 %v3931_v32  ;;  %v238_v58 = vld [vmem:[#allocation5 + $0x3a0] sm:$0xff]  ;;  %v3910_v32 = vcombine.high %v147_v22, %v151_v23  ;;  %v3965_v23 = vcombine.low %v203_v9, %v207_v10  ;;  %v140_v9 = vld [vmem:[#allocation5 + $0x90] sm:$0xff] }
  0x69   :  { %946 = vmatprep.subr.bf16.mxu1 %v3940_v33  ;;  %v242_v61 = vld [vmem:[#allocation5 + $0x3c0] sm:$0xff]  ;;  %v3996_v63 = vcombine.high %v234_v57, %v238_v58  ;;  %v3995_v0 = vcombine.low %v234_v57, %v238_v58  ;;  %v144_v10 = vld [vmem:[#allocation5 + $0xb0] sm:$0xff] }
  0x6a   :  { %v246_v62 = vld [vmem:[#allocation5 + $0x3e0] sm:$0xff] }
  0x6b   :  { %v4004_v3 = vcombine.high %v242_v61, %v246_v62  ;;  %v74_v4 = vld [vmem:[#allocation2] sm:$0xff]  ;;  %v4003_v6 = vcombine.low %v242_v61, %v246_v62 }
  0x6c   :  { %947 = vmatpush1.bf16.msra.mxu1 %v3939_v36  ;;  %v4948_v12 = vpack.c.bf16 %v76_v5, %v74_v4  ;;  %v78_v18 = vld [vmem:[#allocation2 + $0x20] sm:$0xff]  ;;  %v163_v36 = vld [vmem:[#allocation5 + $0x148] sm:$0xff] }
  0x6d   :  { %948 = vmatprep.subr.bf16.mxu1 %v3948_v37  ;;  %v4954_v27 = vpack.c.bf16 %v80_v19, %v78_v18  ;;  %v82_v33 = vld [vmem:[#allocation2 + $0x40] sm:$0xff]  ;;  %v167_v37 = vld [vmem:[#allocation5 + $0x168] sm:$0xff]  ;;  %v101_v18 = vld [vmem:[#allocation2 + $0xd8] sm:$0xff] }
  0x6e   :  { %v3926_v46 = vcombine.high %v163_v36, %v167_v37  ;;  %v86_v47 = vld [vmem:[#allocation2 + $0x60] sm:$0xff]  ;;  %v3925_v49 = vcombine.low %v163_v36, %v167_v37  ;;  %v199_v4 = vld [vmem:[#allocation5 + $0x268] sm:$0xff] }
  0x6f   :  { %v90_v62 = vld [vmem:[#allocation2 + $0x80] sm:$0xff]  ;;  %v211_v19 = vld [vmem:[#allocation5 + $0x2c8] sm:$0xff] }
  0x70   :  { %949 = vmatpush1.bf16.msra.mxu1 %v3947_v40  ;;  %v3918_v40 = vcombine.high %v155_v30, %v159_v31  ;;  %v98_v31 = vld [vmem:[#allocation2 + $0xc0] sm:$0xff]  ;;  %v227_v36 = vld [vmem:[#allocation5 + $0x348] sm:$0xff] }
  0x71   :  { %950 = vmatprep.subr.bf16.mxu1 %v3956_v41  ;;  %v4960_v41 = vpack.c.bf16 %v84_v34, %v82_v33  ;;  %v103_v34 = vld [vmem:[#allocation2 + $0xe8] sm:$0xff] }
  0x72   :  { %v231_v37 = vld [vmem:[#allocation5 + $0x368] sm:$0xff] }
  0x74   :  { %951 = vmatpush1.bf16.msra.mxu1 %v3955_v44  ;;  %v171_v44 = vld [vmem:[#allocation5 + $0x188] sm:$0xff] }
  0x75   :  { %952 = vmatprep.subr.bf16.mxu1 %v3964_v45  ;;  %v175_v45 = vld [vmem:[#allocation5 + $0x1a8] sm:$0xff] }
  0x76   :  { %v3934_v54 = vcombine.high %v171_v44, %v175_v45 }
  0x78   :  { %953 = vmatpush1.bf16.msra.mxu1 %v3963_v48  ;;  %v88_v48 = vld [vmem:[#allocation2 + $0x70] sm:$0xff] }
  0x79   :  { %954 = vmatprep.subr.bf16.mxu1 %v3972_v51  ;;  %v183_v51 = vld [vmem:[#allocation5 + $0x1e8] sm:$0xff] }
  0x7a   :  { %v3942_v58 = vcombine.high %v179_v50, %v183_v51  ;;  %v3941_v61 = vcombine.low %v179_v50, %v183_v51  ;;  %v243_v50 = vld [vmem:[#allocation5 + $0x3c8] sm:$0xff] }
  0x7b   :  { %v247_v51 = vld [vmem:[#allocation5 + $0x3e8] sm:$0xff] }
  0x7c   :  { %955 = vmatpush1.bf16.msra.mxu1 %v3971_v52  ;;  %v91_v52 = vld [vmem:[#allocation2 + $0x88] sm:$0xff] }
  0x7d   :  { %956 = vmatprep.subr.bf16.mxu1 %v3980_v55  ;;  %v4966_v55 = vpack.c.bf16 %v88_v48, %v86_v47  ;;  %v4968_v57 = vpack.c.bf16 %v93_v53, %v91_v52  ;;  %v102_v47 = vld [vmem:[#allocation2 + $0xe0] sm:$0xff]  ;;  %v104_v48 = vld [vmem:[#allocation2 + $0xf0] sm:$0xff] }
  0x7e   :  { %v4278_v52 = vld [vmem:[#allocation8 + $0x4] ss:$8 sps:$4 sm:$0xff]   ;;  %v4990_v53 = vpack.c.bf16 %v104_v48, %v102_v47  ;;  %v4301_v47 = vld [vmem:[#allocation8 + $0x70] ss:$8 sps:$4 sm:$0xff]  }
  0x7f   :  { %3380 = vmatprep.subr.bf16.mxu0 %v4278_v52  ;;  %v4302_v52 = vld [vmem:[#allocation8 + $0x84] ss:$8 sps:$4 sm:$0xff]  }
  0x80   :  { %957 = vmatpush1.bf16.msra.mxu1 %v3979_v56  ;;  %v3933_v56 = vcombine.low %v171_v44, %v175_v45  ;;  %v235_v44 = vld [vmem:[#allocation5 + $0x388] sm:$0xff] }
  0x81   :  { %958 = vmatprep.subr.bf16.mxu1 %v3988_v59  ;;  %v187_v59 = vld [vmem:[#allocation5 + $0x208] sm:$0xff] }
  0x82   :  { %v239_v45 = vld [vmem:[#allocation5 + $0x3a8] sm:$0xff] }
  0x84   :  { %959 = vmatpush1.bf16.msra.mxu1 %v3987_v60  ;;  %v191_v60 = vld [vmem:[#allocation5 + $0x228] sm:$0xff] }
  0x85   :  { %960 = vmatprep.subr.bf16.mxu1 %v3996_v63  ;;  %v92_v63 = vld [vmem:[#allocation2 + $0x90] sm:$0xff] }
  0x86   :  { %v4972_v5 = vpack.c.bf16 %v92_v63, %v90_v62  ;;  %v4283_v62 = vld [vmem:[#allocation8 + $0x10] ss:$8 sps:$4 sm:$0xff]   ;;  %v4005_v63 = vcombine.low %v243_v50, %v247_v51 }
  0x88   :  { %961 = vmatpush1.bf16.msra.mxu1 %v3995_v0  ;;  %v3950_v0 = vcombine.high %v187_v59, %v191_v60 }
  0x89   :  { %962 = vmatprep.subr.bf16.mxu1 %v4004_v3  ;;  %v195_v3 = vld [vmem:[#allocation5 + $0x248] sm:$0xff] }
  0x8a   :  { %v3958_v8 = vcombine.high %v195_v3, %v199_v4 }
  0x8c   :  { %963 = vmatpush1.bf16.msra.mxu1 %v4003_v6  ;;  %v3949_v6 = vcombine.low %v187_v59, %v191_v60  ;;  %v124_v59 = vld [vmem:[#allocation5 + $0x10] sm:$0xff] }
  0x8d   :  { %1045 = vmatprep.subr.bf16.mxu1 %v3886_v11  ;;  %v3957_v11 = vcombine.low %v195_v3, %v199_v4  ;;  %v128_v60 = vld [vmem:[#allocation5 + $0x30] sm:$0xff] }
  0x8e   :  { %v4284_v3 = vld [vmem:[#allocation8 + $0x24] ss:$8 sps:$4 sm:$0xff]   ;;  %v4286_v4 = vld [vmem:[#allocation8 + $0x20] ss:$8 sps:$4 sm:$0xff]  }
  0x8f   :  { %965 = vmatmul.mubr.bf16.vlgmr.msra.gmra.mrb[0].mxu1 %v4948_v12 }
  0x90   :  { %1046 = vmatpush1.bf16.msra.mxu1 %v3885_v13  ;;  %974 = vmatprep.mubr.bf16.mxu1 %v4950_v14  ;;  %v94_v13 = vld [vmem:[#allocation2 + $0xa0] sm:$0xff] }
  0x91   :  { %1047 = vmatprep.subr.bf16.mxu1 %v3894_v17  ;;  %v99_v17 = vld [vmem:[#allocation2 + $0xc8] sm:$0xff]  ;;  %v4978_v22 = vpack.c.bf16 %v96_v15, %v94_v13  ;;  %v4289_v13 = vld [vmem:[#allocation8 + $0x30] ss:$8 sps:$4 sm:$0xff]  }
  0x92   :  { %v4980_v24 = vpack.c.bf16 %v101_v18, %v99_v17  ;;  %v4290_v15 = vld [vmem:[#allocation8 + $0x44] ss:$8 sps:$4 sm:$0xff]   ;;  %v3904_v17 = vcombine.high %v140_v9, %v144_v10 }
  0x93   :  { %v148_v18 = vld [vmem:[#allocation5 + $0xd0] sm:$0xff] }
  0x94   :  { %1048 = vmatpush1.bf16.msra.mxu1 %v3893_v21  ;;  %v215_v21 = vld [vmem:[#allocation5 + $0x2e8] sm:$0xff] }
  0x95   :  { %1049 = vmatprep.subr.bf16.mxu1 %v3902_v26  ;;  %v3974_v25 = vcombine.high %v211_v19, %v215_v21  ;;  %v219_v26 = vld [vmem:[#allocation5 + $0x308] sm:$0xff]  ;;  %v3973_v30 = vcombine.low %v211_v19, %v215_v21  ;;  %v152_v19 = vld [vmem:[#allocation5 + $0xf0] sm:$0xff] }
  0x96   :  { %v4292_v21 = vld [vmem:[#allocation8 + $0x40] ss:$8 sps:$4 sm:$0xff]  }
  0x97   :  { %975 = vmatmul.mubr.bf16.gmra.mrb[4].mxu1 %v4954_v27 }
  0x98   :  { %1050 = vmatpush1.bf16.msra.mxu1 %v3901_v28  ;;  %984 = vmatprep.mubr.bf16.mxu1 %v4956_v29  ;;  %v223_v28 = vld [vmem:[#allocation5 + $0x328] sm:$0xff] }
  0x99   :  { %1051 = vmatprep.subr.bf16.mxu1 %v3910_v32  ;;  %v100_v32 = vld [vmem:[#allocation2 + $0xd0] sm:$0xff]  ;;  %v3982_v33 = vcombine.high %v219_v26, %v223_v28  ;;  %v3981_v39 = vcombine.low %v219_v26, %v223_v28 }
  0x9a   :  { %v4984_v38 = vpack.c.bf16 %v100_v32, %v98_v31  ;;  %v156_v26 = vld [vmem:[#allocation5 + $0x110] sm:$0xff]  ;;  %v4295_v31 = vld [vmem:[#allocation8 + $0x50] ss:$8 sps:$4 sm:$0xff]  }
  0x9b   :  { %v160_v28 = vld [vmem:[#allocation5 + $0x130] sm:$0xff] }
  0x9c   :  { %1052 = vmatpush1.bf16.msra.mxu1 %v3909_v35  ;;  %v105_v35 = vld [vmem:[#allocation2 + $0xf8] sm:$0xff]  ;;  %v4296_v32 = vld [vmem:[#allocation8 + $0x64] ss:$8 sps:$4 sm:$0xff]  }
  0x9d   :  { %1053 = vmatprep.subr.bf16.mxu1 %v3918_v40  ;;  %v4986_v40 = vpack.c.bf16 %v105_v35, %v103_v34  ;;  %v3920_v34 = vcombine.high %v156_v26, %v160_v28  ;;  %v164_v35 = vld [vmem:[#allocation5 + $0x150] sm:$0xff] }
  0x9f   :  { %985 = vmatmul.mubr.bf16.gmra.mrb[8].mxu1 %v4960_v41 }
  0xa0   :  { %1054 = vmatpush1.bf16.msra.mxu1 %v3917_v42  ;;  %994 = vmatprep.mubr.bf16.mxu1 %v4962_v43  ;;  %v3990_v42 = vcombine.high %v227_v36, %v231_v37 }
  0xa1   :  { %1055 = vmatprep.subr.bf16.mxu1 %v3926_v46  ;;  %v3989_v46 = vcombine.low %v227_v36, %v231_v37  ;;  %v168_v36 = vld [vmem:[#allocation5 + $0x170] sm:$0xff] }
  0xa2   :  { %v4298_v37 = vld [vmem:[#allocation8 + $0x60] ss:$8 sps:$4 sm:$0xff]   ;;  %v3927_v48 = vcombine.low %v164_v35, %v168_v36 }
  0xa4   :  { %1056 = vmatpush1.bf16.msra.mxu1 %v3925_v49  ;;  %v3998_v49 = vcombine.high %v235_v44, %v239_v45 }
  0xa5   :  { %1057 = vmatprep.subr.bf16.mxu1 %v3934_v54  ;;  %v4280_v54 = vld [vmem:[#allocation8] ss:$8 sps:$4 sm:$0xff]  }
  0xa6   :  { %3381 = vmatpush1.bf16.msra.mxu0 %v4280_v54  ;;  %v4304_v54 = vld [vmem:[#allocation8 + $0x80] ss:$8 sps:$4 sm:$0xff]  }
  0xa7   :  { %995 = vmatmul.mubr.bf16.gmra.mrb[12].mxu1 %v4966_v55 }
  0xa8   :  { %1058 = vmatpush1.bf16.msra.mxu1 %v3933_v56  ;;  %1004 = vmatprep.mubr.bf16.mxu1 %v4968_v57  ;;  %v3997_v56 = vcombine.low %v235_v44, %v239_v45  ;;  %v172_v44 = vld [vmem:[#allocation5 + $0x190] sm:$0xff] }
  0xa9   :  { %1059 = vmatprep.subr.bf16.mxu1 %v3942_v58  ;;  %v4006_v58 = vcombine.high %v243_v50, %v247_v51  ;;  %v176_v45 = vld [vmem:[#allocation5 + $0x1b0] sm:$0xff] }
  0xaa   :  { %v180_v50 = vld [vmem:[#allocation5 + $0x1d0] sm:$0xff] }
  0xab   :  { %v184_v51 = vld [vmem:[#allocation5 + $0x1f0] sm:$0xff] }
  0xac   :  { %1060 = vmatpush1.bf16.msra.mxu1 %v3941_v61  ;;  %v4281_v61 = vld [vmem:[#allocation8 + $0x14] ss:$8 sps:$4 sm:$0xff]  }
  0xad   :  { %1061 = vmatprep.subr.bf16.mxu1 %v3950_v0  ;;  %v3888_v0 = vcombine.high %v124_v59, %v128_v60  ;;  %3382 = vmatprep.subr.bf16.mxu0 %v4281_v61  ;;  %v4305_v61 = vld [vmem:[#allocation8 + $0x94] ss:$8 sps:$4 sm:$0xff]  }
  0xae   :  { %3383 = vmatpush1.bf16.msra.mxu0 %v4283_v62  ;;  %v4307_v62 = vld [vmem:[#allocation8 + $0x90] ss:$8 sps:$4 sm:$0xff]  }
  0xaf   :  { %1005 = vmatmul.mubr.bf16.gmra.mrb[16].mxu1 %v4972_v5  ;;  %3384 = vmatprep.subr.bf16.mxu0 %v4284_v3  ;;  %v4308_v3 = vld [vmem:[#allocation8 + $0xa4] ss:$8 sps:$4 sm:$0xff]  }
  0xb0   :  { %1062 = vmatpush1.bf16.msra.mxu1 %v3949_v6  ;;  %1014 = vmatprep.mubr.bf16.mxu1 %v4974_v7  ;;  %v3887_v6 = vcombine.low %v124_v59, %v128_v60  ;;  %v188_v59 = vld [vmem:[#allocation5 + $0x210] sm:$0xff] }
  0xb1   :  { %1063 = vmatprep.subr.bf16.mxu1 %v3958_v8  ;;  %v3896_v8 = vcombine.high %v132_v1, %v136_v2  ;;  %v192_v60 = vld [vmem:[#allocation5 + $0x230] sm:$0xff] }
  0xb2   :  { %3385 = vmatpush1.bf16.msra.mxu0 %v4286_v4  ;;  %v4310_v4 = vld [vmem:[#allocation8 + $0xa0] ss:$8 sps:$4 sm:$0xff]  }
  0xb4   :  { %1064 = vmatpush1.bf16.msra.mxu1 %v3957_v11  ;;  %v4287_v11 = vld [vmem:[#allocation8 + $0x34] ss:$8 sps:$4 sm:$0xff]  }
  0xb5   :  { %1065 = vmatprep.subr.bf16.mxu1 %v3966_v16  ;;  %v3895_v16 = vcombine.low %v132_v1, %v136_v2  ;;  %3386 = vmatprep.subr.bf16.mxu0 %v4287_v11  ;;  %v196_v1 = vld [vmem:[#allocation5 + $0x250] sm:$0xff]  ;;  %v4311_v11 = vld [vmem:[#allocation8 + $0xb4] ss:$8 sps:$4 sm:$0xff]  }
  0xb6   :  { %3387 = vmatpush1.bf16.msra.mxu0 %v4289_v13  ;;  %v200_v2 = vld [vmem:[#allocation5 + $0x270] sm:$0xff]  ;;  %v4313_v13 = vld [vmem:[#allocation8 + $0xb0] ss:$8 sps:$4 sm:$0xff]  }
  0xb7   :  { %1015 = vmatmul.mubr.bf16.gmra.mrb[20].mxu1 %v4978_v22  ;;  %3388 = vmatprep.subr.bf16.mxu0 %v4290_v15  ;;  %v3959_v15 = vcombine.low %v196_v1, %v200_v2 }
  0xb8   :  { %1066 = vmatpush1.bf16.msra.mxu1 %v3965_v23  ;;  %1024 = vmatprep.mubr.bf16.mxu1 %v4980_v24  ;;  %v3903_v23 = vcombine.low %v140_v9, %v144_v10  ;;  %v204_v9 = vld [vmem:[#allocation5 + $0x290] sm:$0xff] }
  0xb9   :  { %1067 = vmatprep.subr.bf16.mxu1 %v3974_v25  ;;  %v3912_v25 = vcombine.high %v148_v18, %v152_v19  ;;  %v208_v10 = vld [vmem:[#allocation5 + $0x2b0] sm:$0xff] }
  0xba   :  { %3389 = vmatpush1.bf16.msra.mxu0 %v4292_v21  ;;  %v4316_v21 = vld [vmem:[#allocation8 + $0xc0] ss:$8 sps:$4 sm:$0xff]  }
  0xbc   :  { %1068 = vmatpush1.bf16.msra.mxu1 %v3973_v30  ;;  %v4293_v30 = vld [vmem:[#allocation8 + $0x54] ss:$8 sps:$4 sm:$0xff]  }
  0xbd   :  { %1069 = vmatprep.subr.bf16.mxu1 %v3982_v33  ;;  %v3911_v33 = vcombine.low %v148_v18, %v152_v19  ;;  %3390 = vmatprep.subr.bf16.mxu0 %v4293_v30  ;;  %v216_v18 = vld [vmem:[#allocation5 + $0x2f0] sm:$0xff]  ;;  %v4317_v30 = vld [vmem:[#allocation8 + $0xd4] ss:$8 sps:$4 sm:$0xff]  }
  0xbe   :  { %3391 = vmatpush1.bf16.msra.mxu0 %v4295_v31  ;;  %v4314_v19 = vld [vmem:[#allocation8 + $0xc4] ss:$8 sps:$4 sm:$0xff]   ;;  %v4319_v31 = vld [vmem:[#allocation8 + $0xd0] ss:$8 sps:$4 sm:$0xff]  }
  0xbf   :  { %1025 = vmatmul.mubr.bf16.gmra.mrb[24].mxu1 %v4984_v38  ;;  %3392 = vmatprep.subr.bf16.mxu0 %v4296_v32 }
  0xc0   :  { %1070 = vmatpush1.bf16.msra.mxu1 %v3981_v39  ;;  %1034 = vmatprep.mubr.bf16.mxu1 %v4986_v40  ;;  %v3919_v39 = vcombine.low %v156_v26, %v160_v28  ;;  %v220_v26 = vld [vmem:[#allocation5 + $0x310] sm:$0xff] }
  0xc1   :  { %1071 = vmatprep.subr.bf16.mxu1 %v3990_v42  ;;  %v3928_v42 = vcombine.high %v164_v35, %v168_v36  ;;  %v224_v28 = vld [vmem:[#allocation5 + $0x330] sm:$0xff] }
  0xc2   :  { %3393 = vmatpush1.bf16.msra.mxu0 %v4298_v37  ;;  %v232_v35 = vld [vmem:[#allocation5 + $0x370] sm:$0xff] }
  0xc3   :  { %v4320_v36 = vld [vmem:[#allocation8 + $0xe4] ss:$8 sps:$4 sm:$0xff]   ;;  %v4322_v37 = vld [vmem:[#allocation8 + $0xe0] ss:$8 sps:$4 sm:$0xff]  }
  0xc4   :  { %1072 = vmatpush1.bf16.msra.mxu1 %v3989_v46  ;;  %v4299_v46 = vld [vmem:[#allocation8 + $0x74] ss:$8 sps:$4 sm:$0xff]  }
  0xc5   :  { %1073 = vmatprep.subr.bf16.mxu1 %v3998_v49  ;;  %v3936_v49 = vcombine.high %v172_v44, %v176_v45  ;;  %3394 = vmatprep.subr.bf16.mxu0 %v4299_v46  ;;  %v4323_v46 = vld [vmem:[#allocation8 + $0xf4] ss:$8 sps:$4 sm:$0xff]  }
  0xc6   :  { %3395 = vmatpush1.bf16.msra.mxu0 %v4301_v47  ;;  %v4325_v47 = vld [vmem:[#allocation8 + $0xf0] ss:$8 sps:$4 sm:$0xff]  }
  0xc7   :  { %1035 = vmatmul.mubr.bf16.gmra.mrb[28].mxu1 %v4990_v53  ;;  %3396 = vmatprep.subr.bf16.mxu0 %v4302_v52  ;;  %v4328_v52 = vld [vmem:[#allocation8 + $0x104] ss:$8 sps:$4 sm:$0xff]  }
  0xc8   :  { %1074 = vmatpush1.bf16.msra.mxu1 %v3997_v56  ;;  %1077 = vmatprep.mubr.bf16.mxu1 %v4945_v20  ;;  %v3935_v56 = vcombine.low %v172_v44, %v176_v45  ;;  %v236_v44 = vld [vmem:[#allocation5 + $0x390] sm:$0xff] }
  0xc9   :  { %1075 = vmatprep.subr.bf16.mxu1 %v4006_v58  ;;  %v3944_v58 = vcombine.high %v180_v50, %v184_v51  ;;  %v240_v45 = vld [vmem:[#allocation5 + $0x3b0] sm:$0xff] }
  0xca   :  { %3397 = vmatpush1.bf16.msra.mxu0 %v4304_v54  ;;  %v3999_v54 = vcombine.low %v236_v44, %v240_v45 }
  0xcb   :  { %3398 = vmatprep.subr.bf16.mxu0 %v4305_v61 }
  0xcc   :  { %1076 = vmatpush1.bf16.msra.mxu1 %v4005_v63  ;;  %v3943_v63 = vcombine.low %v180_v50, %v184_v51  ;;  %v244_v50 = vld [vmem:[#allocation5 + $0x3d0] sm:$0xff] }
  0xcd   :  { %1158 = vmatprep.subr.bf16.mxu1 %v3888_v0  ;;  %v3952_v0 = vcombine.high %v188_v59, %v192_v60  ;;  %v248_v51 = vld [vmem:[#allocation5 + $0x3f0] sm:$0xff] }
  0xce   :  { %3399 = vmatpush1.bf16.msra.mxu0 %v4307_v62  ;;  %v133_v62 = vld [vmem:[#allocation5 + $0x58] sm:$0xff] }
  0xcf   :  { %1078 = vmatmul.mubr.bf16.vlgmr.msra.gmra.mrb[32].mxu1 %v4948_v12  ;;  %3400 = vmatprep.subr.bf16.mxu0 %v4308_v3  ;;  %v145_v3 = vld [vmem:[#allocation5 + $0xb8] sm:$0xff] }
  0xd0   :  { %1159 = vmatpush1.bf16.msra.mxu1 %v3887_v6  ;;  %1087 = vmatprep.mubr.bf16.mxu1 %v4950_v14  ;;  %v3951_v6 = vcombine.low %v188_v59, %v192_v60  ;;  %v129_v59 = vld [vmem:[#allocation5 + $0x38] sm:$0xff]  ;;  %v4007_v60 = vcombine.low %v244_v50, %v248_v51 }
  0xd1   :  { %1160 = vmatprep.subr.bf16.mxu1 %v3896_v8  ;;  %v3960_v8 = vcombine.high %v196_v1, %v200_v2  ;;  %v141_v2 = vld [vmem:[#allocation5 + $0x98] sm:$0xff] }
  0xd2   :  { %3401 = vmatpush1.bf16.msra.mxu0 %v4310_v4 }
  0xd3   :  { %3402 = vmatprep.subr.bf16.mxu0 %v4311_v11 }
  0xd4   :  { %1161 = vmatpush1.bf16.msra.mxu1 %v3895_v16  ;;  %v3968_v16 = vcombine.high %v204_v9, %v208_v10 }
  0xd5   :  { %1162 = vmatprep.subr.bf16.mxu1 %v3904_v17  ;;  %v212_v17 = vld [vmem:[#allocation5 + $0x2d0] sm:$0xff] }
  0xd6   :  { %3403 = vmatpush1.bf16.msra.mxu0 %v4313_v13  ;;  %v3975_v32 = vcombine.low %v212_v17, %v216_v18  ;;  %v157_v13 = vld [vmem:[#allocation5 + $0x118] sm:$0xff] }
  0xd7   :  { %1088 = vmatmul.mubr.bf16.gmra.mrb[36].mxu1 %v4954_v27  ;;  %3404 = vmatprep.subr.bf16.mxu0 %v4314_v19  ;;  %v169_v19 = vld [vmem:[#allocation5 + $0x178] sm:$0xff] }
  0xd8   :  { %1163 = vmatpush1.bf16.msra.mxu1 %v3903_v23  ;;  %1097 = vmatprep.mubr.bf16.mxu1 %v4956_v29  ;;  %v3967_v23 = vcombine.low %v204_v9, %v208_v10  ;;  %v153_v9 = vld [vmem:[#allocation5 + $0xf8] sm:$0xff]  ;;  %v3905_v10 = vcombine.low %v141_v2, %v145_v3 }
  0xd9   :  { %1164 = vmatprep.subr.bf16.mxu1 %v3912_v25  ;;  %v3976_v25 = vcombine.high %v212_v17, %v216_v18  ;;  %v165_v18 = vld [vmem:[#allocation5 + $0x158] sm:$0xff] }
  0xda   :  { %3405 = vmatpush1.bf16.msra.mxu0 %v4316_v21 }
  0xdb   :  { %3406 = vmatprep.subr.bf16.mxu0 %v4317_v30 }
  0xdc   :  { %1165 = vmatpush1.bf16.msra.mxu1 %v3911_v33  ;;  %v3984_v33 = vcombine.high %v220_v26, %v224_v28 }
  0xdd   :  { %1166 = vmatprep.subr.bf16.mxu1 %v3920_v34  ;;  %v228_v34 = vld [vmem:[#allocation5 + $0x350] sm:$0xff] }
  0xde   :  { %3407 = vmatpush1.bf16.msra.mxu0 %v4319_v31  ;;  %v181_v31 = vld [vmem:[#allocation5 + $0x1d8] sm:$0xff] }
  0xdf   :  { %1098 = vmatmul.mubr.bf16.gmra.mrb[40].mxu1 %v4960_v41  ;;  %3408 = vmatprep.subr.bf16.mxu0 %v4320_v36  ;;  %v193_v36 = vld [vmem:[#allocation5 + $0x238] sm:$0xff] }
  0xe0   :  { %1167 = vmatpush1.bf16.msra.mxu1 %v3919_v39  ;;  %1107 = vmatprep.mubr.bf16.mxu1 %v4962_v43  ;;  %v3983_v39 = vcombine.low %v220_v26, %v224_v28  ;;  %v177_v26 = vld [vmem:[#allocation5 + $0x1b8] sm:$0xff]  ;;  %v3929_v28 = vcombine.low %v165_v18, %v169_v19 }
  0xe1   :  { %1168 = vmatprep.subr.bf16.mxu1 %v3928_v42  ;;  %v3992_v42 = vcombine.high %v228_v34, %v232_v35 }
  0xe2   :  { %3409 = vmatpush1.bf16.msra.mxu0 %v4322_v37 }
  0xe3   :  { %3410 = vmatprep.subr.bf16.mxu0 %v4323_v46 }
  0xe4   :  { %1169 = vmatpush1.bf16.msra.mxu1 %v3927_v48  ;;  %v3991_v48 = vcombine.low %v228_v34, %v232_v35  ;;  %v189_v35 = vld [vmem:[#allocation5 + $0x218] sm:$0xff] }
  0xe5   :  { %1170 = vmatprep.subr.bf16.mxu1 %v3936_v49  ;;  %v4000_v49 = vcombine.high %v236_v44, %v240_v45  ;;  %v201_v44 = vld [vmem:[#allocation5 + $0x278] sm:$0xff]  ;;  %v3953_v45 = vcombine.low %v189_v35, %v193_v36 }
  0xe6   :  { %3411 = vmatpush1.bf16.msra.mxu0 %v4325_v47  ;;  %v205_v47 = vld [vmem:[#allocation5 + $0x298] sm:$0xff] }
  0xe7   :  { %1108 = vmatmul.mubr.bf16.gmra.mrb[44].mxu1 %v4966_v55  ;;  %3493 = vmatprep.subr.bf16.mxu0 %v4328_v52  ;;  %v217_v52 = vld [vmem:[#allocation5 + $0x2f8] sm:$0xff] }
  0xe8   :  { %1171 = vmatpush1.bf16.msra.mxu1 %v3935_v56  ;;  %1117 = vmatprep.mubr.bf16.mxu1 %v4968_v57  ;;  %v4008_v56 = vcombine.high %v244_v50, %v248_v51  ;;  %v213_v51 = vld [vmem:[#allocation5 + $0x2d8] sm:$0xff] }
  0xe9   :  { %1172 = vmatprep.subr.bf16.mxu1 %v3944_v58  ;;  %v125_v58 = vld [vmem:[#allocation5 + $0x18] sm:$0xff] }
  0xea   :  { %v3890_v61 = vcombine.high %v125_v58, %v129_v59 }
  0xec   :  { %1173 = vmatpush1.bf16.msra.mxu1 %v3943_v63  ;;  %v137_v63 = vld [vmem:[#allocation5 + $0x78] sm:$0xff] }
  0xed   :  { %1174 = vmatprep.subr.bf16.mxu1 %v3952_v0  ;;  %v3889_v0 = vcombine.low %v125_v58, %v129_v59  ;;  %v3898_v1 = vcombine.high %v133_v62, %v137_v63  ;;  %v3897_v4 = vcombine.low %v133_v62, %v137_v63  ;;  %v221_v58 = vld [vmem:[#allocation5 + $0x318] sm:$0xff] }
  0xee   :  { %v225_v59 = vld [vmem:[#allocation5 + $0x338] sm:$0xff] }
  0xef   :  { %1118 = vmatmul.mubr.bf16.gmra.mrb[48].mxu1 %v4972_v5  ;;  %v229_v62 = vld [vmem:[#allocation5 + $0x358] sm:$0xff] }
  0xf0   :  { %1175 = vmatpush1.bf16.msra.mxu1 %v3951_v6  ;;  %1127 = vmatprep.mubr.bf16.mxu1 %v4974_v7  ;;  %v3906_v6 = vcombine.high %v141_v2, %v145_v3  ;;  %v233_v63 = vld [vmem:[#allocation5 + $0x378] sm:$0xff] }
  0xf1   :  { %1176 = vmatprep.subr.bf16.mxu1 %v3960_v8  ;;  %v149_v8 = vld [vmem:[#allocation5 + $0xd8] sm:$0xff] }
  0xf2   :  { %v3914_v11 = vcombine.high %v149_v8, %v153_v9  ;;  %v237_v2 = vld [vmem:[#allocation5 + $0x398] sm:$0xff] }
  0xf3   :  { %v241_v3 = vld [vmem:[#allocation5 + $0x3b8] sm:$0xff] }
  0xf4   :  { %1177 = vmatpush1.bf16.msra.mxu1 %v3959_v15  ;;  %v161_v15 = vld [vmem:[#allocation5 + $0x138] sm:$0xff] }
  0xf5   :  { %1178 = vmatprep.subr.bf16.mxu1 %v3968_v16  ;;  %v3913_v16 = vcombine.low %v149_v8, %v153_v9  ;;  %v3922_v17 = vcombine.high %v157_v13, %v161_v15  ;;  %v3921_v21 = vcombine.low %v157_v13, %v161_v15  ;;  %v245_v8 = vld [vmem:[#allocation5 + $0x3d8] sm:$0xff]  ;;  %v252_v15 = vlaneseq }
  0xf6   :  { %v249_v9 = vld [vmem:[#allocation5 + $0x3f8] sm:$0xff] }
  0xf7   :  { %1128 = vmatmul.mubr.bf16.gmra.mrb[52].mxu1 %v4978_v22  ;;  %v4009_v13 = vcombine.low %v245_v8, %v249_v9 }
  0xf8   :  { %1179 = vmatpush1.bf16.msra.mxu1 %v3967_v23  ;;  %1137 = vmatprep.mubr.bf16.mxu1 %v4980_v24  ;;  %v3930_v23 = vcombine.high %v165_v18, %v169_v19  ;;  %v5033_v18 = vld [vmem:[#allocation7] sm:$0xff] }
  0xf9   :  { %1180 = vmatprep.subr.bf16.mxu1 %v3976_v25  ;;  %v173_v25 = vld [vmem:[#allocation5 + $0x198] sm:$0xff] }
  0xfa   :  { %v3938_v30 = vcombine.high %v173_v25, %v177_v26 }
  0xfc   :  { %1181 = vmatpush1.bf16.msra.mxu1 %v3975_v32  ;;  %v185_v32 = vld [vmem:[#allocation5 + $0x1f8] sm:$0xff] }
  0xfd   :  { %1182 = vmatprep.subr.bf16.mxu1 %v3984_v33  ;;  %v3937_v33 = vcombine.low %v173_v25, %v177_v26  ;;  %v3946_v34 = vcombine.high %v181_v31, %v185_v32  ;;  %v3945_v37 = vcombine.low %v181_v31, %v185_v32 }
  0xff   :  { %1138 = vmatmul.mubr.bf16.gmra.mrb[56].mxu1 %v4984_v38 }
 0x100   :  { %1183 = vmatpush1.bf16.msra.mxu1 %v3983_v39  ;;  %1147 = vmatprep.mubr.bf16.mxu1 %v4986_v40  ;;  %v3954_v39 = vcombine.high %v189_v35, %v193_v36 }
 0x101   :  { %1184 = vmatprep.subr.bf16.mxu1 %v3992_v42  ;;  %v197_v42 = vld [vmem:[#allocation5 + $0x258] sm:$0xff] }
 0x102   :  { %v3962_v46 = vcombine.high %v197_v42, %v201_v44 }
 0x104   :  { %1185 = vmatpush1.bf16.msra.mxu1 %v3991_v48  ;;  %v209_v48 = vld [vmem:[#allocation5 + $0x2b8] sm:$0xff] }
 0x105   :  { %1186 = vmatprep.subr.bf16.mxu1 %v4000_v49  ;;  %v3961_v49 = vcombine.low %v197_v42, %v201_v44  ;;  %v3970_v50 = vcombine.high %v205_v47, %v209_v48 }
 0x107   :  { %1148 = vmatmul.mubr.bf16.gmra.mrb[60].mxu1 %v4990_v53 }
 0x108   :  { %1187 = vmatpush1.bf16.msra.mxu1 %v3999_v54  ;;  %1190 = vmatprep.mubr.bf16.mxu1 %v4945_v20  ;;  %v3969_v54 = vcombine.low %v205_v47, %v209_v48 }
 0x109   :  { %1188 = vmatprep.subr.bf16.mxu1 %v4008_v56  ;;  %v3978_v56 = vcombine.high %v213_v51, %v217_v52 }
 0x10c   :  { %1189 = vmatpush1.bf16.msra.mxu1 %v4007_v60  ;;  %v3977_v60 = vcombine.low %v213_v51, %v217_v52 }
 0x10d   :  { %1271 = vmatprep.subr.bf16.mxu1 %v3890_v61  ;;  %v3986_v61 = vcombine.high %v221_v58, %v225_v59 }
 0x10f   :  { %1191 = vmatmul.mubr.bf16.vlgmr.msra.gmra.mrb[64].mxu1 %v4948_v12 }
 0x110   :  { %1272 = vmatpush1.bf16.msra.mxu1 %v3889_v0  ;;  %1200 = vmatprep.mubr.bf16.mxu1 %v4950_v14  ;;  %v3985_v0 = vcombine.low %v221_v58, %v225_v59 }
 0x111   :  { %1273 = vmatprep.subr.bf16.mxu1 %v3898_v1  ;;  %v3994_v1 = vcombine.high %v229_v62, %v233_v63 }
 0x114   :  { %1274 = vmatpush1.bf16.msra.mxu1 %v3897_v4  ;;  %v3993_v4 = vcombine.low %v229_v62, %v233_v63 }
 0x115   :  { %1275 = vmatprep.subr.bf16.mxu1 %v3906_v6  ;;  %v4002_v6 = vcombine.high %v237_v2, %v241_v3 }
 0x117   :  { %1201 = vmatmul.mubr.bf16.gmra.mrb[68].mxu1 %v4954_v27 }
 0x118   :  { %1276 = vmatpush1.bf16.msra.mxu1 %v3905_v10  ;;  %1210 = vmatprep.mubr.bf16.mxu1 %v4956_v29  ;;  %v4001_v10 = vcombine.low %v237_v2, %v241_v3 }
 0x119   :  { %1277 = vmatprep.subr.bf16.mxu1 %v3914_v11  ;;  %v4010_v11 = vcombine.high %v245_v8, %v249_v9 }
 0x11c   :  { %1278 = vmatpush1.bf16.msra.mxu1 %v3913_v16  ;;  %v5029_v16 = vshrl.u32 %v252_v15, 7 }
 0x11d   :  { %1279 = vmatprep.subr.bf16.mxu1 %v3922_v17 }
 0x11e   :  { %6866 = vst [vmem:[#allocation15_spill] sm:$0xff] %v5029_v16  ;;  %v6857_v17 = vsub.s32 0, %v5029_v16  ;;  %v6856_v19 = vsub.s32 1, %v5029_v16  ;;  %v266_v8 = vsub.s32 3, %v5029_v16 }
 0x11f   :  { %1211 = vmatmul.mubr.bf16.gmra.mrb[72].mxu1 %v4960_v41 }
 0x120   :  { %1280 = vmatpush1.bf16.msra.mxu1 %v3921_v21  ;;  %1220 = vmatprep.mubr.bf16.mxu1 %v4962_v43 }
 0x121   :  { %1281 = vmatprep.subr.bf16.mxu1 %v3930_v23 }
 0x124   :  { %1282 = vmatpush1.bf16.msra.mxu1 %v3929_v28 }
 0x125   :  { %1283 = vmatprep.subr.bf16.mxu1 %v3938_v30 }
 0x127   :  { %1221 = vmatmul.mubr.bf16.gmra.mrb[76].mxu1 %v4966_v55 }
 0x128   :  { %1284 = vmatpush1.bf16.msra.mxu1 %v3937_v33  ;;  %1230 = vmatprep.mubr.bf16.mxu1 %v4968_v57 }
 0x129   :  { %1285 = vmatprep.subr.bf16.mxu1 %v3946_v34 }
 0x12c   :  { %1286 = vmatpush1.bf16.msra.mxu1 %v3945_v37 }
 0x12d   :  { %1287 = vmatprep.subr.bf16.mxu1 %v3954_v39 }
 0x12f   :  { %1231 = vmatmul.mubr.bf16.gmra.mrb[80].mxu1 %v4972_v5 }
 0x130   :  { %1288 = vmatpush1.bf16.msra.mxu1 %v3953_v45  ;;  %1240 = vmatprep.mubr.bf16.mxu1 %v4974_v7 }
 0x131   :  { %1289 = vmatprep.subr.bf16.mxu1 %v3962_v46 }
 0x134   :  { %1290 = vmatpush1.bf16.msra.mxu1 %v3961_v49  ;;  %v262_v49 = vsub.s32 2, %v5029_v16 }
 0x135   :  { %1291 = vmatprep.subr.bf16.mxu1 %v3970_v50 }
 0x136   :  { %v5102_v15 = vrot.slane %v5033_v18, %v262_v49 }
 0x137   :  { %1241 = vmatmul.mubr.bf16.gmra.mrb[84].mxu1 %v4978_v22 }
 0x138   :  { %1292 = vmatpush1.bf16.msra.mxu1 %v3969_v54  ;;  %1250 = vmatprep.mubr.bf16.mxu1 %v4980_v24 }
 0x139   :  { %1293 = vmatprep.subr.bf16.mxu1 %v3978_v56 }
 0x13c   :  { %1294 = vmatpush1.bf16.msra.mxu1 %v3977_v60 }
 0x13d   :  { %1295 = vmatprep.subr.bf16.mxu1 %v3986_v61 }
 0x13f   :  { %1251 = vmatmul.mubr.bf16.gmra.mrb[88].mxu1 %v4984_v38 }
 0x140   :  { %1296 = vmatpush1.bf16.msra.mxu1 %v3985_v0  ;;  %1260 = vmatprep.mubr.bf16.mxu1 %v4986_v40 }
 0x141   :  { %1297 = vmatprep.subr.bf16.mxu1 %v3994_v1 }
 0x144   :  { %1298 = vmatpush1.bf16.msra.mxu1 %v3993_v4 }
 0x145   :  { %1299 = vmatprep.subr.bf16.mxu1 %v4002_v6 }
 0x147   :  { %1261 = vmatmul.mubr.bf16.gmra.mrb[92].mxu1 %v4990_v53 }
 0x148   :  { %1300 = vmatpush1.bf16.msra.mxu1 %v4001_v10  ;;  %1303 = vmatprep.mubr.bf16.mxu1 %v4945_v20  ;;  %v5040_v20 = vrot.slane %v5033_v18, %v6857_v17 }
 0x149   :  { %1301 = vmatprep.subr.bf16.mxu1 %v4010_v11 }
 0x14c   :  { %1302 = vmatpush1.bf16.msra.mxu1 %v4009_v13 }
 0x14f   :  { %1304 = vmatmul.mubr.bf16.vlgmr.msra.gmra.mrb[96].mxu1 %v4948_v12  ;;  %v5045_v12 = vrot.slane %v5033_v18, %v6856_v19 }
 0x150   :  { %1313 = vmatprep.mubr.bf16.mxu1 %v4950_v14 }
 0x157   :  { %1314 = vmatmul.mubr.bf16.gmra.mrb[100].mxu1 %v4954_v27 }
 0x158   :  { %1323 = vmatprep.mubr.bf16.mxu1 %v4956_v29 }
 0x15f   :  { %1324 = vmatmul.mubr.bf16.gmra.mrb[104].mxu1 %v4960_v41 }
 0x160   :  { %1333 = vmatprep.mubr.bf16.mxu1 %v4962_v43 }
 0x162   :  { %v966_v14 = vpop.f32.mrb[0].mxu1 }
 0x163   :  { %v5049_v27 = vadd.f32 %v966_v14, %v5040_v20  ;;  %v968_v29 = vpop.f32.mrb[1].mxu1 }
 0x164   :  { %v5052_v21 = vadd.f32 %v968_v29, %v5045_v12  ;;  %v970_v41 = vpop.f32.mrb[2].mxu1 }
 0x165   :  { %v1512_v23 = vmul.f32 0.044715, %v5049_v27  ;;  %v5056_v25 = vadd.f32 %v970_v41, %v5040_v20  ;;  %v972_v26 = vpop.f32.mrb[3].mxu1 }
 0x166   :  { %v1513_v28 = vmul.f32 0.044715, %v5052_v21  ;;  %v5060_v30 = vadd.f32 %v972_v26, %v5045_v12 }
 0x167   :  { %v1640_v43 = vmul.f32 %v1512_v23, %v5049_v27  ;;  %v1520_v31 = vmul.f32 0.044715, %v5056_v25  ;;  %1334 = vmatmul.mubr.bf16.gmra.mrb[108].mxu1 %v4966_v55  ;;  %v1392_v49 = vmul.f32 0.5, %v5056_v25 }
 0x168   :  { %v1521_v32 = vmul.f32 0.044715, %v5060_v30  ;;  %1343 = vmatprep.mubr.bf16.mxu1 %v4968_v57  ;;  %v1641_v33 = vmul.f32 %v1513_v28, %v5052_v21 }
 0x169   :  { %v1768_v34 = vmul.f32 %v1640_v43, %v5049_v27  ;;  %v1648_v35 = vmul.f32 %v1520_v31, %v5056_v25  ;;  %v1384_v43 = vmul.f32 0.5, %v5049_v27 }
 0x16a   :  { %v976_v36 = vpop.f32.mrb[4].mxu1  ;;  %v1649_v37 = vmul.f32 %v1521_v32, %v5060_v30  ;;  %v1769_v39 = vmul.f32 %v1641_v33, %v5052_v21  ;;  %v5115_v32 = vrot.slane %v5033_v18, %v266_v8 }
 0x16b   :  { %v1776_v42 = vmul.f32 %v1648_v35, %v5056_v25  ;;  %v5074_v44 = vadd.f32 %v976_v36, %v5040_v20  ;;  %v978_v55 = vpop.f32.mrb[5].mxu1  ;;  %v1896_v45 = vadd.f32 %v1768_v34, %v5049_v27 }
 0x16c   :  { %v5078_v57 = vadd.f32 %v978_v55, %v5045_v12  ;;  %v980_v46 = vpop.f32.mrb[6].mxu1  ;;  %v1777_v47 = vmul.f32 %v1649_v37, %v5060_v30  ;;  %v1897_v48 = vadd.f32 %v1769_v39, %v5052_v21  ;;  %v1385_v39 = vmul.f32 0.5, %v5052_v21 }
 0x16d   :  { %v1528_v50 = vmul.f32 0.044715, %v5074_v44  ;;  %v5085_v51 = vadd.f32 %v980_v46, %v5040_v20  ;;  %v982_v52 = vpop.f32.mrb[7].mxu1  ;;  %v1904_v54 = vadd.f32 %v1776_v42, %v5056_v25  ;;  %v2024_v56 = vmul.f32 0.7978846, %v1896_v45 }
 0x16e   :  { %v1529_v58 = vmul.f32 0.044715, %v5078_v57  ;;  %v983_v59 = vadd.f32 %v982_v52, %v5045_v12  ;;  %v1905_v60 = vadd.f32 %v1777_v47, %v5060_v30  ;;  %v2025_v61 = vmul.f32 0.7978846, %v1897_v48 }
 0x16f   :  { %v1656_v62 = vmul.f32 %v1528_v50, %v5074_v44  ;;  %v1536_v63 = vmul.f32 0.044715, %v5085_v51  ;;  %1344 = vmatmul.mubr.bf16.gmra.mrb[112].mxu1 %v4972_v5  ;;  %v2032_v0 = vmul.f32 0.7978846, %v1904_v54  ;;  %4470 = vtanh.f32 %v2024_v56 }
 0x170   :  { %v1657_v1 = vmul.f32 %v1529_v58, %v5078_v57  ;;  %v1537_v2 = vmul.f32 0.044715, %v983_v59  ;;  %1353 = vmatprep.mubr.bf16.mxu1 %v4974_v7  ;;  %v2033_v3 = vmul.f32 0.7978846, %v1905_v60  ;;  %4472 = vtanh.f32 %v2025_v61 }
 0x171   :  { %v1784_v4 = vmul.f32 %v1656_v62, %v5074_v44  ;;  %v1664_v6 = vmul.f32 %v1536_v63, %v5085_v51  ;;  %4474 = vtanh.f32 %v2032_v0  ;;  %v1393_v48 = vmul.f32 0.5, %v5060_v30 }
 0x172   :  { %v1785_v9 = vmul.f32 %v1657_v1, %v5078_v57  ;;  %v1665_v10 = vmul.f32 %v1537_v2, %v983_v59  ;;  %v986_v5 = vpop.f32.mrb[8].mxu1  ;;  %4476 = vtanh.f32 %v2033_v3  ;;  %v5134_v54 = vmul.f32 0.5, %v5078_v57 }
 0x173   :  { %v1792_v11 = vmul.f32 %v1664_v6, %v5085_v51  ;;  %v988_v13 = vpop.f32.mrb[9].mxu1  ;;  %v1912_v23 = vadd.f32 %v1784_v4, %v5074_v44  ;;  %v5110_v26 = vadd.f32 %v986_v5, %v5040_v20  ;;  %v5137_v61 = vmul.f32 0.5, %v983_v59 }
 0x174   :  { %v1793_v7 = vmul.f32 %v1665_v10, %v983_v59  ;;  %v5105_v14 = vadd.f32 %v988_v13, %v5045_v12  ;;  %v990_v29 = vpop.f32.mrb[10].mxu1  ;;  %v1913_v41 = vadd.f32 %v1785_v9, %v5078_v57  ;;  %v1408_v13 = vmul.f32 0.5, %v5085_v51 }
 0x175   :  { %v992_v28 = vpop.f32.mrb[11].mxu1  ;;  %v1920_v31 = vadd.f32 %v1792_v11, %v5085_v51  ;;  %v5122_v37 = vadd.f32 %v990_v29, %v5040_v20  ;;  %v2040_v27 = vmul.f32 0.7978846, %v1912_v23  ;;  %v1544_v47 = vmul.f32 0.044715, %v5110_v26 }
 0x176   :  { %v1545_v33 = vmul.f32 0.044715, %v5105_v14  ;;  %v5119_v34 = vadd.f32 %v992_v28, %v5045_v12  ;;  %v1921_v35 = vadd.f32 %v1793_v7, %v983_v59  ;;  %v2041_v36 = vmul.f32 0.7978846, %v1913_v41  ;;  %v4326_v23 = vld [vmem:[#allocation8 + $0x100] ss:$8 sps:$4 sm:$0xff]  }
 0x177   :  { %1354 = vmatmul.mubr.bf16.gmra.mrb[116].mxu1 %v4978_v22  ;;  %v2048_v42 = vmul.f32 0.7978846, %v1920_v31  ;;  %v1552_v25 = vmul.f32 0.044715, %v5122_v37  ;;  %v1672_v1 = vmul.f32 %v1544_v47, %v5110_v26  ;;  %v1400_v59 = vmul.f32 0.5, %v5074_v44 }
 0x178   :  { %v1673_v55 = vmul.f32 %v1545_v33, %v5105_v14  ;;  %v1553_v18 = vmul.f32 0.044715, %v5119_v34  ;;  %1363 = vmatprep.mubr.bf16.mxu1 %v4980_v24  ;;  %v2049_v45 = vmul.f32 0.7978846, %v1921_v35  ;;  %4478 = vtanh.f32 %v2041_v36 }
 0x179   :  { %v4471_v46 = vpop.eup %4470  ;;  %4480 = vtanh.f32 %v2040_v27  ;;  %v1680_v29 = vmul.f32 %v1552_v25, %v5122_v37  ;;  %v5160_v28 = vmul.f32 0.5, %v5110_v26  ;;  %v1800_v35 = vmul.f32 %v1672_v1, %v5110_v26  ;;  %v4331_v27 = vld [vmem:[#allocation8 + $0x114] ss:$8 sps:$4 sm:$0xff]   ;;  %v4334_v1 = vld [vmem:[#allocation8 + $0x124] ss:$8 sps:$4 sm:$0xff]  }
 0x17a   :  { %v4473_v22 = vpop.eup %4472  ;;  %v1681_v21 = vmul.f32 %v1553_v18, %v5119_v34  ;;  %v996_v50 = vpop.f32.mrb[12].mxu1  ;;  %v2280_v52 = vadd.f32 1.0, %v4471_v46  ;;  %4482 = vtanh.f32 %v2049_v45  ;;  %v1801_v56 = vmul.f32 %v1673_v55, %v5105_v14 }
 0x17b   :  { %v4475_v24 = vpop.eup %4474  ;;  %v998_v58 = vpop.f32.mrb[13].mxu1  ;;  %v2281_v60 = vadd.f32 1.0, %v4473_v22  ;;  %4484 = vtanh.f32 %v2048_v42  ;;  %v5146_v2 = vadd.f32 %v996_v50, %v5040_v20  ;;  %v5173_v47 = vmul.f32 0.5, %v5105_v14 }
 0x17c   :  { %v4477_v30 = vpop.eup %4476  ;;  %v1809_v62 = vmul.f32 %v1681_v21, %v5119_v34  ;;  %v5142_v63 = vadd.f32 %v998_v58, %v5045_v12  ;;  %v1000_v0 = vpop.f32.mrb[14].mxu1  ;;  %v2288_v57 = vadd.f32 1.0, %v4475_v24  ;;  %v2408_v9 = vmul.f32 %v2280_v52, %v1384_v43 }
 0x17d   :  { %v1002_v3 = vpop.f32.mrb[15].mxu1  ;;  %v2289_v4 = vadd.f32 1.0, %v4477_v30  ;;  %v2409_v5 = vmul.f32 %v2281_v60, %v1385_v39  ;;  %v1929_v7 = vadd.f32 %v1801_v56, %v5105_v14  ;;  %v1560_v43 = vmul.f32 0.044715, %v5146_v2  ;;  %v4329_v60 = vld [vmem:[#allocation8 + $0x110] ss:$8 sps:$4 sm:$0xff]  }
 0x17e   :  { %v1561_v6 = vmul.f32 0.044715, %v5142_v63  ;;  %v5151_v8 = vadd.f32 %v1002_v3, %v5045_v12  ;;  %v2416_v10 = vmul.f32 %v2288_v57, %v1392_v49  ;;  %v1937_v44 = vadd.f32 %v1809_v62, %v5119_v34 }
 0x17f   :  { %1364 = vmatmul.mubr.bf16.gmra.mrb[120].mxu1 %v4984_v38  ;;  %v2417_v11 = vmul.f32 %v2289_v4, %v1393_v48  ;;  %v2057_v33 = vmul.f32 0.7978846, %v1929_v7  ;;  %v5167_v39 = vadd.f32 %v1000_v0, %v5040_v20  ;;  %v1808_v49 = vmul.f32 %v1680_v29, %v5122_v37  ;;  %v4332_v7 = vld [vmem:[#allocation8 + $0x120] ss:$8 sps:$4 sm:$0xff]  }
 0x180   :  { %v2536_v41 = vpack.c.bf16 %v2416_v10, %v2408_v9  ;;  %1373 = vmatprep.mubr.bf16.mxu1 %v4986_v40  ;;  %v1569_v38 = vmul.f32 0.044715, %v5151_v8  ;;  %v1689_v36 = vmul.f32 %v1561_v6, %v5142_v63  ;;  %v2065_v42 = vmul.f32 0.7978846, %v1937_v44 }
 0x181   :  { %v2537_v31 = vpack.c.bf16 %v2417_v11, %v2409_v5  ;;  %4486 = vtanh.f32 %v2057_v33  ;;  %v1688_v24 = vmul.f32 %v1560_v43, %v5146_v2  ;;  %v1568_v62 = vmul.f32 0.044715, %v5167_v39 }
 0x182   :  { %v4479_v51 = vpop.eup %4478  ;;  %v1006_v40 = vpop.f32.mrb[16].mxu1  ;;  %4488 = vtanh.f32 %v2065_v42  ;;  %v1697_v56 = vmul.f32 %v1569_v38, %v5151_v8  ;;  %v1817_v25 = vmul.f32 %v1689_v36, %v5142_v63  ;;  %v1928_v9 = vadd.f32 %v1800_v35, %v5110_v26 }
 0x183   :  { %v4481_v55 = vpop.eup %4480  ;;  %v5170_v18 = vadd.f32 %v1006_v40, %v5040_v20  ;;  %v1008_v45 = vpop.f32.mrb[17].mxu1  ;;  %3412 = vmatprep.mubr.bf16.mxu0 %v2537_v31  ;;  %v2297_v46 = vadd.f32 1.0, %v4479_v51  ;;  %v1936_v29 = vadd.f32 %v1808_v49, %v5122_v37  ;;  %v1425_v51 = vmul.f32 0.5, %v5119_v34  ;;  %v4335_v34 = vld [vmem:[#allocation8 + $0x130] ss:$8 sps:$4 sm:$0xff]  }
 0x184   :  { %v4483_v48 = vpop.eup %4482  ;;  %v5177_v22 = vadd.f32 %v1008_v45, %v5045_v12  ;;  %v1010_v21 = vpop.f32.mrb[18].mxu1  ;;  %3413 = vmatmul.mubr.bf16.vlgmr.msra.gmra.mrb[0].mxu0 %v2536_v41  ;;  %v2296_v50 = vadd.f32 1.0, %v4481_v55  ;;  %v1825_v41 = vmul.f32 %v1697_v56, %v5151_v8  ;;  %v2056_v43 = vmul.f32 0.7978846, %v1928_v9 }
 0x185   :  { %v4485_v52 = vpop.eup %4484  ;;  %v5182_v58 = vadd.f32 %v1010_v21, %v5040_v20  ;;  %v1012_v14 = vpop.f32.mrb[19].mxu1  ;;  %3494 = vmatpush1.bf16.msra.mxu0 %v4326_v23  ;;  %v2305_v30 = vadd.f32 1.0, %v4483_v48  ;;  %v1576_v3 = vmul.f32 0.044715, %v5170_v18  ;;  %v2425_v4 = vmul.f32 %v2297_v46, %v5134_v54 }
 0x186   :  { %v5187_v0 = vadd.f32 %v1012_v14, %v5045_v12  ;;  %3495 = vmatprep.subr.bf16.mxu0 %v4331_v27  ;;  %v2304_v57 = vadd.f32 1.0, %v4485_v52  ;;  %v1577_v10 = vmul.f32 0.044715, %v5177_v22  ;;  %v2424_v5 = vmul.f32 %v2296_v50, %v1400_v59  ;;  %v4340_v14 = vld [vmem:[#allocation8 + $0x144] ss:$8 sps:$4 sm:$0xff]  }
 0x187   :  { %1374 = vmatmul.mubr.bf16.gmra.mrb[124].mxu1 %v4990_v53  ;;  %v2433_v6 = vmul.f32 %v2305_v30, %v5137_v61  ;;  %v1584_v23 = vmul.f32 0.044715, %v5182_v58  ;;  %v4337_v53 = vld [vmem:[#allocation8 + $0x134] ss:$8 sps:$4 sm:$0xff]   ;;  %v1696_v54 = vmul.f32 %v1568_v62, %v5167_v39  ;;  %v2064_v59 = vmul.f32 0.7978846, %v1936_v29 }
 0x188   :  { %v2432_v11 = vmul.f32 %v2304_v57, %v1408_v13  ;;  %v1585_v61 = vmul.f32 0.044715, %v5187_v0  ;;  %v1704_v13 = vmul.f32 %v1576_v3, %v5170_v18  ;;  %4490 = vtanh.f32 %v2056_v43  ;;  %v4343_v29 = vld [vmem:[#allocation8 + $0x154] ss:$8 sps:$4 sm:$0xff]  }
 0x189   :  { %3496 = vmatpush1.bf16.msra.mxu0 %v4329_v60  ;;  %v2545_v44 = vpack.c.bf16 %v2433_v6, %v2425_v4  ;;  %v1816_v35 = vmul.f32 %v1688_v24, %v5146_v2  ;;  %v1705_v36 = vmul.f32 %v1577_v10, %v5177_v22  ;;  %4492 = vtanh.f32 %v2064_v59  ;;  %v4338_v10 = vld [vmem:[#allocation8 + $0x140] ss:$8 sps:$4 sm:$0xff]  }
 0x18a   :  { %v1016_v26 = vpop.f32.mrb[20].mxu1  ;;  %v2544_v38 = vpack.c.bf16 %v2432_v11, %v2424_v5  ;;  %3497 = vmatprep.subr.bf16.mxu0 %v4334_v1  ;;  %v1712_v55 = vmul.f32 %v1584_v23, %v5182_v58  ;;  %v1945_v48 = vadd.f32 %v1817_v25, %v5142_v63  ;;  %v1953_v49 = vadd.f32 %v1825_v41, %v5151_v8 }
 0x18b   :  { %v5202_v31 = vadd.f32 %v1016_v26, %v5040_v20  ;;  %v1018_v33 = vpop.f32.mrb[21].mxu1  ;;  %3422 = vmatprep.mubr.bf16.mxu0 %v2545_v44  ;;  %v4487_v42 = vpop.eup %4486  ;;  %v1824_v50 = vmul.f32 %v1696_v54, %v5167_v39  ;;  %v1713_v52 = vmul.f32 %v1585_v61, %v5187_v0  ;;  %v1424_v56 = vmul.f32 0.5, %v5122_v37 }
 0x18c   :  { %v5208_v40 = vadd.f32 %v1018_v33, %v5045_v12  ;;  %v1020_v27 = vpop.f32.mrb[22].mxu1  ;;  %3423 = vmatmul.mubr.bf16.gmra.mrb[4].mxu0 %v2544_v38  ;;  %v4489_v21 = vpop.eup %4488  ;;  %v2313_v24 = vadd.f32 1.0, %v4487_v42  ;;  %v5220_v60 = vmul.f32 %v1704_v13, %v5170_v18  ;;  %v2073_v57 = vmul.f32 0.7978846, %v1945_v48 }
 0x18d   :  { %v5212_v45 = vadd.f32 %v1020_v27, %v5040_v20  ;;  %v1022_v46 = vpop.f32.mrb[23].mxu1  ;;  %3498 = vmatpush1.bf16.msra.mxu0 %v4332_v7  ;;  %v1592_v30 = vmul.f32 0.044715, %v5202_v31  ;;  %v2321_v62 = vadd.f32 1.0, %v4489_v21  ;;  %v1833_v25 = vmul.f32 %v1705_v36, %v5177_v22 }
 0x18e   :  { %3499 = vmatprep.subr.bf16.mxu0 %v4337_v53  ;;  %v1593_v1 = vmul.f32 0.044715, %v5208_v40  ;;  %v5226_v3 = vadd.f32 %v1022_v46, %v5045_v12  ;;  %v2081_v4 = vmul.f32 0.7978846, %v1953_v49  ;;  %v5229_v6 = vmul.f32 %v1712_v55, %v5182_v58  ;;  %v4346_v49 = vld [vmem:[#allocation8 + $0x164] ss:$8 sps:$4 sm:$0xff]  }
 0x18f   :  { %v2441_v37 = vmul.f32 %v2313_v24, %v5173_v47  ;;  %v2449_v9 = vmul.f32 %v2321_v62, %v1425_v51  ;;  %4494 = vtanh.f32 %v2073_v57  ;;  %v1841_v5 = vmul.f32 %v1713_v52, %v5187_v0 }
 0x190   :  { %v1600_v11 = vmul.f32 0.044715, %v5212_v45  ;;  %v5235_v41 = vmul.f32 0.5, %v5142_v63  ;;  %4496 = vtanh.f32 %v2081_v4  ;;  %v1720_v23 = vmul.f32 %v1592_v30, %v5202_v31  ;;  %v4341_v63 = vld [vmem:[#allocation8 + $0x150] ss:$8 sps:$4 sm:$0xff]  }
 0x191   :  { %3500 = vmatpush1.bf16.msra.mxu0 %v4335_v34  ;;  %v2553_v53 = vpack.c.bf16 %v2449_v9, %v2441_v37  ;;  %v1944_v43 = vadd.f32 %v1816_v35, %v5146_v2  ;;  %v1721_v54 = vmul.f32 %v1593_v1, %v5208_v40  ;;  %v1601_v61 = vmul.f32 0.044715, %v5226_v3 }
 0x192   :  { %v1026_v7 = vpop.f32.mrb[24].mxu1  ;;  %3501 = vmatprep.subr.bf16.mxu0 %v4340_v14  ;;  %v1952_v59 = vadd.f32 %v1824_v50, %v5167_v39  ;;  %v4491_v13 = vpop.eup %4490  ;;  %v1441_v35 = vmul.f32 0.5, %v5151_v8  ;;  %v5253_v36 = vmul.f32 0.5, %v5146_v2  ;;  %v1728_v55 = vmul.f32 %v1600_v11, %v5212_v45 }
 0x193   :  { %v5239_v44 = vadd.f32 %v1026_v7, %v5040_v20  ;;  %v1028_v47 = vpop.f32.mrb[25].mxu1  ;;  %3432 = vmatprep.mubr.bf16.mxu0 %v2553_v53  ;;  %v2072_v27 = vmul.f32 0.7978846, %v1944_v43  ;;  %v4493_v42 = vpop.eup %4492  ;;  %v2312_v46 = vadd.f32 1.0, %v4491_v13  ;;  %v5260_v21 = vmul.f32 %v1720_v23, %v5202_v31  ;;  %v4349_v23 = vld [vmem:[#allocation8 + $0x174] ss:$8 sps:$4 sm:$0xff]  }
 0x194   :  { %v5245_v26 = vadd.f32 %v1028_v47, %v5045_v12  ;;  %v1030_v38 = vpop.f32.mrb[26].mxu1  ;;  %v2080_v48 = vmul.f32 0.7978846, %v1952_v59  ;;  %v2320_v8 = vadd.f32 1.0, %v4493_v42  ;;  %v5264_v2 = vmul.f32 %v1721_v54, %v5208_v40 }
 0x195   :  { %v5249_v33 = vadd.f32 %v1030_v38, %v5040_v20  ;;  %v1032_v51 = vpop.f32.mrb[27].mxu1  ;;  %3502 = vmatpush1.bf16.msra.mxu0 %v4338_v10  ;;  %v1608_v50 = vmul.f32 0.044715, %v5239_v44  ;;  %4498 = vtanh.f32 %v2072_v27  ;;  %v1729_v52 = vmul.f32 %v1601_v61, %v5226_v3  ;;  %v4344_v10 = vld [vmem:[#allocation8 + $0x160] ss:$8 sps:$4 sm:$0xff]  }
 0x196   :  { %v5257_v34 = vadd.f32 %v1032_v51, %v5045_v12  ;;  %3503 = vmatprep.subr.bf16.mxu0 %v4343_v29  ;;  %v1609_v24 = vmul.f32 0.044715, %v5245_v26  ;;  %4500 = vtanh.f32 %v2080_v48  ;;  %v2440_v30 = vmul.f32 %v2312_v46, %v5160_v28 }
 0x197   :  { %v1616_v14 = vmul.f32 0.044715, %v5249_v33  ;;  %v2448_v62 = vmul.f32 %v2320_v8, %v1424_v56  ;;  %v1961_v57 = vadd.f32 %v1833_v25, %v5177_v22  ;;  %v5272_v1 = vmul.f32 %v1728_v55, %v5212_v45  ;;  %v4347_v55 = vld [vmem:[#allocation8 + $0x170] ss:$8 sps:$4 sm:$0xff]  }
 0x198   :  { %v1617_v4 = vmul.f32 0.044715, %v5257_v34  ;;  %v5276_v9 = vmul.f32 0.5, %v5167_v39  ;;  %v1969_v11 = vadd.f32 %v1841_v5, %v5187_v0  ;;  %v1736_v28 = vmul.f32 %v1608_v50, %v5239_v44  ;;  %v4352_v50 = vld [vmem:[#allocation8 + $0x184] ss:$8 sps:$4 sm:$0xff]  }
 0x199   :  { %3504 = vmatpush1.bf16.msra.mxu0 %v4341_v63  ;;  %v4495_v7 = vpop.eup %4494  ;;  %v2552_v56 = vpack.c.bf16 %v2448_v62, %v2440_v30  ;;  %v2089_v47 = vmul.f32 0.7978846, %v1961_v57  ;;  %v1737_v43 = vmul.f32 %v1609_v24, %v5245_v26  ;;  %v1744_v5 = vmul.f32 %v1616_v14, %v5249_v33  ;;  %v4350_v62 = vld [vmem:[#allocation8 + $0x180] ss:$8 sps:$4 sm:$0xff]  }
 0x19a   :  { %v1036_v37 = vpop.f32.mrb[28].mxu1  ;;  %3505 = vmatprep.subr.bf16.mxu0 %v4346_v49  ;;  %v4497_v53 = vpop.eup %4496  ;;  %v2329_v54 = vadd.f32 1.0, %v4495_v7  ;;  %v2097_v38 = vmul.f32 0.7978846, %v1969_v11  ;;  %v5292_v51 = vmul.f32 %v1729_v52, %v5226_v3  ;;  %v1745_v27 = vmul.f32 %v1617_v4, %v5257_v34 }
 0x19b   :  { %v5281_v29 = vadd.f32 %v1036_v37, %v5040_v20  ;;  %v1038_v25 = vpop.f32.mrb[29].mxu1  ;;  %3433 = vmatmul.mubr.bf16.gmra.mrb[8].mxu0 %v2552_v56  ;;  %v2337_v63 = vadd.f32 1.0, %v4497_v53  ;;  %4502 = vtanh.f32 %v2089_v47  ;;  %v5304_v8 = vmul.f32 %v1736_v28, %v5239_v44  ;;  %v4355_v56 = vld [vmem:[#allocation8 + $0x194] ss:$8 sps:$4 sm:$0xff]  }
 0x19c   :  { %v5285_v39 = vadd.f32 %v1038_v25, %v5045_v12  ;;  %v1040_v61 = vpop.f32.mrb[30].mxu1  ;;  %4504 = vtanh.f32 %v2097_v38  ;;  %v2457_v48 = vmul.f32 %v2329_v54, %v5235_v41  ;;  %v5307_v52 = vmul.f32 0.5, %v5187_v0 }
 0x19d   :  { %v5289_v59 = vadd.f32 %v1040_v61, %v5040_v20  ;;  %v1042_v13 = vpop.f32.mrb[31].mxu1  ;;  %3506 = vmatpush1.bf16.msra.mxu0 %v4344_v10  ;;  %v1624_v46 = vmul.f32 0.044715, %v5281_v29  ;;  %v2465_v49 = vmul.f32 %v2337_v63, %v1441_v35  ;;  %v5301_v20 = vmul.f32 0.5, %v5177_v22 }
 0x19e   :  { %v5296_v42 = vadd.f32 %v1042_v13, %v5045_v12  ;;  %3507 = vmatprep.subr.bf16.mxu0 %v4349_v23  ;;  %v1960_v12 = vadd.f32 %v5220_v60, %v5170_v18  ;;  %v1968_v24 = vadd.f32 %v5229_v6, %v5182_v58  ;;  %v5314_v41 = vmul.f32 %v1737_v43, %v5245_v26 }
 0x19f   :  { %v4499_v14 = vpop.eup %4498  ;;  %v5317_v22 = vmul.f32 %v1744_v5, %v5249_v33  ;;  %v2561_v35 = vpack.c.bf16 %v2465_v49, %v2457_v48  ;;  %v5320_v30 = vmul.f32 0.5, %v5170_v18  ;;  %v5323_v57 = vmul.f32 %v1745_v27, %v5257_v34  ;;  %v4358_v49 = vld [vmem:[#allocation8 + $0x1a4] ss:$8 sps:$4 sm:$0xff]  }
 0x1a0   :  { %v4501_v0 = vpop.eup %4500  ;;  %v1625_v60 = vmul.f32 0.044715, %v5285_v39  ;;  %v2328_v4 = vadd.f32 1.0, %v4499_v14  ;;  %v2088_v37 = vmul.f32 0.7978846, %v1960_v12  ;;  %v1752_v10 = vmul.f32 %v1624_v46, %v5281_v29 }
 0x1a1   :  { %3508 = vmatpush1.bf16.msra.mxu0 %v4347_v55  ;;  %3442 = vmatprep.mubr.bf16.mxu0 %v2561_v35  ;;  %v2336_v11 = vadd.f32 1.0, %v4501_v0  ;;  %v2096_v28 = vmul.f32 0.7978846, %v1968_v24  ;;  %v1632_v25 = vmul.f32 0.044715, %v5289_v59  ;;  %v5335_v53 = vmul.f32 0.5, %v5182_v58 }
 0x1a2   :  { %v1079_v6 = vpop.f32.mrb[32].mxu1  ;;  %3509 = vmatprep.subr.bf16.mxu0 %v4352_v50  ;;  %4506 = vtanh.f32 %v2088_v37  ;;  %v2456_v43 = vmul.f32 %v2328_v4, %v5253_v36  ;;  %v1753_v63 = vmul.f32 %v1625_v60, %v5285_v39  ;;  %v1633_v13 = vmul.f32 0.044715, %v5296_v42  ;;  %v4353_v58 = vld [vmem:[#allocation8 + $0x190] ss:$8 sps:$4 sm:$0xff]  }
 0x1a3   :  { %v5328_v7 = vadd.f32 %v1079_v6, %v5102_v15  ;;  %v1081_v18 = vpop.f32.mrb[33].mxu1  ;;  %v2464_v54 = vmul.f32 %v2336_v11, %v5276_v9  ;;  %4508 = vtanh.f32 %v2096_v28  ;;  %v5349_v36 = vmul.f32 %v1752_v10, %v5281_v29 }
 0x1a4   :  { %v5332_v23 = vadd.f32 %v1081_v18, %v5115_v32  ;;  %v1083_v47 = vpop.f32.mrb[34].mxu1  ;;  %v1977_v35 = vadd.f32 %v5264_v2, %v5208_v40  ;;  %v1985_v4 = vadd.f32 %v5292_v51, %v5226_v3  ;;  %v1760_v6 = vmul.f32 %v1632_v25, %v5289_v59  ;;  %v4356_v2 = vld [vmem:[#allocation8 + $0x1a0] ss:$8 sps:$4 sm:$0xff]   ;;  %v4361_v25 = vld [vmem:[#allocation8 + $0x1b4] ss:$8 sps:$4 sm:$0xff]  }
 0x1a5   :  { %v1514_v61 = vmul.f32 0.044715, %v5328_v7  ;;  %v5341_v38 = vadd.f32 %v1083_v47, %v5102_v15  ;;  %v1085_v5 = vpop.f32.mrb[35].mxu1  ;;  %3510 = vmatpush1.bf16.msra.mxu0 %v4350_v62  ;;  %v4503_v55 = vpop.eup %4502  ;;  %v2560_v9 = vpack.c.bf16 %v2464_v54, %v2456_v43  ;;  %v1761_v37 = vmul.f32 %v1633_v13, %v5296_v42 }
 0x1a6   :  { %v5346_v27 = vadd.f32 %v1085_v5, %v5115_v32  ;;  %3511 = vmatprep.subr.bf16.mxu0 %v4355_v56  ;;  %v4505_v50 = vpop.eup %4504  ;;  %v1515_v12 = vmul.f32 0.044715, %v5332_v23  ;;  %v2345_v24 = vadd.f32 1.0, %v4503_v55  ;;  %v5364_v11 = vmul.f32 0.5, %v5208_v40 }
 0x1a7   :  { %v1642_v46 = vmul.f32 %v1514_v61, %v5328_v7  ;;  %v1522_v48 = vmul.f32 0.044715, %v5341_v38  ;;  %3443 = vmatmul.mubr.bf16.gmra.mrb[12].mxu0 %v2560_v9  ;;  %v2353_v0 = vadd.f32 1.0, %v4505_v50  ;;  %v2105_v18 = vmul.f32 0.7978846, %v1977_v35 }
 0x1a8   :  { %v1523_v14 = vmul.f32 0.044715, %v5346_v27  ;;  %v2473_v28 = vmul.f32 %v2345_v24, %v5301_v20  ;;  %v5373_v54 = vmul.f32 %v1753_v63, %v5285_v39  ;;  %v1643_v40 = vmul.f32 %v1515_v12, %v5332_v23  ;;  %v4364_v50 = vld [vmem:[#allocation8 + $0x1c4] ss:$8 sps:$4 sm:$0xff]  }
 0x1a9   :  { %v1770_v62 = vmul.f32 %v1642_v46, %v5328_v7  ;;  %v1650_v60 = vmul.f32 %v1522_v48, %v5341_v38  ;;  %3512 = vmatpush1.bf16.msra.mxu0 %v4353_v58  ;;  %v2481_v56 = vmul.f32 %v2353_v0, %v5307_v52  ;;  %v2113_v61 = vmul.f32 0.7978846, %v1985_v4 }
 0x1aa   :  { %v1089_v10 = vpop.f32.mrb[36].mxu1  ;;  %3513 = vmatprep.subr.bf16.mxu0 %v4358_v49  ;;  %4510 = vtanh.f32 %v2105_v18  ;;  %v1651_v52 = vmul.f32 %v1523_v14, %v5346_v27  ;;  %v5382_v46 = vmul.f32 %v1760_v6, %v5289_v59  ;;  %v5385_v63 = vmul.f32 %v1761_v37, %v5296_v42  ;;  %v4359_v49 = vld [vmem:[#allocation8 + $0x1b0] ss:$8 sps:$4 sm:$0xff]   ;;  %v4362_v6 = vld [vmem:[#allocation8 + $0x1c0] ss:$8 sps:$4 sm:$0xff]  }
 0x1ab   :  { %v1778_v47 = vmul.f32 %v1650_v60, %v5341_v38  ;;  %v5370_v43 = vadd.f32 %v1089_v10, %v5102_v15  ;;  %v1091_v51 = vpop.f32.mrb[37].mxu1  ;;  %v1898_v20 = vadd.f32 %v1770_v62, %v5328_v7  ;;  %v2569_v13 = vpack.c.bf16 %v2481_v56, %v2473_v28 }
 0x1ac   :  { %v1093_v5 = vpop.f32.mrb[38].mxu1  ;;  %v5379_v58 = vadd.f32 %v1091_v51, %v5115_v32  ;;  %v4507_v9 = vpop.eup %4506  ;;  %4512 = vtanh.f32 %v2113_v61  ;;  %v5389_v12 = vmul.f32 0.5, %v5328_v7  ;;  %v5393_v35 = vmul.f32 0.5, %v5226_v3 }
 0x1ad   :  { %v1095_v55 = vpop.f32.mrb[39].mxu1  ;;  %v1906_v48 = vadd.f32 %v1778_v47, %v5341_v38  ;;  %3514 = vmatpush1.bf16.msra.mxu0 %v4356_v2  ;;  %3452 = vmatprep.mubr.bf16.mxu0 %v2569_v13  ;;  %v2344_v24 = vadd.f32 1.0, %v4507_v9  ;;  %v1530_v14 = vmul.f32 0.044715, %v5370_v43  ;;  %v4509_v62 = vpop.eup %4508  ;;  %v5396_v0 = vmul.f32 %v1643_v40, %v5332_v23 }
 0x1ae   :  { %3515 = vmatprep.subr.bf16.mxu0 %v4361_v25  ;;  %v5399_v60 = vmul.f32 0.5, %v5341_v38  ;;  %v5402_v4 = vadd.f32 %v1093_v5, %v5102_v15  ;;  %v1976_v7 = vadd.f32 %v5260_v21, %v5202_v31  ;;  %v2026_v37 = vmul.f32 0.7978846, %v1898_v20  ;;  %v4367_v5 = vld [vmem:[#allocation8 + $0x1d4] ss:$8 sps:$4 sm:$0xff]  }
 0x1af   :  { %v2352_v10 = vadd.f32 1.0, %v4509_v62  ;;  %v5407_v3 = vmul.f32 %v1651_v52, %v5346_v27  ;;  %v1531_v18 = vmul.f32 0.044715, %v5379_v58  ;;  %v2034_v2 = vmul.f32 0.7978846, %v1906_v48 }
 0x1b0   :  { %v5411_v28 = vmul.f32 0.5, %v5202_v31  ;;  %v1984_v38 = vadd.f32 %v5272_v1, %v5212_v45  ;;  %v2104_v56 = vmul.f32 0.7978846, %v1976_v7  ;;  %v2472_v21 = vmul.f32 %v2344_v24, %v5320_v30  ;;  %v4365_v24 = vld [vmem:[#allocation8 + $0x1d0] ss:$8 sps:$4 sm:$0xff]  }
 0x1b1   :  { %3516 = vmatpush1.bf16.msra.mxu0 %v4359_v49  ;;  %v2480_v51 = vmul.f32 %v2352_v10, %v5335_v53  ;;  %v1658_v25 = vmul.f32 %v1530_v14, %v5370_v43  ;;  %v5419_v40 = vadd.f32 %v1095_v55, %v5115_v32  ;;  %v1538_v31 = vmul.f32 0.044715, %v5402_v4 }
 0x1b2   :  { %v1099_v47 = vpop.f32.mrb[40].mxu1  ;;  %3517 = vmatprep.subr.bf16.mxu0 %v4364_v50  ;;  %v2112_v20 = vmul.f32 0.7978846, %v1984_v38  ;;  %4514 = vtanh.f32 %v2104_v56  ;;  %v1659_v53 = vmul.f32 %v1531_v18, %v5379_v58  ;;  %v1993_v49 = vadd.f32 %v5314_v41, %v5245_v26 }
 0x1b3   :  { %v1101_v61 = vpop.f32.mrb[41].mxu1  ;;  %v5423_v1 = vadd.f32 %v1099_v47, %v5102_v15  ;;  %4516 = vtanh.f32 %v2026_v37  ;;  %v2568_v30 = vpack.c.bf16 %v2480_v51, %v2472_v21  ;;  %v1539_v48 = vmul.f32 0.044715, %v5419_v40  ;;  %v4370_v37 = vld [vmem:[#allocation8 + $0x1e4] ss:$8 sps:$4 sm:$0xff]  }
 0x1b4   :  { %v1103_v13 = vpop.f32.mrb[42].mxu1  ;;  %v5427_v52 = vadd.f32 %v1101_v61, %v5115_v32  ;;  %v4511_v9 = vpop.eup %4510  ;;  %4518 = vtanh.f32 %v2112_v20  ;;  %v2001_v50 = vadd.f32 %v5323_v57, %v5257_v34  ;;  %v5435_v14 = vmul.f32 %v1658_v25, %v5370_v43  ;;  %v4368_v61 = vld [vmem:[#allocation8 + $0x1e0] ss:$8 sps:$4 sm:$0xff]  }
 0x1b5   :  { %v1105_v55 = vpop.f32.mrb[43].mxu1  ;;  %3518 = vmatpush1.bf16.msra.mxu0 %v4362_v6  ;;  %4520 = vtanh.f32 %v2034_v2  ;;  %v2361_v62 = vadd.f32 1.0, %v4511_v9  ;;  %v5438_v7 = vmul.f32 0.5, %v5212_v45  ;;  %v1666_v18 = vmul.f32 %v1538_v31, %v5402_v4 }
 0x1b6   :  { %3453 = vmatmul.mubr.bf16.gmra.mrb[16].mxu0 %v2568_v30  ;;  %3519 = vmatprep.subr.bf16.mxu0 %v4367_v5  ;;  %v4513_v10 = vpop.eup %4512  ;;  %v1546_v41 = vmul.f32 0.044715, %v5423_v1  ;;  %v2121_v38 = vmul.f32 0.7978846, %v1993_v49  ;;  %v2129_v57 = vmul.f32 0.7978846, %v2001_v50  ;;  %v5443_v6 = vmul.f32 %v1659_v53, %v5379_v58 }
 0x1b7   :  { %v2369_v2 = vadd.f32 1.0, %v4513_v10  ;;  %v1547_v56 = vmul.f32 0.044715, %v5427_v52  ;;  %v5447_v47 = vmul.f32 0.5, %v5245_v26  ;;  %v2489_v45 = vmul.f32 %v2361_v62, %v5364_v11  ;;  %v4373_v11 = vld [vmem:[#allocation8 + $0x1f4] ss:$8 sps:$4 sm:$0xff]  }
 0x1b8   :  { %v1667_v21 = vmul.f32 %v1539_v48, %v5419_v40  ;;  %4522 = vtanh.f32 %v2121_v38  ;;  %v5452_v51 = vadd.f32 %v1103_v13, %v5102_v15  ;;  %v1992_v31 = vadd.f32 %v5304_v8, %v5239_v44 }
 0x1b9   :  { %3520 = vmatpush1.bf16.msra.mxu0 %v4365_v24  ;;  %v2497_v5 = vmul.f32 %v2369_v2, %v5393_v35  ;;  %4524 = vtanh.f32 %v2129_v57  ;;  %v2000_v26 = vadd.f32 %v5317_v22, %v5249_v33  ;;  %v5460_v30 = vmul.f32 %v1666_v18, %v5402_v4  ;;  %v4371_v18 = vld [vmem:[#allocation8 + $0x1f0] ss:$8 sps:$4 sm:$0xff]   ;;  %v4376_v2 = vld [vmem:[#allocation8 + $0x204] ss:$8 sps:$4 sm:$0xff]  }
 0x1ba   :  { %v1109_v25 = vpop.f32.mrb[44].mxu1  ;;  %3521 = vmatprep.subr.bf16.mxu0 %v4370_v37  ;;  %v1674_v13 = vmul.f32 %v1546_v41, %v5423_v1  ;;  %v5464_v53 = vadd.f32 %v1105_v55, %v5115_v32  ;;  %v1675_v8 = vmul.f32 %v1547_v56, %v5427_v52  ;;  %v2120_v49 = vmul.f32 0.7978846, %v1992_v31 }
 0x1bb   :  { %v1111_v20 = vpop.f32.mrb[45].mxu1  ;;  %v5467_v35 = vadd.f32 %v1109_v25, %v5102_v15  ;;  %v2577_v48 = vpack.c.bf16 %v2497_v5, %v2489_v45  ;;  %v2128_v22 = vmul.f32 0.7978846, %v2000_v26  ;;  %v1489_v62 = vmul.f32 0.5, %v5257_v34 }
 0x1bc   :  { %v1113_v9 = vpop.f32.mrb[46].mxu1  ;;  %v4515_v24 = vpop.eup %4514  ;;  %v1554_v37 = vmul.f32 0.044715, %v5452_v51  ;;  %v5473_v10 = vmul.f32 0.5, %v5239_v44  ;;  %v5476_v55 = vadd.f32 %v1111_v20, %v5115_v32  ;;  %v5481_v57 = vmul.f32 %v1667_v21, %v5419_v40 }
 0x1bd   :  { %v1115_v50 = vpop.f32.mrb[47].mxu1  ;;  %3522 = vmatpush1.bf16.msra.mxu0 %v4368_v61  ;;  %v5478_v41 = vpop.eup %4516  ;;  %3462 = vmatprep.mubr.bf16.mxu0 %v2577_v48  ;;  %v2360_v38 = vadd.f32 1.0, %v4515_v24  ;;  %4526 = vtanh.f32 %v2120_v49  ;;  %v2009_v34 = vadd.f32 %v5373_v54, %v5285_v39  ;;  %v5486_v56 = vmul.f32 %v1674_v13, %v5423_v1 }
 0x1be   :  { %3523 = vmatprep.subr.bf16.mxu0 %v4373_v11  ;;  %v4519_v44 = vpop.eup %4518  ;;  %4528 = vtanh.f32 %v2128_v22  ;;  %v1555_v45 = vmul.f32 0.044715, %v5464_v53  ;;  %v1562_v25 = vmul.f32 0.044715, %v5467_v35  ;;  %v5493_v21 = vmul.f32 %v1675_v8, %v5427_v52 }
 0x1bf   :  { %v5490_v61 = vpop.eup %4520  ;;  %v2368_v5 = vadd.f32 1.0, %v4519_v44  ;;  %v2017_v54 = vadd.f32 %v5385_v63, %v5296_v42  ;;  %v2137_v31 = vmul.f32 0.7978846, %v2009_v34  ;;  %v1682_v26 = vmul.f32 %v1554_v37, %v5452_v51 }
 0x1c0   :  { %v1488_v20 = vmul.f32 0.5, %v5249_v33  ;;  %v1563_v11 = vmul.f32 0.044715, %v5476_v55  ;;  %v5501_v13 = vadd.f32 %v1113_v9, %v5102_v15  ;;  %v2488_v49 = vmul.f32 %v2360_v38, %v5411_v28 }
 0x1c1   :  { %3524 = vmatpush1.bf16.msra.mxu0 %v4371_v18  ;;  %v2496_v8 = vmul.f32 %v2368_v5, %v5438_v7  ;;  %v2145_v22 = vmul.f32 0.7978846, %v2017_v54  ;;  %4530 = vtanh.f32 %v2137_v31  ;;  %v1683_v37 = vmul.f32 %v1555_v45, %v5464_v53 }
 0x1c2   :  { %v1119_v48 = vpop.f32.mrb[48].mxu1  ;;  %3606 = vmatprep.subr.bf16.mxu0 %v4376_v2  ;;  %v4523_v63 = vpop.eup %4522  ;;  %v1690_v33 = vmul.f32 %v1562_v25, %v5467_v35  ;;  %v2008_v34 = vadd.f32 %v5349_v36, %v5281_v29  ;;  %v2016_v9 = vadd.f32 %v5382_v46, %v5289_v59  ;;  %v1570_v7 = vmul.f32 0.044715, %v5501_v13 }
 0x1c3   :  { %v1121_v24 = vpop.f32.mrb[49].mxu1  ;;  %v4525_v44 = vpop.eup %4524  ;;  %v2576_v28 = vpack.c.bf16 %v2496_v8, %v2488_v49  ;;  %v2377_v38 = vadd.f32 1.0, %v4523_v63  ;;  %4532 = vtanh.f32 %v2145_v22  ;;  %v1497_v54 = vmul.f32 0.5, %v5285_v39 }
 0x1c4   :  { %v1123_v18 = vpop.f32.mrb[50].mxu1  ;;  %v2385_v2 = vadd.f32 1.0, %v4525_v44  ;;  %v2136_v45 = vmul.f32 0.7978846, %v2008_v34  ;;  %v2144_v31 = vmul.f32 0.7978846, %v2016_v9  ;;  %v5514_v25 = vmul.f32 %v1682_v26, %v5452_v51 }
 0x1c5   :  { %v1125_v5 = vpop.f32.mrb[51].mxu1  ;;  %3463 = vmatmul.mubr.bf16.gmra.mrb[20].mxu0 %v2576_v28  ;;  %v1691_v36 = vmul.f32 %v1563_v11, %v5476_v55  ;;  %v1505_v46 = vmul.f32 0.5, %v5296_v42  ;;  %v5519_v49 = vadd.f32 %v1115_v50, %v5115_v32  ;;  %v2505_v8 = vmul.f32 %v2377_v38, %v5447_v47 }
 0x1c6   :  { %v2513_v22 = vmul.f32 %v2385_v2, %v1489_v62  ;;  %4534 = vtanh.f32 %v2136_v45  ;;  %v5523_v63 = vadd.f32 %v1119_v48, %v5102_v15  ;;  %v5526_v34 = vmul.f32 %v1683_v37, %v5464_v53 }
 0x1c7   :  { %v4527_v39 = vpop.eup %4526  ;;  %v5529_v26 = vmul.f32 %v1690_v33, %v5467_v35  ;;  %4536 = vtanh.f32 %v2144_v31  ;;  %v5532_v42 = vadd.f32 %v1121_v24, %v5115_v32  ;;  %v1698_v47 = vmul.f32 %v1570_v7, %v5501_v13 }
 0x1c8   :  { %v4529_v50 = vpop.eup %4528  ;;  %v2585_v11 = vpack.c.bf16 %v2513_v22, %v2505_v8  ;;  %v2376_v9 = vadd.f32 1.0, %v4527_v39  ;;  %v1899_v62 = vadd.f32 %v5396_v0, %v5332_v23  ;;  %v5538_v37 = vmul.f32 %v1691_v36, %v5476_v55 }
 0x1c9   :  { %v2384_v44 = vadd.f32 1.0, %v4529_v50  ;;  %v1496_v33 = vmul.f32 0.5, %v5281_v29  ;;  %v1571_v28 = vmul.f32 0.044715, %v5519_v49  ;;  %v1504_v24 = vmul.f32 0.5, %v5289_v59 }
 0x1ca   :  { %v1129_v48 = vpop.f32.mrb[52].mxu1  ;;  %3472 = vmatprep.mubr.bf16.mxu0 %v2585_v11  ;;  %v1578_v2 = vmul.f32 0.044715, %v5523_v63  ;;  %v1907_v7 = vadd.f32 %v5407_v3, %v5346_v27  ;;  %v2027_v45 = vmul.f32 0.7978846, %v1899_v62  ;;  %v2504_v8 = vmul.f32 %v2376_v9, %v5473_v10 }
 0x1cb   :  { %v1131_v38 = vpop.f32.mrb[53].mxu1  ;;  %v4531_v31 = vpop.eup %4530  ;;  %v2512_v36 = vmul.f32 %v2384_v44, %v1488_v20  ;;  %v1579_v22 = vmul.f32 0.044715, %v5532_v42  ;;  %v2282_v29 = vadd.f32 1.0, %v5478_v41  ;;  %v5550_v11 = vmul.f32 %v1698_v47, %v5501_v13 }
 0x1cc   :  { %v1133_v0 = vpop.f32.mrb[54].mxu1  ;;  %v2393_v50 = vadd.f32 1.0, %v4531_v31  ;;  %v2035_v59 = vmul.f32 0.7978846, %v1907_v7  ;;  %4538 = vtanh.f32 %v2027_v45  ;;  %v5553_v3 = vadd.f32 %v1123_v18, %v5102_v15 }
 0x1cd   :  { %v1135_v39 = vpop.f32.mrb[55].mxu1  ;;  %v4533_v19 = vpop.eup %4532  ;;  %v2584_v17 = vpack.c.bf16 %v2512_v36, %v2504_v8  ;;  %v2290_v62 = vadd.f32 1.0, %v5490_v61  ;;  %v5557_v10 = vadd.f32 %v1125_v5, %v5115_v32  ;;  %v1699_v41 = vmul.f32 %v1571_v28, %v5519_v49 }
 0x1ce   :  { %v2401_v20 = vadd.f32 1.0, %v4533_v19  ;;  %v5561_v9 = vmul.f32 0.5, %v5332_v23  ;;  %4540 = vtanh.f32 %v2035_v59  ;;  %v1706_v47 = vmul.f32 %v1578_v2, %v5523_v63 }
 0x1cf   :  { %3473 = vmatmul.mubr.bf16.gmra.mrb[24].mxu0 %v2584_v17  ;;  %v1707_v44 = vmul.f32 %v1579_v22, %v5532_v42  ;;  %v5566_v18 = vmul.f32 %v2282_v29, %v5389_v12  ;;  %v5569_v61 = vmul.f32 %v2290_v62, %v5399_v60  ;;  %v2521_v7 = vmul.f32 %v2393_v50, %v1497_v54 }
 0x1d0   :  { %v4535_v5 = vpop.eup %4534  ;;  %v2529_v19 = vmul.f32 %v2401_v20, %v1505_v46  ;;  %v1395_v28 = vmul.f32 0.5, %v5346_v27  ;;  %v5573_v23 = vadd.f32 %v1129_v48, %v5102_v15  ;;  %v1586_v2 = vmul.f32 0.044715, %v5553_v3 }
 0x1d1   :  { %v4537_v17 = vpop.eup %4536  ;;  %v2392_v31 = vadd.f32 1.0, %v4535_v5  ;;  %v2538_v12 = vpack.c.bf16 %v5569_v61, %v5566_v18  ;;  %v1587_v8 = vmul.f32 0.044715, %v5557_v10  ;;  %v5580_v54 = vadd.f32 %v1131_v38, %v5115_v32 }
 0x1d2   :  { %v1139_v45 = vpop.f32.mrb[56].mxu1  ;;  %v2593_v36 = vpack.c.bf16 %v2529_v19, %v2521_v7  ;;  %v2400_v22 = vadd.f32 1.0, %v4537_v17  ;;  %v1915_v27 = vadd.f32 %v5443_v6, %v5379_v58  ;;  %v5585_v48 = vmul.f32 %v1699_v41, %v5519_v49 }
 0x1d3   :  { %v1141_v60 = vpop.f32.mrb[57].mxu1  ;;  %v5588_v29 = vmul.f32 %v1706_v47, %v5523_v63  ;;  %v5591_v50 = vmul.f32 %v1707_v44, %v5532_v42  ;;  %v1923_v59 = vadd.f32 %v5481_v57, %v5419_v40  ;;  %v2520_v38 = vmul.f32 %v2392_v31, %v1496_v33 }
 0x1d4   :  { %v1143_v46 = vpop.f32.mrb[58].mxu1  ;;  %3482 = vmatprep.mubr.bf16.mxu0 %v2593_v36  ;;  %v2528_v20 = vmul.f32 %v2400_v22, %v1504_v24  ;;  %v1594_v6 = vmul.f32 0.044715, %v5573_v23  ;;  %v2043_v5 = vmul.f32 0.7978846, %v1915_v27  ;;  %v1714_v41 = vmul.f32 %v1586_v2, %v5553_v3 }
 0x1d5   :  { %v5595_v62 = vpop.f32.mrb[59].mxu1  ;;  %v1715_v7 = vmul.f32 %v1587_v8, %v5557_v10  ;;  %v5601_v47 = vmul.f32 0.5, %v5379_v58  ;;  %v2051_v44 = vmul.f32 0.7978846, %v1923_v59  ;;  %v1595_v57 = vmul.f32 0.044715, %v5580_v54 }
 0x1d6   :  { %v4539_v19 = vpop.eup %4538  ;;  %v2592_v17 = vpack.c.bf16 %v2528_v20, %v2520_v38  ;;  %4542 = vtanh.f32 %v2043_v5  ;;  %v5605_v36 = vadd.f32 %v1133_v0, %v5102_v15  ;;  %v1914_v24 = vadd.f32 %v5435_v14, %v5370_v43 }
 0x1d7   :  { %v2283_v33 = vadd.f32 1.0, %v4539_v19  ;;  %4544 = vtanh.f32 %v2051_v44  ;;  %v1922_v31 = vadd.f32 %v5460_v30, %v5402_v4  ;;  %v1722_v58 = vmul.f32 %v1594_v6, %v5573_v23 }
 0x1d8   :  { %v4541_v2 = vpop.eup %4540  ;;  %3483 = vmatmul.mubr.bf16.gmra.mrb[28].mxu0 %v2592_v17  ;;  %v5613_v8 = vadd.f32 %v1135_v39, %v5115_v32  ;;  %v5616_v22 = vadd.f32 %v1139_v45, %v5102_v15  ;;  %v5619_v0 = vadd.f32 %v1141_v60, %v5115_v32  ;;  %v5622_v14 = vmul.f32 %v1714_v41, %v5553_v3 }
 0x1d9   :  { %v2291_v59 = vadd.f32 1.0, %v4541_v2  ;;  %v2042_v38 = vmul.f32 0.7978846, %v1914_v24  ;;  %v2050_v30 = vmul.f32 0.7978846, %v1922_v31  ;;  %v5627_v6 = vmul.f32 %v1715_v7, %v5557_v10 }
 0x1da   :  { %v1149_v27 = vpop.f32.mrb[60].mxu1  ;;  %v1723_v39 = vmul.f32 %v1595_v57, %v5580_v54  ;;  %v1411_v45 = vmul.f32 0.5, %v5419_v40  ;;  %v1602_v5 = vmul.f32 0.044715, %v5605_v36  ;;  %v2411_v60 = vmul.f32 %v2283_v33, %v5561_v9  ;;  %v4374_v31 = vld [vmem:[#allocation8 + $0x200] ss:$8 sps:$4 sm:$0xff]  }
 0x1db   :  { %v5624_v20 = vpop.f32.mrb[61].mxu1  ;;  %v2419_v44 = vmul.f32 %v2291_v59, %v1395_v28  ;;  %4546 = vtanh.f32 %v2042_v38  ;;  %v1603_v41 = vmul.f32 0.044715, %v5613_v8  ;;  %v5637_v17 = vmul.f32 %v1722_v58, %v5573_v23  ;;  %v4379_v2 = vld [vmem:[#allocation8 + $0x214] ss:$8 sps:$4 sm:$0xff]  }
 0x1dc   :  { %v5634_v19 = vpop.f32.mrb[62].mxu1  ;;  %4548 = vtanh.f32 %v2050_v30  ;;  %v1610_v7 = vmul.f32 0.044715, %v5616_v22  ;;  %v1611_v57 = vmul.f32 0.044715, %v5619_v0  ;;  %v1931_v9 = vadd.f32 %v5493_v21, %v5427_v52 }
 0x1dd   :  { %6867 = vst [vmem:[#allocation16_spill] sm:$0xff] %v5637_v17  ;;  %v5641_v24 = vpop.f32.mrb[63].mxu1  ;;  %v2539_v40 = vpack.c.bf16 %v2419_v44, %v2411_v60  ;;  %v1939_v28 = vadd.f32 %v5526_v34, %v5464_v53  ;;  %v5648_v33 = vadd.f32 %v1143_v46, %v5102_v15  ;;  %v5651_v58 = vmul.f32 %v1723_v39, %v5580_v54 }
 0x1de   :  { %v1730_v59 = vmul.f32 %v1602_v5, %v5605_v36  ;;  %v1402_v38 = vmul.f32 0.5, %v5370_v43  ;;  %v1410_v30 = vmul.f32 0.5, %v5402_v4  ;;  %v2059_v60 = vmul.f32 0.7978846, %v1931_v9 }
 0x1df   :  { %6868 = vst [vmem:[#allocation17_spill] sm:$0xff] %v5648_v33  ;;  %3525 = vmatprep.mubr.bf16.mxu0 %v2539_v40  ;;  %v2067_v44 = vmul.f32 0.7978846, %v1939_v28  ;;  %v1618_v21 = vmul.f32 0.044715, %v5648_v33  ;;  %v1930_v34 = vadd.f32 %v5486_v56, %v5423_v1  ;;  %v1731_v39 = vmul.f32 %v1603_v41, %v5613_v8 }
 0x1e0   :  { %v4543_v46 = vpop.eup %4542  ;;  %3526 = vmatmul.mubr.bf16.vlgmr.msra.gmra.mrb[0].mxu0 %v2538_v12  ;;  %v1738_v5 = vmul.f32 %v1610_v7, %v5616_v22  ;;  %v1938_v43 = vadd.f32 %v5514_v25, %v5452_v51  ;;  %v5668_v4 = vadd.f32 %v5595_v62, %v5115_v32  ;;  %v4377_v56 = vld [vmem:[#allocation8 + $0x210] ss:$8 sps:$4 sm:$0xff]   ;;  %v1739_v18 = vmul.f32 %v1611_v57, %v5619_v0  ;;  %v4382_v7 = vld [vmem:[#allocation8 + $0x224] ss:$8 sps:$4 sm:$0xff]  }
 0x1e1   :  { %v4545_v9 = vpop.eup %4544  ;;  %3607 = vmatpush1.bf16.msra.mxu0 %v4374_v31  ;;  %v2299_v28 = vadd.f32 1.0, %v4543_v46  ;;  %4550 = vtanh.f32 %v2059_v60  ;;  %v2058_v61 = vmul.f32 0.7978846, %v1930_v34  ;;  %v5676_v62 = vadd.f32 %v1149_v27, %v5102_v15 }
 0x1e2   :  { %v5670_v40 = vpop.f32.mrb[64].mxu1  ;;  %3608 = vmatprep.subr.bf16.mxu0 %v4379_v2  ;;  %v2307_v41 = vadd.f32 1.0, %v4545_v9  ;;  %4552 = vtanh.f32 %v2067_v44  ;;  %v2066_v25 = vmul.f32 0.7978846, %v1938_v43  ;;  %v5681_v31 = vmul.f32 %v1730_v59, %v5605_v36  ;;  %v4380_v43 = vld [vmem:[#allocation8 + $0x220] ss:$8 sps:$4 sm:$0xff]  }
 0x1e3   :  { %v5673_v12 = vpop.f32.mrb[65].mxu1  ;;  %v5684_v46 = vmul.f32 0.5, %v5427_v52  ;;  %v1746_v57 = vmul.f32 %v1618_v21, %v5648_v33  ;;  %4554 = vtanh.f32 %v2058_v61  ;;  %v2427_v2 = vmul.f32 %v2299_v28, %v5601_v47  ;;  %v4385_v28 = vld [vmem:[#allocation8 + $0x234] ss:$8 sps:$4 sm:$0xff]  }
 0x1e4   :  { %v5678_v17 = vpop.f32.mrb[66].mxu1  ;;  %v2435_v44 = vmul.f32 %v2307_v41, %v1411_v45  ;;  %4556 = vtanh.f32 %v2066_v25  ;;  %v1619_v27 = vmul.f32 0.044715, %v5668_v4  ;;  %v5692_v59 = vmul.f32 %v1731_v39, %v5613_v8 }
 0x1e5   :  { %v5687_v60 = vpop.f32.mrb[67].mxu1  ;;  %v4547_v34 = vpop.eup %4546  ;;  %3609 = vmatpush1.bf16.msra.mxu0 %v4377_v56  ;;  %v5695_v52 = vmul.f32 %v1738_v5, %v5616_v22  ;;  %v1427_v21 = vmul.f32 0.5, %v5464_v53  ;;  %v1947_v9 = vadd.f32 %v5538_v37, %v5476_v55  ;;  %v5701_v41 = vmul.f32 %v1739_v18, %v5619_v0 }
 0x1e6   :  { %v4549_v61 = vpop.eup %4548  ;;  %v2547_v47 = vpack.c.bf16 %v2435_v44, %v2427_v2  ;;  %v2298_v45 = vadd.f32 1.0, %v4547_v34  ;;  %3610 = vmatprep.subr.bf16.mxu0 %v4382_v7  ;;  %v1626_v56 = vmul.f32 0.044715, %v5676_v62  ;;  %v5706_v5 = vadd.f32 %v5624_v20, %v5115_v32 }
 0x1e7   :  { %6869 = vst [vmem:[#allocation18_spill] sm:$0xff] %v5695_v52  ;;  %v2306_v39 = vadd.f32 1.0, %v4549_v61  ;;  %v1955_v53 = vadd.f32 %v5585_v48, %v5519_v49  ;;  %v2075_v25 = vmul.f32 0.7978846, %v1947_v9  ;;  %v5711_v37 = vmul.f32 %v1746_v57, %v5648_v33  ;;  %v4383_v48 = vld [vmem:[#allocation8 + $0x230] ss:$8 sps:$4 sm:$0xff]  }
 0x1e8   :  { %3535 = vmatprep.mubr.bf16.mxu0 %v2547_v47  ;;  %v1418_v7 = vmul.f32 0.5, %v5423_v1  ;;  %v1426_v18 = vmul.f32 0.5, %v5452_v51  ;;  %v1747_v2 = vmul.f32 %v1619_v27, %v5668_v4  ;;  %v2426_v34 = vmul.f32 %v2298_v45, %v1402_v38  ;;  %v4386_v33 = vld [vmem:[#allocation8 + $0x240] ss:$8 sps:$4 sm:$0xff]  }
 0x1e9   :  { %6870 = vst [vmem:[#allocation19_spill] sm:$0xff] %v5711_v37  ;;  %v2434_v61 = vmul.f32 %v2306_v39, %v1410_v30  ;;  %3611 = vmatpush1.bf16.msra.mxu0 %v4380_v43  ;;  %v2083_v20 = vmul.f32 0.7978846, %v1955_v53  ;;  %4558 = vtanh.f32 %v2075_v25  ;;  %v1754_v57 = vmul.f32 %v1626_v56, %v5676_v62  ;;  %v4388_v43 = vld [vmem:[#allocation8 + $0x244] ss:$8 sps:$4 sm:$0xff]  }
 0x1ea   :  { %v5716_v44 = vpop.f32.mrb[68].mxu1  ;;  %3612 = vmatprep.subr.bf16.mxu0 %v4385_v28  ;;  %v5722_v9 = vmul.f32 0.5, %v5476_v55  ;;  %v1946_v1 = vadd.f32 %v5529_v26, %v5467_v35  ;;  %v1954_v51 = vadd.f32 %v5550_v11, %v5501_v13  ;;  %v1627_v47 = vmul.f32 0.044715, %v5706_v5 }
 0x1eb   :  { %v5718_v52 = vpop.f32.mrb[69].mxu1  ;;  %v4551_v30 = vpop.eup %4550  ;;  %v2546_v27 = vpack.c.bf16 %v2434_v61, %v2426_v34  ;;  %4560 = vtanh.f32 %v2083_v20  ;;  %v270_v45 = vsub.s32 4, %v5029_v16  ;;  %v5735_v39 = vmul.f32 0.5, %v5519_v49  ;;  %v5741_v61 = vld [vmem:[#allocation7] sm:$0xff] }
 0x1ec   :  { %v5728_v38 = vpop.f32.mrb[70].mxu1  ;;  %v4553_v55 = vpop.eup %4552  ;;  %v2315_v56 = vadd.f32 1.0, %v4551_v30  ;;  %v2074_v26 = vmul.f32 0.7978846, %v1946_v1  ;;  %v2082_v53 = vmul.f32 0.7978846, %v1954_v51  ;;  %v5739_v34 = vadd.f32 %v5634_v19, %v5102_v15 }
 0x1ed   :  { %v5732_v28 = vpop.f32.mrb[71].mxu1  ;;  %v4555_v11 = vpop.eup %4554  ;;  %3536 = vmatmul.mubr.bf16.gmra.mrb[4].mxu0 %v2546_v27  ;;  %v2323_v25 = vadd.f32 1.0, %v4553_v55  ;;  %6871 = vst [vmem:[#allocation20_spill] sm:$0xff] %v5741_v61  ;;  %v5744_v20 = vrot.slane %v5741_v61, %v270_v45  ;;  %v274_v37 = vsub.s32 5, %v5029_v16  ;;  %v5748_v1 = vmul.f32 %v1747_v2, %v5668_v4  ;;  %v4391_v45 = vld [vmem:[#allocation8 + $0x254] ss:$8 sps:$4 sm:$0xff]  }
 0x1ee   :  { %v4557_v30 = vpop.eup %4556  ;;  %3613 = vmatpush1.bf16.msra.mxu0 %v4383_v48  ;;  %v2314_v49 = vadd.f32 1.0, %v4555_v11  ;;  %4562 = vtanh.f32 %v2074_v26  ;;  %v5752_v51 = vadd.f32 %v5641_v24, %v5115_v32  ;;  %v2443_v15 = vmul.f32 %v2315_v56, %v5684_v46 }
 0x1ef   :  { %v2451_v19 = vmul.f32 %v2323_v25, %v1427_v21  ;;  %v2322_v27 = vadd.f32 1.0, %v4557_v30  ;;  %3614 = vmatprep.subr.bf16.mxu0 %v4388_v43  ;;  %4564 = vtanh.f32 %v2082_v53  ;;  %v5756_v55 = vmul.f32 %v1754_v57, %v5676_v62  ;;  %v4389_v43 = vld [vmem:[#allocation8 + $0x250] ss:$8 sps:$4 sm:$0xff]  }
 0x1f0   :  { %v1755_v48 = vmul.f32 %v1627_v47, %v5706_v5  ;;  %v5761_v2 = vadd.f32 %v5670_v40, %v5744_v20  ;;  %v5764_v26 = vrot.slane %v5741_v61, %v274_v37  ;;  %v2442_v46 = vmul.f32 %v2314_v49, %v1418_v7 }
 0x1f1   :  { %6872 = vst [vmem:[#allocation21_spill] sm:$0xff] %v5756_v55  ;;  %v2555_v24 = vpack.c.bf16 %v2451_v19, %v2443_v15  ;;  %v2450_v21 = vmul.f32 %v2322_v27, %v1426_v18  ;;  %v1634_v56 = vmul.f32 0.044715, %v5739_v34  ;;  %v1635_v57 = vmul.f32 0.044715, %v5752_v51 }
 0x1f2   :  { %v5766_v32 = vpop.f32.mrb[72].mxu1  ;;  %3615 = vmatpush1.bf16.msra.mxu0 %v4386_v33  ;;  %v1516_v47 = vmul.f32 0.044715, %v5761_v2  ;;  %v5775_v40 = vadd.f32 %v5673_v12, %v5764_v26  ;;  %v1963_v37 = vadd.f32 %v5591_v50, %v5532_v42  ;;  %v1434_v25 = vmul.f32 0.5, %v5467_v35  ;;  %v4394_v33 = vld [vmem:[#allocation8 + $0x264] ss:$8 sps:$4 sm:$0xff]  }
 0x1f3   :  { %v5769_v53 = vpop.f32.mrb[73].mxu1  ;;  %v4559_v7 = vpop.eup %4558  ;;  %3545 = vmatprep.mubr.bf16.mxu0 %v2555_v24  ;;  %v2554_v18 = vpack.c.bf16 %v2450_v21, %v2442_v46  ;;  %3616 = vmatprep.subr.bf16.mxu0 %v4391_v45  ;;  %v1971_v30 = vadd.f32 %v5627_v6, %v5557_v10  ;;  %v5786_v49 = vadd.f32 %v5678_v17, %v5744_v20  ;;  %v1442_v50 = vmul.f32 0.5, %v5501_v13  ;;  %v4392_v21 = vld [vmem:[#allocation8 + $0x260] ss:$8 sps:$4 sm:$0xff]  }
 0x1f4   :  { %v5779_v11 = vpop.f32.mrb[74].mxu1  ;;  %v2331_v15 = vadd.f32 1.0, %v4559_v7  ;;  %v1644_v19 = vmul.f32 %v1516_v47, %v5761_v2  ;;  %v2091_v27 = vmul.f32 0.7978846, %v1963_v37  ;;  %v5793_v35 = vmul.f32 %v1755_v48, %v5706_v5  ;;  %v4397_v37 = vld [vmem:[#allocation8 + $0x274] ss:$8 sps:$4 sm:$0xff]  }
 0x1f5   :  { %v5788_v12 = vpop.f32.mrb[75].mxu1  ;;  %v4561_v24 = vpop.eup %4560  ;;  %3546 = vmatmul.mubr.bf16.gmra.mrb[8].mxu0 %v2554_v18  ;;  %v1762_v45 = vmul.f32 %v1634_v56, %v5739_v34  ;;  %v2099_v6 = vmul.f32 0.7978846, %v1971_v30  ;;  %v1524_v46 = vmul.f32 0.044715, %v5786_v49  ;;  %v1763_v7 = vmul.f32 %v1635_v57, %v5752_v51 }
 0x1f6   :  { %3617 = vmatpush1.bf16.msra.mxu0 %v4389_v43  ;;  %v2339_v17 = vadd.f32 1.0, %v4561_v24  ;;  %v1772_v13 = vmul.f32 %v1644_v19, %v5761_v2  ;;  %v1517_v47 = vmul.f32 0.044715, %v5775_v40  ;;  %4566 = vtanh.f32 %v2091_v27 }
 0x1f7   :  { %3618 = vmatprep.subr.bf16.mxu0 %v4394_v33  ;;  %v1652_v48 = vmul.f32 %v1524_v46, %v5786_v49  ;;  %v1962_v56 = vadd.f32 %v5588_v29, %v5523_v63  ;;  %v1970_v18 = vadd.f32 %v5622_v14, %v5553_v3  ;;  %v2459_v30 = vmul.f32 %v2331_v15, %v5722_v9 }
 0x1f8   :  { %v4563_v43 = vpop.eup %4562  ;;  %v2467_v57 = vmul.f32 %v2339_v17, %v5735_v39  ;;  %v1900_v19 = vadd.f32 %v1772_v13, %v5761_v2  ;;  %4568 = vtanh.f32 %v2099_v6  ;;  %v5814_v14 = vmul.f32 %v1762_v45, %v5739_v34  ;;  %v4395_v39 = vld [vmem:[#allocation8 + $0x270] ss:$8 sps:$4 sm:$0xff]   ;;  %v4400_v45 = vld [vmem:[#allocation8 + $0x284] ss:$8 sps:$4 sm:$0xff]  }
 0x1f9   :  { %v4565_v33 = vpop.eup %4564  ;;  %v2330_v27 = vadd.f32 1.0, %v4563_v43  ;;  %v1780_v46 = vmul.f32 %v1652_v48, %v5786_v49  ;;  %v2090_v61 = vmul.f32 0.7978846, %v1962_v56  ;;  %v2098_v16 = vmul.f32 0.7978846, %v1970_v18 }
 0x1fa   :  { %v5808_v24 = vpop.f32.mrb[76].mxu1  ;;  %v2563_v55 = vpack.c.bf16 %v2467_v57, %v2459_v30  ;;  %v2338_v9 = vadd.f32 1.0, %v4565_v33  ;;  %3619 = vmatpush1.bf16.msra.mxu0 %v4392_v21  ;;  %v5818_v15 = vadd.f32 %v5687_v60, %v5764_v26  ;;  %v5823_v17 = vmul.f32 %v1763_v7, %v5752_v51 }
 0x1fb   :  { %v5811_v29 = vpop.f32.mrb[77].mxu1  ;;  %3620 = vmatprep.subr.bf16.mxu0 %v4397_v37  ;;  %v1451_v13 = vmul.f32 0.5, %v5532_v42  ;;  %v1908_v48 = vadd.f32 %v1780_v46, %v5786_v49  ;;  %4570 = vtanh.f32 %v2090_v61  ;;  %v2458_v21 = vmul.f32 %v2330_v27, %v1434_v25  ;;  %v4398_v25 = vld [vmem:[#allocation8 + $0x280] ss:$8 sps:$4 sm:$0xff]  }
 0x1fc   :  { %v5820_v6 = vpop.f32.mrb[78].mxu1  ;;  %3555 = vmatprep.mubr.bf16.mxu0 %v2563_v55  ;;  %v2466_v18 = vmul.f32 %v2338_v9, %v1442_v50  ;;  %v1645_v60 = vmul.f32 %v1517_v47, %v5775_v40  ;;  %v5832_v43 = vadd.f32 %v5716_v44, %v5744_v20  ;;  %v2028_v7 = vmul.f32 0.7978846, %v1900_v19 }
 0x1fd   :  { %v5827_v56 = vpop.f32.mrb[79].mxu1  ;;  %v1459_v37 = vmul.f32 0.5, %v5557_v10  ;;  %4572 = vtanh.f32 %v2098_v16  ;;  %v1525_v42 = vmul.f32 0.044715, %v5818_v15  ;;  %v5837_v61 = vmul.f32 0.5, %v5761_v2 }
 0x1fe   :  { %6873 = vst [vmem:[#allocation22_spill] sm:$0xff] %v5832_v43  ;;  %v2562_v30 = vpack.c.bf16 %v2466_v18, %v2458_v21  ;;  %3621 = vmatpush1.bf16.msra.mxu0 %v4395_v39  ;;  %v2036_v55 = vmul.f32 0.7978846, %v1908_v48  ;;  %v5841_v50 = vadd.f32 %v5718_v52, %v5764_v26  ;;  %v5844_v44 = vmul.f32 0.5, %v5786_v49  ;;  %v4403_v16 = vld [vmem:[#allocation8 + $0x294] ss:$8 sps:$4 sm:$0xff]  }
 0x1ff   :  { %v5847_v47 = vmul.f32 0.5, %v5523_v63  ;;  %3622 = vmatprep.subr.bf16.mxu0 %v4400_v45  ;;  %v1979_v10 = vadd.f32 %v5651_v58, %v5580_v54  ;;  %v1987_v2 = vadd.f32 %v5692_v59, %v5613_v8  ;;  %v5854_v57 = vmul.f32 %v1645_v60, %v5775_v40 }
 0x200   :  { %3556 = vmatmul.mubr.bf16.gmra.mrb[12].mxu0 %v2562_v30  ;;  %v1458_v52 = vmul.f32 0.5, %v5553_v3  ;;  %v1532_v49 = vmul.f32 0.044715, %v5832_v43  ;;  %v5860_v63 = vadd.f32 %v5728_v38, %v5744_v20  ;;  %v4567_v33 = vpop.eup %4566  ;;  %4574 = vtanh.f32 %v2028_v7  ;;  %v4401_v3 = vld [vmem:[#allocation8 + $0x290] ss:$8 sps:$4 sm:$0xff]   ;;  %v6874_v38 = vld [vmem:[#allocation16_spill] sm:$0xff] }
 0x201   :  { %v1653_v58 = vmul.f32 %v1525_v42, %v5818_v15  ;;  %v2107_v27 = vmul.f32 0.7978846, %v1979_v10  ;;  %v2115_v59 = vmul.f32 0.7978846, %v1987_v2  ;;  %v2347_v39 = vadd.f32 1.0, %v4567_v33 }
 0x202   :  { %v5862_v19 = vpop.f32.mrb[80].mxu1  ;;  %v4569_v9 = vpop.eup %4568  ;;  %4576 = vtanh.f32 %v2036_v55  ;;  %3623 = vmatpush1.bf16.msra.mxu0 %v4398_v25  ;;  %v1533_v48 = vmul.f32 0.044715, %v5841_v50  ;;  %v1978_v45 = vadd.f32 %v6874_v38, %v5573_v23  ;;  %v1986_v60 = vadd.f32 %v5681_v31, %v5605_v36  ;;  %v4406_v7 = vld [vmem:[#allocation8 + $0x2a4] ss:$8 sps:$4 sm:$0xff]  }
 0x203   :  { %v5865_v46 = vpop.f32.mrb[81].mxu1  ;;  %v2355_v18 = vadd.f32 1.0, %v4569_v9  ;;  %3624 = vmatprep.subr.bf16.mxu0 %v4403_v16  ;;  %4578 = vtanh.f32 %v2107_v27  ;;  %v5876_v42 = vadd.f32 %v5732_v28, %v5764_v26  ;;  %v1660_v55 = vmul.f32 %v1532_v49, %v5832_v43  ;;  %v4404_v49 = vld [vmem:[#allocation8 + $0x2a0] ss:$8 sps:$4 sm:$0xff]  }
 0x204   :  { %v5870_v21 = vpop.f32.mrb[82].mxu1  ;;  %4580 = vtanh.f32 %v2115_v59  ;;  %v1540_v25 = vmul.f32 0.044715, %v5860_v63  ;;  %v2106_v10 = vmul.f32 0.7978846, %v1978_v45  ;;  %v2475_v33 = vmul.f32 %v2347_v39, %v1451_v13 }
 0x205   :  { %v5878_v30 = vpop.f32.mrb[83].mxu1  ;;  %v4571_v2 = vpop.eup %4570  ;;  %v2483_v16 = vmul.f32 %v2355_v18, %v1459_v37  ;;  %v2114_v27 = vmul.f32 0.7978846, %v1986_v60  ;;  %v5884_v31 = vadd.f32 %v5766_v32, %v5744_v20  ;;  %v5887_v28 = vmul.f32 0.5, %v5580_v54  ;;  %v4409_v32 = vld [vmem:[#allocation8 + $0x2b4] ss:$8 sps:$4 sm:$0xff]  }
 0x206   :  { %v2346_v9 = vadd.f32 1.0, %v4571_v2  ;;  %3625 = vmatpush1.bf16.msra.mxu0 %v4401_v3  ;;  %v5890_v38 = vmul.f32 0.5, %v5613_v8  ;;  %4582 = vtanh.f32 %v2106_v10  ;;  %v1661_v13 = vmul.f32 %v1533_v48, %v5841_v50 }
 0x207   :  { %v4573_v59 = vpop.eup %4572  ;;  %v2571_v45 = vpack.c.bf16 %v2483_v16, %v2475_v33  ;;  %4584 = vtanh.f32 %v2114_v27  ;;  %3626 = vmatprep.subr.bf16.mxu0 %v4406_v7  ;;  %v1541_v37 = vmul.f32 0.044715, %v5876_v42  ;;  %v5895_v3 = vmul.f32 %v1653_v58, %v5818_v15 }
 0x208   :  { %v2354_v39 = vadd.f32 1.0, %v4573_v59  ;;  %v5898_v54 = vmul.f32 0.5, %v5573_v23  ;;  %v5902_v8 = vadd.f32 %v5769_v53, %v5764_v26  ;;  %v5907_v48 = vmul.f32 %v1660_v55, %v5832_v43  ;;  %v4407_v53 = vld [vmem:[#allocation8 + $0x2b0] ss:$8 sps:$4 sm:$0xff]  }
 0x209   :  { %3565 = vmatprep.mubr.bf16.mxu0 %v2571_v45  ;;  %v1668_v60 = vmul.f32 %v1540_v25, %v5860_v63  ;;  %v1548_v7 = vmul.f32 0.044715, %v5884_v31  ;;  %v1995_v58 = vadd.f32 %v5701_v41, %v5619_v0  ;;  %v2474_v23 = vmul.f32 %v2346_v9, %v5847_v47  ;;  %v4412_v9 = vld [vmem:[#allocation8 + $0x2c4] ss:$8 sps:$4 sm:$0xff]  }
 0x20a   :  { %v5904_v18 = vpop.f32.mrb[84].mxu1  ;;  %6875 = vst [vmem:[#allocation16_spill] sm:$0xff] %v5907_v48  ;;  %v2482_v2 = vmul.f32 %v2354_v39, %v1458_v52  ;;  %3627 = vmatpush1.bf16.msra.mxu0 %v4404_v49  ;;  %v2003_v33 = vadd.f32 %v5748_v1, %v5668_v4  ;;  %v5920_v55 = vadd.f32 %v5779_v11, %v5744_v20  ;;  %v5924_v16 = vpop.eup %4574  ;;  %v1474_v27 = vmul.f32 0.5, %v5605_v36  ;;  %v6880_v36 = vld [vmem:[#allocation18_spill] sm:$0xff] }
 0x20b   :  { %v5913_v10 = vpop.f32.mrb[85].mxu1  ;;  %v5927_v41 = vmul.f32 %v1661_v13, %v5841_v50  ;;  %v1669_v47 = vmul.f32 %v1541_v37, %v5876_v42  ;;  %3628 = vmatprep.subr.bf16.mxu0 %v4409_v32  ;;  %v2123_v52 = vmul.f32 0.7978846, %v1995_v58  ;;  %v1549_v59 = vmul.f32 0.044715, %v5902_v8  ;;  %v6881_v32 = vld [vmem:[#allocation17_spill] sm:$0xff] }
 0x20c   :  { %v5922_v25 = vpop.f32.mrb[86].mxu1  ;;  %v5933_v1 = vpop.eup %4576  ;;  %v2570_v11 = vpack.c.bf16 %v2482_v2, %v2474_v23  ;;  %v2131_v45 = vmul.f32 0.7978846, %v2003_v33  ;;  %v1556_v39 = vmul.f32 0.044715, %v5920_v55  ;;  %v5938_v13 = vmul.f32 %v1668_v60, %v5860_v63  ;;  %v6882_v58 = vld [vmem:[#allocation19_spill] sm:$0xff] }
 0x20d   :  { %6876 = vst [vmem:[#allocation23_spill] sm:$0xff] %v5922_v25  ;;  %6877 = vst [vmem:[#allocation24_spill] sm:$0xff] %v5927_v41  ;;  %v5931_v49 = vpop.f32.mrb[87].mxu1  ;;  %v4579_v48 = vpop.eup %4578  ;;  %4586 = vtanh.f32 %v2123_v52  ;;  %v1994_v37 = vadd.f32 %v6880_v36, %v5616_v22  ;;  %v2002_v43 = vadd.f32 %v6882_v58, %v6881_v32  ;;  %v1676_v23 = vmul.f32 %v1548_v7, %v5884_v31  ;;  %v4410_v33 = vld [vmem:[#allocation8 + $0x2c0] ss:$8 sps:$4 sm:$0xff]  }
 0x20e   :  { %6878 = vst [vmem:[#allocation25_spill] sm:$0xff] %v5931_v49  ;;  %6879 = vst [vmem:[#allocation26_spill] sm:$0xff] %v5938_v13  ;;  %v4581_v49 = vpop.eup %4580  ;;  %3566 = vmatmul.mubr.bf16.gmra.mrb[16].mxu0 %v2570_v11  ;;  %v2363_v25 = vadd.f32 1.0, %v4579_v48  ;;  %v5946_v2 = vmul.f32 0.5, %v5619_v0  ;;  %4588 = vtanh.f32 %v2131_v45  ;;  %v5950_v36 = vadd.f32 %v5788_v12, %v5764_v26  ;;  %v4415_v0 = vld [vmem:[#allocation8 + $0x2d4] ss:$8 sps:$4 sm:$0xff]  }
 0x20f   :  { %v2371_v41 = vadd.f32 1.0, %v4581_v49  ;;  %3629 = vmatpush1.bf16.msra.mxu0 %v4407_v53  ;;  %v2122_v60 = vmul.f32 0.7978846, %v1994_v37  ;;  %v2130_v52 = vmul.f32 0.7978846, %v2002_v43  ;;  %v5953_v58 = vmul.f32 %v1669_v47, %v5876_v42 }
 0x210   :  { %v4583_v13 = vpop.eup %4582  ;;  %v1677_v48 = vmul.f32 %v1549_v59, %v5902_v8  ;;  %v1684_v7 = vmul.f32 %v1556_v39, %v5920_v55  ;;  %3630 = vmatprep.subr.bf16.mxu0 %v4412_v9  ;;  %v5959_v49 = vadd.f32 %v5808_v24, %v5744_v20  ;;  %v2491_v12 = vmul.f32 %v2363_v25, %v5887_v28  ;;  %v4413_v25 = vld [vmem:[#allocation8 + $0x2d0] ss:$8 sps:$4 sm:$0xff]  }
 0x211   :  { %v4585_v43 = vpop.eup %4584  ;;  %v2499_v11 = vmul.f32 %v2371_v41, %v5890_v38  ;;  %v2362_v45 = vadd.f32 1.0, %v4583_v13  ;;  %4590 = vtanh.f32 %v2122_v60  ;;  %v1491_v39 = vmul.f32 0.5, %v5668_v4 }
 0x212   :  { %v5961_v53 = vpop.f32.mrb[88].mxu1  ;;  %v2370_v59 = vadd.f32 1.0, %v4585_v43  ;;  %4592 = vtanh.f32 %v2130_v52  ;;  %v5970_v9 = vadd.f32 %v5811_v29, %v5764_v26  ;;  %v5978_v28 = vmul.f32 0.5, %v5616_v22  ;;  %v6884_v43 = vld [vmem:[#allocation21_spill] sm:$0xff] }
 0x213   :  { %6883 = vst [vmem:[#allocation18_spill] sm:$0xff] %v5961_v53  ;;  %v5965_v47 = vpop.f32.mrb[89].mxu1  ;;  %v2579_v37 = vpack.c.bf16 %v2499_v11, %v2491_v12  ;;  %v5975_v53 = vmul.f32 %v1676_v23, %v5884_v31  ;;  %v1557_v38 = vmul.f32 0.044715, %v5950_v36  ;;  %3631 = vmatpush1.bf16.msra.mxu0 %v4410_v33  ;;  %v2490_v4 = vmul.f32 %v2362_v45, %v5898_v54  ;;  %v4418_v23 = vld [vmem:[#allocation8 + $0x2e4] ss:$8 sps:$4 sm:$0xff]  }
 0x214   :  { %v5972_v24 = vpop.f32.mrb[90].mxu1  ;;  %v2498_v13 = vmul.f32 %v2370_v59, %v1474_v27  ;;  %v5985_v29 = vmul.f32 0.5, %v6881_v32  ;;  %3632 = vmatprep.subr.bf16.mxu0 %v4415_v0  ;;  %v1564_v60 = vmul.f32 0.044715, %v5959_v49  ;;  %v5989_v22 = vmul.f32 %v1677_v48, %v5902_v8 }
 0x215   :  { %v5981_v41 = vpop.f32.mrb[91].mxu1  ;;  %3575 = vmatprep.mubr.bf16.mxu0 %v2579_v37  ;;  %v5992_v52 = vmul.f32 %v1684_v7, %v5920_v55  ;;  %v2011_v33 = vadd.f32 %v5793_v35, %v5706_v5  ;;  %v2019_v54 = vadd.f32 %v5823_v17, %v5752_v51  ;;  %v1565_v32 = vmul.f32 0.044715, %v5970_v9  ;;  %v4416_v17 = vld [vmem:[#allocation8 + $0x2e0] ss:$8 sps:$4 sm:$0xff]  }
 0x216   :  { %v2578_v27 = vpack.c.bf16 %v2498_v13, %v2490_v4  ;;  %v6001_v0 = vadd.f32 %v5820_v6, %v5744_v20  ;;  %v2010_v48 = vadd.f32 %v6884_v43, %v5676_v62  ;;  %v1685_v7 = vmul.f32 %v1557_v38, %v5950_v36  ;;  %v4421_v43 = vld [vmem:[#allocation8 + $0x2f4] ss:$8 sps:$4 sm:$0xff]  }
 0x217   :  { %v4587_v12 = vpop.eup %4586  ;;  %3633 = vmatpush1.bf16.msra.mxu0 %v4413_v25  ;;  %v2139_v11 = vmul.f32 0.7978846, %v2011_v33  ;;  %v2147_v45 = vmul.f32 0.7978846, %v2019_v54  ;;  %v2018_v35 = vadd.f32 %v5814_v14, %v5739_v34  ;;  %v1692_v4 = vmul.f32 %v1564_v60, %v5959_v49 }
 0x218   :  { %v4589_v59 = vpop.eup %4588  ;;  %3576 = vmatmul.mubr.bf16.gmra.mrb[20].mxu0 %v2578_v27  ;;  %v2379_v37 = vadd.f32 1.0, %v4587_v12  ;;  %v2138_v6 = vmul.f32 0.7978846, %v2010_v48  ;;  %3634 = vmatprep.subr.bf16.mxu0 %v4418_v23  ;;  %v6011_v13 = vadd.f32 %v5827_v56, %v5764_v26  ;;  %v6017_v14 = vadd.f32 %v5862_v19, %v5744_v20  ;;  %v4419_v19 = vld [vmem:[#allocation8 + $0x2f0] ss:$8 sps:$4 sm:$0xff]  }
 0x219   :  { %v2387_v25 = vadd.f32 1.0, %v4589_v59  ;;  %4594 = vtanh.f32 %v2139_v11  ;;  %v2146_v33 = vmul.f32 0.7978846, %v2018_v35  ;;  %v1693_v60 = vmul.f32 %v1565_v32, %v5970_v9 }
 0x21a   :  { %v6013_v38 = vpop.f32.mrb[92].mxu1  ;;  %v6023_v23 = vmul.f32 0.5, %v5706_v5  ;;  %4596 = vtanh.f32 %v2147_v45  ;;  %v1572_v56 = vmul.f32 0.044715, %v6001_v0  ;;  %v2507_v12 = vmul.f32 %v2379_v37, %v5946_v2 }
 0x21b   :  { %v6019_v54 = vpop.f32.mrb[93].mxu1  ;;  %v4591_v48 = vpop.eup %4590  ;;  %v2515_v11 = vmul.f32 %v2387_v25, %v1491_v39  ;;  %v6030_v35 = vmul.f32 %v1685_v7, %v5950_v36  ;;  %4598 = vtanh.f32 %v2138_v6  ;;  %3635 = vmatpush1.bf16.msra.mxu0 %v4416_v17  ;;  %v6035_v45 = vmul.f32 %v1692_v4, %v5959_v49 }
 0x21c   :  { %6885 = vst [vmem:[#allocation17_spill] sm:$0xff] %v6019_v54  ;;  %v6026_v27 = vpop.f32.mrb[94].mxu1  ;;  %v4593_v32 = vpop.eup %4592  ;;  %v2378_v5 = vadd.f32 1.0, %v4591_v48  ;;  %v1507_v54 = vmul.f32 0.5, %v5752_v51  ;;  %4600 = vtanh.f32 %v2146_v33  ;;  %3636 = vmatprep.subr.bf16.mxu0 %v4421_v43  ;;  %v1573_v7 = vmul.f32 0.044715, %v6011_v13 }
 0x21d   :  { %6886 = vst [vmem:[#allocation19_spill] sm:$0xff] %v6026_v27  ;;  %v6032_v59 = vpop.f32.mrb[95].mxu1  ;;  %v4424_v27 = vld [vmem:[#allocation8 + $0x304] ss:$8 sps:$4 sm:$0xff]   ;;  %v2587_v2 = vpack.c.bf16 %v2515_v11, %v2507_v12  ;;  %v2386_v39 = vadd.f32 1.0, %v4593_v32  ;;  %v6041_v17 = vmul.f32 %v1693_v60, %v5970_v9  ;;  %v1700_v6 = vmul.f32 %v1572_v56, %v6001_v0 }
 0x21e   :  { %v1580_v37 = vmul.f32 0.044715, %v6017_v14  ;;  %v1498_v25 = vmul.f32 0.5, %v5676_v62  ;;  %v6047_v4 = vadd.f32 %v5865_v46, %v5764_v26  ;;  %v2506_v51 = vmul.f32 %v2378_v5, %v5978_v28 }
 0x21f   :  { %3585 = vmatprep.mubr.bf16.mxu0 %v2587_v2  ;;  %v2514_v43 = vmul.f32 %v2386_v39, %v5985_v29  ;;  %3637 = vmatpush1.bf16.msra.mxu0 %v4419_v19  ;;  %v1901_v33 = vadd.f32 %v5854_v57, %v5775_v40  ;;  %v2284_v60 = vadd.f32 1.0, %v5924_v16  ;;  %v1506_v48 = vmul.f32 0.5, %v5739_v34 }
 0x220   :  { %v1909_v62 = vadd.f32 %v5895_v3, %v5818_v15  ;;  %v6059_v46 = vadd.f32 %v5870_v21, %v5744_v20  ;;  %v2292_v56 = vadd.f32 1.0, %v5933_v1  ;;  %3719 = vmatprep.subr.bf16.mxu0 %v4424_v27  ;;  %v1701_v12 = vmul.f32 %v1573_v7, %v6011_v13 }
 0x221   :  { %v2586_v29 = vpack.c.bf16 %v2514_v43, %v2506_v51  ;;  %v1708_v57 = vmul.f32 %v1580_v37, %v6017_v14  ;;  %v2029_v16 = vmul.f32 0.7978846, %v1901_v33  ;;  %v1581_v34 = vmul.f32 0.044715, %v6047_v4 }
 0x222   :  { %v6062_v28 = vpop.f32.mrb[96].mxu1  ;;  %v2037_v3 = vmul.f32 0.7978846, %v1909_v62  ;;  %v6070_v19 = vmul.f32 %v2284_v60, %v5837_v61  ;;  %v6073_v21 = vmul.f32 %v2292_v56, %v5844_v44  ;;  %v6076_v27 = vmul.f32 %v1700_v6, %v6001_v0 }
 0x223   :  { %v6066_v11 = vpop.f32.mrb[97].mxu1  ;;  %v4595_v1 = vpop.eup %4594  ;;  %3586 = vmatmul.mubr.bf16.gmra.mrb[24].mxu0 %v2586_v29  ;;  %4602 = vtanh.f32 %v2029_v16  ;;  %v1588_v32 = vmul.f32 0.044715, %v6059_v46  ;;  %v6081_v5 = vadd.f32 %v5878_v30, %v5764_v26  ;;  %v6089_v7 = vadd.f32 %v5904_v18, %v5744_v20 }
 0x224   :  { %v6083_v2 = vpop.f32.mrb[98].mxu1  ;;  %v4597_v39 = vpop.eup %4596  ;;  %v2395_v61 = vadd.f32 1.0, %v4595_v1  ;;  %4604 = vtanh.f32 %v2037_v3  ;;  %v6094_v43 = vmul.f32 %v1701_v12, %v6011_v13  ;;  %v1389_v30 = vmul.f32 0.5, %v5775_v40 }
 0x225   :  { %v6091_v37 = vpop.f32.mrb[99].mxu1  ;;  %v4599_v6 = vpop.eup %4598  ;;  %v2403_v51 = vadd.f32 1.0, %v4597_v39  ;;  %v6099_v33 = vadd.f32 %v5913_v10, %v5764_v26  ;;  %v6102_v56 = vmul.f32 %v1708_v57, %v6017_v14  ;;  %v1709_v18 = vmul.f32 %v1581_v34, %v6047_v4  ;;  %v6889_v39 = vld [vmem:[#allocation24_spill] sm:$0xff] }
 0x226   :  { %6887 = vst [vmem:[#allocation21_spill] sm:$0xff] %v6091_v37  ;;  %v4601_v60 = vpop.eup %4600  ;;  %v2394_v62 = vadd.f32 1.0, %v4599_v6  ;;  %v1397_v29 = vmul.f32 0.5, %v5818_v15  ;;  %v2523_v16 = vmul.f32 %v2395_v61, %v6023_v23  ;;  %v1589_v1 = vmul.f32 0.044715, %v6081_v5 }
 0x227   :  { %6888 = vst [vmem:[#allocation27_spill] sm:$0xff] %v6102_v56  ;;  %v2531_v3 = vmul.f32 %v2403_v51, %v1507_v54  ;;  %v2402_v12 = vadd.f32 1.0, %v4601_v60  ;;  %v1716_v40 = vmul.f32 %v1588_v32, %v6059_v46  ;;  %v1596_v10 = vmul.f32 0.044715, %v6089_v7  ;;  %v6891_v60 = vld [vmem:[#allocation23_spill] sm:$0xff] }
 0x228   :  { %v1917_v6 = vadd.f32 %v6889_v39, %v5841_v50  ;;  %v1925_v57 = vadd.f32 %v5953_v58, %v5876_v42  ;;  %v2522_v15 = vmul.f32 %v2394_v62, %v1498_v25  ;;  %v1597_v54 = vmul.f32 0.044715, %v6099_v33  ;;  %v6893_v62 = vld [vmem:[#allocation22_spill] sm:$0xff] }
 0x229   :  { %v2595_v34 = vpack.c.bf16 %v2531_v3, %v2523_v16  ;;  %v2530_v37 = vmul.f32 %v2402_v12, %v1506_v48  ;;  %v6120_v61 = vmul.f32 %v1709_v18, %v6047_v4  ;;  %v6124_v39 = vadd.f32 %v6891_v60, %v5744_v20  ;;  %v6894_v16 = vld [vmem:[#allocation16_spill] sm:$0xff]  ;;  %v6896_v12 = vld [vmem:[#allocation26_spill] sm:$0xff] }
 0x22a   :  { %v6114_v44 = vpop.f32.mrb[100].mxu1  ;;  %v2045_v32 = vmul.f32 0.7978846, %v1917_v6  ;;  %v2053_v51 = vmul.f32 0.7978846, %v1925_v57  ;;  %v1717_v25 = vmul.f32 %v1589_v1, %v6081_v5  ;;  %v6130_v48 = vmul.f32 0.5, %v5841_v50 }
 0x22b   :  { %v6117_v23 = vpop.f32.mrb[101].mxu1  ;;  %3595 = vmatprep.mubr.bf16.mxu0 %v2595_v34  ;;  %v2594_v58 = vpack.c.bf16 %v2530_v37, %v2522_v15  ;;  %v1916_v3 = vadd.f32 %v6894_v16, %v6893_v62  ;;  %v1924_v6 = vadd.f32 %v6896_v12, %v5860_v63  ;;  %v6897_v57 = vld [vmem:[#allocation25_spill] sm:$0xff]  ;;  %v6898_v37 = vld [vmem:[#allocation18_spill] sm:$0xff]  ;;  %v6147_v50 = vmul.f32 %v1716_v40, %v6059_v46 }
 0x22c   :  { %6890 = vst [vmem:[#allocation24_spill] sm:$0xff] %v6117_v23  ;;  %v6126_v56 = vpop.f32.mrb[102].mxu1  ;;  %4606 = vtanh.f32 %v2045_v32  ;;  %v6140_v60 = vadd.f32 %v6897_v57, %v5764_v26  ;;  %v6144_v34 = vadd.f32 %v6898_v37, %v5744_v20  ;;  %v1724_v15 = vmul.f32 %v1596_v10, %v6089_v7 }
 0x22d   :  { %6892 = vst [vmem:[#allocation23_spill] sm:$0xff] %v6126_v56  ;;  %v6134_v18 = vpop.f32.mrb[103].mxu1  ;;  %v4603_v1 = vpop.eup %4602  ;;  %3596 = vmatmul.mubr.bf16.gmra.mrb[28].mxu0 %v2594_v58  ;;  %4608 = vtanh.f32 %v2053_v51  ;;  %v2044_v32 = vmul.f32 0.7978846, %v1916_v3  ;;  %v1725_v12 = vmul.f32 %v1597_v54, %v6099_v33  ;;  %v1604_v57 = vmul.f32 0.044715, %v6124_v39 }
 0x22e   :  { %6895 = vst [vmem:[#allocation22_spill] sm:$0xff] %v6134_v18  ;;  %v4605_v16 = vpop.eup %4604  ;;  %v2285_v18 = vadd.f32 1.0, %v4603_v1  ;;  %v2052_v56 = vmul.f32 0.7978846, %v1924_v6  ;;  %v1413_v37 = vmul.f32 0.5, %v5876_v42  ;;  %v6155_v58 = vadd.f32 %v5965_v47, %v5764_v26 }
 0x22f   :  { %v2293_v23 = vadd.f32 1.0, %v4605_v16  ;;  %4610 = vtanh.f32 %v2044_v32  ;;  %v6158_v40 = vmul.f32 %v1717_v25, %v6081_v5  ;;  %v1605_v10 = vmul.f32 0.044715, %v6140_v60  ;;  %v4422_v32 = vld [vmem:[#allocation8 + $0x300] ss:$8 sps:$4 sm:$0xff]  }
 0x230   :  { %4612 = vtanh.f32 %v2052_v56  ;;  %v1612_v51 = vmul.f32 0.044715, %v6144_v34  ;;  %v2413_v3 = vmul.f32 %v2285_v18, %v1389_v30  ;;  %v6165_v1 = vmul.f32 %v1724_v15, %v6089_v7 }
 0x231   :  { %v2421_v6 = vmul.f32 %v2293_v23, %v1397_v29  ;;  %v1933_v42 = vadd.f32 %v5989_v22, %v5902_v8  ;;  %v6172_v25 = vmul.f32 %v1725_v12, %v6099_v33  ;;  %v1732_v56 = vmul.f32 %v1604_v57, %v6124_v39  ;;  %v4427_v12 = vld [vmem:[#allocation8 + $0x314] ss:$8 sps:$4 sm:$0xff]  }
 0x232   :  { %v6162_v54 = vpop.f32.mrb[104].mxu1  ;;  %6900 = vst [vmem:[#allocation26_spill] sm:$0xff] %v6165_v1  ;;  %v1941_v16 = vadd.f32 %v6030_v35, %v5950_v36  ;;  %v6179_v30 = vadd.f32 %v5972_v24, %v5744_v20  ;;  %v1404_v22 = vmul.f32 0.5, %v6893_v62  ;;  %v1613_v18 = vmul.f32 0.044715, %v6155_v58 }
 0x233   :  { %6899 = vst [vmem:[#allocation16_spill] sm:$0xff] %v6162_v54  ;;  %v6169_v47 = vpop.f32.mrb[105].mxu1  ;;  %v2541_v23 = vpack.c.bf16 %v2421_v6, %v2413_v3  ;;  %v2061_v15 = vmul.f32 0.7978846, %v1933_v42  ;;  %v1412_v57 = vmul.f32 0.5, %v5860_v63  ;;  %v1733_v54 = vmul.f32 %v1605_v10, %v6140_v60 }
 0x234   :  { %6901 = vst [vmem:[#allocation25_spill] sm:$0xff] %v6169_v47  ;;  %v6181_v29 = vpop.f32.mrb[106].mxu1  ;;  %v1740_v35 = vmul.f32 %v1612_v51, %v6144_v34  ;;  %v2069_v1 = vmul.f32 0.7978846, %v1941_v16  ;;  %v1620_v24 = vmul.f32 0.044715, %v6179_v30  ;;  %v1932_v62 = vadd.f32 %v5975_v53, %v5884_v31 }
 0x235   :  { %v6185_v47 = vpop.f32.mrb[107].mxu1  ;;  %3638 = vmatprep.mubr.bf16.mxu0 %v2541_v23  ;;  %4614 = vtanh.f32 %v2061_v15  ;;  %v1940_v3 = vadd.f32 %v5992_v52, %v5920_v55  ;;  %v6903_v42 = vpack.c.bf16 %v6073_v21, %v6070_v19  ;;  %v4425_v63 = vld [vmem:[#allocation8 + $0x310] ss:$8 sps:$4 sm:$0xff]   ;;  %v6199_v10 = vmul.f32 %v1732_v56, %v6124_v39  ;;  %v4430_v21 = vld [vmem:[#allocation8 + $0x324] ss:$8 sps:$4 sm:$0xff]  }
 0x236   :  { %6902 = vst [vmem:[#allocation18_spill] sm:$0xff] %v6185_v47  ;;  %v4607_v6 = vpop.eup %4606  ;;  %v6202_v51 = vmul.f32 0.5, %v5902_v8  ;;  %v6205_v16 = vmul.f32 0.5, %v5950_v36  ;;  %4616 = vtanh.f32 %v2069_v1  ;;  %v1741_v52 = vmul.f32 %v1613_v18, %v6155_v58 }
 0x237   :  { %3639 = vmatmul.mubr.bf16.vlgmr.msra.gmra.mrb[0].mxu0 %v6903_v42  ;;  %v4609_v53 = vpop.eup %4608  ;;  %v2301_v23 = vadd.f32 1.0, %v4607_v6  ;;  %v2060_v15 = vmul.f32 0.7978846, %v1932_v62  ;;  %v2068_v47 = vmul.f32 0.7978846, %v1940_v3  ;;  %v6209_v56 = vmul.f32 %v1733_v54, %v6140_v60  ;;  %v6905_v54 = vld [vmem:[#allocation17_spill] sm:$0xff] }
 0x238   :  { %3720 = vmatpush1.bf16.msra.mxu0 %v4422_v32  ;;  %v2309_v19 = vadd.f32 1.0, %v4609_v53  ;;  %v6213_v8 = vadd.f32 %v5981_v41, %v5764_v26  ;;  %v6217_v36 = vadd.f32 %v6013_v38, %v5744_v20  ;;  %v6222_v18 = vmul.f32 %v1740_v35, %v6144_v34 }
 0x239   :  { %3721 = vmatprep.subr.bf16.mxu0 %v4427_v12  ;;  %v4611_v32 = vpop.eup %4610  ;;  %v1748_v12 = vmul.f32 %v1620_v24, %v6179_v30  ;;  %4618 = vtanh.f32 %v2060_v15  ;;  %v6227_v62 = vadd.f32 %v6905_v54, %v5764_v26  ;;  %v2429_v6 = vmul.f32 %v2301_v23, %v6130_v48 }
 0x23a   :  { %v6219_v1 = vpop.f32.mrb[108].mxu1  ;;  %v4613_v41 = vpop.eup %4612  ;;  %v2437_v38 = vmul.f32 %v2309_v19, %v1413_v37  ;;  %v2300_v42 = vadd.f32 1.0, %v4611_v32  ;;  %4620 = vtanh.f32 %v2068_v47  ;;  %v6235_v24 = vmul.f32 %v1741_v52, %v6155_v58  ;;  %v4433_v37 = vld [vmem:[#allocation8 + $0x334] ss:$8 sps:$4 sm:$0xff]  }
 0x23b   :  { %6904 = vst [vmem:[#allocation28_spill] sm:$0xff] %v6219_v1  ;;  %v6229_v3 = vpop.f32.mrb[109].mxu1  ;;  %v2308_v35 = vadd.f32 1.0, %v4613_v41  ;;  %v4428_v1 = vld [vmem:[#allocation8 + $0x320] ss:$8 sps:$4 sm:$0xff]   ;;  %v6238_v15 = vmul.f32 0.5, %v5884_v31  ;;  %v1949_v54 = vadd.f32 %v6041_v17, %v5970_v9  ;;  %v1957_v23 = vadd.f32 %v6094_v43, %v6011_v13 }
 0x23c   :  { %6906 = vst [vmem:[#allocation17_spill] sm:$0xff] %v6229_v3  ;;  %v6232_v53 = vpop.f32.mrb[110].mxu1  ;;  %3722 = vmatpush1.bf16.msra.mxu0 %v4425_v63  ;;  %v2549_v48 = vpack.c.bf16 %v2437_v38, %v2429_v6  ;;  %v1621_v47 = vmul.f32 0.044715, %v6213_v8  ;;  %v1628_v63 = vmul.f32 0.044715, %v6217_v36  ;;  %v2428_v52 = vmul.f32 %v2300_v42, %v1404_v22 }
 0x23d   :  { %6907 = vst [vmem:[#allocation29_spill] sm:$0xff] %v6232_v53  ;;  %v6242_v3 = vpop.f32.mrb[111].mxu1  ;;  %3723 = vmatprep.subr.bf16.mxu0 %v4430_v21  ;;  %v2436_v19 = vmul.f32 %v2308_v35, %v1412_v57  ;;  %v1428_v31 = vmul.f32 0.5, %v5920_v55  ;;  %v2077_v32 = vmul.f32 0.7978846, %v1949_v54  ;;  %v6250_v17 = vmul.f32 %v1748_v12, %v6179_v30 }
 0x23e   :  { %6908 = vst [vmem:[#allocation30_spill] sm:$0xff] %v6242_v3  ;;  %3648 = vmatprep.mubr.bf16.mxu0 %v2549_v48  ;;  %v1629_v41 = vmul.f32 0.044715, %v6227_v62  ;;  %v6254_v21 = vmul.f32 0.5, %v5970_v9  ;;  %v2085_v6 = vmul.f32 0.7978846, %v1957_v23  ;;  %v1948_v43 = vadd.f32 %v6035_v45, %v5959_v49 }
 0x23f   :  { %v4615_v38 = vpop.eup %4614  ;;  %v2548_v3 = vpack.c.bf16 %v2436_v19, %v2428_v52  ;;  %v4431_v53 = vld [vmem:[#allocation8 + $0x330] ss:$8 sps:$4 sm:$0xff]   ;;  %4622 = vtanh.f32 %v2077_v32  ;;  %v1956_v55 = vadd.f32 %v6076_v27, %v6001_v0  ;;  %v4436_v12 = vld [vmem:[#allocation8 + $0x344] ss:$8 sps:$4 sm:$0xff]   ;;  %v1749_v42 = vmul.f32 %v1621_v47, %v6213_v8 }
 0x240   :  { %3724 = vmatpush1.bf16.msra.mxu0 %v4428_v1  ;;  %v4617_v22 = vpop.eup %4616  ;;  %v2317_v57 = vadd.f32 1.0, %v4615_v38  ;;  %v1756_v9 = vmul.f32 %v1628_v63, %v6217_v36  ;;  %4624 = vtanh.f32 %v2085_v6  ;;  %v2076_v54 = vmul.f32 0.7978846, %v1948_v43  ;;  %v6909_v23 = vld [vmem:[#allocation15_spill] sm:$0xff] }
 0x241   :  { %3725 = vmatprep.subr.bf16.mxu0 %v4433_v37  ;;  %3649 = vmatmul.mubr.bf16.gmra.mrb[4].mxu0 %v2548_v3  ;;  %v2325_v1 = vadd.f32 1.0, %v4617_v22  ;;  %v2084_v48 = vmul.f32 0.7978846, %v1956_v55  ;;  %v278_v45 = vsub.s32 6, %v6909_v23  ;;  %v1757_v52 = vmul.f32 %v1629_v41, %v6227_v62  ;;  %v6910_v27 = vld [vmem:[#allocation19_spill] sm:$0xff]  ;;  %v6911_v41 = vld [vmem:[#allocation20_spill] sm:$0xff] }
 0x242   :  { %v6262_v35 = vpop.f32.mrb[112].mxu1  ;;  %v6268_v37 = vadd.f32 %v6910_v27, %v5744_v20  ;;  %v6272_v47 = vadd.f32 %v6032_v59, %v5764_v26  ;;  %v282_v63 = vsub.s32 7, %v6909_v23  ;;  %v2445_v32 = vmul.f32 %v2317_v57, %v6202_v51  ;;  %v4434_v38 = vld [vmem:[#allocation8 + $0x340] ss:$8 sps:$4 sm:$0xff]   ;;  %v4439_v22 = vld [vmem:[#allocation8 + $0x354] ss:$8 sps:$4 sm:$0xff]  }
 0x243   :  { %v6275_v19 = vpop.f32.mrb[113].mxu1  ;;  %v4619_v3 = vpop.eup %4618  ;;  %v2453_v6 = vmul.f32 %v2325_v1, %v6205_v16  ;;  %4626 = vtanh.f32 %v2076_v54  ;;  %v6280_v43 = vrot.slane %v6911_v41, %v278_v45  ;;  %v6285_v59 = vmul.f32 %v1749_v42, %v6213_v8  ;;  %v4727_v54 = vld [vmem:[#allocation7] sm:$0xff] }
 0x244   :  { %3726 = vmatpush1.bf16.msra.mxu0 %v4431_v53  ;;  %v6282_v20 = vpop.f32.mrb[114].mxu1  ;;  %v4621_v55 = vpop.eup %4620  ;;  %v2316_v26 = vadd.f32 1.0, %v4619_v3  ;;  %v1445_v53 = vmul.f32 0.5, %v6011_v13  ;;  %4628 = vtanh.f32 %v2084_v48  ;;  %v6294_v45 = vrot.slane %v4727_v54, %v282_v63 }
 0x245   :  { %6912 = vst [vmem:[#allocation19_spill] sm:$0xff] %v6282_v20  ;;  %3727 = vmatprep.subr.bf16.mxu0 %v4436_v12  ;;  %v6288_v51 = vpop.f32.mrb[115].mxu1  ;;  %v2557_v16 = vpack.c.bf16 %v2453_v6, %v2445_v32  ;;  %v2324_v57 = vadd.f32 1.0, %v4621_v55  ;;  %v6292_v1 = vadd.f32 %v6062_v28, %v6280_v43  ;;  %v6297_v12 = vmul.f32 %v1756_v9, %v6217_v36  ;;  %v4437_v32 = vld [vmem:[#allocation8 + $0x350] ss:$8 sps:$4 sm:$0xff]  }
 0x246   :  { %6913 = vst [vmem:[#allocation20_spill] sm:$0xff] %v6288_v51  ;;  %v6300_v42 = vmul.f32 %v1757_v52, %v6227_v62  ;;  %v1636_v13 = vmul.f32 0.044715, %v6268_v37  ;;  %v1965_v48 = vadd.f32 %v6120_v61, %v6047_v4  ;;  %v2444_v27 = vmul.f32 %v2316_v26, %v6238_v15  ;;  %v4442_v26 = vld [vmem:[#allocation8 + $0x364] ss:$8 sps:$4 sm:$0xff]  }
 0x247   :  { %3658 = vmatprep.mubr.bf16.mxu0 %v2557_v16  ;;  %v2452_v3 = vmul.f32 %v2324_v57, %v1428_v31  ;;  %v1637_v28 = vmul.f32 0.044715, %v6272_v47  ;;  %v1518_v63 = vmul.f32 0.044715, %v6292_v1  ;;  %v6310_v9 = vadd.f32 %v6066_v11, %v6294_v45 }
 0x248   :  { %3728 = vmatpush1.bf16.msra.mxu0 %v4434_v38  ;;  %v1973_v52 = vadd.f32 %v6158_v40, %v6081_v5  ;;  %v2093_v6 = vmul.f32 0.7978846, %v1965_v48  ;;  %v6316_v61 = vadd.f32 %v6083_v2, %v6280_v43  ;;  %v1436_v41 = vmul.f32 0.5, %v5959_v49 }
 0x249   :  { %3729 = vmatprep.subr.bf16.mxu0 %v4439_v22  ;;  %v4623_v31 = vpop.eup %4622  ;;  %v2556_v38 = vpack.c.bf16 %v2452_v3, %v2444_v27  ;;  %v1444_v55 = vmul.f32 0.5, %v6001_v0  ;;  %v1646_v11 = vmul.f32 %v1518_v63, %v6292_v1  ;;  %v1764_v57 = vmul.f32 %v1636_v13, %v6268_v37  ;;  %v4440_v63 = vld [vmem:[#allocation8 + $0x360] ss:$8 sps:$4 sm:$0xff]  }
 0x24a   :  { %v6318_v15 = vpop.f32.mrb[116].mxu1  ;;  %v4625_v16 = vpop.eup %4624  ;;  %v2333_v40 = vadd.f32 1.0, %v4623_v31  ;;  %v2101_v54 = vmul.f32 0.7978846, %v1973_v52  ;;  %4630 = vtanh.f32 %v2093_v6  ;;  %v1765_v27 = vmul.f32 %v1637_v28, %v6272_v47  ;;  %v6918_v13 = vld [vmem:[#allocation27_spill] sm:$0xff] }
 0x24b   :  { %6914 = vst [vmem:[#allocation31_spill] sm:$0xff] %v6318_v15  ;;  %v6323_v22 = vpop.f32.mrb[117].mxu1  ;;  %3659 = vmatmul.mubr.bf16.gmra.mrb[8].mxu0 %v2556_v38  ;;  %v2341_v48 = vadd.f32 1.0, %v4625_v16  ;;  %v1774_v49 = vmul.f32 %v1646_v11, %v6292_v1  ;;  %v1526_v0 = vmul.f32 0.044715, %v6316_v61  ;;  %v1964_v52 = vadd.f32 %v6918_v13, %v6017_v14  ;;  %v6919_v15 = vld [vmem:[#allocation21_spill] sm:$0xff] }
 0x24c   :  { %6915 = vst [vmem:[#allocation32_spill] sm:$0xff] %v6323_v22  ;;  %v6326_v2 = vpop.f32.mrb[118].mxu1  ;;  %3730 = vmatpush1.bf16.msra.mxu0 %v4437_v32  ;;  %v1519_v31 = vmul.f32 0.044715, %v6310_v9  ;;  %4632 = vtanh.f32 %v2101_v54  ;;  %v1972_v6 = vadd.f32 %v6147_v50, %v6059_v46  ;;  %v2461_v28 = vmul.f32 %v2333_v40, %v6254_v21  ;;  %v4445_v11 = vld [vmem:[#allocation8 + $0x374] ss:$8 sps:$4 sm:$0xff]  }
 0x24d   :  { %6916 = vst [vmem:[#allocation33_spill] sm:$0xff] %v6326_v2  ;;  %v6331_v3 = vpop.f32.mrb[119].mxu1  ;;  %v4627_v38 = vpop.eup %4626  ;;  %v2469_v16 = vmul.f32 %v2341_v48, %v1445_v53  ;;  %3731 = vmatprep.subr.bf16.mxu0 %v4442_v26  ;;  %v1902_v23 = vadd.f32 %v1774_v49, %v6292_v1  ;;  %v1654_v32 = vmul.f32 %v1526_v0, %v6316_v61  ;;  %v2092_v22 = vmul.f32 0.7978846, %v1964_v52  ;;  %v4443_v40 = vld [vmem:[#allocation8 + $0x370] ss:$8 sps:$4 sm:$0xff]  }
 0x24e   :  { %6917 = vst [vmem:[#allocation34_spill] sm:$0xff] %v6331_v3  ;;  %v4629_v3 = vpop.eup %4628  ;;  %v2332_v2 = vadd.f32 1.0, %v4627_v38  ;;  %v2100_v54 = vmul.f32 0.7978846, %v1972_v6  ;;  %v6343_v13 = vadd.f32 %v6919_v15, %v6294_v45  ;;  %v1453_v20 = vmul.f32 0.5, %v6047_v4 }
 0x24f   :  { %v2565_v51 = vpack.c.bf16 %v2469_v16, %v2461_v28  ;;  %v2340_v50 = vadd.f32 1.0, %v4629_v3  ;;  %v1782_v21 = vmul.f32 %v1654_v32, %v6316_v61  ;;  %v6348_v53 = vmul.f32 %v1764_v57, %v6268_v37  ;;  %v4448_v52 = vld [vmem:[#allocation8 + $0x384] ss:$8 sps:$4 sm:$0xff]   ;;  %v4446_v38 = vld [vmem:[#allocation8 + $0x380] ss:$8 sps:$4 sm:$0xff]  }
 0x250   :  { %v6351_v26 = vmul.f32 %v1765_v27, %v6272_v47  ;;  %3732 = vmatpush1.bf16.msra.mxu0 %v4440_v63  ;;  %v1461_v48 = vmul.f32 0.5, %v6081_v5  ;;  %4634 = vtanh.f32 %v2092_v22  ;;  %v2460_v15 = vmul.f32 %v2332_v2, %v1436_v41  ;;  %v6921_v22 = vld [vmem:[#allocation24_spill] sm:$0xff]  ;;  %v4451_v32 = vld [vmem:[#allocation8 + $0x394] ss:$8 sps:$4 sm:$0xff]  }
 0x251   :  { %3668 = vmatprep.mubr.bf16.mxu0 %v2565_v51  ;;  %v2468_v0 = vmul.f32 %v2340_v50, %v1444_v55  ;;  %3733 = vmatprep.subr.bf16.mxu0 %v4445_v11  ;;  %v2030_v4 = vmul.f32 0.7978846, %v1902_v23  ;;  %v1647_v3 = vmul.f32 %v1519_v31, %v6310_v9  ;;  %v6360_v27 = vmul.f32 0.5, %v6292_v1 }
 0x252   :  { %v6354_v49 = vpop.f32.mrb[120].mxu1  ;;  %4636 = vtanh.f32 %v2100_v54  ;;  %v1527_v63 = vmul.f32 0.044715, %v6343_v13  ;;  %v6365_v5 = vadd.f32 %v6114_v44, %v6280_v43  ;;  %v1910_v23 = vadd.f32 %v1782_v21, %v6316_v61 }
 0x253   :  { %v6357_v57 = vpop.f32.mrb[121].mxu1  ;;  %v2564_v41 = vpack.c.bf16 %v2468_v0, %v2460_v15  ;;  %v6371_v55 = vmul.f32 0.5, %v6017_v14  ;;  %v6375_v2 = vadd.f32 %v6921_v22, %v6294_v45  ;;  %v6380_v6 = vmul.f32 0.5, %v6316_v61  ;;  %v6923_v61 = vld [vmem:[#allocation23_spill] sm:$0xff] }
 0x254   :  { %v6367_v51 = vpop.f32.mrb[122].mxu1  ;;  %v4631_v31 = vpop.eup %4630  ;;  %3734 = vmatpush1.bf16.msra.mxu0 %v4443_v40  ;;  %v6383_v44 = vmul.f32 0.5, %v6059_v46  ;;  %v1981_v28 = vadd.f32 %v6172_v25, %v6099_v33  ;;  %v1989_v14 = vadd.f32 %v6209_v56, %v6140_v60  ;;  %4638 = vtanh.f32 %v2030_v4 }
 0x255   :  { %6920 = vst [vmem:[#allocation27_spill] sm:$0xff] %v6367_v51  ;;  %v6377_v1 = vpop.f32.mrb[123].mxu1  ;;  %3669 = vmatmul.mubr.bf16.gmra.mrb[12].mxu0 %v2564_v41  ;;  %v6390_v16 = vmul.f32 %v1647_v3, %v6310_v9  ;;  %v2349_v11 = vadd.f32 1.0, %v4631_v31  ;;  %3735 = vmatprep.subr.bf16.mxu0 %v4448_v52  ;;  %v6394_v54 = vadd.f32 %v6923_v61, %v6280_v43  ;;  %v1534_v25 = vmul.f32 0.044715, %v6365_v5  ;;  %v6924_v41 = vld [vmem:[#allocation26_spill] sm:$0xff] }
 0x256   :  { %6922 = vst [vmem:[#allocation21_spill] sm:$0xff] %v6377_v1  ;;  %v4633_v46 = vpop.eup %4632  ;;  %v1655_v50 = vmul.f32 %v1527_v63, %v6343_v13  ;;  %v2109_v21 = vmul.f32 0.7978846, %v1981_v28  ;;  %v2117_v40 = vmul.f32 0.7978846, %v1989_v14  ;;  %v6400_v4 = vmul.f32 0.5, %v6099_v33 }
 0x257   :  { %v2357_v56 = vadd.f32 1.0, %v4633_v46  ;;  %v2038_v15 = vmul.f32 0.7978846, %v1910_v23  ;;  %v1535_v0 = vmul.f32 0.044715, %v6375_v2  ;;  %v1980_v22 = vadd.f32 %v6924_v41, %v6089_v7  ;;  %v6926_v33 = vld [vmem:[#allocation22_spill] sm:$0xff] }
 0x258   :  { %3736 = vmatpush1.bf16.msra.mxu0 %v4446_v38  ;;  %v4449_v3 = vld [vmem:[#allocation8 + $0x390] ss:$8 sps:$4 sm:$0xff]   ;;  %4640 = vtanh.f32 %v2109_v21  ;;  %v1542_v52 = vmul.f32 0.044715, %v6394_v54  ;;  %v1988_v63 = vadd.f32 %v6199_v10, %v6124_v39  ;;  %v2477_v28 = vmul.f32 %v2349_v11, %v1453_v20  ;;  %v4454_v14 = vld [vmem:[#allocation8 + $0x3a4] ss:$8 sps:$4 sm:$0xff]  }
 0x259   :  { %v2485_v23 = vmul.f32 %v2357_v56, %v1461_v48  ;;  %3737 = vmatprep.subr.bf16.mxu0 %v4451_v32  ;;  %4642 = vtanh.f32 %v2117_v40  ;;  %v6411_v38 = vadd.f32 %v6926_v33, %v6294_v45  ;;  %v1662_v21 = vmul.f32 %v1534_v25, %v6365_v5  ;;  %v6928_v10 = vld [vmem:[#allocation16_spill] sm:$0xff] }
 0x25a   :  { %v6407_v31 = vpop.f32.mrb[124].mxu1  ;;  %v4635_v46 = vpop.eup %4634  ;;  %v2108_v41 = vmul.f32 0.7978846, %v1980_v22  ;;  %v2116_v1 = vmul.f32 0.7978846, %v1988_v63  ;;  %v6418_v51 = vadd.f32 %v6928_v10, %v6280_v43  ;;  %4644 = vtanh.f32 %v2038_v15 }
 0x25b   :  { %6925 = vst [vmem:[#allocation24_spill] sm:$0xff] %v6407_v31  ;;  %v6413_v61 = vpop.f32.mrb[125].mxu1  ;;  %v2573_v48 = vpack.c.bf16 %v2485_v23, %v2477_v28  ;;  %v2348_v11 = vadd.f32 1.0, %v4635_v46  ;;  %v6423_v32 = vmul.f32 0.5, %v6140_v60  ;;  %v6428_v33 = vmul.f32 %v1655_v50, %v6343_v13  ;;  %v4452_v63 = vld [vmem:[#allocation8 + $0x3a0] ss:$8 sps:$4 sm:$0xff]  }
 0x25c   :  { %6927 = vst [vmem:[#allocation23_spill] sm:$0xff] %v6413_v61  ;;  %v6420_v20 = vpop.f32.mrb[126].mxu1  ;;  %v4637_v56 = vpop.eup %4636  ;;  %3738 = vmatpush1.bf16.msra.mxu0 %v4449_v3  ;;  %v1663_v25 = vmul.f32 %v1535_v0, %v6375_v2  ;;  %v1670_v22 = vmul.f32 %v1542_v52, %v6394_v54  ;;  %4646 = vtanh.f32 %v2108_v41  ;;  %v1543_v60 = vmul.f32 0.044715, %v6411_v38  ;;  %v4457_v15 = vld [vmem:[#allocation8 + $0x3b4] ss:$8 sps:$4 sm:$0xff]  }
 0x25d   :  { %6929 = vst [vmem:[#allocation26_spill] sm:$0xff] %v6420_v20  ;;  %v6425_v40 = vpop.f32.mrb[127].mxu1  ;;  %3678 = vmatprep.mubr.bf16.mxu0 %v2573_v48  ;;  %v2356_v28 = vadd.f32 1.0, %v4637_v56  ;;  %4648 = vtanh.f32 %v2116_v1  ;;  %3739 = vmatprep.subr.bf16.mxu0 %v4454_v14  ;;  %v6931_v23 = vld [vmem:[#allocation25_spill] sm:$0xff]  ;;  %v6438_v50 = vmul.f32 %v1662_v21, %v6365_v5  ;;  %v6441_v0 = vmul.f32 0.5, %v6089_v7 }
 0x25e   :  { %6930 = vst [vmem:[#allocation22_spill] sm:$0xff] %v6425_v40  ;;  %v6435_v46 = vadd.f32 %v6931_v23, %v6294_v45  ;;  %v1550_v3 = vmul.f32 0.044715, %v6418_v51  ;;  %v1997_v52 = vadd.f32 %v6235_v24, %v6155_v58  ;;  %v6446_v1 = vpop.eup %4638  ;;  %v2476_v14 = vmul.f32 %v2348_v11, %v6371_v55  ;;  %v4455_v56 = vld [vmem:[#allocation8 + $0x3b0] ss:$8 sps:$4 sm:$0xff]  }
 0x25f   :  { %v2484_v41 = vmul.f32 %v2356_v28, %v6383_v44  ;;  %v2005_v10 = vadd.f32 %v6285_v59, %v6213_v8  ;;  %v6454_v21 = vadd.f32 %v6181_v29, %v6280_v43  ;;  %v6457_v7 = vmul.f32 %v1663_v25, %v6375_v2  ;;  %v4460_v29 = vld [vmem:[#allocation8 + $0x3c4] ss:$8 sps:$4 sm:$0xff]  }
 0x260   :  { %v6460_v48 = vmul.f32 %v1670_v22, %v6394_v54  ;;  %v1476_v24 = vmul.f32 0.5, %v6124_v39  ;;  %3740 = vmatpush1.bf16.msra.mxu0 %v4452_v63  ;;  %v2125_v55 = vmul.f32 0.7978846, %v1997_v52  ;;  %v1671_v44 = vmul.f32 %v1543_v60, %v6411_v38 }
 0x261   :  { %v2572_v11 = vpack.c.bf16 %v2484_v41, %v2476_v14  ;;  %3741 = vmatprep.subr.bf16.mxu0 %v4457_v15  ;;  %v1551_v59 = vmul.f32 0.044715, %v6435_v46  ;;  %v2133_v28 = vmul.f32 0.7978846, %v2005_v10  ;;  %v1678_v25 = vmul.f32 %v1550_v3, %v6418_v51  ;;  %v4458_v15 = vld [vmem:[#allocation8 + $0x3c0] ss:$8 sps:$4 sm:$0xff]  }
 0x262   :  { %v4641_v23 = vpop.eup %4640  ;;  %4650 = vtanh.f32 %v2125_v55  ;;  %v1996_v22 = vadd.f32 %v6222_v18, %v6144_v34  ;;  %v2004_v39 = vadd.f32 %v6250_v17, %v6179_v30  ;;  %v1558_v60 = vmul.f32 0.044715, %v6454_v21  ;;  %v6932_v14 = vld [vmem:[#allocation18_spill] sm:$0xff]  ;;  %v6933_v18 = vld [vmem:[#allocation28_spill] sm:$0xff] }
 0x263   :  { %v4643_v63 = vpop.eup %4642  ;;  %3679 = vmatmul.mubr.bf16.gmra.mrb[16].mxu0 %v2572_v11  ;;  %v2365_v52 = vadd.f32 1.0, %v4641_v23  ;;  %4652 = vtanh.f32 %v2133_v28  ;;  %v6473_v41 = vadd.f32 %v6932_v14, %v6294_v45  ;;  %v6477_v40 = vadd.f32 %v6933_v18, %v6280_v43  ;;  %v6934_v18 = vld [vmem:[#allocation17_spill] sm:$0xff] }
 0x264   :  { %v2373_v10 = vadd.f32 1.0, %v4643_v63  ;;  %3742 = vmatpush1.bf16.msra.mxu0 %v4455_v56  ;;  %v2124_v3 = vmul.f32 0.7978846, %v1996_v22  ;;  %v2132_v55 = vmul.f32 0.7978846, %v2004_v39  ;;  %v6479_v17 = vpop.eup %4644  ;;  %v6482_v11 = vmul.f32 %v1671_v44, %v6411_v38 }
 0x265   :  { %v1679_v28 = vmul.f32 %v1551_v59, %v6435_v46  ;;  %v1485_v23 = vmul.f32 0.5, %v6155_v58  ;;  %v1493_v14 = vmul.f32 0.5, %v6213_v8  ;;  %3743 = vmatprep.subr.bf16.mxu0 %v4460_v29  ;;  %v4463_v63 = vld [vmem:[#allocation8 + $0x3d4] ss:$8 sps:$4 sm:$0xff]   ;;  %v2493_v22 = vmul.f32 %v2365_v52, %v6400_v4  ;;  %v4461_v4 = vld [vmem:[#allocation8 + $0x3d0] ss:$8 sps:$4 sm:$0xff]  }
 0x266   :  { %v4647_v56 = vpop.eup %4646  ;;  %v2501_v39 = vmul.f32 %v2373_v10, %v6423_v32  ;;  %4654 = vtanh.f32 %v2124_v3  ;;  %v6491_v20 = vadd.f32 %v6934_v18, %v6294_v45  ;;  %v1686_v59 = vmul.f32 %v1558_v60, %v6454_v21  ;;  %v4464_v18 = vld [vmem:[#allocation8 + $0x3e0] ss:$8 sps:$4 sm:$0xff]  }
 0x267   :  { %v4649_v44 = vpop.eup %4648  ;;  %v2364_v61 = vadd.f32 1.0, %v4647_v56  ;;  %4656 = vtanh.f32 %v2132_v55  ;;  %v1559_v58 = vmul.f32 0.044715, %v6473_v41  ;;  %v6496_v31 = vmul.f32 %v1678_v25, %v6418_v51  ;;  %v4466_v55 = vld [vmem:[#allocation8 + $0x3e4] ss:$8 sps:$4 sm:$0xff]  }
 0x268   :  { %v2581_v8 = vpack.c.bf16 %v2501_v39, %v2493_v22  ;;  %v2372_v29 = vadd.f32 1.0, %v4649_v44  ;;  %3744 = vmatpush1.bf16.msra.mxu0 %v4458_v15  ;;  %v1566_v32 = vmul.f32 0.044715, %v6477_v40  ;;  %v6500_v52 = vmul.f32 %v1679_v28, %v6435_v46 }
 0x269   :  { %v1484_v10 = vmul.f32 0.5, %v6144_v34  ;;  %v1492_v3 = vmul.f32 0.5, %v6179_v30  ;;  %3745 = vmatprep.subr.bf16.mxu0 %v4463_v63  ;;  %v2013_v60 = vadd.f32 %v6300_v42, %v6227_v62  ;;  %v2492_v25 = vmul.f32 %v2364_v61, %v6441_v0 }
 0x26a   :  { %3688 = vmatprep.mubr.bf16.mxu0 %v2581_v8  ;;  %v2500_v56 = vmul.f32 %v2372_v29, %v1476_v24  ;;  %v1567_v15 = vmul.f32 0.044715, %v6491_v20  ;;  %v2021_v22 = vadd.f32 %v6351_v26, %v6272_v47  ;;  %v6511_v28 = vmul.f32 %v1686_v59, %v6454_v21  ;;  %v6935_v59 = vld [vmem:[#allocation29_spill] sm:$0xff] }
 0x26b   :  { %v1687_v34 = vmul.f32 %v1559_v58, %v6473_v41  ;;  %v2141_v30 = vmul.f32 0.7978846, %v2013_v60  ;;  %v2012_v63 = vadd.f32 %v6297_v12, %v6217_v36  ;;  %v1694_v61 = vmul.f32 %v1566_v32, %v6477_v40  ;;  %v4469_v12 = vld [vmem:[#allocation8 + $0x3f4] ss:$8 sps:$4 sm:$0xff]  }
 0x26c   :  { %v4651_v42 = vpop.eup %4650  ;;  %v2580_v39 = vpack.c.bf16 %v2500_v56, %v2492_v25  ;;  %3746 = vmatpush1.bf16.msra.mxu0 %v4461_v4  ;;  %v2149_v0 = vmul.f32 0.7978846, %v2021_v22  ;;  %v2020_v24 = vadd.f32 %v6348_v53, %v6268_v37  ;;  %v6521_v58 = vadd.f32 %v6935_v59, %v6280_v43  ;;  %v6936_v53 = vld [vmem:[#allocation30_spill] sm:$0xff] }
 0x26d   :  { %v4653_v26 = vpop.eup %4652  ;;  %v2381_v44 = vadd.f32 1.0, %v4651_v42  ;;  %4658 = vtanh.f32 %v2141_v30  ;;  %v2140_v8 = vmul.f32 0.7978846, %v2012_v63  ;;  %3747 = vmatprep.subr.bf16.mxu0 %v4466_v55  ;;  %v1695_v4 = vmul.f32 %v1567_v15, %v6491_v20  ;;  %v4467_v15 = vld [vmem:[#allocation8 + $0x3f0] ss:$8 sps:$4 sm:$0xff]  }
 0x26e   :  { %3689 = vmatmul.mubr.bf16.gmra.mrb[20].mxu0 %v2580_v39  ;;  %v2389_v29 = vadd.f32 1.0, %v4653_v26  ;;  %4660 = vtanh.f32 %v2149_v0  ;;  %v2148_v32 = vmul.f32 0.7978846, %v2020_v24  ;;  %v1501_v60 = vmul.f32 0.5, %v6227_v62 }
 0x26f   :  { %4662 = vtanh.f32 %v2140_v8  ;;  %v6527_v25 = vadd.f32 %v6936_v53, %v6294_v45  ;;  %v6531_v56 = vadd.f32 %v6262_v35, %v6280_v43  ;;  %v2509_v55 = vmul.f32 %v2381_v44, %v1485_v23 }
 0x270   :  { %v4655_v22 = vpop.eup %4654  ;;  %v2517_v30 = vmul.f32 %v2389_v29, %v1493_v14  ;;  %v1509_v63 = vmul.f32 0.5, %v6272_v47  ;;  %4664 = vtanh.f32 %v2148_v32  ;;  %3748 = vmatpush1.bf16.msra.mxu0 %v4464_v18  ;;  %v6535_v62 = vmul.f32 %v1687_v34, %v6473_v41 }
 0x271   :  { %v4657_v42 = vpop.eup %4656  ;;  %v2380_v39 = vadd.f32 1.0, %v4655_v22  ;;  %v1574_v0 = vmul.f32 0.044715, %v6521_v58  ;;  %3749 = vmatprep.subr.bf16.mxu0 %v4469_v12  ;;  %v6540_v35 = vadd.f32 %v6275_v19, %v6294_v45  ;;  %v6543_v14 = vmul.f32 %v1694_v61, %v6477_v40 }
 0x272   :  { %v2589_v24 = vpack.c.bf16 %v2517_v30, %v2509_v55  ;;  %v2388_v23 = vadd.f32 1.0, %v4657_v42  ;;  %v6546_v47 = vmul.f32 %v1695_v4, %v6491_v20  ;;  %v1500_v18 = vmul.f32 0.5, %v6217_v36  ;;  %v6938_v55 = vld [vmem:[#allocation20_spill] sm:$0xff] }
 0x273   :  { %v1575_v34 = vmul.f32 0.044715, %v6527_v25  ;;  %v1582_v26 = vmul.f32 0.044715, %v6531_v56  ;;  %v1903_v44 = vadd.f32 %v6390_v16, %v6310_v9  ;;  %v2508_v19 = vmul.f32 %v2380_v39, %v1484_v10  ;;  %v6937_v10 = vld [vmem:[#allocation19_spill] sm:$0xff] }
 0x274   :  { %3698 = vmatprep.mubr.bf16.mxu0 %v2589_v24  ;;  %v2516_v59 = vmul.f32 %v2388_v23, %v1492_v3  ;;  %3750 = vmatpush1.bf16.msra.mxu0 %v4467_v15  ;;  %v1911_v61 = vadd.f32 %v6428_v33, %v6343_v13  ;;  %v2286_v8 = vadd.f32 1.0, %v6446_v1  ;;  %v1702_v12 = vmul.f32 %v1574_v0, %v6521_v58 }
 0x275   :  { %v1583_v36 = vmul.f32 0.044715, %v6540_v35  ;;  %v2031_v29 = vmul.f32 0.7978846, %v1903_v44  ;;  %v2294_v4 = vadd.f32 1.0, %v6479_v17  ;;  %v1508_v53 = vmul.f32 0.5, %v6268_v37 }
 0x276   :  { %v2588_v32 = vpack.c.bf16 %v2516_v59, %v2508_v19  ;;  %v2039_v16 = vmul.f32 0.7978846, %v1911_v61  ;;  %v6562_v3 = vadd.f32 %v6937_v10, %v6280_v43  ;;  %v6565_v33 = vmul.f32 %v2286_v8, %v6360_v27  ;;  %v6939_v59 = vld [vmem:[#allocation31_spill] sm:$0xff] }
 0x277   :  { %v4659_v22 = vpop.eup %4658  ;;  %4666 = vtanh.f32 %v2031_v29  ;;  %v6568_v1 = vmul.f32 %v2294_v4, %v6380_v6  ;;  %v6572_v30 = vadd.f32 %v6938_v55, %v6294_v45  ;;  %v1703_v15 = vmul.f32 %v1575_v34, %v6527_v25 }
 0x278   :  { %v4661_v17 = vpop.eup %4660  ;;  %3699 = vmatmul.mubr.bf16.gmra.mrb[24].mxu0 %v2588_v32  ;;  %v2397_v37 = vadd.f32 1.0, %v4659_v22  ;;  %v1710_v42 = vmul.f32 %v1582_v26, %v6531_v56  ;;  %4668 = vtanh.f32 %v2039_v16  ;;  %v6577_v27 = vmul.f32 %v1702_v12, %v6521_v58  ;;  %v6940_v26 = vld [vmem:[#allocation32_spill] sm:$0xff] }
 0x279   :  { %v4663_v39 = vpop.eup %4662  ;;  %v2405_v0 = vadd.f32 1.0, %v4661_v17  ;;  %v1711_v6 = vmul.f32 %v1583_v36, %v6540_v35  ;;  %v2542_v24 = vpack.c.bf16 %v6568_v1, %v6565_v33  ;;  %v1590_v19 = vmul.f32 0.044715, %v6562_v3  ;;  %v6945_v33 = vld [vmem:[#allocation21_spill] sm:$0xff] }
 0x27a   :  { %v4665_v23 = vpop.eup %4664  ;;  %v2396_v44 = vadd.f32 1.0, %v4663_v39  ;;  %v6585_v34 = vadd.f32 %v6939_v59, %v6280_v43  ;;  %v6589_v61 = vadd.f32 %v6940_v26, %v6294_v45  ;;  %v2525_v8 = vmul.f32 %v2397_v37, %v1501_v60 }
 0x27b   :  { %v2533_v12 = vmul.f32 %v2405_v0, %v1509_v63  ;;  %v2404_v29 = vadd.f32 1.0, %v4665_v23  ;;  %v1591_v36 = vmul.f32 0.044715, %v6572_v30  ;;  %v6593_v4 = vmul.f32 %v1703_v15, %v6527_v25 }
 0x27c   :  { %v6596_v32 = vmul.f32 %v1710_v42, %v6531_v56  ;;  %v1391_v16 = vmul.f32 0.5, %v6310_v9  ;;  %v1399_v10 = vmul.f32 0.5, %v6343_v13  ;;  %v2524_v55 = vmul.f32 %v2396_v44, %v1500_v18 }
 0x27d   :  { %v2597_v22 = vpack.c.bf16 %v2533_v12, %v2525_v8  ;;  %v2532_v17 = vmul.f32 %v2404_v29, %v1508_v53  ;;  %v6601_v39 = vmul.f32 %v1711_v6, %v6540_v35  ;;  %v1718_v60 = vmul.f32 %v1590_v19, %v6562_v3  ;;  %v6941_v53 = vld [vmem:[#allocation33_spill] sm:$0xff]  ;;  %v6942_v19 = vld [vmem:[#allocation34_spill] sm:$0xff] }
 0x27e   :  { %v1598_v63 = vmul.f32 0.044715, %v6585_v34  ;;  %v1919_v37 = vadd.f32 %v6457_v7, %v6375_v2  ;;  %v1927_v15 = vadd.f32 %v6482_v11, %v6411_v38  ;;  %v1719_v13 = vmul.f32 %v1591_v36, %v6572_v30 }
 0x27f   :  { %3708 = vmatprep.mubr.bf16.mxu0 %v2597_v22  ;;  %v2596_v9 = vpack.c.bf16 %v2532_v17, %v2524_v55  ;;  %v1599_v18 = vmul.f32 0.044715, %v6589_v61  ;;  %v6613_v42 = vadd.f32 %v6941_v53, %v6280_v43  ;;  %v1918_v23 = vadd.f32 %v6438_v50, %v6365_v5 }
 0x280   :  { %v2047_v0 = vmul.f32 0.7978846, %v1919_v37  ;;  %v2055_v6 = vmul.f32 0.7978846, %v1927_v15  ;;  %v1926_v7 = vadd.f32 %v6460_v48, %v6394_v54  ;;  %v6622_v59 = vadd.f32 %v6942_v19, %v6294_v45 }
 0x281   :  { %v4667_v44 = vpop.eup %4666  ;;  %3709 = vmatmul.mubr.bf16.gmra.mrb[28].mxu0 %v2596_v9  ;;  %v1606_v11 = vmul.f32 0.044715, %v6613_v42  ;;  %v6626_v26 = vadd.f32 %v6354_v49, %v6280_v43  ;;  %v6630_v8 = vadd.f32 %v6357_v57, %v6294_v45  ;;  %v2046_v48 = vmul.f32 0.7978846, %v1918_v23 }
 0x282   :  { %v4669_v50 = vpop.eup %4668  ;;  %v2287_v12 = vadd.f32 1.0, %v4667_v44  ;;  %4670 = vtanh.f32 %v2047_v0  ;;  %v2054_v29 = vmul.f32 0.7978846, %v1926_v7  ;;  %v6633_v22 = vmul.f32 %v1718_v60, %v6562_v3 }
 0x283   :  { %v2295_v36 = vadd.f32 1.0, %v4669_v50  ;;  %v1726_v55 = vmul.f32 %v1598_v63, %v6585_v34  ;;  %4672 = vtanh.f32 %v2055_v6  ;;  %v1727_v17 = vmul.f32 %v1599_v18, %v6589_v61 }
 0x284   :  { %v1407_v49 = vmul.f32 0.5, %v6375_v2  ;;  %v1734_v37 = vmul.f32 %v1606_v11, %v6613_v42  ;;  %4674 = vtanh.f32 %v2046_v48  ;;  %v2415_v57 = vmul.f32 %v2287_v12, %v1391_v16  ;;  %v6944_v12 = vld [vmem:[#allocation27_spill] sm:$0xff] }
 0x285   :  { %v2423_v15 = vmul.f32 %v2295_v36, %v1399_v10  ;;  %4676 = vtanh.f32 %v2054_v29  ;;  %v1607_v9 = vmul.f32 0.044715, %v6622_v59  ;;  %v6641_v53 = vmul.f32 %v1719_v13, %v6572_v30 }
 0x286   :  { %v1415_v60 = vmul.f32 0.5, %v6411_v38  ;;  %v1614_v63 = vmul.f32 0.044715, %v6626_v26  ;;  %v1615_v0 = vmul.f32 0.044715, %v6630_v8  ;;  %v6647_v2 = vmul.f32 %v1726_v55, %v6585_v34 }
 0x287   :  { %v2543_v18 = vpack.c.bf16 %v2423_v15, %v2415_v57  ;;  %v1935_v16 = vadd.f32 %v6500_v52, %v6435_v46  ;;  %v1943_v10 = vadd.f32 %v6535_v62, %v6473_v41  ;;  %v6654_v6 = vmul.f32 %v1727_v17, %v6589_v61  ;;  %v6946_v57 = vld [vmem:[#allocation23_spill] sm:$0xff] }
 0x288   :  { %v6657_v13 = vmul.f32 %v1734_v37, %v6613_v42  ;;  %v1406_v38 = vmul.f32 0.5, %v6365_v5  ;;  %v1414_v23 = vmul.f32 0.5, %v6394_v54  ;;  %v1735_v7 = vmul.f32 %v1607_v9, %v6622_v59  ;;  %v6943_v54 = vld [vmem:[#allocation24_spill] sm:$0xff] }
 0x289   :  { %3751 = vmatprep.mubr.bf16.mxu0 %v2543_v18  ;;  %v2063_v44 = vmul.f32 0.7978846, %v1935_v16  ;;  %v2071_v11 = vmul.f32 0.7978846, %v1943_v10  ;;  %v1934_v52 = vadd.f32 %v6496_v31, %v6418_v51  ;;  %v1742_v62 = vmul.f32 %v1614_v63, %v6626_v26 }
 0x28a   :  { %3752 = vmatmul.mubr.bf16.vlgmr.msra.gmra.mrb[0].mxu0 %v2542_v24  ;;  %v1743_v19 = vmul.f32 %v1615_v0, %v6630_v8  ;;  %v1942_v5 = vadd.f32 %v6511_v28, %v6454_v21  ;;  %v6673_v50 = vadd.f32 %v6943_v54, %v6280_v43  ;;  %v6677_v48 = vadd.f32 %v6944_v12, %v6280_v43 }
 0x28b   :  { %4678 = vtanh.f32 %v2063_v44  ;;  %v2062_v31 = vmul.f32 0.7978846, %v1934_v52  ;;  %v6681_v1 = vadd.f32 %v6945_v33, %v6294_v45  ;;  %v1423_v29 = vmul.f32 0.5, %v6435_v46 }
 0x28c   :  { %v4671_v24 = vpop.eup %4670  ;;  %v1431_v36 = vmul.f32 0.5, %v6473_v41  ;;  %4680 = vtanh.f32 %v2071_v11  ;;  %v2070_v28 = vmul.f32 0.7978846, %v1942_v5  ;;  %v6686_v37 = vmul.f32 %v1735_v7, %v6622_v59 }
 0x28d   :  { %v4673_v55 = vpop.eup %4672  ;;  %v2303_v17 = vadd.f32 1.0, %v4671_v24  ;;  %4682 = vtanh.f32 %v2062_v31  ;;  %v6690_v15 = vadd.f32 %v6946_v57, %v6294_v45  ;;  %v6693_v0 = vmul.f32 %v1742_v62, %v6626_v26  ;;  %v6947_v24 = vld [vmem:[#allocation26_spill] sm:$0xff] }
 0x28e   :  { %v4675_v9 = vpop.eup %4674  ;;  %v2311_v63 = vadd.f32 1.0, %v4673_v55  ;;  %v6696_v46 = vmul.f32 %v1743_v19, %v6630_v8  ;;  %4684 = vtanh.f32 %v2070_v28  ;;  %v1622_v16 = vmul.f32 0.044715, %v6677_v48 }
 0x28f   :  { %v4677_v41 = vpop.eup %4676  ;;  %v2302_v18 = vadd.f32 1.0, %v4675_v9  ;;  %v1422_v10 = vmul.f32 0.5, %v6418_v51  ;;  %v1623_v7 = vmul.f32 0.044715, %v6681_v1  ;;  %v2431_v44 = vmul.f32 %v2303_v17, %v1407_v49 }
 0x290   :  { %v2439_v11 = vmul.f32 %v2311_v63, %v1415_v60  ;;  %v2310_v52 = vadd.f32 1.0, %v4677_v41  ;;  %v1630_v5 = vmul.f32 0.044715, %v6673_v50  ;;  %v1430_v62 = vmul.f32 0.5, %v6454_v21 }
 0x291   :  { %v2430_v54 = vmul.f32 %v2302_v18, %v1406_v38  ;;  %v1631_v19 = vmul.f32 0.044715, %v6690_v15  ;;  %v1951_v12 = vadd.f32 %v6546_v47, %v6491_v20  ;;  %v1959_v51 = vadd.f32 %v6593_v4, %v6527_v25  ;;  %v6948_v18 = vld [vmem:[#allocation22_spill] sm:$0xff] }
 0x292   :  { %v2551_v31 = vpack.c.bf16 %v2439_v11, %v2431_v44  ;;  %v2438_v33 = vmul.f32 %v2310_v52, %v1414_v23  ;;  %v6710_v49 = vadd.f32 %v6947_v24, %v6280_v43  ;;  %v1750_v60 = vmul.f32 %v1622_v16, %v6677_v48 }
 0x293   :  { %v1751_v38 = vmul.f32 %v1623_v7, %v6681_v1  ;;  %v2079_v28 = vmul.f32 0.7978846, %v1951_v12  ;;  %v1950_v21 = vadd.f32 %v6543_v14, %v6477_v40  ;;  %v1758_v47 = vmul.f32 %v1630_v5, %v6673_v50 }
 0x294   :  { %3761 = vmatprep.mubr.bf16.mxu0 %v2551_v31  ;;  %v2550_v55 = vpack.c.bf16 %v2438_v33, %v2430_v54  ;;  %v2087_v23 = vmul.f32 0.7978846, %v1959_v51  ;;  %v1958_v4 = vadd.f32 %v6577_v27, %v6521_v58  ;;  %v1759_v43 = vmul.f32 %v1631_v19, %v6690_v15 }
 0x295   :  { %v4679_v17 = vpop.eup %4678  ;;  %v6721_v57 = vmul.f32 0.5, %v6491_v20  ;;  %4686 = vtanh.f32 %v2079_v28  ;;  %v2078_v9 = vmul.f32 0.7978846, %v1950_v21  ;;  %v6725_v16 = vadd.f32 %v6948_v18, %v6294_v45 }
 0x296   :  { %v4681_v63 = vpop.eup %4680  ;;  %3762 = vmatmul.mubr.bf16.gmra.mrb[4].mxu0 %v2550_v55  ;;  %v2319_v41 = vadd.f32 1.0, %v4679_v17  ;;  %4688 = vtanh.f32 %v2087_v23  ;;  %v2086_v14 = vmul.f32 0.7978846, %v1958_v4  ;;  %v6728_v27 = vmul.f32 %v1750_v60, %v6677_v48 }
 0x297   :  { %v4683_v7 = vpop.eup %4682  ;;  %v2327_v44 = vadd.f32 1.0, %v4681_v63  ;;  %v1879_v11 = vmul.f32 %v1751_v38, %v6681_v1  ;;  %4690 = vtanh.f32 %v2078_v9  ;;  %v6732_v5 = vmul.f32 %v1758_v47, %v6673_v50 }
 0x298   :  { %v4685_v20 = vpop.eup %4684  ;;  %v2318_v52 = vadd.f32 1.0, %v4683_v7  ;;  %v1447_v54 = vmul.f32 0.5, %v6527_v25  ;;  %4692 = vtanh.f32 %v2086_v14  ;;  %v2447_v19 = vmul.f32 %v2319_v41, %v1423_v29 }
 0x299   :  { %v2455_v12 = vmul.f32 %v2327_v44, %v1431_v36  ;;  %v2326_v45 = vadd.f32 1.0, %v4685_v20  ;;  %v1967_v31 = vadd.f32 %v6601_v39, %v6540_v35  ;;  %v6738_v33 = vmul.f32 %v1759_v43, %v6690_v15 }
 0x29a   :  { %v1438_v51 = vmul.f32 0.5, %v6477_v40  ;;  %v1639_v24 = vmul.f32 0.044715, %v6725_v16  ;;  %v1975_v60 = vadd.f32 %v6641_v53, %v6572_v30  ;;  %v2446_v28 = vmul.f32 %v2318_v52, %v1422_v10 }
 0x29b   :  { %v2559_v38 = vpack.c.bf16 %v2455_v12, %v2447_v19  ;;  %v2454_v25 = vmul.f32 %v2326_v45, %v1430_v62  ;;  %v2095_v21 = vmul.f32 0.7978846, %v1967_v31  ;;  %v1446_v29 = vmul.f32 0.5, %v6521_v58 }
 0x29c   :  { %v2103_v36 = vmul.f32 0.7978846, %v1975_v60  ;;  %v1966_v39 = vadd.f32 %v6596_v32, %v6531_v56  ;;  %v1974_v55 = vadd.f32 %v6633_v22, %v6562_v3  ;;  %v1638_v47 = vmul.f32 0.044715, %v6710_v49 }
 0x29d   :  { %3771 = vmatprep.mubr.bf16.mxu0 %v2559_v38  ;;  %v2558_v40 = vpack.c.bf16 %v2454_v25, %v2446_v28  ;;  %4694 = vtanh.f32 %v2095_v21  ;;  %v1983_v53 = vadd.f32 %v6654_v6, %v6589_v61  ;;  %v1991_v58 = vadd.f32 %v6686_v37, %v6622_v59 }
 0x29e   :  { %4696 = vtanh.f32 %v2103_v36  ;;  %v2094_v10 = vmul.f32 0.7978846, %v1966_v39  ;;  %v2102_v62 = vmul.f32 0.7978846, %v1974_v55  ;;  %v1767_v32 = vmul.f32 %v1639_v24, %v6725_v16 }
 0x29f   :  { %v4687_v23 = vpop.eup %4686  ;;  %3772 = vmatmul.mubr.bf16.gmra.mrb[8].mxu0 %v2558_v40  ;;  %v1455_v22 = vmul.f32 0.5, %v6540_v35  ;;  %v2111_v4 = vmul.f32 0.7978846, %v1983_v53  ;;  %v1982_v17 = vadd.f32 %v6647_v2, %v6585_v34  ;;  %v2119_v6 = vmul.f32 0.7978846, %v1991_v58 }
 0x2a0   :  { %v4689_v43 = vpop.eup %4688  ;;  %v2335_v9 = vadd.f32 1.0, %v4687_v23  ;;  %4698 = vtanh.f32 %v2094_v10  ;;  %v1990_v63 = vadd.f32 %v6657_v13, %v6613_v42  ;;  %v1766_v37 = vmul.f32 %v1638_v47, %v6710_v49 }
 0x2a1   :  { %v4691_v41 = vpop.eup %4690  ;;  %v2343_v14 = vadd.f32 1.0, %v4689_v43  ;;  %4700 = vtanh.f32 %v2102_v62  ;;  %v2110_v18 = vmul.f32 0.7978846, %v1982_v17  ;;  %v1463_v35 = vmul.f32 0.5, %v6572_v30 }
 0x2a2   :  { %v4693_v7 = vpop.eup %4692  ;;  %v2334_v44 = vadd.f32 1.0, %v4691_v41  ;;  %4702 = vtanh.f32 %v2111_v4  ;;  %v2118_v20 = vmul.f32 0.7978846, %v1990_v63  ;;  %v2463_v2 = vmul.f32 %v2335_v9, %v6721_v57 }
 0x2a3   :  { %v2471_v52 = vmul.f32 %v2343_v14, %v1447_v54  ;;  %v2342_v19 = vadd.f32 1.0, %v4693_v7  ;;  %4704 = vtanh.f32 %v2119_v6  ;;  %v1895_v12 = vmul.f32 %v1767_v32, %v6725_v16 }
 0x2a4   :  { %4706 = vtanh.f32 %v2110_v18  ;;  %v1999_v13 = vadd.f32 %v6696_v46, %v6630_v8  ;;  %v2007_v45 = vadd.f32 %v1879_v11, %v6681_v1  ;;  %v2462_v24 = vmul.f32 %v2334_v44, %v1438_v51 }
 0x2a5   :  { %v2567_v31 = vpack.c.bf16 %v2471_v52, %v2463_v2  ;;  %v2470_v60 = vmul.f32 %v2342_v19, %v1446_v29  ;;  %4708 = vtanh.f32 %v2118_v20  ;;  %v1894_v30 = vmul.f32 %v1766_v37, %v6710_v49 }
 0x2a6   :  { %v2127_v38 = vmul.f32 0.7978846, %v1999_v13  ;;  %v2135_v28 = vmul.f32 0.7978846, %v2007_v45  ;;  %v1998_v57 = vadd.f32 %v6693_v0, %v6626_v26  ;;  %v1454_v21 = vmul.f32 0.5, %v6531_v56 }
 0x2a7   :  { %v4695_v54 = vpop.eup %4694  ;;  %3781 = vmatprep.mubr.bf16.mxu0 %v2567_v31  ;;  %v2566_v25 = vpack.c.bf16 %v2470_v60, %v2462_v24  ;;  %v1462_v46 = vmul.f32 0.5, %v6562_v3  ;;  %v2006_v11 = vadd.f32 %v6728_v27, %v6677_v48  ;;  %v2015_v39 = vadd.f32 %v6738_v33, %v6690_v15 }
 0x2a8   :  { %v4697_v51 = vpop.eup %4696  ;;  %v2351_v29 = vadd.f32 1.0, %v4695_v54  ;;  %4710 = vtanh.f32 %v2127_v38  ;;  %v2126_v36 = vmul.f32 0.7978846, %v1998_v57  ;;  %v2023_v40 = vadd.f32 %v1895_v12, %v6725_v16 }
 0x2a9   :  { %3782 = vmatmul.mubr.bf16.gmra.mrb[12].mxu0 %v2566_v25  ;;  %v2359_v55 = vadd.f32 1.0, %v4697_v51  ;;  %4712 = vtanh.f32 %v2135_v28  ;;  %v2134_v0 = vmul.f32 0.7978846, %v2006_v11  ;;  %v1471_v3 = vmul.f32 0.5, %v6589_v61 }
 0x2aa   :  { %v4699_v47 = vpop.eup %4698  ;;  %v2479_v56 = vmul.f32 %v2351_v29, %v1455_v22  ;;  %4714 = vtanh.f32 %v2126_v36  ;;  %v2143_v53 = vmul.f32 0.7978846, %v2015_v39  ;;  %v2151_v58 = vmul.f32 0.7978846, %v2023_v40 }
 0x2ab   :  { %v4701_v27 = vpop.eup %4700  ;;  %v2487_v10 = vmul.f32 %v2359_v55, %v1463_v35  ;;  %v2350_v62 = vadd.f32 1.0, %v4699_v47  ;;  %4716 = vtanh.f32 %v2134_v0  ;;  %v1479_v33 = vmul.f32 0.5, %v6622_v59 }
 0x2ac   :  { %v4703_v23 = vpop.eup %4702  ;;  %v2358_v32 = vadd.f32 1.0, %v4701_v27  ;;  %4718 = vtanh.f32 %v2143_v53  ;;  %v2014_v4 = vadd.f32 %v6732_v5, %v6673_v50  ;;  %v2022_v41 = vadd.f32 %v1894_v30, %v6710_v49 }
 0x2ad   :  { %v4705_v17 = vpop.eup %4704  ;;  %v2575_v43 = vpack.c.bf16 %v2487_v10, %v2479_v56  ;;  %v2478_v22 = vmul.f32 %v2350_v62, %v1454_v21  ;;  %v2367_v9 = vadd.f32 1.0, %v4703_v23  ;;  %4720 = vtanh.f32 %v2151_v58  ;;  %v2728_v23 = vld [vmem:[%s6854_s4] sm:$0x3]  ;;  %s4856_s4 = smov [#allocation10]  }
 0x2ae   :  { %v4707_v61 = vpop.eup %4706  ;;  %v2486_v6 = vmul.f32 %v2358_v32, %v1462_v46  ;;  %v2375_v63 = vadd.f32 1.0, %v4705_v17  ;;  %v2142_v14 = vmul.f32 0.7978846, %v2014_v4  ;;  %v1470_v59 = vmul.f32 0.5, %v6585_v34  ;;  %v6949_v32 = vld [vmem:[#allocation15_spill] sm:$0xff]  ;;  %s3869_s21 = sshll.u32 %s4856_s4, 4  ;;  %s3870_s21 = int_to_ptr.vmem [resolvable:$true] %s3869_s21 }
 0x2af   :  { %v4709_v37 = vpop.eup %4708  ;;  %3791 = vmatprep.mubr.bf16.mxu0 %v2575_v43  ;;  %v2495_v18 = vmul.f32 %v2367_v9, %v1471_v3  ;;  %v1478_v7 = vmul.f32 0.5, %v6613_v42  ;;  %v2366_v44 = vadd.f32 1.0, %v4707_v61  ;;  %v2150_v2 = vmul.f32 0.7978846, %v2022_v41  ;;  %s4816_s22 = scalar_lea.vmem %s3870_s21, 4096  ;;  %p4821_p5 = scmp.lt.s32.totalorder %s3870_s21, %s3870_s21 }
 0x2b0   :  { %v2574_v5 = vpack.c.bf16 %v2486_v6, %v2478_v22  ;;  %v2503_v35 = vmul.f32 %v2375_v63, %v1479_v33  ;;  %v2374_v20 = vadd.f32 1.0, %v4709_v37  ;;  %4722 = vtanh.f32 %v2142_v14  ;;  %p4817_p4 = scmp.ne.s32.totalorder %s3870_s21, %s4816_s22  ;;  %p4822_p6 = scmp.lt.s32.totalorder %s4816_s22, %s4816_s22 }
 0x2b1   :  { %v2494_v12 = vmul.f32 %v2366_v44, %v1470_v59  ;;  %4724 = vtanh.f32 %v2150_v2  ;;  %v1487_v34 = vmul.f32 0.5, %v6630_v8  ;;  %v1495_v42 = vmul.f32 0.5, %v6681_v1 }
 0x2b2   :  { %v4711_v52 = vpop.eup %4710  ;;  %3792 = vmatmul.mubr.bf16.gmra.mrb[16].mxu0 %v2574_v5  ;;  %v2583_v19 = vpack.c.bf16 %v2503_v35, %v2495_v18  ;;  %v2502_v13 = vmul.f32 %v2374_v20, %v1478_v7  ;;  %v1486_v28 = vmul.f32 0.5, %v6626_v26  ;;  %v1494_v46 = vmul.f32 0.5, %v6677_v48  ;;  %p4823_p7 = por %p4822_p6, %p4821_p5 }
 0x2b3   :  { %v4713_v45 = vpop.eup %4712  ;;  %v2383_v31 = vadd.f32 1.0, %v4711_v52  ;;  %v1503_v29 = vmul.f32 0.5, %v6690_v15  ;;  %v1511_v36 = vmul.f32 0.5, %v6725_v16  ;;  %v1502_v27 = vmul.f32 0.5, %v6673_v50 }
 0x2b4   :  { %v4715_v24 = vpop.eup %4714  ;;  %3801 = vmatprep.mubr.bf16.mxu0 %v2583_v19  ;;  %v2582_v60 = vpack.c.bf16 %v2502_v13, %v2494_v12  ;;  %v2391_v30 = vadd.f32 1.0, %v4713_v45  ;;  %v1510_v15 = vmul.f32 0.5, %v6710_v49  ;;  %v6950_v33 = vsub.s32 0, %v6949_v32  ;;  %p4824_p8 = pnand %p4823_p7, %p4817_p4 }
 0x2b5   :  { %v4717_v38 = vpop.eup %4716  ;;  %v2382_v57 = vadd.f32 1.0, %v4715_v24  ;;  %v2511_v25 = vmul.f32 %v2383_v31, %v1487_v34  ;;  %v6951_v17 = vsub.s32 1, %v6949_v32 }
 0x2b6   :  { %v4719_v54 = vpop.eup %4718  ;;  %v2519_v21 = vmul.f32 %v2391_v30, %v1495_v42  ;;  %v2390_v11 = vadd.f32 1.0, %v4717_v38  ;;  %v6797_v4 = vrot.slane %v2728_v23, %v6950_v33 }
 0x2b7   :  { %v4721_v51 = vpop.eup %4720  ;;  %v2399_v39 = vadd.f32 1.0, %v4719_v54  ;;  %v2510_v55 = vmul.f32 %v2382_v57, %v1486_v28  ;;  %v6801_v50 = vrot.slane %v2728_v23, %v6951_v17 }
 0x2b8   :  { %v2591_v8 = vpack.c.bf16 %v2519_v21, %v2511_v25  ;;  %v2518_v1 = vmul.f32 %v2390_v11, %v1494_v46  ;;  %v2407_v0 = vadd.f32 1.0, %v4721_v51 }
 0x2b9   :  { %v2527_v26 = vmul.f32 %v2399_v39, %v1503_v29 }
 0x2ba   :  { %3802 = vmatmul.mubr.bf16.gmra.mrb[20].mxu0 %v2582_v60  ;;  %v2590_v40 = vpack.c.bf16 %v2518_v1, %v2510_v55  ;;  %v2535_v47 = vmul.f32 %v2407_v0, %v1511_v36  ;;  %v4723_v56 = vpop.eup %4722 }
 0x2bb   :  { %3811 = vmatprep.mubr.bf16.mxu0 %v2591_v8  ;;  %v4725_v3 = vpop.eup %4724  ;;  %v2398_v48 = vadd.f32 1.0, %v4723_v56 }
 0x2bc   :  { %v2599_v53 = vpack.c.bf16 %v2535_v47, %v2527_v26  ;;  %v2406_v10 = vadd.f32 1.0, %v4725_v3 }
 0x2bd   :  { %v2526_v16 = vmul.f32 %v2398_v48, %v1502_v27 }
 0x2be   :  { %v2534_v62 = vmul.f32 %v2406_v10, %v1510_v15 }
 0x2c0   :  { %v2598_v58 = vpack.c.bf16 %v2534_v62, %v2526_v16 }
 0x2c2   :  { %3812 = vmatmul.mubr.bf16.gmra.mrb[24].mxu0 %v2590_v40 }
 0x2c3   :  { %3821 = vmatprep.mubr.bf16.mxu0 %v2599_v53 }
 0x2ca   :  { %3822 = vmatmul.mubr.bf16.gmra.mrb[28].mxu0 %v2598_v58 }
 0x35d   :  { %v3753_v49 = vpop.f32.mrb[0].mxu0 }
 0x35e   :  { %v4139_v43 = vadd.f32 %v3753_v49, %v6797_v4  ;;  %v3755_v22 = vpop.f32.mrb[1].mxu0 }
 0x35f   :  { %v4140_v9 = vadd.f32 %v3755_v22, %v6801_v50  ;;  %v3757_v61 = vpop.f32.mrb[2].mxu0 }
 0x360   :  { %3832 = vst [vmem:[#allocation10] sm:$0xff] %v4139_v43  ;;  %v4141_v6 = vadd.f32 %v3757_v61, %v6797_v4  ;;  %v3759_v63 = vpop.f32.mrb[3].mxu0 }
 0x361   :  { %3833 = vst [vmem:[#allocation10 + $0x8] sm:$0xff] %v4140_v9  ;;  %v4142_v41 = vadd.f32 %v3759_v63, %v6801_v50 }
 0x362   :  { %3834 = vst [vmem:[#allocation10 + $0x10] sm:$0xff] %v4141_v6 }
 0x363   :  { %3835 = vst [vmem:[#allocation10 + $0x18] sm:$0xff] %v4142_v41 }
 0x369   :  { %v3763_v14 = vpop.f32.mrb[4].mxu0 }
 0x36a   :  { %v4143_v37 = vadd.f32 %v3763_v14, %v6797_v4  ;;  %v3765_v18 = vpop.f32.mrb[5].mxu0 }
 0x36b   :  { %v4144_v59 = vadd.f32 %v3765_v18, %v6801_v50  ;;  %v3767_v7 = vpop.f32.mrb[6].mxu0 }
 0x36c   :  { %3836 = vst [vmem:[#allocation10 + $0x20] sm:$0xff] %v4143_v37  ;;  %v4145_v44 = vadd.f32 %v3767_v7, %v6797_v4  ;;  %v3769_v5 = vpop.f32.mrb[7].mxu0 }
 0x36d   :  { %3837 = vst [vmem:[#allocation10 + $0x28] sm:$0xff] %v4144_v59  ;;  %v4146_v35 = vadd.f32 %v3769_v5, %v6801_v50 }
 0x36e   :  { %3838 = vst [vmem:[#allocation10 + $0x30] sm:$0xff] %v4145_v44 }
 0x36f   :  { %3839 = vst [vmem:[#allocation10 + $0x38] sm:$0xff] %v4146_v35 }
 0x372   :  { %v3773_v20 = vpop.f32.mrb[8].mxu0 }
 0x373   :  { %v4147_v2 = vadd.f32 %v3773_v20, %v6797_v4  ;;  %v3775_v52 = vpop.f32.mrb[9].mxu0 }
 0x374   :  { %v4148_v19 = vadd.f32 %v3775_v52, %v6801_v50  ;;  %v3777_v12 = vpop.f32.mrb[10].mxu0 }
 0x375   :  { %3840 = vst [vmem:[#allocation10 + $0x40] sm:$0xff] %v4147_v2  ;;  %v4149_v13 = vadd.f32 %v3777_v12, %v6797_v4  ;;  %v3779_v45 = vpop.f32.mrb[11].mxu0 }
 0x376   :  { %3841 = vst [vmem:[#allocation10 + $0x48] sm:$0xff] %v4148_v19  ;;  %v4150_v31 = vadd.f32 %v3779_v45, %v6801_v50 }
 0x377   :  { %3842 = vst [vmem:[#allocation10 + $0x50] sm:$0xff] %v4149_v13 }
 0x378   :  { %3843 = vst [vmem:[#allocation10 + $0x58] sm:$0xff] %v4150_v31 }
 0x37c   :  { %v3783_v24 = vpop.f32.mrb[12].mxu0 }
 0x37d   :  { %v4151_v60 = vadd.f32 %v3783_v24, %v6797_v4  ;;  %v3785_v34 = vpop.f32.mrb[13].mxu0 }
 0x37e   :  { %v4152_v42 = vadd.f32 %v3785_v34, %v6801_v50  ;;  %v3787_v30 = vpop.f32.mrb[14].mxu0 }
 0x37f   :  { %3844 = vst [vmem:[#allocation10 + $0x60] sm:$0xff] %v4151_v60  ;;  %v4153_v38 = vadd.f32 %v3787_v30, %v6797_v4  ;;  %v3789_v28 = vpop.f32.mrb[15].mxu0 }
 0x380   :  { %3845 = vst [vmem:[#allocation10 + $0x68] sm:$0xff] %v4152_v42  ;;  %v4154_v57 = vadd.f32 %v3789_v28, %v6801_v50 }
 0x381   :  { %3846 = vst [vmem:[#allocation10 + $0x70] sm:$0xff] %v4153_v38 }
 0x382   :  { %3847 = vst [vmem:[#allocation10 + $0x78] sm:$0xff] %v4154_v57 }
 0x385   :  { %v3793_v54 = vpop.f32.mrb[16].mxu0 }
 0x386   :  { %v4155_v25 = vadd.f32 %v3793_v54, %v6797_v4  ;;  %v3795_v21 = vpop.f32.mrb[17].mxu0 }
 0x387   :  { %v4156_v46 = vadd.f32 %v3795_v21, %v6801_v50  ;;  %v3797_v11 = vpop.f32.mrb[18].mxu0 }
 0x388   :  { %3848 = vst [vmem:[#allocation10 + $0x80] sm:$0xff] %v4155_v25  ;;  %v4157_v51 = vadd.f32 %v3797_v11, %v6797_v4  ;;  %v3799_v29 = vpop.f32.mrb[19].mxu0 }
 0x389   :  { %3849 = vst [vmem:[#allocation10 + $0x88] sm:$0xff] %v4156_v46  ;;  %v4158_v36 = vadd.f32 %v3799_v29, %v6801_v50 }
 0x38a   :  { %3850 = vst [vmem:[#allocation10 + $0x90] sm:$0xff] %v4157_v51 }
 0x38b   :  { %3851 = vst [vmem:[#allocation10 + $0x98] sm:$0xff] %v4158_v36 }
 0x38d   :  { %v3803_v39 = vpop.f32.mrb[20].mxu0 }
 0x38e   :  { %v4159_v8 = vadd.f32 %v3803_v39, %v6797_v4  ;;  %v3805_v55 = vpop.f32.mrb[21].mxu0 }
 0x38f   :  { %v4160_v1 = vadd.f32 %v3805_v55, %v6801_v50  ;;  %v3807_v0 = vpop.f32.mrb[22].mxu0 }
 0x390   :  { %3852 = vst [vmem:[#allocation10 + $0xa0] sm:$0xff] %v4159_v8  ;;  %v4161_v40 = vadd.f32 %v3807_v0, %v6797_v4  ;;  %v3809_v26 = vpop.f32.mrb[23].mxu0 }
 0x391   :  { %3853 = vst [vmem:[#allocation10 + $0xa8] sm:$0xff] %v4160_v1  ;;  %v4162_v47 = vadd.f32 %v3809_v26, %v6801_v50 }
 0x392   :  { %3854 = vst [vmem:[#allocation10 + $0xb0] sm:$0xff] %v4161_v40 }
 0x393   :  { %3855 = vst [vmem:[#allocation10 + $0xb8] sm:$0xff] %v4162_v47 }
 0x395   :  { %v3813_v56 = vpop.f32.mrb[24].mxu0 }
 0x396   :  { %v4163_v3 = vadd.f32 %v3813_v56, %v6797_v4  ;;  %v3815_v53 = vpop.f32.mrb[25].mxu0 }
 0x397   :  { %v4164_v48 = vadd.f32 %v3815_v53, %v6801_v50  ;;  %v3817_v27 = vpop.f32.mrb[26].mxu0 }
 0x398   :  { %3856 = vst [vmem:[#allocation10 + $0xc0] sm:$0xff] %v4163_v3  ;;  %v4165_v15 = vadd.f32 %v3817_v27, %v6797_v4  ;;  %v3819_v10 = vpop.f32.mrb[27].mxu0 }
 0x399   :  { %3857 = vst [vmem:[#allocation10 + $0xc8] sm:$0xff] %v4164_v48  ;;  %v4166_v16 = vadd.f32 %v3819_v10, %v6801_v50 }
 0x39a   :  { %3858 = vst [vmem:[#allocation10 + $0xd0] sm:$0xff] %v4165_v15 }
 0x39b   :  { %3859 = vst [vmem:[#allocation10 + $0xd8] sm:$0xff] %v4166_v16 }
 0x39d   :  { %v3823_v62 = vpop.f32.mrb[28].mxu0 }
 0x39e   :  { %v4167_v58 = vadd.f32 %v3823_v62, %v6797_v4  ;;  %v3825_v23 = vpop.f32.mrb[29].mxu0 }
 0x39f   :  { %v4168_v32 = vadd.f32 %v3825_v23, %v6801_v50  ;;  %v3827_v33 = vpop.f32.mrb[30].mxu0 }
 0x3a0   :  { %3860 = vst [vmem:[#allocation10 + $0xe0] sm:$0xff] %v4167_v58  ;;  %v4169_v17 = vadd.f32 %v3827_v33, %v6797_v4  ;;  %v3829_v49 = vpop.f32.mrb[31].mxu0 }
 0x3a1   :  { %3861 = vst [vmem:[#allocation10 + $0xe8] sm:$0xff] %v4168_v32  ;;  %v4170_v43 = vadd.f32 %v3829_v49, %v6801_v50 }
 0x3a2   :  { %3862 = vst [vmem:[#allocation10 + $0xf0] sm:$0xff] %v4169_v17 }
 0x3a3   :  { %3863 = vst [vmem:[#allocation10 + $0xf8] sm:$0xff] %v4170_v43 }
 0x3a4   :  { %4827 = shalt.err (!%p4824_p8)
}
 0x3a5   :  { %s4828_s25 = scalar_lea.hbm %s6855_s5, 4096 }
 0x3a6   :  { %p4829_p9 = scmp.ne.s32.totalorder %s6855_s5, %s4828_s25  ;;  %p4832_p10 = scmp.lt.u32.totalorder %s4828_s25, %s6855_s5 }
 0x3a8   :  { %p4834_p11 = pnand %p4832_p10, %p4829_p9 }
 0x3aa   :  { %4837 = shalt.err (!%p4834_p11)
}
 0x3ab   :  { %3875 = dma.vmem_to_hbm [thread:$0]  %s3870_s21, 4096, %s6855_s5, [#allocation4], %s4850_s1, %s4850_s1, %s4851_s17  }
 0x3ac   :  { %4844 = dma.done.wait [#allocation4], 4096  }
 0x3ad   :  { %4845 = vsyncadd [#allocation4], 4294963200 }
 0x3ae   :  { %3879 = vsyncpa [#allocation3], 1 }
 0x3af   :  { %3880 = vsyncpa [#allocation6], 1 }
 0x3b0   :  { %3881 = vsyncpa [#allocation9], 1 }
 0x3b1   :  { %3882 = vsyncpa [#allocation4], 1 }

// kernel: tpu_custom_call.1
= control target key start
LH: loop header
LB: loop body
LE: loop exit
PB: predicated region body
PF: predicated region fallthrough
CT: control target
= control target key end

     0   :  { %10 = vsyncpa [#allocation3], 0  ;;  %s6850_s0 = inlined_call_operand.hbm [shape: f32[128,256], index: 0, kind: input, shape index: {}]   ;;  %s6851_s1 = inlined_call_operand.hbm [shape: bf16[256,1024], index: 1, kind: input, shape index: {}]   ;;  %s6852_s2 = inlined_call_operand.hbm [shape: f32[1,1024], index: 2, kind: input, shape index: {}]   ;;  %s6853_s3 = inlined_call_operand.hbm [shape: bf16[1024,256], index: 3, kind: input, shape index: {}]   ;;  %s6854_s4 = inlined_call_operand.vmem [shape: f32[1,256], index: 4, kind: input, shape index: {}]   ;;  %s6855_s5 = inlined_call_operand.hbm [shape: f32[128,256], index: 5, kind: output, shape index: {}]  }
   0x1   :  { %11 = vsyncpa [#allocation6], 0 }
   0x2   :  { %12 = vsyncpa [#allocation9], 0 }
   0x3   :  { %13 = vsyncpa [#allocation4], 0  ;;  %s4846_s18 = smov [#allocation5]   ;;  %s4728_s22 = scalar_lea.hbm %s6851_s1, 16384 }
   0x4   :  { %s31_s19 = sshll.u32 %s4846_s18, 4  ;;  %p4729_p0 = scmp.ne.s32.totalorder %s6851_s1, %s4728_s22  ;;  %s32_s19 = int_to_ptr.vmem [resolvable:$true] %s31_s19 }
   0x5   :  { %p4732_p1 = scmp.lt.u32.totalorder %s4728_s22, %s6851_s1 }
   0x7   :  { %p4734_p2 = pnand %p4732_p1, %p4729_p0 }
   0x9   :  { %4737 = shalt.err (!%p4734_p2)
}
   0xa   :  { %s4738_s27 = scalar_lea.vmem %s32_s19, 16384  ;;  %p4743_p4 = scmp.lt.s32.totalorder %s32_s19, %s32_s19 }
   0xb   :  { %p4739_p3 = scmp.ne.s32.totalorder %s32_s19, %s4738_s27  ;;  %p4744_p5 = scmp.lt.s32.totalorder %s4738_s27, %s4738_s27 }
   0xd   :  { %p4745_p6 = por %p4744_p5, %p4743_p4 }
   0xf   :  { %p4746_p7 = pnand %p4745_p6, %p4739_p3 }
  0x11   :  { %4749 = shalt.err (!%p4746_p7)
}
  0x12   :  { %s4847_s28 = smov 512   ;;  %s4848_s29 = smov 32  }
  0x13   :  { %37 = dma.hbm_to_vmem [thread:$0]  %s6851_s1, 16384, %s32_s19, [#allocation6], %s4847_s28, %s4847_s28, %s4848_s29  }
  0x14   :  { %s4849_s7 = smov [#allocation2]   ;;  %s4750_s11 = scalar_lea.hbm %s6850_s0, 4096 }
  0x15   :  { %s19_s8 = sshll.u32 %s4849_s7, 4  ;;  %p4751_p8 = scmp.ne.s32.totalorder %s6850_s0, %s4750_s11  ;;  %s20_s8 = int_to_ptr.vmem [resolvable:$true] %s19_s8 }
  0x16   :  { %p4754_p9 = scmp.lt.u32.totalorder %s4750_s11, %s6850_s0 }
  0x18   :  { %p4756_p10 = pnand %p4754_p9, %p4751_p8 }
  0x1a   :  { %4759 = shalt.err (!%p4756_p10)
}
  0x1b   :  { %s4760_s16 = scalar_lea.vmem %s20_s8, 4096  ;;  %p4765_p12 = scmp.lt.s32.totalorder %s20_s8, %s20_s8 }
  0x1c   :  { %p4761_p11 = scmp.ne.s32.totalorder %s20_s8, %s4760_s16  ;;  %p4766_p13 = scmp.lt.s32.totalorder %s4760_s16, %s4760_s16 }
  0x1e   :  { %p4767_p0 = por %p4766_p13, %p4765_p12 }
  0x20   :  { %p4768_p1 = pnand %p4767_p0, %p4761_p11 }
  0x22   :  { %4771 = shalt.err (!%p4768_p1)
}
  0x23   :  { %s4850_s1 = smov 256   ;;  %s4851_s17 = smov 16  }
  0x24   :  { %25 = dma.hbm_to_vmem [thread:$0]  %s6850_s0, 4096, %s20_s8, [#allocation3], %s4850_s1, %s4850_s1, %s4851_s17  }
  0x25   :  { %s4852_s20 = smov [#allocation7]   ;;  %s4853_s22 = smov [#allocation8]  }
  0x26   :  { %s44_s21 = sshll.u32 %s4852_s20, 4  ;;  %s53_s23 = sshll.u32 %s4853_s22, 4  ;;  %s45_s21 = int_to_ptr.vmem [resolvable:$true] %s44_s21  ;;  %s4914_s23 = int_to_ptr.vmem [resolvable:$true] %s53_s23 }
  0x27   :  { %s4772_s26 = scalar_lea.hbm %s6852_s2, 128 }
  0x28   :  { %p4773_p2 = scmp.ne.s32.totalorder %s6852_s2, %s4772_s26  ;;  %p4776_p3 = scmp.lt.u32.totalorder %s4772_s26, %s6852_s2 }
  0x2a   :  { %p4778_p4 = pnand %p4776_p3, %p4773_p2 }
  0x2c   :  { %4781 = shalt.err (!%p4778_p4)
}
  0x2d   :  { %s4782_s0 = scalar_lea.vmem %s45_s21, 128  ;;  %p4787_p6 = scmp.lt.s32.totalorder %s45_s21, %s45_s21 }
  0x2e   :  { %p4783_p5 = scmp.ne.s32.totalorder %s45_s21, %s4782_s0  ;;  %p4788_p7 = scmp.lt.s32.totalorder %s4782_s0, %s4782_s0 }
  0x30   :  { %p4789_p8 = por %p4788_p7, %p4787_p6 }
  0x32   :  { %p4790_p9 = pnand %p4789_p8, %p4783_p5 }
  0x34   :  { %4793 = shalt.err (!%p4790_p9)
}
  0x35   :  { %47 = dma.hbm_to_vmem [thread:$0]  %s6852_s2, 128, %s45_s21, [#allocation6]  }
  0x36   :  { %s4794_s10 = scalar_lea.hbm %s6853_s3, 16384 }
  0x37   :  { %p4795_p10 = scmp.ne.s32.totalorder %s6853_s3, %s4794_s10  ;;  %p4798_p11 = scmp.lt.u32.totalorder %s4794_s10, %s6853_s3 }
  0x39   :  { %p4800_p12 = pnand %p4798_p11, %p4795_p10 }
  0x3b   :  { %4803 = shalt.err (!%p4800_p12)
}
  0x3c   :  { %s4804_s15 = scalar_lea.vmem %s4914_s23, 16384  ;;  %p4809_p0 = scmp.lt.s32.totalorder %s4914_s23, %s4914_s23 }
  0x3d   :  { %p4805_p13 = scmp.ne.s32.totalorder %s4914_s23, %s4804_s15  ;;  %p4810_p1 = scmp.lt.s32.totalorder %s4804_s15, %s4804_s15 }
  0x3f   :  { %p4811_p2 = por %p4810_p1, %p4809_p0 }
  0x41   :  { %p4812_p3 = pnand %p4811_p2, %p4805_p13 }
  0x43   :  { %4815 = shalt.err (!%p4812_p3)
}
  0x44   :  { %s4854_s2 = smov 128   ;;  %s4855_s16 = smov 8  }
  0x45   :  { %59 = dma.hbm_to_vmem [thread:$0]  %s6853_s3, 16384, %s4914_s23, [#allocation9], %s4854_s2, %s4854_s2, %s4855_s16  }
  0x46   :  { %4838 = dma.done.wait [#allocation3], 4096  }
  0x47   :  { %4839 = vsyncadd [#allocation3], 4294963200 }
  0x48   :  { %4840 = dma.done.wait [#allocation6], 16512  }
  0x49   :  { %4841 = vsyncadd [#allocation6], 4294950784 }
  0x4a   :  { %4842 = dma.done.wait [#allocation9], 16384  }
  0x4b   :  { %4843 = vsyncadd [#allocation9], 4294950912  ;;  %v122_v0 = vld [vmem:[#allocation5] sm:$0xff]  ;;  %v75_v17 = vld [vmem:[#allocation2 + $0x8] sm:$0xff] }
  0x4c   :  { %v126_v1 = vld [vmem:[#allocation5 + $0x20] sm:$0xff]  ;;  %v77_v18 = vld [vmem:[#allocation2 + $0x18] sm:$0xff] }
  0x4d   :  { %v130_v2 = vld [vmem:[#allocation5 + $0x40] sm:$0xff]  ;;  %v3884_v3 = vcombine.high %v122_v0, %v126_v1  ;;  %v3883_v4 = vcombine.low %v122_v0, %v126_v1  ;;  %v4945_v20 = vpack.c.bf16 %v77_v18, %v75_v17  ;;  %v123_v1 = vld [vmem:[#allocation5 + $0x8] sm:$0xff] }
  0x4e   :  { %v134_v5 = vld [vmem:[#allocation5 + $0x60] sm:$0xff] }
  0x4f   :  { %v3892_v6 = vcombine.high %v130_v2, %v134_v5  ;;  %v138_v7 = vld [vmem:[#allocation5 + $0x80] sm:$0xff]  ;;  %932 = vmatprep.subr.bf16.mxu1 %v3884_v3  ;;  %v3891_v9 = vcombine.low %v130_v2, %v134_v5  ;;  %964 = vmatprep.mubr.bf16.mxu1 %v4945_v20  ;;  %v127_v2 = vld [vmem:[#allocation5 + $0x28] sm:$0xff]  ;;  %v76_v5 = vld [vmem:[#allocation2 + $0x10] sm:$0xff] }
  0x50   :  { %v142_v8 = vld [vmem:[#allocation5 + $0xa0] sm:$0xff]  ;;  %933 = vmatpush1.bf16.msra.mxu1 %v3883_v4 }
  0x51   :  { %934 = vmatprep.subr.bf16.mxu1 %v3892_v6  ;;  %v3900_v10 = vcombine.high %v138_v7, %v142_v8  ;;  %v146_v11 = vld [vmem:[#allocation5 + $0xc0] sm:$0xff]  ;;  %v3899_v13 = vcombine.low %v138_v7, %v142_v8  ;;  %v131_v7 = vld [vmem:[#allocation5 + $0x48] sm:$0xff] }
  0x52   :  { %v150_v12 = vld [vmem:[#allocation5 + $0xe0] sm:$0xff]  ;;  %v135_v8 = vld [vmem:[#allocation5 + $0x68] sm:$0xff] }
  0x53   :  { %v3908_v14 = vcombine.high %v146_v11, %v150_v12  ;;  %v154_v15 = vld [vmem:[#allocation5 + $0x100] sm:$0xff]  ;;  %v3907_v19 = vcombine.low %v146_v11, %v150_v12  ;;  %v3886_v11 = vcombine.high %v123_v1, %v127_v2  ;;  %v3894_v17 = vcombine.high %v131_v7, %v135_v8 }
  0x54   :  { %935 = vmatpush1.bf16.msra.mxu1 %v3891_v9  ;;  %v158_v16 = vld [vmem:[#allocation5 + $0x120] sm:$0xff]  ;;  %v79_v9 = vld [vmem:[#allocation2 + $0x28] sm:$0xff] }
  0x55   :  { %936 = vmatprep.subr.bf16.mxu1 %v3900_v10  ;;  %v3916_v21 = vcombine.high %v154_v15, %v158_v16  ;;  %v162_v22 = vld [vmem:[#allocation5 + $0x140] sm:$0xff]  ;;  %v3915_v24 = vcombine.low %v154_v15, %v158_v16  ;;  %v81_v10 = vld [vmem:[#allocation2 + $0x38] sm:$0xff]  ;;  %v139_v15 = vld [vmem:[#allocation5 + $0x88] sm:$0xff] }
  0x56   :  { %v166_v23 = vld [vmem:[#allocation5 + $0x160] sm:$0xff]  ;;  %v143_v16 = vld [vmem:[#allocation5 + $0xa8] sm:$0xff] }
  0x57   :  { %v3924_v25 = vcombine.high %v162_v22, %v166_v23  ;;  %v170_v26 = vld [vmem:[#allocation5 + $0x180] sm:$0xff]  ;;  %v3923_v28 = vcombine.low %v162_v22, %v166_v23  ;;  %v147_v22 = vld [vmem:[#allocation5 + $0xc8] sm:$0xff] }
  0x58   :  { %937 = vmatpush1.bf16.msra.mxu1 %v3899_v13  ;;  %v174_v27 = vld [vmem:[#allocation5 + $0x1a0] sm:$0xff]  ;;  %v3885_v13 = vcombine.low %v123_v1, %v127_v2  ;;  %v151_v23 = vld [vmem:[#allocation5 + $0xe8] sm:$0xff]  ;;  %v97_v2 = vld [vmem:[#allocation2 + $0xb8] sm:$0xff] }
  0x59   :  { %938 = vmatprep.subr.bf16.mxu1 %v3908_v14  ;;  %v3932_v29 = vcombine.high %v170_v26, %v174_v27  ;;  %v178_v30 = vld [vmem:[#allocation5 + $0x1c0] sm:$0xff]  ;;  %v3931_v32 = vcombine.low %v170_v26, %v174_v27  ;;  %v4950_v14 = vpack.c.bf16 %v81_v10, %v79_v9  ;;  %v3902_v26 = vcombine.high %v139_v15, %v143_v16  ;;  %v95_v1 = vld [vmem:[#allocation2 + $0xa8] sm:$0xff] }
  0x5a   :  { %v182_v31 = vld [vmem:[#allocation5 + $0x1e0] sm:$0xff]  ;;  %v203_v9 = vld [vmem:[#allocation5 + $0x288] sm:$0xff] }
  0x5b   :  { %v3940_v33 = vcombine.high %v178_v30, %v182_v31  ;;  %v186_v34 = vld [vmem:[#allocation5 + $0x200] sm:$0xff]  ;;  %v3939_v36 = vcombine.low %v178_v30, %v182_v31  ;;  %v155_v30 = vld [vmem:[#allocation5 + $0x108] sm:$0xff] }
  0x5c   :  { %939 = vmatpush1.bf16.msra.mxu1 %v3907_v19  ;;  %v190_v35 = vld [vmem:[#allocation5 + $0x220] sm:$0xff]  ;;  %v80_v19 = vld [vmem:[#allocation2 + $0x30] sm:$0xff]  ;;  %v159_v31 = vld [vmem:[#allocation5 + $0x128] sm:$0xff] }
  0x5d   :  { %940 = vmatprep.subr.bf16.mxu1 %v3916_v21  ;;  %v3948_v37 = vcombine.high %v186_v34, %v190_v35  ;;  %v194_v38 = vld [vmem:[#allocation5 + $0x240] sm:$0xff]  ;;  %v3947_v40 = vcombine.low %v186_v34, %v190_v35  ;;  %v3893_v21 = vcombine.low %v131_v7, %v135_v8  ;;  %v84_v34 = vld [vmem:[#allocation2 + $0x50] sm:$0xff]  ;;  %v3909_v35 = vcombine.low %v147_v22, %v151_v23  ;;  %v207_v10 = vld [vmem:[#allocation5 + $0x2a8] sm:$0xff] }
  0x5e   :  { %v198_v39 = vld [vmem:[#allocation5 + $0x260] sm:$0xff]  ;;  %v4974_v7 = vpack.c.bf16 %v97_v2, %v95_v1  ;;  %v132_v1 = vld [vmem:[#allocation5 + $0x50] sm:$0xff] }
  0x5f   :  { %v3956_v41 = vcombine.high %v194_v38, %v198_v39  ;;  %v202_v42 = vld [vmem:[#allocation5 + $0x280] sm:$0xff]  ;;  %v3955_v44 = vcombine.low %v194_v38, %v198_v39  ;;  %v87_v38 = vld [vmem:[#allocation2 + $0x68] sm:$0xff]  ;;  %v89_v39 = vld [vmem:[#allocation2 + $0x78] sm:$0xff] }
  0x60   :  { %941 = vmatpush1.bf16.msra.mxu1 %v3915_v24  ;;  %v206_v43 = vld [vmem:[#allocation5 + $0x2a0] sm:$0xff]  ;;  %v83_v24 = vld [vmem:[#allocation2 + $0x48] sm:$0xff]  ;;  %v136_v2 = vld [vmem:[#allocation5 + $0x70] sm:$0xff] }
  0x61   :  { %942 = vmatprep.subr.bf16.mxu1 %v3924_v25  ;;  %v3964_v45 = vcombine.high %v202_v42, %v206_v43  ;;  %v210_v46 = vld [vmem:[#allocation5 + $0x2c0] sm:$0xff]  ;;  %v3963_v48 = vcombine.low %v202_v42, %v206_v43  ;;  %v85_v25 = vld [vmem:[#allocation2 + $0x58] sm:$0xff]  ;;  %v3917_v42 = vcombine.low %v155_v30, %v159_v31  ;;  %v4962_v43 = vpack.c.bf16 %v89_v39, %v87_v38 }
  0x62   :  { %v214_v47 = vld [vmem:[#allocation5 + $0x2e0] sm:$0xff] }
  0x63   :  { %v218_v49 = vld [vmem:[#allocation5 + $0x300] sm:$0xff]  ;;  %v3972_v51 = vcombine.high %v210_v46, %v214_v47  ;;  %v3971_v52 = vcombine.low %v210_v46, %v214_v47 }
  0x64   :  { %943 = vmatpush1.bf16.msra.mxu1 %v3923_v28  ;;  %v222_v50 = vld [vmem:[#allocation5 + $0x320] sm:$0xff]  ;;  %v3901_v28 = vcombine.low %v139_v15, %v143_v16  ;;  %v96_v15 = vld [vmem:[#allocation2 + $0xb0] sm:$0xff]  ;;  %v3966_v16 = vcombine.high %v203_v9, %v207_v10 }
  0x65   :  { %944 = vmatprep.subr.bf16.mxu1 %v3932_v29  ;;  %v226_v53 = vld [vmem:[#allocation5 + $0x340] sm:$0xff]  ;;  %v3980_v55 = vcombine.high %v218_v49, %v222_v50  ;;  %v3979_v56 = vcombine.low %v218_v49, %v222_v50  ;;  %v4956_v29 = vpack.c.bf16 %v85_v25, %v83_v24  ;;  %v179_v50 = vld [vmem:[#allocation5 + $0x1c8] sm:$0xff] }
  0x66   :  { %v230_v54 = vld [vmem:[#allocation5 + $0x360] sm:$0xff] }
  0x67   :  { %v234_v57 = vld [vmem:[#allocation5 + $0x380] sm:$0xff]  ;;  %v3988_v59 = vcombine.high %v226_v53, %v230_v54  ;;  %v3987_v60 = vcombine.low %v226_v53, %v230_v54  ;;  %v93_v53 = vld [vmem:[#allocation2 + $0x98] sm:$0xff] }
  0x68   :  { %945 = vmatpush1.bf16.msra.mxu1 %v3931_v32  ;;  %v238_v58 = vld [vmem:[#allocation5 + $0x3a0] sm:$0xff]  ;;  %v3910_v32 = vcombine.high %v147_v22, %v151_v23  ;;  %v3965_v23 = vcombine.low %v203_v9, %v207_v10  ;;  %v140_v9 = vld [vmem:[#allocation5 + $0x90] sm:$0xff] }
  0x69   :  { %946 = vmatprep.subr.bf16.mxu1 %v3940_v33  ;;  %v242_v61 = vld [vmem:[#allocation5 + $0x3c0] sm:$0xff]  ;;  %v3996_v63 = vcombine.high %v234_v57, %v238_v58  ;;  %v3995_v0 = vcombine.low %v234_v57, %v238_v58  ;;  %v144_v10 = vld [vmem:[#allocation5 + $0xb0] sm:$0xff] }
  0x6a   :  { %v246_v62 = vld [vmem:[#allocation5 + $0x3e0] sm:$0xff] }
  0x6b   :  { %v4004_v3 = vcombine.high %v242_v61, %v246_v62  ;;  %v74_v4 = vld [vmem:[#allocation2] sm:$0xff]  ;;  %v4003_v6 = vcombine.low %v242_v61, %v246_v62 }
  0x6c   :  { %947 = vmatpush1.bf16.msra.mxu1 %v3939_v36  ;;  %v4948_v12 = vpack.c.bf16 %v76_v5, %v74_v4  ;;  %v78_v18 = vld [vmem:[#allocation2 + $0x20] sm:$0xff]  ;;  %v163_v36 = vld [vmem:[#allocation5 + $0x148] sm:$0xff] }
  0x6d   :  { %948 = vmatprep.subr.bf16.mxu1 %v3948_v37  ;;  %v4954_v27 = vpack.c.bf16 %v80_v19, %v78_v18  ;;  %v82_v33 = vld [vmem:[#allocation2 + $0x40] sm:$0xff]  ;;  %v167_v37 = vld [vmem:[#allocation5 + $0x168] sm:$0xff]  ;;  %v101_v18 = vld [vmem:[#allocation2 + $0xd8] sm:$0xff] }
  0x6e   :  { %v3926_v46 = vcombine.high %v163_v36, %v167_v37  ;;  %v86_v47 = vld [vmem:[#allocation2 + $0x60] sm:$0xff]  ;;  %v3925_v49 = vcombine.low %v163_v36, %v167_v37  ;;  %v199_v4 = vld [vmem:[#allocation5 + $0x268] sm:$0xff] }
  0x6f   :  { %v90_v62 = vld [vmem:[#allocation2 + $0x80] sm:$0xff]  ;;  %v211_v19 = vld [vmem:[#allocation5 + $0x2c8] sm:$0xff] }
  0x70   :  { %949 = vmatpush1.bf16.msra.mxu1 %v3947_v40  ;;  %v3918_v40 = vcombine.high %v155_v30, %v159_v31  ;;  %v98_v31 = vld [vmem:[#allocation2 + $0xc0] sm:$0xff]  ;;  %v227_v36 = vld [vmem:[#allocation5 + $0x348] sm:$0xff] }
  0x71   :  { %950 = vmatprep.subr.bf16.mxu1 %v3956_v41  ;;  %v4960_v41 = vpack.c.bf16 %v84_v34, %v82_v33  ;;  %v103_v34 = vld [vmem:[#allocation2 + $0xe8] sm:$0xff] }
  0x72   :  { %v231_v37 = vld [vmem:[#allocation5 + $0x368] sm:$0xff] }
  0x74   :  { %951 = vmatpush1.bf16.msra.mxu1 %v3955_v44  ;;  %v171_v44 = vld [vmem:[#allocation5 + $0x188] sm:$0xff] }
  0x75   :  { %952 = vmatprep.subr.bf16.mxu1 %v3964_v45  ;;  %v175_v45 = vld [vmem:[#allocation5 + $0x1a8] sm:$0xff] }
  0x76   :  { %v3934_v54 = vcombine.high %v171_v44, %v175_v45 }
  0x78   :  { %953 = vmatpush1.bf16.msra.mxu1 %v3963_v48  ;;  %v88_v48 = vld [vmem:[#allocation2 + $0x70] sm:$0xff] }
  0x79   :  { %954 = vmatprep.subr.bf16.mxu1 %v3972_v51  ;;  %v183_v51 = vld [vmem:[#allocation5 + $0x1e8] sm:$0xff] }
  0x7a   :  { %v3942_v58 = vcombine.high %v179_v50, %v183_v51  ;;  %v3941_v61 = vcombine.low %v179_v50, %v183_v51  ;;  %v243_v50 = vld [vmem:[#allocation5 + $0x3c8] sm:$0xff] }
  0x7b   :  { %v247_v51 = vld [vmem:[#allocation5 + $0x3e8] sm:$0xff] }
  0x7c   :  { %955 = vmatpush1.bf16.msra.mxu1 %v3971_v52  ;;  %v91_v52 = vld [vmem:[#allocation2 + $0x88] sm:$0xff] }
  0x7d   :  { %956 = vmatprep.subr.bf16.mxu1 %v3980_v55  ;;  %v4966_v55 = vpack.c.bf16 %v88_v48, %v86_v47  ;;  %v4968_v57 = vpack.c.bf16 %v93_v53, %v91_v52  ;;  %v102_v47 = vld [vmem:[#allocation2 + $0xe0] sm:$0xff]  ;;  %v104_v48 = vld [vmem:[#allocation2 + $0xf0] sm:$0xff] }
  0x7e   :  { %v4278_v52 = vld [vmem:[#allocation8 + $0x4] ss:$8 sps:$4 sm:$0xff]   ;;  %v4990_v53 = vpack.c.bf16 %v104_v48, %v102_v47  ;;  %v4301_v47 = vld [vmem:[#allocation8 + $0x70] ss:$8 sps:$4 sm:$0xff]  }
  0x7f   :  { %3380 = vmatprep.subr.bf16.mxu0 %v4278_v52  ;;  %v4302_v52 = vld [vmem:[#allocation8 + $0x84] ss:$8 sps:$4 sm:$0xff]  }
  0x80   :  { %957 = vmatpush1.bf16.msra.mxu1 %v3979_v56  ;;  %v3933_v56 = vcombine.low %v171_v44, %v175_v45  ;;  %v235_v44 = vld [vmem:[#allocation5 + $0x388] sm:$0xff] }
  0x81   :  { %958 = vmatprep.subr.bf16.mxu1 %v3988_v59  ;;  %v187_v59 = vld [vmem:[#allocation5 + $0x208] sm:$0xff] }
  0x82   :  { %v239_v45 = vld [vmem:[#allocation5 + $0x3a8] sm:$0xff] }
  0x84   :  { %959 = vmatpush1.bf16.msra.mxu1 %v3987_v60  ;;  %v191_v60 = vld [vmem:[#allocation5 + $0x228] sm:$0xff] }
  0x85   :  { %960 = vmatprep.subr.bf16.mxu1 %v3996_v63  ;;  %v92_v63 = vld [vmem:[#allocation2 + $0x90] sm:$0xff] }
  0x86   :  { %v4972_v5 = vpack.c.bf16 %v92_v63, %v90_v62  ;;  %v4283_v62 = vld [vmem:[#allocation8 + $0x10] ss:$8 sps:$4 sm:$0xff]   ;;  %v4005_v63 = vcombine.low %v243_v50, %v247_v51 }
  0x88   :  { %961 = vmatpush1.bf16.msra.mxu1 %v3995_v0  ;;  %v3950_v0 = vcombine.high %v187_v59, %v191_v60 }
  0x89   :  { %962 = vmatprep.subr.bf16.mxu1 %v4004_v3  ;;  %v195_v3 = vld [vmem:[#allocation5 + $0x248] sm:$0xff] }
  0x8a   :  { %v3958_v8 = vcombine.high %v195_v3, %v199_v4 }
  0x8c   :  { %963 = vmatpush1.bf16.msra.mxu1 %v4003_v6  ;;  %v3949_v6 = vcombine.low %v187_v59, %v191_v60  ;;  %v124_v59 = vld [vmem:[#allocation5 + $0x10] sm:$0xff] }
  0x8d   :  { %1045 = vmatprep.subr.bf16.mxu1 %v3886_v11  ;;  %v3957_v11 = vcombine.low %v195_v3, %v199_v4  ;;  %v128_v60 = vld [vmem:[#allocation5 + $0x30] sm:$0xff] }
  0x8e   :  { %v4284_v3 = vld [vmem:[#allocation8 + $0x24] ss:$8 sps:$4 sm:$0xff]   ;;  %v4286_v4 = vld [vmem:[#allocation8 + $0x20] ss:$8 sps:$4 sm:$0xff]  }
  0x8f   :  { %965 = vmatmul.mubr.bf16.vlgmr.msra.gmra.mrb[0].mxu1 %v4948_v12 }
  0x90   :  { %1046 = vmatpush1.bf16.msra.mxu1 %v3885_v13  ;;  %974 = vmatprep.mubr.bf16.mxu1 %v4950_v14  ;;  %v94_v13 = vld [vmem:[#allocation2 + $0xa0] sm:$0xff] }
  0x91   :  { %1047 = vmatprep.subr.bf16.mxu1 %v3894_v17  ;;  %v99_v17 = vld [vmem:[#allocation2 + $0xc8] sm:$0xff]  ;;  %v4978_v22 = vpack.c.bf16 %v96_v15, %v94_v13  ;;  %v4289_v13 = vld [vmem:[#allocation8 + $0x30] ss:$8 sps:$4 sm:$0xff]  }
  0x92   :  { %v4980_v24 = vpack.c.bf16 %v101_v18, %v99_v17  ;;  %v4290_v15 = vld [vmem:[#allocation8 + $0x44] ss:$8 sps:$4 sm:$0xff]   ;;  %v3904_v17 = vcombine.high %v140_v9, %v144_v10 }
  0x93   :  { %v148_v18 = vld [vmem:[#allocation5 + $0xd0] sm:$0xff] }
  0x94   :  { %1048 = vmatpush1.bf16.msra.mxu1 %v3893_v21  ;;  %v215_v21 = vld [vmem:[#allocation5 + $0x2e8] sm:$0xff] }
  0x95   :  { %1049 = vmatprep.subr.bf16.mxu1 %v3902_v26  ;;  %v3974_v25 = vcombine.high %v211_v19, %v215_v21  ;;  %v219_v26 = vld [vmem:[#allocation5 + $0x308] sm:$0xff]  ;;  %v3973_v30 = vcombine.low %v211_v19, %v215_v21  ;;  %v152_v19 = vld [vmem:[#allocation5 + $0xf0] sm:$0xff] }
  0x96   :  { %v4292_v21 = vld [vmem:[#allocation8 + $0x40] ss:$8 sps:$4 sm:$0xff]  }
  0x97   :  { %975 = vmatmul.mubr.bf16.gmra.mrb[4].mxu1 %v4954_v27 }
  0x98   :  { %1050 = vmatpush1.bf16.msra.mxu1 %v3901_v28  ;;  %984 = vmatprep.mubr.bf16.mxu1 %v4956_v29  ;;  %v223_v28 = vld [vmem:[#allocation5 + $0x328] sm:$0xff] }
  0x99   :  { %1051 = vmatprep.subr.bf16.mxu1 %v3910_v32  ;;  %v100_v32 = vld [vmem:[#allocation2 + $0xd0] sm:$0xff]  ;;  %v3982_v33 = vcombine.high %v219_v26, %v223_v28  ;;  %v3981_v39 = vcombine.low %v219_v26, %v223_v28 }
  0x9a   :  { %v4984_v38 = vpack.c.bf16 %v100_v32, %v98_v31  ;;  %v156_v26 = vld [vmem:[#allocation5 + $0x110] sm:$0xff]  ;;  %v4295_v31 = vld [vmem:[#allocation8 + $0x50] ss:$8 sps:$4 sm:$0xff]  }
  0x9b   :  { %v160_v28 = vld [vmem:[#allocation5 + $0x130] sm:$0xff] }
  0x9c   :  { %1052 = vmatpush1.bf16.msra.mxu1 %v3909_v35  ;;  %v105_v35 = vld [vmem:[#allocation2 + $0xf8] sm:$0xff]  ;;  %v4296_v32 = vld [vmem:[#allocation8 + $0x64] ss:$8 sps:$4 sm:$0xff]  }
  0x9d   :  { %1053 = vmatprep.subr.bf16.mxu1 %v3918_v40  ;;  %v4986_v40 = vpack.c.bf16 %v105_v35, %v103_v34  ;;  %v3920_v34 = vcombine.high %v156_v26, %v160_v28  ;;  %v164_v35 = vld [vmem:[#allocation5 + $0x150] sm:$0xff] }
  0x9f   :  { %985 = vmatmul.mubr.bf16.gmra.mrb[8].mxu1 %v4960_v41 }
  0xa0   :  { %1054 = vmatpush1.bf16.msra.mxu1 %v3917_v42  ;;  %994 = vmatprep.mubr.bf16.mxu1 %v4962_v43  ;;  %v3990_v42 = vcombine.high %v227_v36, %v231_v37 }
  0xa1   :  { %1055 = vmatprep.subr.bf16.mxu1 %v3926_v46  ;;  %v3989_v46 = vcombine.low %v227_v36, %v231_v37  ;;  %v168_v36 = vld [vmem:[#allocation5 + $0x170] sm:$0xff] }
  0xa2   :  { %v4298_v37 = vld [vmem:[#allocation8 + $0x60] ss:$8 sps:$4 sm:$0xff]   ;;  %v3927_v48 = vcombine.low %v164_v35, %v168_v36 }
  0xa4   :  { %1056 = vmatpush1.bf16.msra.mxu1 %v3925_v49  ;;  %v3998_v49 = vcombine.high %v235_v44, %v239_v45 }
  0xa5   :  { %1057 = vmatprep.subr.bf16.mxu1 %v3934_v54  ;;  %v4280_v54 = vld [vmem:[#allocation8] ss:$8 sps:$4 sm:$0xff]  }
  0xa6   :  { %3381 = vmatpush1.bf16.msra.mxu0 %v4280_v54  ;;  %v4304_v54 = vld [vmem:[#allocation8 + $0x80] ss:$8 sps:$4 sm:$0xff]  }
  0xa7   :  { %995 = vmatmul.mubr.bf16.gmra.mrb[12].mxu1 %v4966_v55 }
  0xa8   :  { %1058 = vmatpush1.bf16.msra.mxu1 %v3933_v56  ;;  %1004 = vmatprep.mubr.bf16.mxu1 %v4968_v57  ;;  %v3997_v56 = vcombine.low %v235_v44, %v239_v45  ;;  %v172_v44 = vld [vmem:[#allocation5 + $0x190] sm:$0xff] }
  0xa9   :  { %1059 = vmatprep.subr.bf16.mxu1 %v3942_v58  ;;  %v4006_v58 = vcombine.high %v243_v50, %v247_v51  ;;  %v176_v45 = vld [vmem:[#allocation5 + $0x1b0] sm:$0xff] }
  0xaa   :  { %v180_v50 = vld [vmem:[#allocation5 + $0x1d0] sm:$0xff] }
  0xab   :  { %v184_v51 = vld [vmem:[#allocation5 + $0x1f0] sm:$0xff] }
  0xac   :  { %1060 = vmatpush1.bf16.msra.mxu1 %v3941_v61  ;;  %v4281_v61 = vld [vmem:[#allocation8 + $0x14] ss:$8 sps:$4 sm:$0xff]  }
  0xad   :  { %1061 = vmatprep.subr.bf16.mxu1 %v3950_v0  ;;  %v3888_v0 = vcombine.high %v124_v59, %v128_v60  ;;  %3382 = vmatprep.subr.bf16.mxu0 %v4281_v61  ;;  %v4305_v61 = vld [vmem:[#allocation8 + $0x94] ss:$8 sps:$4 sm:$0xff]  }
  0xae   :  { %3383 = vmatpush1.bf16.msra.mxu0 %v4283_v62  ;;  %v4307_v62 = vld [vmem:[#allocation8 + $0x90] ss:$8 sps:$4 sm:$0xff]  }
  0xaf   :  { %1005 = vmatmul.mubr.bf16.gmra.mrb[16].mxu1 %v4972_v5  ;;  %3384 = vmatprep.subr.bf16.mxu0 %v4284_v3  ;;  %v4308_v3 = vld [vmem:[#allocation8 + $0xa4] ss:$8 sps:$4 sm:$0xff]  }
  0xb0   :  { %1062 = vmatpush1.bf16.msra.mxu1 %v3949_v6  ;;  %1014 = vmatprep.mubr.bf16.mxu1 %v4974_v7  ;;  %v3887_v6 = vcombine.low %v124_v59, %v128_v60  ;;  %v188_v59 = vld [vmem:[#allocation5 + $0x210] sm:$0xff] }
  0xb1   :  { %1063 = vmatprep.subr.bf16.mxu1 %v3958_v8  ;;  %v3896_v8 = vcombine.high %v132_v1, %v136_v2  ;;  %v192_v60 = vld [vmem:[#allocation5 + $0x230] sm:$0xff] }
  0xb2   :  { %3385 = vmatpush1.bf16.msra.mxu0 %v4286_v4  ;;  %v4310_v4 = vld [vmem:[#allocation8 + $0xa0] ss:$8 sps:$4 sm:$0xff]  }
  0xb4   :  { %1064 = vmatpush1.bf16.msra.mxu1 %v3957_v11  ;;  %v4287_v11 = vld [vmem:[#allocation8 + $0x34] ss:$8 sps:$4 sm:$0xff]  }
  0xb5   :  { %1065 = vmatprep.subr.bf16.mxu1 %v3966_v16  ;;  %v3895_v16 = vcombine.low %v132_v1, %v136_v2  ;;  %3386 = vmatprep.subr.bf16.mxu0 %v4287_v11  ;;  %v196_v1 = vld [vmem:[#allocation5 + $0x250] sm:$0xff]  ;;  %v4311_v11 = vld [vmem:[#allocation8 + $0xb4] ss:$8 sps:$4 sm:$0xff]  }
  0xb6   :  { %3387 = vmatpush1.bf16.msra.mxu0 %v4289_v13  ;;  %v200_v2 = vld [vmem:[#allocation5 + $0x270] sm:$0xff]  ;;  %v4313_v13 = vld [vmem:[#allocation8 + $0xb0] ss:$8 sps:$4 sm:$0xff]  }
  0xb7   :  { %1015 = vmatmul.mubr.bf16.gmra.mrb[20].mxu1 %v4978_v22  ;;  %3388 = vmatprep.subr.bf16.mxu0 %v4290_v15  ;;  %v3959_v15 = vcombine.low %v196_v1, %v200_v2 }
  0xb8   :  { %1066 = vmatpush1.bf16.msra.mxu1 %v3965_v23  ;;  %1024 = vmatprep.mubr.bf16.mxu1 %v4980_v24  ;;  %v3903_v23 = vcombine.low %v140_v9, %v144_v10  ;;  %v204_v9 = vld [vmem:[#allocation5 + $0x290] sm:$0xff] }
  0xb9   :  { %1067 = vmatprep.subr.bf16.mxu1 %v3974_v25  ;;  %v3912_v25 = vcombine.high %v148_v18, %v152_v19  ;;  %v208_v10 = vld [vmem:[#allocation5 + $0x2b0] sm:$0xff] }
  0xba   :  { %3389 = vmatpush1.bf16.msra.mxu0 %v4292_v21  ;;  %v4316_v21 = vld [vmem:[#allocation8 + $0xc0] ss:$8 sps:$4 sm:$0xff]  }
  0xbc   :  { %1068 = vmatpush1.bf16.msra.mxu1 %v3973_v30  ;;  %v4293_v30 = vld [vmem:[#allocation8 + $0x54] ss:$8 sps:$4 sm:$0xff]  }
  0xbd   :  { %1069 = vmatprep.subr.bf16.mxu1 %v3982_v33  ;;  %v3911_v33 = vcombine.low %v148_v18, %v152_v19  ;;  %3390 = vmatprep.subr.bf16.mxu0 %v4293_v30  ;;  %v216_v18 = vld [vmem:[#allocation5 + $0x2f0] sm:$0xff]  ;;  %v4317_v30 = vld [vmem:[#allocation8 + $0xd4] ss:$8 sps:$4 sm:$0xff]  }
  0xbe   :  { %3391 = vmatpush1.bf16.msra.mxu0 %v4295_v31  ;;  %v4314_v19 = vld [vmem:[#allocation8 + $0xc4] ss:$8 sps:$4 sm:$0xff]   ;;  %v4319_v31 = vld [vmem:[#allocation8 + $0xd0] ss:$8 sps:$4 sm:$0xff]  }
  0xbf   :  { %1025 = vmatmul.mubr.bf16.gmra.mrb[24].mxu1 %v4984_v38  ;;  %3392 = vmatprep.subr.bf16.mxu0 %v4296_v32 }
  0xc0   :  { %1070 = vmatpush1.bf16.msra.mxu1 %v3981_v39  ;;  %1034 = vmatprep.mubr.bf16.mxu1 %v4986_v40  ;;  %v3919_v39 = vcombine.low %v156_v26, %v160_v28  ;;  %v220_v26 = vld [vmem:[#allocation5 + $0x310] sm:$0xff] }
  0xc1   :  { %1071 = vmatprep.subr.bf16.mxu1 %v3990_v42  ;;  %v3928_v42 = vcombine.high %v164_v35, %v168_v36  ;;  %v224_v28 = vld [vmem:[#allocation5 + $0x330] sm:$0xff] }
  0xc2   :  { %3393 = vmatpush1.bf16.msra.mxu0 %v4298_v37  ;;  %v232_v35 = vld [vmem:[#allocation5 + $0x370] sm:$0xff] }
  0xc3   :  { %v4320_v36 = vld [vmem:[#allocation8 + $0xe4] ss:$8 sps:$4 sm:$0xff]   ;;  %v4322_v37 = vld [vmem:[#allocation8 + $0xe0] ss:$8 sps:$4 sm:$0xff]  }
  0xc4   :  { %1072 = vmatpush1.bf16.msra.mxu1 %v3989_v46  ;;  %v4299_v46 = vld [vmem:[#allocation8 + $0x74] ss:$8 sps:$4 sm:$0xff]  }
  0xc5   :  { %1073 = vmatprep.subr.bf16.mxu1 %v3998_v49  ;;  %v3936_v49 = vcombine.high %v172_v44, %v176_v45  ;;  %3394 = vmatprep.subr.bf16.mxu0 %v4299_v46  ;;  %v4323_v46 = vld [vmem:[#allocation8 + $0xf4] ss:$8 sps:$4 sm:$0xff]  }
  0xc6   :  { %3395 = vmatpush1.bf16.msra.mxu0 %v4301_v47  ;;  %v4325_v47 = vld [vmem:[#allocation8 + $0xf0] ss:$8 sps:$4 sm:$0xff]  }
  0xc7   :  { %1035 = vmatmul.mubr.bf16.gmra.mrb[28].mxu1 %v4990_v53  ;;  %3396 = vmatprep.subr.bf16.mxu0 %v4302_v52  ;;  %v4328_v52 = vld [vmem:[#allocation8 + $0x104] ss:$8 sps:$4 sm:$0xff]  }
  0xc8   :  { %1074 = vmatpush1.bf16.msra.mxu1 %v3997_v56  ;;  %1077 = vmatprep.mubr.bf16.mxu1 %v4945_v20  ;;  %v3935_v56 = vcombine.low %v172_v44, %v176_v45  ;;  %v236_v44 = vld [vmem:[#allocation5 + $0x390] sm:$0xff] }
  0xc9   :  { %1075 = vmatprep.subr.bf16.mxu1 %v4006_v58  ;;  %v3944_v58 = vcombine.high %v180_v50, %v184_v51  ;;  %v240_v45 = vld [vmem:[#allocation5 + $0x3b0] sm:$0xff] }
  0xca   :  { %3397 = vmatpush1.bf16.msra.mxu0 %v4304_v54  ;;  %v3999_v54 = vcombine.low %v236_v44, %v240_v45 }
  0xcb   :  { %3398 = vmatprep.subr.bf16.mxu0 %v4305_v61 }
  0xcc   :  { %1076 = vmatpush1.bf16.msra.mxu1 %v4005_v63  ;;  %v3943_v63 = vcombine.low %v180_v50, %v184_v51  ;;  %v244_v50 = vld [vmem:[#allocation5 + $0x3d0] sm:$0xff] }
  0xcd   :  { %1158 = vmatprep.subr.bf16.mxu1 %v3888_v0  ;;  %v3952_v0 = vcombine.high %v188_v59, %v192_v60  ;;  %v248_v51 = vld [vmem:[#allocation5 + $0x3f0] sm:$0xff] }
  0xce   :  { %3399 = vmatpush1.bf16.msra.mxu0 %v4307_v62  ;;  %v133_v62 = vld [vmem:[#allocation5 + $0x58] sm:$0xff] }
  0xcf   :  { %1078 = vmatmul.mubr.bf16.vlgmr.msra.gmra.mrb[32].mxu1 %v4948_v12  ;;  %3400 = vmatprep.subr.bf16.mxu0 %v4308_v3  ;;  %v145_v3 = vld [vmem:[#allocation5 + $0xb8] sm:$0xff] }
  0xd0   :  { %1159 = vmatpush1.bf16.msra.mxu1 %v3887_v6  ;;  %1087 = vmatprep.mubr.bf16.mxu1 %v4950_v14  ;;  %v3951_v6 = vcombine.low %v188_v59, %v192_v60  ;;  %v129_v59 = vld [vmem:[#allocation5 + $0x38] sm:$0xff]  ;;  %v4007_v60 = vcombine.low %v244_v50, %v248_v51 }
  0xd1   :  { %1160 = vmatprep.subr.bf16.mxu1 %v3896_v8  ;;  %v3960_v8 = vcombine.high %v196_v1, %v200_v2  ;;  %v141_v2 = vld [vmem:[#allocation5 + $0x98] sm:$0xff] }
  0xd2   :  { %3401 = vmatpush1.bf16.msra.mxu0 %v4310_v4 }
  0xd3   :  { %3402 = vmatprep.subr.bf16.mxu0 %v4311_v11 }
  0xd4   :  { %1161 = vmatpush1.bf16.msra.mxu1 %v3895_v16  ;;  %v3968_v16 = vcombine.high %v204_v9, %v208_v10 }
  0xd5   :  { %1162 = vmatprep.subr.bf16.mxu1 %v3904_v17  ;;  %v212_v17 = vld [vmem:[#allocation5 + $0x2d0] sm:$0xff] }
  0xd6   :  { %3403 = vmatpush1.bf16.msra.mxu0 %v4313_v13  ;;  %v3975_v32 = vcombine.low %v212_v17, %v216_v18  ;;  %v157_v13 = vld [vmem:[#allocation5 + $0x118] sm:$0xff] }
  0xd7   :  { %1088 = vmatmul.mubr.bf16.gmra.mrb[36].mxu1 %v4954_v27  ;;  %3404 = vmatprep.subr.bf16.mxu0 %v4314_v19  ;;  %v169_v19 = vld [vmem:[#allocation5 + $0x178] sm:$0xff] }
  0xd8   :  { %1163 = vmatpush1.bf16.msra.mxu1 %v3903_v23  ;;  %1097 = vmatprep.mubr.bf16.mxu1 %v4956_v29  ;;  %v3967_v23 = vcombine.low %v204_v9, %v208_v10  ;;  %v153_v9 = vld [vmem:[#allocation5 + $0xf8] sm:$0xff]  ;;  %v3905_v10 = vcombine.low %v141_v2, %v145_v3 }
  0xd9   :  { %1164 = vmatprep.subr.bf16.mxu1 %v3912_v25  ;;  %v3976_v25 = vcombine.high %v212_v17, %v216_v18  ;;  %v165_v18 = vld [vmem:[#allocation5 + $0x158] sm:$0xff] }
  0xda   :  { %3405 = vmatpush1.bf16.msra.mxu0 %v4316_v21 }
  0xdb   :  { %3406 = vmatprep.subr.bf16.mxu0 %v4317_v30 }
  0xdc   :  { %1165 = vmatpush1.bf16.msra.mxu1 %v3911_v33  ;;  %v3984_v33 = vcombine.high %v220_v26, %v224_v28 }
  0xdd   :  { %1166 = vmatprep.subr.bf16.mxu1 %v3920_v34  ;;  %v228_v34 = vld [vmem:[#allocation5 + $0x350] sm:$0xff] }
  0xde   :  { %3407 = vmatpush1.bf16.msra.mxu0 %v4319_v31  ;;  %v181_v31 = vld [vmem:[#allocation5 + $0x1d8] sm:$0xff] }
  0xdf   :  { %1098 = vmatmul.mubr.bf16.gmra.mrb[40].mxu1 %v4960_v41  ;;  %3408 = vmatprep.subr.bf16.mxu0 %v4320_v36  ;;  %v193_v36 = vld [vmem:[#allocation5 + $0x238] sm:$0xff] }
  0xe0   :  { %1167 = vmatpush1.bf16.msra.mxu1 %v3919_v39  ;;  %1107 = vmatprep.mubr.bf16.mxu1 %v4962_v43  ;;  %v3983_v39 = vcombine.low %v220_v26, %v224_v28  ;;  %v177_v26 = vld [vmem:[#allocation5 + $0x1b8] sm:$0xff]  ;;  %v3929_v28 = vcombine.low %v165_v18, %v169_v19 }
  0xe1   :  { %1168 = vmatprep.subr.bf16.mxu1 %v3928_v42  ;;  %v3992_v42 = vcombine.high %v228_v34, %v232_v35 }
  0xe2   :  { %3409 = vmatpush1.bf16.msra.mxu0 %v4322_v37 }
  0xe3   :  { %3410 = vmatprep.subr.bf16.mxu0 %v4323_v46 }
  0xe4   :  { %1169 = vmatpush1.bf16.msra.mxu1 %v3927_v48  ;;  %v3991_v48 = vcombine.low %v228_v34, %v232_v35  ;;  %v189_v35 = vld [vmem:[#allocation5 + $0x218] sm:$0xff] }
  0xe5   :  { %1170 = vmatprep.subr.bf16.mxu1 %v3936_v49  ;;  %v4000_v49 = vcombine.high %v236_v44, %v240_v45  ;;  %v201_v44 = vld [vmem:[#allocation5 + $0x278] sm:$0xff]  ;;  %v3953_v45 = vcombine.low %v189_v35, %v193_v36 }
  0xe6   :  { %3411 = vmatpush1.bf16.msra.mxu0 %v4325_v47  ;;  %v205_v47 = vld [vmem:[#allocation5 + $0x298] sm:$0xff] }
  0xe7   :  { %1108 = vmatmul.mubr.bf16.gmra.mrb[44].mxu1 %v4966_v55  ;;  %3493 = vmatprep.subr.bf16.mxu0 %v4328_v52  ;;  %v217_v52 = vld [vmem:[#allocation5 + $0x2f8] sm:$0xff] }
  0xe8   :  { %1171 = vmatpush1.bf16.msra.mxu1 %v3935_v56  ;;  %1117 = vmatprep.mubr.bf16.mxu1 %v4968_v57  ;;  %v4008_v56 = vcombine.high %v244_v50, %v248_v51  ;;  %v213_v51 = vld [vmem:[#allocation5 + $0x2d8] sm:$0xff] }
  0xe9   :  { %1172 = vmatprep.subr.bf16.mxu1 %v3944_v58  ;;  %v125_v58 = vld [vmem:[#allocation5 + $0x18] sm:$0xff] }
  0xea   :  { %v3890_v61 = vcombine.high %v125_v58, %v129_v59 }
  0xec   :  { %1173 = vmatpush1.bf16.msra.mxu1 %v3943_v63  ;;  %v137_v63 = vld [vmem:[#allocation5 + $0x78] sm:$0xff] }
  0xed   :  { %1174 = vmatprep.subr.bf16.mxu1 %v3952_v0  ;;  %v3889_v0 = vcombine.low %v125_v58, %v129_v59  ;;  %v3898_v1 = vcombine.high %v133_v62, %v137_v63  ;;  %v3897_v4 = vcombine.low %v133_v62, %v137_v63  ;;  %v221_v58 = vld [vmem:[#allocation5 + $0x318] sm:$0xff] }
  0xee   :  { %v225_v59 = vld [vmem:[#allocation5 + $0x338] sm:$0xff] }
  0xef   :  { %1118 = vmatmul.mubr.bf16.gmra.mrb[48].mxu1 %v4972_v5  ;;  %v229_v62 = vld [vmem:[#allocation5 + $0x358] sm:$0xff] }
  0xf0   :  { %1175 = vmatpush1.bf16.msra.mxu1 %v3951_v6  ;;  %1127 = vmatprep.mubr.bf16.mxu1 %v4974_v7  ;;  %v3906_v6 = vcombine.high %v141_v2, %v145_v3  ;;  %v233_v63 = vld [vmem:[#allocation5 + $0x378] sm:$0xff] }
  0xf1   :  { %1176 = vmatprep.subr.bf16.mxu1 %v3960_v8  ;;  %v149_v8 = vld [vmem:[#allocation5 + $0xd8] sm:$0xff] }
  0xf2   :  { %v3914_v11 = vcombine.high %v149_v8, %v153_v9  ;;  %v237_v2 = vld [vmem:[#allocation5 + $0x398] sm:$0xff] }
  0xf3   :  { %v241_v3 = vld [vmem:[#allocation5 + $0x3b8] sm:$0xff] }
  0xf4   :  { %1177 = vmatpush1.bf16.msra.mxu1 %v3959_v15  ;;  %v161_v15 = vld [vmem:[#allocation5 + $0x138] sm:$0xff] }
  0xf5   :  { %1178 = vmatprep.subr.bf16.mxu1 %v3968_v16  ;;  %v3913_v16 = vcombine.low %v149_v8, %v153_v9  ;;  %v3922_v17 = vcombine.high %v157_v13, %v161_v15  ;;  %v3921_v21 = vcombine.low %v157_v13, %v161_v15  ;;  %v245_v8 = vld [vmem:[#allocation5 + $0x3d8] sm:$0xff]  ;;  %v252_v15 = vlaneseq }
  0xf6   :  { %v249_v9 = vld [vmem:[#allocation5 + $0x3f8] sm:$0xff] }
  0xf7   :  { %1128 = vmatmul.mubr.bf16.gmra.mrb[52].mxu1 %v4978_v22  ;;  %v4009_v13 = vcombine.low %v245_v8, %v249_v9 }
  0xf8   :  { %1179 = vmatpush1.bf16.msra.mxu1 %v3967_v23  ;;  %1137 = vmatprep.mubr.bf16.mxu1 %v4980_v24  ;;  %v3930_v23 = vcombine.high %v165_v18, %v169_v19  ;;  %v5033_v18 = vld [vmem:[#allocation7] sm:$0xff] }
  0xf9   :  { %1180 = vmatprep.subr.bf16.mxu1 %v3976_v25  ;;  %v173_v25 = vld [vmem:[#allocation5 + $0x198] sm:$0xff] }
  0xfa   :  { %v3938_v30 = vcombine.high %v173_v25, %v177_v26 }
  0xfc   :  { %1181 = vmatpush1.bf16.msra.mxu1 %v3975_v32  ;;  %v185_v32 = vld [vmem:[#allocation5 + $0x1f8] sm:$0xff] }
  0xfd   :  { %1182 = vmatprep.subr.bf16.mxu1 %v3984_v33  ;;  %v3937_v33 = vcombine.low %v173_v25, %v177_v26  ;;  %v3946_v34 = vcombine.high %v181_v31, %v185_v32  ;;  %v3945_v37 = vcombine.low %v181_v31, %v185_v32 }
  0xff   :  { %1138 = vmatmul.mubr.bf16.gmra.mrb[56].mxu1 %v4984_v38 }
 0x100   :  { %1183 = vmatpush1.bf16.msra.mxu1 %v3983_v39  ;;  %1147 = vmatprep.mubr.bf16.mxu1 %v4986_v40  ;;  %v3954_v39 = vcombine.high %v189_v35, %v193_v36 }
 0x101   :  { %1184 = vmatprep.subr.bf16.mxu1 %v3992_v42  ;;  %v197_v42 = vld [vmem:[#allocation5 + $0x258] sm:$0xff] }
 0x102   :  { %v3962_v46 = vcombine.high %v197_v42, %v201_v44 }
 0x104   :  { %1185 = vmatpush1.bf16.msra.mxu1 %v3991_v48  ;;  %v209_v48 = vld [vmem:[#allocation5 + $0x2b8] sm:$0xff] }
 0x105   :  { %1186 = vmatprep.subr.bf16.mxu1 %v4000_v49  ;;  %v3961_v49 = vcombine.low %v197_v42, %v201_v44  ;;  %v3970_v50 = vcombine.high %v205_v47, %v209_v48 }
 0x107   :  { %1148 = vmatmul.mubr.bf16.gmra.mrb[60].mxu1 %v4990_v53 }
 0x108   :  { %1187 = vmatpush1.bf16.msra.mxu1 %v3999_v54  ;;  %1190 = vmatprep.mubr.bf16.mxu1 %v4945_v20  ;;  %v3969_v54 = vcombine.low %v205_v47, %v209_v48 }
 0x109   :  { %1188 = vmatprep.subr.bf16.mxu1 %v4008_v56  ;;  %v3978_v56 = vcombine.high %v213_v51, %v217_v52 }
 0x10c   :  { %1189 = vmatpush1.bf16.msra.mxu1 %v4007_v60  ;;  %v3977_v60 = vcombine.low %v213_v51, %v217_v52 }
 0x10d   :  { %1271 = vmatprep.subr.bf16.mxu1 %v3890_v61  ;;  %v3986_v61 = vcombine.high %v221_v58, %v225_v59 }
 0x10f   :  { %1191 = vmatmul.mubr.bf16.vlgmr.msra.gmra.mrb[64].mxu1 %v4948_v12 }
 0x110   :  { %1272 = vmatpush1.bf16.msra.mxu1 %v3889_v0  ;;  %1200 = vmatprep.mubr.bf16.mxu1 %v4950_v14  ;;  %v3985_v0 = vcombine.low %v221_v58, %v225_v59 }
 0x111   :  { %1273 = vmatprep.subr.bf16.mxu1 %v3898_v1  ;;  %v3994_v1 = vcombine.high %v229_v62, %v233_v63 }
 0x114   :  { %1274 = vmatpush1.bf16.msra.mxu1 %v3897_v4  ;;  %v3993_v4 = vcombine.low %v229_v62, %v233_v63 }
 0x115   :  { %1275 = vmatprep.subr.bf16.mxu1 %v3906_v6  ;;  %v4002_v6 = vcombine.high %v237_v2, %v241_v3 }
 0x117   :  { %1201 = vmatmul.mubr.bf16.gmra.mrb[68].mxu1 %v4954_v27 }
 0x118   :  { %1276 = vmatpush1.bf16.msra.mxu1 %v3905_v10  ;;  %1210 = vmatprep.mubr.bf16.mxu1 %v4956_v29  ;;  %v4001_v10 = vcombine.low %v237_v2, %v241_v3 }
 0x119   :  { %1277 = vmatprep.subr.bf16.mxu1 %v3914_v11  ;;  %v4010_v11 = vcombine.high %v245_v8, %v249_v9 }
 0x11c   :  { %1278 = vmatpush1.bf16.msra.mxu1 %v3913_v16  ;;  %v5029_v16 = vshrl.u32 %v252_v15, 7 }
 0x11d   :  { %1279 = vmatprep.subr.bf16.mxu1 %v3922_v17 }
 0x11e   :  { %6866 = vst [vmem:[#allocation15_spill] sm:$0xff] %v5029_v16  ;;  %v6857_v17 = vsub.s32 0, %v5029_v16  ;;  %v6856_v19 = vsub.s32 1, %v5029_v16  ;;  %v266_v8 = vsub.s32 3, %v5029_v16 }
 0x11f   :  { %1211 = vmatmul.mubr.bf16.gmra.mrb[72].mxu1 %v4960_v41 }
 0x120   :  { %1280 = vmatpush1.bf16.msra.mxu1 %v3921_v21  ;;  %1220 = vmatprep.mubr.bf16.mxu1 %v4962_v43 }
 0x121   :  { %1281 = vmatprep.subr.bf16.mxu1 %v3930_v23 }
 0x124   :  { %1282 = vmatpush1.bf16.msra.mxu1 %v3929_v28 }
 0x125   :  { %1283 = vmatprep.subr.bf16.mxu1 %v3938_v30 }
 0x127   :  { %1221 = vmatmul.mubr.bf16.gmra.mrb[76].mxu1 %v4966_v55 }
 0x128   :  { %1284 = vmatpush1.bf16.msra.mxu1 %v3937_v33  ;;  %1230 = vmatprep.mubr.bf16.mxu1 %v4968_v57 }
 0x129   :  { %1285 = vmatprep.subr.bf16.mxu1 %v3946_v34 }
 0x12c   :  { %1286 = vmatpush1.bf16.msra.mxu1 %v3945_v37 }
 0x12d   :  { %1287 = vmatprep.subr.bf16.mxu1 %v3954_v39 }
 0x12f   :  { %1231 = vmatmul.mubr.bf16.gmra.mrb[80].mxu1 %v4972_v5 }
 0x130   :  { %1288 = vmatpush1.bf16.msra.mxu1 %v3953_v45  ;;  %1240 = vmatprep.mubr.bf16.mxu1 %v4974_v7 }
 0x131   :  { %1289 = vmatprep.subr.bf16.mxu1 %v3962_v46 }
 0x134   :  { %1290 = vmatpush1.bf16.msra.mxu1 %v3961_v49  ;;  %v262_v49 = vsub.s32 2, %v5029_v16 }
 0x135   :  { %1291 = vmatprep.subr.bf16.mxu1 %v3970_v50 }
 0x136   :  { %v5102_v15 = vrot.slane %v5033_v18, %v262_v49 }
 0x137   :  { %1241 = vmatmul.mubr.bf16.gmra.mrb[84].mxu1 %v4978_v22 }
 0x138   :  { %1292 = vmatpush1.bf16.msra.mxu1 %v3969_v54  ;;  %1250 = vmatprep.mubr.bf16.mxu1 %v4980_v24 }
 0x139   :  { %1293 = vmatprep.subr.bf16.mxu1 %v3978_v56 }
 0x13c   :  { %1294 = vmatpush1.bf16.msra.mxu1 %v3977_v60 }
 0x13d   :  { %1295 = vmatprep.subr.bf16.mxu1 %v3986_v61 }
 0x13f   :  { %1251 = vmatmul.mubr.bf16.gmra.mrb[88].mxu1 %v4984_v38 }
 0x140   :  { %1296 = vmatpush1.bf16.msra.mxu1 %v3985_v0  ;;  %1260 = vmatprep.mubr.bf16.mxu1 %v4986_v40 }
 0x141   :  { %1297 = vmatprep.subr.bf16.mxu1 %v3994_v1 }
 0x144   :  { %1298 = vmatpush1.bf16.msra.mxu1 %v3993_v4 }
 0x145   :  { %1299 = vmatprep.subr.bf16.mxu1 %v4002_v6 }
 0x147   :  { %1261 = vmatmul.mubr.bf16.gmra.mrb[92].mxu1 %v4990_v53 }
 0x148   :  { %1300 = vmatpush1.bf16.msra.mxu1 %v4001_v10  ;;  %1303 = vmatprep.mubr.bf16.mxu1 %v4945_v20  ;;  %v5040_v20 = vrot.slane %v5033_v18, %v6857_v17 }
 0x149   :  { %1301 = vmatprep.subr.bf16.mxu1 %v4010_v11 }
 0x14c   :  { %1302 = vmatpush1.bf16.msra.mxu1 %v4009_v13 }
 0x14f   :  { %1304 = vmatmul.mubr.bf16.vlgmr.msra.gmra.mrb[96].mxu1 %v4948_v12  ;;  %v5045_v12 = vrot.slane %v5033_v18, %v6856_v19 }
 0x150   :  { %1313 = vmatprep.mubr.bf16.mxu1 %v4950_v14 }
 0x157   :  { %1314 = vmatmul.mubr.bf16.gmra.mrb[100].mxu1 %v4954_v27 }
 0x158   :  { %1323 = vmatprep.mubr.bf16.mxu1 %v4956_v29 }
 0x15f   :  { %1324 = vmatmul.mubr.bf16.gmra.mrb[104].mxu1 %v4960_v41 }
 0x160   :  { %1333 = vmatprep.mubr.bf16.mxu1 %v4962_v43 }
 0x162   :  { %v966_v14 = vpop.f32.mrb[0].mxu1 }
 0x163   :  { %v5049_v27 = vadd.f32 %v966_v14, %v5040_v20  ;;  %v968_v29 = vpop.f32.mrb[1].mxu1 }
 0x164   :  { %v5052_v21 = vadd.f32 %v968_v29, %v5045_v12  ;;  %v970_v41 = vpop.f32.mrb[2].mxu1 }
 0x165   :  { %v1512_v23 = vmul.f32 0.044715, %v5049_v27  ;;  %v5056_v25 = vadd.f32 %v970_v41, %v5040_v20  ;;  %v972_v26 = vpop.f32.mrb[3].mxu1 }
 0x166   :  { %v1513_v28 = vmul.f32 0.044715, %v5052_v21  ;;  %v5060_v30 = vadd.f32 %v972_v26, %v5045_v12 }
 0x167   :  { %v1640_v43 = vmul.f32 %v1512_v23, %v5049_v27  ;;  %v1520_v31 = vmul.f32 0.044715, %v5056_v25  ;;  %1334 = vmatmul.mubr.bf16.gmra.mrb[108].mxu1 %v4966_v55  ;;  %v1392_v49 = vmul.f32 0.5, %v5056_v25 }
 0x168   :  { %v1521_v32 = vmul.f32 0.044715, %v5060_v30  ;;  %1343 = vmatprep.mubr.bf16.mxu1 %v4968_v57  ;;  %v1641_v33 = vmul.f32 %v1513_v28, %v5052_v21 }
 0x169   :  { %v1768_v34 = vmul.f32 %v1640_v43, %v5049_v27  ;;  %v1648_v35 = vmul.f32 %v1520_v31, %v5056_v25  ;;  %v1384_v43 = vmul.f32 0.5, %v5049_v27 }
 0x16a   :  { %v976_v36 = vpop.f32.mrb[4].mxu1  ;;  %v1649_v37 = vmul.f32 %v1521_v32, %v5060_v30  ;;  %v1769_v39 = vmul.f32 %v1641_v33, %v5052_v21  ;;  %v5115_v32 = vrot.slane %v5033_v18, %v266_v8 }
 0x16b   :  { %v1776_v42 = vmul.f32 %v1648_v35, %v5056_v25  ;;  %v5074_v44 = vadd.f32 %v976_v36, %v5040_v20  ;;  %v978_v55 = vpop.f32.mrb[5].mxu1  ;;  %v1896_v45 = vadd.f32 %v1768_v34, %v5049_v27 }
 0x16c   :  { %v5078_v57 = vadd.f32 %v978_v55, %v5045_v12  ;;  %v980_v46 = vpop.f32.mrb[6].mxu1  ;;  %v1777_v47 = vmul.f32 %v1649_v37, %v5060_v30  ;;  %v1897_v48 = vadd.f32 %v1769_v39, %v5052_v21  ;;  %v1385_v39 = vmul.f32 0.5, %v5052_v21 }
 0x16d   :  { %v1528_v50 = vmul.f32 0.044715, %v5074_v44  ;;  %v5085_v51 = vadd.f32 %v980_v46, %v5040_v20  ;;  %v982_v52 = vpop.f32.mrb[7].mxu1  ;;  %v1904_v54 = vadd.f32 %v1776_v42, %v5056_v25  ;;  %v2024_v56 = vmul.f32 0.7978846, %v1896_v45 }
 0x16e   :  { %v1529_v58 = vmul.f32 0.044715, %v5078_v57  ;;  %v983_v59 = vadd.f32 %v982_v52, %v5045_v12  ;;  %v1905_v60 = vadd.f32 %v1777_v47, %v5060_v30  ;;  %v2025_v61 = vmul.f32 0.7978846, %v1897_v48 }
 0x16f   :  { %v1656_v62 = vmul.f32 %v1528_v50, %v5074_v44  ;;  %v1536_v63 = vmul.f32 0.044715, %v5085_v51  ;;  %1344 = vmatmul.mubr.bf16.gmra.mrb[112].mxu1 %v4972_v5  ;;  %v2032_v0 = vmul.f32 0.7978846, %v1904_v54  ;;  %4470 = vtanh.f32 %v2024_v56 }
 0x170   :  { %v1657_v1 = vmul.f32 %v1529_v58, %v5078_v57  ;;  %v1537_v2 = vmul.f32 0.044715, %v983_v59  ;;  %1353 = vmatprep.mubr.bf16.mxu1 %v4974_v7  ;;  %v2033_v3 = vmul.f32 0.7978846, %v1905_v60  ;;  %4472 = vtanh.f32 %v2025_v61 }
 0x171   :  { %v1784_v4 = vmul.f32 %v1656_v62, %v5074_v44  ;;  %v1664_v6 = vmul.f32 %v1536_v63, %v5085_v51  ;;  %4474 = vtanh.f32 %v2032_v0  ;;  %v1393_v48 = vmul.f32 0.5, %v5060_v30 }
 0x172   :  { %v1785_v9 = vmul.f32 %v1657_v1, %v5078_v57  ;;  %v1665_v10 = vmul.f32 %v1537_v2, %v983_v59  ;;  %v986_v5 = vpop.f32.mrb[8].mxu1  ;;  %4476 = vtanh.f32 %v2033_v3  ;;  %v5134_v54 = vmul.f32 0.5, %v5078_v57 }
 0x173   :  { %v1792_v11 = vmul.f32 %v1664_v6, %v5085_v51  ;;  %v988_v13 = vpop.f32.mrb[9].mxu1  ;;  %v1912_v23 = vadd.f32 %v1784_v4, %v5074_v44  ;;  %v5110_v26 = vadd.f32 %v986_v5, %v5040_v20  ;;  %v5137_v61 = vmul.f32 0.5, %v983_v59 }
 0x174   :  { %v1793_v7 = vmul.f32 %v1665_v10, %v983_v59  ;;  %v5105_v14 = vadd.f32 %v988_v13, %v5045_v12  ;;  %v990_v29 = vpop.f32.mrb[10].mxu1  ;;  %v1913_v41 = vadd.f32 %v1785_v9, %v5078_v57  ;;  %v1408_v13 = vmul.f32 0.5, %v5085_v51 }
 0x175   :  { %v992_v28 = vpop.f32.mrb[11].mxu1  ;;  %v1920_v31 = vadd.f32 %v1792_v11, %v5085_v51  ;;  %v5122_v37 = vadd.f32 %v990_v29, %v5040_v20  ;;  %v2040_v27 = vmul.f32 0.7978846, %v1912_v23  ;;  %v1544_v47 = vmul.f32 0.044715, %v5110_v26 }
 0x176   :  { %v1545_v33 = vmul.f32 0.044715, %v5105_v14  ;;  %v5119_v34 = vadd.f32 %v992_v28, %v5045_v12  ;;  %v1921_v35 = vadd.f32 %v1793_v7, %v983_v59  ;;  %v2041_v36 = vmul.f32 0.7978846, %v1913_v41  ;;  %v4326_v23 = vld [vmem:[#allocation8 + $0x100] ss:$8 sps:$4 sm:$0xff]  }
 0x177   :  { %1354 = vmatmul.mubr.bf16.gmra.mrb[116].mxu1 %v4978_v22  ;;  %v2048_v42 = vmul.f32 0.7978846, %v1920_v31  ;;  %v1552_v25 = vmul.f32 0.044715, %v5122_v37  ;;  %v1672_v1 = vmul.f32 %v1544_v47, %v5110_v26  ;;  %v1400_v59 = vmul.f32 0.5, %v5074_v44 }
 0x178   :  { %v1673_v55 = vmul.f32 %v1545_v33, %v5105_v14  ;;  %v1553_v18 = vmul.f32 0.044715, %v5119_v34  ;;  %1363 = vmatprep.mubr.bf16.mxu1 %v4980_v24  ;;  %v2049_v45 = vmul.f32 0.7978846, %v1921_v35  ;;  %4478 = vtanh.f32 %v2041_v36 }
 0x179   :  { %v4471_v46 = vpop.eup %4470  ;;  %4480 = vtanh.f32 %v2040_v27  ;;  %v1680_v29 = vmul.f32 %v1552_v25, %v5122_v37  ;;  %v5160_v28 = vmul.f32 0.5, %v5110_v26  ;;  %v1800_v35 = vmul.f32 %v1672_v1, %v5110_v26  ;;  %v4331_v27 = vld [vmem:[#allocation8 + $0x114] ss:$8 sps:$4 sm:$0xff]   ;;  %v4334_v1 = vld [vmem:[#allocation8 + $0x124] ss:$8 sps:$4 sm:$0xff]  }
 0x17a   :  { %v4473_v22 = vpop.eup %4472  ;;  %v1681_v21 = vmul.f32 %v1553_v18, %v5119_v34  ;;  %v996_v50 = vpop.f32.mrb[12].mxu1  ;;  %v2280_v52 = vadd.f32 1.0, %v4471_v46  ;;  %4482 = vtanh.f32 %v2049_v45  ;;  %v1801_v56 = vmul.f32 %v1673_v55, %v5105_v14 }
 0x17b   :  { %v4475_v24 = vpop.eup %4474  ;;  %v998_v58 = vpop.f32.mrb[13].mxu1  ;;  %v2281_v60 = vadd.f32 1.0, %v4473_v22  ;;  %4484 = vtanh.f32 %v2048_v42  ;;  %v5146_v2 = vadd.f32 %v996_v50, %v5040_v20  ;;  %v5173_v47 = vmul.f32 0.5, %v5105_v14 }
 0x17c   :  { %v4477_v30 = vpop.eup %4476  ;;  %v1809_v62 = vmul.f32 %v1681_v21, %v5119_v34  ;;  %v5142_v63 = vadd.f32 %v998_v58, %v5045_v12  ;;  %v1000_v0 = vpop.f32.mrb[14].mxu1  ;;  %v2288_v57 = vadd.f32 1.0, %v4475_v24  ;;  %v2408_v9 = vmul.f32 %v2280_v52, %v1384_v43 }
 0x17d   :  { %v1002_v3 = vpop.f32.mrb[15].mxu1  ;;  %v2289_v4 = vadd.f32 1.0, %v4477_v30  ;;  %v2409_v5 = vmul.f32 %v2281_v60, %v1385_v39  ;;  %v1929_v7 = vadd.f32 %v1801_v56, %v5105_v14  ;;  %v1560_v43 = vmul.f32 0.044715, %v5146_v2  ;;  %v4329_v60 = vld [vmem:[#allocation8 + $0x110] ss:$8 sps:$4 sm:$0xff]  }
 0x17e   :  { %v1561_v6 = vmul.f32 0.044715, %v5142_v63  ;;  %v5151_v8 = vadd.f32 %v1002_v3, %v5045_v12  ;;  %v2416_v10 = vmul.f32 %v2288_v57, %v1392_v49  ;;  %v1937_v44 = vadd.f32 %v1809_v62, %v5119_v34 }
 0x17f   :  { %1364 = vmatmul.mubr.bf16.gmra.mrb[120].mxu1 %v4984_v38  ;;  %v2417_v11 = vmul.f32 %v2289_v4, %v1393_v48  ;;  %v2057_v33 = vmul.f32 0.7978846, %v1929_v7  ;;  %v5167_v39 = vadd.f32 %v1000_v0, %v5040_v20  ;;  %v1808_v49 = vmul.f32 %v1680_v29, %v5122_v37  ;;  %v4332_v7 = vld [vmem:[#allocation8 + $0x120] ss:$8 sps:$4 sm:$0xff]  }
 0x180   :  { %v2536_v41 = vpack.c.bf16 %v2416_v10, %v2408_v9  ;;  %1373 = vmatprep.mubr.bf16.mxu1 %v4986_v40  ;;  %v1569_v38 = vmul.f32 0.044715, %v5151_v8  ;;  %v1689_v36 = vmul.f32 %v1561_v6, %v5142_v63  ;;  %v2065_v42 = vmul.f32 0.7978846, %v1937_v44 }
 0x181   :  { %v2537_v31 = vpack.c.bf16 %v2417_v11, %v2409_v5  ;;  %4486 = vtanh.f32 %v2057_v33  ;;  %v1688_v24 = vmul.f32 %v1560_v43, %v5146_v2  ;;  %v1568_v62 = vmul.f32 0.044715, %v5167_v39 }
 0x182   :  { %v4479_v51 = vpop.eup %4478  ;;  %v1006_v40 = vpop.f32.mrb[16].mxu1  ;;  %4488 = vtanh.f32 %v2065_v42  ;;  %v1697_v56 = vmul.f32 %v1569_v38, %v5151_v8  ;;  %v1817_v25 = vmul.f32 %v1689_v36, %v5142_v63  ;;  %v1928_v9 = vadd.f32 %v1800_v35, %v5110_v26 }
 0x183   :  { %v4481_v55 = vpop.eup %4480  ;;  %v5170_v18 = vadd.f32 %v1006_v40, %v5040_v20  ;;  %v1008_v45 = vpop.f32.mrb[17].mxu1  ;;  %3412 = vmatprep.mubr.bf16.mxu0 %v2537_v31  ;;  %v2297_v46 = vadd.f32 1.0, %v4479_v51  ;;  %v1936_v29 = vadd.f32 %v1808_v49, %v5122_v37  ;;  %v1425_v51 = vmul.f32 0.5, %v5119_v34  ;;  %v4335_v34 = vld [vmem:[#allocation8 + $0x130] ss:$8 sps:$4 sm:$0xff]  }
 0x184   :  { %v4483_v48 = vpop.eup %4482  ;;  %v5177_v22 = vadd.f32 %v1008_v45, %v5045_v12  ;;  %v1010_v21 = vpop.f32.mrb[18].mxu1  ;;  %3413 = vmatmul.mubr.bf16.vlgmr.msra.gmra.mrb[0].mxu0 %v2536_v41  ;;  %v2296_v50 = vadd.f32 1.0, %v4481_v55  ;;  %v1825_v41 = vmul.f32 %v1697_v56, %v5151_v8  ;;  %v2056_v43 = vmul.f32 0.7978846, %v1928_v9 }
 0x185   :  { %v4485_v52 = vpop.eup %4484  ;;  %v5182_v58 = vadd.f32 %v1010_v21, %v5040_v20  ;;  %v1012_v14 = vpop.f32.mrb[19].mxu1  ;;  %3494 = vmatpush1.bf16.msra.mxu0 %v4326_v23  ;;  %v2305_v30 = vadd.f32 1.0, %v4483_v48  ;;  %v1576_v3 = vmul.f32 0.044715, %v5170_v18  ;;  %v2425_v4 = vmul.f32 %v2297_v46, %v5134_v54 }
 0x186   :  { %v5187_v0 = vadd.f32 %v1012_v14, %v5045_v12  ;;  %3495 = vmatprep.subr.bf16.mxu0 %v4331_v27  ;;  %v2304_v57 = vadd.f32 1.0, %v4485_v52  ;;  %v1577_v10 = vmul.f32 0.044715, %v5177_v22  ;;  %v2424_v5 = vmul.f32 %v2296_v50, %v1400_v59  ;;  %v4340_v14 = vld [vmem:[#allocation8 + $0x144] ss:$8 sps:$4 sm:$0xff]  }
 0x187   :  { %1374 = vmatmul.mubr.bf16.gmra.mrb[124].mxu1 %v4990_v53  ;;  %v2433_v6 = vmul.f32 %v2305_v30, %v5137_v61  ;;  %v1584_v23 = vmul.f32 0.044715, %v5182_v58  ;;  %v4337_v53 = vld [vmem:[#allocation8 + $0x134] ss:$8 sps:$4 sm:$0xff]   ;;  %v1696_v54 = vmul.f32 %v1568_v62, %v5167_v39  ;;  %v2064_v59 = vmul.f32 0.7978846, %v1936_v29 }
 0x188   :  { %v2432_v11 = vmul.f32 %v2304_v57, %v1408_v13  ;;  %v1585_v61 = vmul.f32 0.044715, %v5187_v0  ;;  %v1704_v13 = vmul.f32 %v1576_v3, %v5170_v18  ;;  %4490 = vtanh.f32 %v2056_v43  ;;  %v4343_v29 = vld [vmem:[#allocation8 + $0x154] ss:$8 sps:$4 sm:$0xff]  }
 0x189   :  { %3496 = vmatpush1.bf16.msra.mxu0 %v4329_v60  ;;  %v2545_v44 = vpack.c.bf16 %v2433_v6, %v2425_v4  ;;  %v1816_v35 = vmul.f32 %v1688_v24, %v5146_v2  ;;  %v1705_v36 = vmul.f32 %v1577_v10, %v5177_v22  ;;  %4492 = vtanh.f32 %v2064_v59  ;;  %v4338_v10 = vld [vmem:[#allocation8 + $0x140] ss:$8 sps:$4 sm:$0xff]  }
 0x18a   :  { %v1016_v26 = vpop.f32.mrb[20].mxu1  ;;  %v2544_v38 = vpack.c.bf16 %v2432_v11, %v2424_v5  ;;  %3497 = vmatprep.subr.bf16.mxu0 %v4334_v1  ;;  %v1712_v55 = vmul.f32 %v1584_v23, %v5182_v58  ;;  %v1945_v48 = vadd.f32 %v1817_v25, %v5142_v63  ;;  %v1953_v49 = vadd.f32 %v1825_v41, %v5151_v8 }
 0x18b   :  { %v5202_v31 = vadd.f32 %v1016_v26, %v5040_v20  ;;  %v1018_v33 = vpop.f32.mrb[21].mxu1  ;;  %3422 = vmatprep.mubr.bf16.mxu0 %v2545_v44  ;;  %v4487_v42 = vpop.eup %4486  ;;  %v1824_v50 = vmul.f32 %v1696_v54, %v5167_v39  ;;  %v1713_v52 = vmul.f32 %v1585_v61, %v5187_v0  ;;  %v1424_v56 = vmul.f32 0.5, %v5122_v37 }
 0x18c   :  { %v5208_v40 = vadd.f32 %v1018_v33, %v5045_v12  ;;  %v1020_v27 = vpop.f32.mrb[22].mxu1  ;;  %3423 = vmatmul.mubr.bf16.gmra.mrb[4].mxu0 %v2544_v38  ;;  %v4489_v21 = vpop.eup %4488  ;;  %v2313_v24 = vadd.f32 1.0, %v4487_v42  ;;  %v5220_v60 = vmul.f32 %v1704_v13, %v5170_v18  ;;  %v2073_v57 = vmul.f32 0.7978846, %v1945_v48 }
 0x18d   :  { %v5212_v45 = vadd.f32 %v1020_v27, %v5040_v20  ;;  %v1022_v46 = vpop.f32.mrb[23].mxu1  ;;  %3498 = vmatpush1.bf16.msra.mxu0 %v4332_v7  ;;  %v1592_v30 = vmul.f32 0.044715, %v5202_v31  ;;  %v2321_v62 = vadd.f32 1.0, %v4489_v21  ;;  %v1833_v25 = vmul.f32 %v1705_v36, %v5177_v22 }
 0x18e   :  { %3499 = vmatprep.subr.bf16.mxu0 %v4337_v53  ;;  %v1593_v1 = vmul.f32 0.044715, %v5208_v40  ;;  %v5226_v3 = vadd.f32 %v1022_v46, %v5045_v12  ;;  %v2081_v4 = vmul.f32 0.7978846, %v1953_v49  ;;  %v5229_v6 = vmul.f32 %v1712_v55, %v5182_v58  ;;  %v4346_v49 = vld [vmem:[#allocation8 + $0x164] ss:$8 sps:$4 sm:$0xff]  }
 0x18f   :  { %v2441_v37 = vmul.f32 %v2313_v24, %v5173_v47  ;;  %v2449_v9 = vmul.f32 %v2321_v62, %v1425_v51  ;;  %4494 = vtanh.f32 %v2073_v57  ;;  %v1841_v5 = vmul.f32 %v1713_v52, %v5187_v0 }
 0x190   :  { %v1600_v11 = vmul.f32 0.044715, %v5212_v45  ;;  %v5235_v41 = vmul.f32 0.5, %v5142_v63  ;;  %4496 = vtanh.f32 %v2081_v4  ;;  %v1720_v23 = vmul.f32 %v1592_v30, %v5202_v31  ;;  %v4341_v63 = vld [vmem:[#allocation8 + $0x150] ss:$8 sps:$4 sm:$0xff]  }
 0x191   :  { %3500 = vmatpush1.bf16.msra.mxu0 %v4335_v34  ;;  %v2553_v53 = vpack.c.bf16 %v2449_v9, %v2441_v37  ;;  %v1944_v43 = vadd.f32 %v1816_v35, %v5146_v2  ;;  %v1721_v54 = vmul.f32 %v1593_v1, %v5208_v40  ;;  %v1601_v61 = vmul.f32 0.044715, %v5226_v3 }
 0x192   :  { %v1026_v7 = vpop.f32.mrb[24].mxu1  ;;  %3501 = vmatprep.subr.bf16.mxu0 %v4340_v14  ;;  %v1952_v59 = vadd.f32 %v1824_v50, %v5167_v39  ;;  %v4491_v13 = vpop.eup %4490  ;;  %v1441_v35 = vmul.f32 0.5, %v5151_v8  ;;  %v5253_v36 = vmul.f32 0.5, %v5146_v2  ;;  %v1728_v55 = vmul.f32 %v1600_v11, %v5212_v45 }
 0x193   :  { %v5239_v44 = vadd.f32 %v1026_v7, %v5040_v20  ;;  %v1028_v47 = vpop.f32.mrb[25].mxu1  ;;  %3432 = vmatprep.mubr.bf16.mxu0 %v2553_v53  ;;  %v2072_v27 = vmul.f32 0.7978846, %v1944_v43  ;;  %v4493_v42 = vpop.eup %4492  ;;  %v2312_v46 = vadd.f32 1.0, %v4491_v13  ;;  %v5260_v21 = vmul.f32 %v1720_v23, %v5202_v31  ;;  %v4349_v23 = vld [vmem:[#allocation8 + $0x174] ss:$8 sps:$4 sm:$0xff]  }
 0x194   :  { %v5245_v26 = vadd.f32 %v1028_v47, %v5045_v12  ;;  %v1030_v38 = vpop.f32.mrb[26].mxu1  ;;  %v2080_v48 = vmul.f32 0.7978846, %v1952_v59  ;;  %v2320_v8 = vadd.f32 1.0, %v4493_v42  ;;  %v5264_v2 = vmul.f32 %v1721_v54, %v5208_v40 }
 0x195   :  { %v5249_v33 = vadd.f32 %v1030_v38, %v5040_v20  ;;  %v1032_v51 = vpop.f32.mrb[27].mxu1  ;;  %3502 = vmatpush1.bf16.msra.mxu0 %v4338_v10  ;;  %v1608_v50 = vmul.f32 0.044715, %v5239_v44  ;;  %4498 = vtanh.f32 %v2072_v27  ;;  %v1729_v52 = vmul.f32 %v1601_v61, %v5226_v3  ;;  %v4344_v10 = vld [vmem:[#allocation8 + $0x160] ss:$8 sps:$4 sm:$0xff]  }
 0x196   :  { %v5257_v34 = vadd.f32 %v1032_v51, %v5045_v12  ;;  %3503 = vmatprep.subr.bf16.mxu0 %v4343_v29  ;;  %v1609_v24 = vmul.f32 0.044715, %v5245_v26  ;;  %4500 = vtanh.f32 %v2080_v48  ;;  %v2440_v30 = vmul.f32 %v2312_v46, %v5160_v28 }
 0x197   :  { %v1616_v14 = vmul.f32 0.044715, %v5249_v33  ;;  %v2448_v62 = vmul.f32 %v2320_v8, %v1424_v56  ;;  %v1961_v57 = vadd.f32 %v1833_v25, %v5177_v22  ;;  %v5272_v1 = vmul.f32 %v1728_v55, %v5212_v45  ;;  %v4347_v55 = vld [vmem:[#allocation8 + $0x170] ss:$8 sps:$4 sm:$0xff]  }
 0x198   :  { %v1617_v4 = vmul.f32 0.044715, %v5257_v34  ;;  %v5276_v9 = vmul.f32 0.5, %v5167_v39  ;;  %v1969_v11 = vadd.f32 %v1841_v5, %v5187_v0  ;;  %v1736_v28 = vmul.f32 %v1608_v50, %v5239_v44  ;;  %v4352_v50 = vld [vmem:[#allocation8 + $0x184] ss:$8 sps:$4 sm:$0xff]  }
 0x199   :  { %3504 = vmatpush1.bf16.msra.mxu0 %v4341_v63  ;;  %v4495_v7 = vpop.eup %4494  ;;  %v2552_v56 = vpack.c.bf16 %v2448_v62, %v2440_v30  ;;  %v2089_v47 = vmul.f32 0.7978846, %v1961_v57  ;;  %v1737_v43 = vmul.f32 %v1609_v24, %v5245_v26  ;;  %v1744_v5 = vmul.f32 %v1616_v14, %v5249_v33  ;;  %v4350_v62 = vld [vmem:[#allocation8 + $0x180] ss:$8 sps:$4 sm:$0xff]  }
 0x19a   :  { %v1036_v37 = vpop.f32.mrb[28].mxu1  ;;  %3505 = vmatprep.subr.bf16.mxu0 %v4346_v49  ;;  %v4497_v53 = vpop.eup %4496  ;;  %v2329_v54 = vadd.f32 1.0, %v4495_v7  ;;  %v2097_v38 = vmul.f32 0.7978846, %v1969_v11  ;;  %v5292_v51 = vmul.f32 %v1729_v52, %v5226_v3  ;;  %v1745_v27 = vmul.f32 %v1617_v4, %v5257_v34 }
 0x19b   :  { %v5281_v29 = vadd.f32 %v1036_v37, %v5040_v20  ;;  %v1038_v25 = vpop.f32.mrb[29].mxu1  ;;  %3433 = vmatmul.mubr.bf16.gmra.mrb[8].mxu0 %v2552_v56  ;;  %v2337_v63 = vadd.f32 1.0, %v4497_v53  ;;  %4502 = vtanh.f32 %v2089_v47  ;;  %v5304_v8 = vmul.f32 %v1736_v28, %v5239_v44  ;;  %v4355_v56 = vld [vmem:[#allocation8 + $0x194] ss:$8 sps:$4 sm:$0xff]  }
 0x19c   :  { %v5285_v39 = vadd.f32 %v1038_v25, %v5045_v12  ;;  %v1040_v61 = vpop.f32.mrb[30].mxu1  ;;  %4504 = vtanh.f32 %v2097_v38  ;;  %v2457_v48 = vmul.f32 %v2329_v54, %v5235_v41  ;;  %v5307_v52 = vmul.f32 0.5, %v5187_v0 }
 0x19d   :  { %v5289_v59 = vadd.f32 %v1040_v61, %v5040_v20  ;;  %v1042_v13 = vpop.f32.mrb[31].mxu1  ;;  %3506 = vmatpush1.bf16.msra.mxu0 %v4344_v10  ;;  %v1624_v46 = vmul.f32 0.044715, %v5281_v29  ;;  %v2465_v49 = vmul.f32 %v2337_v63, %v1441_v35  ;;  %v5301_v20 = vmul.f32 0.5, %v5177_v22 }
 0x19e   :  { %v5296_v42 = vadd.f32 %v1042_v13, %v5045_v12  ;;  %3507 = vmatprep.subr.bf16.mxu0 %v4349_v23  ;;  %v1960_v12 = vadd.f32 %v5220_v60, %v5170_v18  ;;  %v1968_v24 = vadd.f32 %v5229_v6, %v5182_v58  ;;  %v5314_v41 = vmul.f32 %v1737_v43, %v5245_v26 }
 0x19f   :  { %v4499_v14 = vpop.eup %4498  ;;  %v5317_v22 = vmul.f32 %v1744_v5, %v5249_v33  ;;  %v2561_v35 = vpack.c.bf16 %v2465_v49, %v2457_v48  ;;  %v5320_v30 = vmul.f32 0.5, %v5170_v18  ;;  %v5323_v57 = vmul.f32 %v1745_v27, %v5257_v34  ;;  %v4358_v49 = vld [vmem:[#allocation8 + $0x1a4] ss:$8 sps:$4 sm:$0xff]  }
 0x1a0   :  { %v4501_v0 = vpop.eup %4500  ;;  %v1625_v60 = vmul.f32 0.044715, %v5285_v39  ;;  %v2328_v4 = vadd.f32 1.0, %v4499_v14  ;;  %v2088_v37 = vmul.f32 0.7978846, %v1960_v12  ;;  %v1752_v10 = vmul.f32 %v1624_v46, %v5281_v29 }
 0x1a1   :  { %3508 = vmatpush1.bf16.msra.mxu0 %v4347_v55  ;;  %3442 = vmatprep.mubr.bf16.mxu0 %v2561_v35  ;;  %v2336_v11 = vadd.f32 1.0, %v4501_v0  ;;  %v2096_v28 = vmul.f32 0.7978846, %v1968_v24  ;;  %v1632_v25 = vmul.f32 0.044715, %v5289_v59  ;;  %v5335_v53 = vmul.f32 0.5, %v5182_v58 }
 0x1a2   :  { %v1079_v6 = vpop.f32.mrb[32].mxu1  ;;  %3509 = vmatprep.subr.bf16.mxu0 %v4352_v50  ;;  %4506 = vtanh.f32 %v2088_v37  ;;  %v2456_v43 = vmul.f32 %v2328_v4, %v5253_v36  ;;  %v1753_v63 = vmul.f32 %v1625_v60, %v5285_v39  ;;  %v1633_v13 = vmul.f32 0.044715, %v5296_v42  ;;  %v4353_v58 = vld [vmem:[#allocation8 + $0x190] ss:$8 sps:$4 sm:$0xff]  }
 0x1a3   :  { %v5328_v7 = vadd.f32 %v1079_v6, %v5102_v15  ;;  %v1081_v18 = vpop.f32.mrb[33].mxu1  ;;  %v2464_v54 = vmul.f32 %v2336_v11, %v5276_v9  ;;  %4508 = vtanh.f32 %v2096_v28  ;;  %v5349_v36 = vmul.f32 %v1752_v10, %v5281_v29 }
 0x1a4   :  { %v5332_v23 = vadd.f32 %v1081_v18, %v5115_v32  ;;  %v1083_v47 = vpop.f32.mrb[34].mxu1  ;;  %v1977_v35 = vadd.f32 %v5264_v2, %v5208_v40  ;;  %v1985_v4 = vadd.f32 %v5292_v51, %v5226_v3  ;;  %v1760_v6 = vmul.f32 %v1632_v25, %v5289_v59  ;;  %v4356_v2 = vld [vmem:[#allocation8 + $0x1a0] ss:$8 sps:$4 sm:$0xff]   ;;  %v4361_v25 = vld [vmem:[#allocation8 + $0x1b4] ss:$8 sps:$4 sm:$0xff]  }
 0x1a5   :  { %v1514_v61 = vmul.f32 0.044715, %v5328_v7  ;;  %v5341_v38 = vadd.f32 %v1083_v47, %v5102_v15  ;;  %v1085_v5 = vpop.f32.mrb[35].mxu1  ;;  %3510 = vmatpush1.bf16.msra.mxu0 %v4350_v62  ;;  %v4503_v55 = vpop.eup %4502  ;;  %v2560_v9 = vpack.c.bf16 %v2464_v54, %v2456_v43  ;;  %v1761_v37 = vmul.f32 %v1633_v13, %v5296_v42 }
 0x1a6   :  { %v5346_v27 = vadd.f32 %v1085_v5, %v5115_v32  ;;  %3511 = vmatprep.subr.bf16.mxu0 %v4355_v56  ;;  %v4505_v50 = vpop.eup %4504  ;;  %v1515_v12 = vmul.f32 0.044715, %v5332_v23  ;;  %v2345_v24 = vadd.f32 1.0, %v4503_v55  ;;  %v5364_v11 = vmul.f32 0.5, %v5208_v40 }
 0x1a7   :  { %v1642_v46 = vmul.f32 %v1514_v61, %v5328_v7  ;;  %v1522_v48 = vmul.f32 0.044715, %v5341_v38  ;;  %3443 = vmatmul.mubr.bf16.gmra.mrb[12].mxu0 %v2560_v9  ;;  %v2353_v0 = vadd.f32 1.0, %v4505_v50  ;;  %v2105_v18 = vmul.f32 0.7978846, %v1977_v35 }
 0x1a8   :  { %v1523_v14 = vmul.f32 0.044715, %v5346_v27  ;;  %v2473_v28 = vmul.f32 %v2345_v24, %v5301_v20  ;;  %v5373_v54 = vmul.f32 %v1753_v63, %v5285_v39  ;;  %v1643_v40 = vmul.f32 %v1515_v12, %v5332_v23  ;;  %v4364_v50 = vld [vmem:[#allocation8 + $0x1c4] ss:$8 sps:$4 sm:$0xff]  }
 0x1a9   :  { %v1770_v62 = vmul.f32 %v1642_v46, %v5328_v7  ;;  %v1650_v60 = vmul.f32 %v1522_v48, %v5341_v38  ;;  %3512 = vmatpush1.bf16.msra.mxu0 %v4353_v58  ;;  %v2481_v56 = vmul.f32 %v2353_v0, %v5307_v52  ;;  %v2113_v61 = vmul.f32 0.7978846, %v1985_v4 }
 0x1aa   :  { %v1089_v10 = vpop.f32.mrb[36].mxu1  ;;  %3513 = vmatprep.subr.bf16.mxu0 %v4358_v49  ;;  %4510 = vtanh.f32 %v2105_v18  ;;  %v1651_v52 = vmul.f32 %v1523_v14, %v5346_v27  ;;  %v5382_v46 = vmul.f32 %v1760_v6, %v5289_v59  ;;  %v5385_v63 = vmul.f32 %v1761_v37, %v5296_v42  ;;  %v4359_v49 = vld [vmem:[#allocation8 + $0x1b0] ss:$8 sps:$4 sm:$0xff]   ;;  %v4362_v6 = vld [vmem:[#allocation8 + $0x1c0] ss:$8 sps:$4 sm:$0xff]  }
 0x1ab   :  { %v1778_v47 = vmul.f32 %v1650_v60, %v5341_v38  ;;  %v5370_v43 = vadd.f32 %v1089_v10, %v5102_v15  ;;  %v1091_v51 = vpop.f32.mrb[37].mxu1  ;;  %v1898_v20 = vadd.f32 %v1770_v62, %v5328_v7  ;;  %v2569_v13 = vpack.c.bf16 %v2481_v56, %v2473_v28 }
 0x1ac   :  { %v1093_v5 = vpop.f32.mrb[38].mxu1  ;;  %v5379_v58 = vadd.f32 %v1091_v51, %v5115_v32  ;;  %v4507_v9 = vpop.eup %4506  ;;  %4512 = vtanh.f32 %v2113_v61  ;;  %v5389_v12 = vmul.f32 0.5, %v5328_v7  ;;  %v5393_v35 = vmul.f32 0.5, %v5226_v3 }
 0x1ad   :  { %v1095_v55 = vpop.f32.mrb[39].mxu1  ;;  %v1906_v48 = vadd.f32 %v1778_v47, %v5341_v38  ;;  %3514 = vmatpush1.bf16.msra.mxu0 %v4356_v2  ;;  %3452 = vmatprep.mubr.bf16.mxu0 %v2569_v13  ;;  %v2344_v24 = vadd.f32 1.0, %v4507_v9  ;;  %v1530_v14 = vmul.f32 0.044715, %v5370_v43  ;;  %v4509_v62 = vpop.eup %4508  ;;  %v5396_v0 = vmul.f32 %v1643_v40, %v5332_v23 }
 0x1ae   :  { %3515 = vmatprep.subr.bf16.mxu0 %v4361_v25  ;;  %v5399_v60 = vmul.f32 0.5, %v5341_v38  ;;  %v5402_v4 = vadd.f32 %v1093_v5, %v5102_v15  ;;  %v1976_v7 = vadd.f32 %v5260_v21, %v5202_v31  ;;  %v2026_v37 = vmul.f32 0.7978846, %v1898_v20  ;;  %v4367_v5 = vld [vmem:[#allocation8 + $0x1d4] ss:$8 sps:$4 sm:$0xff]  }
 0x1af   :  { %v2352_v10 = vadd.f32 1.0, %v4509_v62  ;;  %v5407_v3 = vmul.f32 %v1651_v52, %v5346_v27  ;;  %v1531_v18 = vmul.f32 0.044715, %v5379_v58  ;;  %v2034_v2 = vmul.f32 0.7978846, %v1906_v48 }
 0x1b0   :  { %v5411_v28 = vmul.f32 0.5, %v5202_v31  ;;  %v1984_v38 = vadd.f32 %v5272_v1, %v5212_v45  ;;  %v2104_v56 = vmul.f32 0.7978846, %v1976_v7  ;;  %v2472_v21 = vmul.f32 %v2344_v24, %v5320_v30  ;;  %v4365_v24 = vld [vmem:[#allocation8 + $0x1d0] ss:$8 sps:$4 sm:$0xff]  }
 0x1b1   :  { %3516 = vmatpush1.bf16.msra.mxu0 %v4359_v49  ;;  %v2480_v51 = vmul.f32 %v2352_v10, %v5335_v53  ;;  %v1658_v25 = vmul.f32 %v1530_v14, %v5370_v43  ;;  %v5419_v40 = vadd.f32 %v1095_v55, %v5115_v32  ;;  %v1538_v31 = vmul.f32 0.044715, %v5402_v4 }
 0x1b2   :  { %v1099_v47 = vpop.f32.mrb[40].mxu1  ;;  %3517 = vmatprep.subr.bf16.mxu0 %v4364_v50  ;;  %v2112_v20 = vmul.f32 0.7978846, %v1984_v38  ;;  %4514 = vtanh.f32 %v2104_v56  ;;  %v1659_v53 = vmul.f32 %v1531_v18, %v5379_v58  ;;  %v1993_v49 = vadd.f32 %v5314_v41, %v5245_v26 }
 0x1b3   :  { %v1101_v61 = vpop.f32.mrb[41].mxu1  ;;  %v5423_v1 = vadd.f32 %v1099_v47, %v5102_v15  ;;  %4516 = vtanh.f32 %v2026_v37  ;;  %v2568_v30 = vpack.c.bf16 %v2480_v51, %v2472_v21  ;;  %v1539_v48 = vmul.f32 0.044715, %v5419_v40  ;;  %v4370_v37 = vld [vmem:[#allocation8 + $0x1e4] ss:$8 sps:$4 sm:$0xff]  }
 0x1b4   :  { %v1103_v13 = vpop.f32.mrb[42].mxu1  ;;  %v5427_v52 = vadd.f32 %v1101_v61, %v5115_v32  ;;  %v4511_v9 = vpop.eup %4510  ;;  %4518 = vtanh.f32 %v2112_v20  ;;  %v2001_v50 = vadd.f32 %v5323_v57, %v5257_v34  ;;  %v5435_v14 = vmul.f32 %v1658_v25, %v5370_v43  ;;  %v4368_v61 = vld [vmem:[#allocation8 + $0x1e0] ss:$8 sps:$4 sm:$0xff]  }
 0x1b5   :  { %v1105_v55 = vpop.f32.mrb[43].mxu1  ;;  %3518 = vmatpush1.bf16.msra.mxu0 %v4362_v6  ;;  %4520 = vtanh.f32 %v2034_v2  ;;  %v2361_v62 = vadd.f32 1.0, %v4511_v9  ;;  %v5438_v7 = vmul.f32 0.5, %v5212_v45  ;;  %v1666_v18 = vmul.f32 %v1538_v31, %v5402_v4 }
 0x1b6   :  { %3453 = vmatmul.mubr.bf16.gmra.mrb[16].mxu0 %v2568_v30  ;;  %3519 = vmatprep.subr.bf16.mxu0 %v4367_v5  ;;  %v4513_v10 = vpop.eup %4512  ;;  %v1546_v41 = vmul.f32 0.044715, %v5423_v1  ;;  %v2121_v38 = vmul.f32 0.7978846, %v1993_v49  ;;  %v2129_v57 = vmul.f32 0.7978846, %v2001_v50  ;;  %v5443_v6 = vmul.f32 %v1659_v53, %v5379_v58 }
 0x1b7   :  { %v2369_v2 = vadd.f32 1.0, %v4513_v10  ;;  %v1547_v56 = vmul.f32 0.044715, %v5427_v52  ;;  %v5447_v47 = vmul.f32 0.5, %v5245_v26  ;;  %v2489_v45 = vmul.f32 %v2361_v62, %v5364_v11  ;;  %v4373_v11 = vld [vmem:[#allocation8 + $0x1f4] ss:$8 sps:$4 sm:$0xff]  }
 0x1b8   :  { %v1667_v21 = vmul.f32 %v1539_v48, %v5419_v40  ;;  %4522 = vtanh.f32 %v2121_v38  ;;  %v5452_v51 = vadd.f32 %v1103_v13, %v5102_v15  ;;  %v1992_v31 = vadd.f32 %v5304_v8, %v5239_v44 }
 0x1b9   :  { %3520 = vmatpush1.bf16.msra.mxu0 %v4365_v24  ;;  %v2497_v5 = vmul.f32 %v2369_v2, %v5393_v35  ;;  %4524 = vtanh.f32 %v2129_v57  ;;  %v2000_v26 = vadd.f32 %v5317_v22, %v5249_v33  ;;  %v5460_v30 = vmul.f32 %v1666_v18, %v5402_v4  ;;  %v4371_v18 = vld [vmem:[#allocation8 + $0x1f0] ss:$8 sps:$4 sm:$0xff]   ;;  %v4376_v2 = vld [vmem:[#allocation8 + $0x204] ss:$8 sps:$4 sm:$0xff]  }
 0x1ba   :  { %v1109_v25 = vpop.f32.mrb[44].mxu1  ;;  %3521 = vmatprep.subr.bf16.mxu0 %v4370_v37  ;;  %v1674_v13 = vmul.f32 %v1546_v41, %v5423_v1  ;;  %v5464_v53 = vadd.f32 %v1105_v55, %v5115_v32  ;;  %v1675_v8 = vmul.f32 %v1547_v56, %v5427_v52  ;;  %v2120_v49 = vmul.f32 0.7978846, %v1992_v31 }
 0x1bb   :  { %v1111_v20 = vpop.f32.mrb[45].mxu1  ;;  %v5467_v35 = vadd.f32 %v1109_v25, %v5102_v15  ;;  %v2577_v48 = vpack.c.bf16 %v2497_v5, %v2489_v45  ;;  %v2128_v22 = vmul.f32 0.7978846, %v2000_v26  ;;  %v1489_v62 = vmul.f32 0.5, %v5257_v34 }
 0x1bc   :  { %v1113_v9 = vpop.f32.mrb[46].mxu1  ;;  %v4515_v24 = vpop.eup %4514  ;;  %v1554_v37 = vmul.f32 0.044715, %v5452_v51  ;;  %v5473_v10 = vmul.f32 0.5, %v5239_v44  ;;  %v5476_v55 = vadd.f32 %v1111_v20, %v5115_v32  ;;  %v5481_v57 = vmul.f32 %v1667_v21, %v5419_v40 }
 0x1bd   :  { %v1115_v50 = vpop.f32.mrb[47].mxu1  ;;  %3522 = vmatpush1.bf16.msra.mxu0 %v4368_v61  ;;  %v5478_v41 = vpop.eup %4516  ;;  %3462 = vmatprep.mubr.bf16.mxu0 %v2577_v48  ;;  %v2360_v38 = vadd.f32 1.0, %v4515_v24  ;;  %4526 = vtanh.f32 %v2120_v49  ;;  %v2009_v34 = vadd.f32 %v5373_v54, %v5285_v39  ;;  %v5486_v56 = vmul.f32 %v1674_v13, %v5423_v1 }
 0x1be   :  { %3523 = vmatprep.subr.bf16.mxu0 %v4373_v11  ;;  %v4519_v44 = vpop.eup %4518  ;;  %4528 = vtanh.f32 %v2128_v22  ;;  %v1555_v45 = vmul.f32 0.044715, %v5464_v53  ;;  %v1562_v25 = vmul.f32 0.044715, %v5467_v35  ;;  %v5493_v21 = vmul.f32 %v1675_v8, %v5427_v52 }
 0x1bf   :  { %v5490_v61 = vpop.eup %4520  ;;  %v2368_v5 = vadd.f32 1.0, %v4519_v44  ;;  %v2017_v54 = vadd.f32 %v5385_v63, %v5296_v42  ;;  %v2137_v31 = vmul.f32 0.7978846, %v2009_v34  ;;  %v1682_v26 = vmul.f32 %v1554_v37, %v5452_v51 }
 0x1c0   :  { %v1488_v20 = vmul.f32 0.5, %v5249_v33  ;;  %v1563_v11 = vmul.f32 0.044715, %v5476_v55  ;;  %v5501_v13 = vadd.f32 %v1113_v9, %v5102_v15  ;;  %v2488_v49 = vmul.f32 %v2360_v38, %v5411_v28 }
 0x1c1   :  { %3524 = vmatpush1.bf16.msra.mxu0 %v4371_v18  ;;  %v2496_v8 = vmul.f32 %v2368_v5, %v5438_v7  ;;  %v2145_v22 = vmul.f32 0.7978846, %v2017_v54  ;;  %4530 = vtanh.f32 %v2137_v31  ;;  %v1683_v37 = vmul.f32 %v1555_v45, %v5464_v53 }
 0x1c2   :  { %v1119_v48 = vpop.f32.mrb[48].mxu1  ;;  %3606 = vmatprep.subr.bf16.mxu0 %v4376_v2  ;;  %v4523_v63 = vpop.eup %4522  ;;  %v1690_v33 = vmul.f32 %v1562_v25, %v5467_v35  ;;  %v2008_v34 = vadd.f32 %v5349_v36, %v5281_v29  ;;  %v2016_v9 = vadd.f32 %v5382_v46, %v5289_v59  ;;  %v1570_v7 = vmul.f32 0.044715, %v5501_v13 }
 0x1c3   :  { %v1121_v24 = vpop.f32.mrb[49].mxu1  ;;  %v4525_v44 = vpop.eup %4524  ;;  %v2576_v28 = vpack.c.bf16 %v2496_v8, %v2488_v49  ;;  %v2377_v38 = vadd.f32 1.0, %v4523_v63  ;;  %4532 = vtanh.f32 %v2145_v22  ;;  %v1497_v54 = vmul.f32 0.5, %v5285_v39 }
 0x1c4   :  { %v1123_v18 = vpop.f32.mrb[50].mxu1  ;;  %v2385_v2 = vadd.f32 1.0, %v4525_v44  ;;  %v2136_v45 = vmul.f32 0.7978846, %v2008_v34  ;;  %v2144_v31 = vmul.f32 0.7978846, %v2016_v9  ;;  %v5514_v25 = vmul.f32 %v1682_v26, %v5452_v51 }
 0x1c5   :  { %v1125_v5 = vpop.f32.mrb[51].mxu1  ;;  %3463 = vmatmul.mubr.bf16.gmra.mrb[20].mxu0 %v2576_v28  ;;  %v1691_v36 = vmul.f32 %v1563_v11, %v5476_v55  ;;  %v1505_v46 = vmul.f32 0.5, %v5296_v42  ;;  %v5519_v49 = vadd.f32 %v1115_v50, %v5115_v32  ;;  %v2505_v8 = vmul.f32 %v2377_v38, %v5447_v47 }
 0x1c6   :  { %v2513_v22 = vmul.f32 %v2385_v2, %v1489_v62  ;;  %4534 = vtanh.f32 %v2136_v45  ;;  %v5523_v63 = vadd.f32 %v1119_v48, %v5102_v15  ;;  %v5526_v34 = vmul.f32 %v1683_v37, %v5464_v53 }
 0x1c7   :  { %v4527_v39 = vpop.eup %4526  ;;  %v5529_v26 = vmul.f32 %v1690_v33, %v5467_v35  ;;  %4536 = vtanh.f32 %v2144_v31  ;;  %v5532_v42 = vadd.f32 %v1121_v24, %v5115_v32  ;;  %v1698_v47 = vmul.f32 %v1570_v7, %v5501_v13 }
 0x1c8   :  { %v4529_v50 = vpop.eup %4528  ;;  %v2585_v11 = vpack.c.bf16 %v2513_v22, %v2505_v8  ;;  %v2376_v9 = vadd.f32 1.0, %v4527_v39  ;;  %v1899_v62 = vadd.f32 %v5396_v0, %v5332_v23  ;;  %v5538_v37 = vmul.f32 %v1691_v36, %v5476_v55 }
 0x1c9   :  { %v2384_v44 = vadd.f32 1.0, %v4529_v50  ;;  %v1496_v33 = vmul.f32 0.5, %v5281_v29  ;;  %v1571_v28 = vmul.f32 0.044715, %v5519_v49  ;;  %v1504_v24 = vmul.f32 0.5, %v5289_v59 }
 0x1ca   :  { %v1129_v48 = vpop.f32.mrb[52].mxu1  ;;  %3472 = vmatprep.mubr.bf16.mxu0 %v2585_v11  ;;  %v1578_v2 = vmul.f32 0.044715, %v5523_v63  ;;  %v1907_v7 = vadd.f32 %v5407_v3, %v5346_v27  ;;  %v2027_v45 = vmul.f32 0.7978846, %v1899_v62  ;;  %v2504_v8 = vmul.f32 %v2376_v9, %v5473_v10 }
 0x1cb   :  { %v1131_v38 = vpop.f32.mrb[53].mxu1  ;;  %v4531_v31 = vpop.eup %4530  ;;  %v2512_v36 = vmul.f32 %v2384_v44, %v1488_v20  ;;  %v1579_v22 = vmul.f32 0.044715, %v5532_v42  ;;  %v2282_v29 = vadd.f32 1.0, %v5478_v41  ;;  %v5550_v11 = vmul.f32 %v1698_v47, %v5501_v13 }
 0x1cc   :  { %v1133_v0 = vpop.f32.mrb[54].mxu1  ;;  %v2393_v50 = vadd.f32 1.0, %v4531_v31  ;;  %v2035_v59 = vmul.f32 0.7978846, %v1907_v7  ;;  %4538 = vtanh.f32 %v2027_v45  ;;  %v5553_v3 = vadd.f32 %v1123_v18, %v5102_v15 }
 0x1cd   :  { %v1135_v39 = vpop.f32.mrb[55].mxu1  ;;  %v4533_v19 = vpop.eup %4532  ;;  %v2584_v17 = vpack.c.bf16 %v2512_v36, %v2504_v8  ;;  %v2290_v62 = vadd.f32 1.0, %v5490_v61  ;;  %v5557_v10 = vadd.f32 %v1125_v5, %v5115_v32  ;;  %v1699_v41 = vmul.f32 %v1571_v28, %v5519_v49 }
 0x1ce   :  { %v2401_v20 = vadd.f32 1.0, %v4533_v19  ;;  %v5561_v9 = vmul.f32 0.5, %v5332_v23  ;;  %4540 = vtanh.f32 %v2035_v59  ;;  %v1706_v47 = vmul.f32 %v1578_v2, %v5523_v63 }
 0x1cf   :  { %3473 = vmatmul.mubr.bf16.gmra.mrb[24].mxu0 %v2584_v17  ;;  %v1707_v44 = vmul.f32 %v1579_v22, %v5532_v42  ;;  %v5566_v18 = vmul.f32 %v2282_v29, %v5389_v12  ;;  %v5569_v61 = vmul.f32 %v2290_v62, %v5399_v60  ;;  %v2521_v7 = vmul.f32 %v2393_v50, %v1497_v54 }
 0x1d0   :  { %v4535_v5 = vpop.eup %4534  ;;  %v2529_v19 = vmul.f32 %v2401_v20, %v1505_v46  ;;  %v1395_v28 = vmul.f32 0.5, %v5346_v27  ;;  %v5573_v23 = vadd.f32 %v1129_v48, %v5102_v15  ;;  %v1586_v2 = vmul.f32 0.044715, %v5553_v3 }
 0x1d1   :  { %v4537_v17 = vpop.eup %4536  ;;  %v2392_v31 = vadd.f32 1.0, %v4535_v5  ;;  %v2538_v12 = vpack.c.bf16 %v5569_v61, %v5566_v18  ;;  %v1587_v8 = vmul.f32 0.044715, %v5557_v10  ;;  %v5580_v54 = vadd.f32 %v1131_v38, %v5115_v32 }
 0x1d2   :  { %v1139_v45 = vpop.f32.mrb[56].mxu1  ;;  %v2593_v36 = vpack.c.bf16 %v2529_v19, %v2521_v7  ;;  %v2400_v22 = vadd.f32 1.0, %v4537_v17  ;;  %v1915_v27 = vadd.f32 %v5443_v6, %v5379_v58  ;;  %v5585_v48 = vmul.f32 %v1699_v41, %v5519_v49 }
 0x1d3   :  { %v1141_v60 = vpop.f32.mrb[57].mxu1  ;;  %v5588_v29 = vmul.f32 %v1706_v47, %v5523_v63  ;;  %v5591_v50 = vmul.f32 %v1707_v44, %v5532_v42  ;;  %v1923_v59 = vadd.f32 %v5481_v57, %v5419_v40  ;;  %v2520_v38 = vmul.f32 %v2392_v31, %v1496_v33 }
 0x1d4   :  { %v1143_v46 = vpop.f32.mrb[58].mxu1  ;;  %3482 = vmatprep.mubr.bf16.mxu0 %v2593_v36  ;;  %v2528_v20 = vmul.f32 %v2400_v22, %v1504_v24  ;;  %v1594_v6 = vmul.f32 0.044715, %v5573_v23  ;;  %v2043_v5 = vmul.f32 0.7978846, %v1915_v27  ;;  %v1714_v41 = vmul.f32 %v1586_v2, %v5553_v3 }
 0x1d5   :  { %v5595_v62 = vpop.f32.mrb[59].mxu1  ;;  %v1715_v7 = vmul.f32 %v1587_v8, %v5557_v10  ;;  %v5601_v47 = vmul.f32 0.5, %v5379_v58  ;;  %v2051_v44 = vmul.f32 0.7978846, %v1923_v59  ;;  %v1595_v57 = vmul.f32 0.044715, %v5580_v54 }
 0x1d6   :  { %v4539_v19 = vpop.eup %4538  ;;  %v2592_v17 = vpack.c.bf16 %v2528_v20, %v2520_v38  ;;  %4542 = vtanh.f32 %v2043_v5  ;;  %v5605_v36 = vadd.f32 %v1133_v0, %v5102_v15  ;;  %v1914_v24 = vadd.f32 %v5435_v14, %v5370_v43 }
 0x1d7   :  { %v2283_v33 = vadd.f32 1.0, %v4539_v19  ;;  %4544 = vtanh.f32 %v2051_v44  ;;  %v1922_v31 = vadd.f32 %v5460_v30, %v5402_v4  ;;  %v1722_v58 = vmul.f32 %v1594_v6, %v5573_v23 }
 0x1d8   :  { %v4541_v2 = vpop.eup %4540  ;;  %3483 = vmatmul.mubr.bf16.gmra.mrb[28].mxu0 %v2592_v17  ;;  %v5613_v8 = vadd.f32 %v1135_v39, %v5115_v32  ;;  %v5616_v22 = vadd.f32 %v1139_v45, %v5102_v15  ;;  %v5619_v0 = vadd.f32 %v1141_v60, %v5115_v32  ;;  %v5622_v14 = vmul.f32 %v1714_v41, %v5553_v3 }
 0x1d9   :  { %v2291_v59 = vadd.f32 1.0, %v4541_v2  ;;  %v2042_v38 = vmul.f32 0.7978846, %v1914_v24  ;;  %v2050_v30 = vmul.f32 0.7978846, %v1922_v31  ;;  %v5627_v6 = vmul.f32 %v1715_v7, %v5557_v10 }
 0x1da   :  { %v1149_v27 = vpop.f32.mrb[60].mxu1  ;;  %v1723_v39 = vmul.f32 %v1595_v57, %v5580_v54  ;;  %v1411_v45 = vmul.f32 0.5, %v5419_v40  ;;  %v1602_v5 = vmul.f32 0.044715, %v5605_v36  ;;  %v2411_v60 = vmul.f32 %v2283_v33, %v5561_v9  ;;  %v4374_v31 = vld [vmem:[#allocation8 + $0x200] ss:$8 sps:$4 sm:$0xff]  }
 0x1db   :  { %v5624_v20 = vpop.f32.mrb[61].mxu1  ;;  %v2419_v44 = vmul.f32 %v2291_v59, %v1395_v28  ;;  %4546 = vtanh.f32 %v2042_v38  ;;  %v1603_v41 = vmul.f32 0.044715, %v5613_v8  ;;  %v5637_v17 = vmul.f32 %v1722_v58, %v5573_v23  ;;  %v4379_v2 = vld [vmem:[#allocation8 + $0x214] ss:$8 sps:$4 sm:$0xff]  }
 0x1dc   :  { %v5634_v19 = vpop.f32.mrb[62].mxu1  ;;  %4548 = vtanh.f32 %v2050_v30  ;;  %v1610_v7 = vmul.f32 0.044715, %v5616_v22  ;;  %v1611_v57 = vmul.f32 0.044715, %v5619_v0  ;;  %v1931_v9 = vadd.f32 %v5493_v21, %v5427_v52 }
 0x1dd   :  { %6867 = vst [vmem:[#allocation16_spill] sm:$0xff] %v5637_v17  ;;  %v5641_v24 = vpop.f32.mrb[63].mxu1  ;;  %v2539_v40 = vpack.c.bf16 %v2419_v44, %v2411_v60  ;;  %v1939_v28 = vadd.f32 %v5526_v34, %v5464_v53  ;;  %v5648_v33 = vadd.f32 %v1143_v46, %v5102_v15  ;;  %v5651_v58 = vmul.f32 %v1723_v39, %v5580_v54 }
 0x1de   :  { %v1730_v59 = vmul.f32 %v1602_v5, %v5605_v36  ;;  %v1402_v38 = vmul.f32 0.5, %v5370_v43  ;;  %v1410_v30 = vmul.f32 0.5, %v5402_v4  ;;  %v2059_v60 = vmul.f32 0.7978846, %v1931_v9 }
 0x1df   :  { %6868 = vst [vmem:[#allocation17_spill] sm:$0xff] %v5648_v33  ;;  %3525 = vmatprep.mubr.bf16.mxu0 %v2539_v40  ;;  %v2067_v44 = vmul.f32 0.7978846, %v1939_v28  ;;  %v1618_v21 = vmul.f32 0.044715, %v5648_v33  ;;  %v1930_v34 = vadd.f32 %v5486_v56, %v5423_v1  ;;  %v1731_v39 = vmul.f32 %v1603_v41, %v5613_v8 }
 0x1e0   :  { %v4543_v46 = vpop.eup %4542  ;;  %3526 = vmatmul.mubr.bf16.vlgmr.msra.gmra.mrb[0].mxu0 %v2538_v12  ;;  %v1738_v5 = vmul.f32 %v1610_v7, %v5616_v22  ;;  %v1938_v43 = vadd.f32 %v5514_v25, %v5452_v51  ;;  %v5668_v4 = vadd.f32 %v5595_v62, %v5115_v32  ;;  %v4377_v56 = vld [vmem:[#allocation8 + $0x210] ss:$8 sps:$4 sm:$0xff]   ;;  %v1739_v18 = vmul.f32 %v1611_v57, %v5619_v0  ;;  %v4382_v7 = vld [vmem:[#allocation8 + $0x224] ss:$8 sps:$4 sm:$0xff]  }
 0x1e1   :  { %v4545_v9 = vpop.eup %4544  ;;  %3607 = vmatpush1.bf16.msra.mxu0 %v4374_v31  ;;  %v2299_v28 = vadd.f32 1.0, %v4543_v46  ;;  %4550 = vtanh.f32 %v2059_v60  ;;  %v2058_v61 = vmul.f32 0.7978846, %v1930_v34  ;;  %v5676_v62 = vadd.f32 %v1149_v27, %v5102_v15 }
 0x1e2   :  { %v5670_v40 = vpop.f32.mrb[64].mxu1  ;;  %3608 = vmatprep.subr.bf16.mxu0 %v4379_v2  ;;  %v2307_v41 = vadd.f32 1.0, %v4545_v9  ;;  %4552 = vtanh.f32 %v2067_v44  ;;  %v2066_v25 = vmul.f32 0.7978846, %v1938_v43  ;;  %v5681_v31 = vmul.f32 %v1730_v59, %v5605_v36  ;;  %v4380_v43 = vld [vmem:[#allocation8 + $0x220] ss:$8 sps:$4 sm:$0xff]  }
 0x1e3   :  { %v5673_v12 = vpop.f32.mrb[65].mxu1  ;;  %v5684_v46 = vmul.f32 0.5, %v5427_v52  ;;  %v1746_v57 = vmul.f32 %v1618_v21, %v5648_v33  ;;  %4554 = vtanh.f32 %v2058_v61  ;;  %v2427_v2 = vmul.f32 %v2299_v28, %v5601_v47  ;;  %v4385_v28 = vld [vmem:[#allocation8 + $0x234] ss:$8 sps:$4 sm:$0xff]  }
 0x1e4   :  { %v5678_v17 = vpop.f32.mrb[66].mxu1  ;;  %v2435_v44 = vmul.f32 %v2307_v41, %v1411_v45  ;;  %4556 = vtanh.f32 %v2066_v25  ;;  %v1619_v27 = vmul.f32 0.044715, %v5668_v4  ;;  %v5692_v59 = vmul.f32 %v1731_v39, %v5613_v8 }
 0x1e5   :  { %v5687_v60 = vpop.f32.mrb[67].mxu1  ;;  %v4547_v34 = vpop.eup %4546  ;;  %3609 = vmatpush1.bf16.msra.mxu0 %v4377_v56  ;;  %v5695_v52 = vmul.f32 %v1738_v5, %v5616_v22  ;;  %v1427_v21 = vmul.f32 0.5, %v5464_v53  ;;  %v1947_v9 = vadd.f32 %v5538_v37, %v5476_v55  ;;  %v5701_v41 = vmul.f32 %v1739_v18, %v5619_v0 }
 0x1e6   :  { %v4549_v61 = vpop.eup %4548  ;;  %v2547_v47 = vpack.c.bf16 %v2435_v44, %v2427_v2  ;;  %v2298_v45 = vadd.f32 1.0, %v4547_v34  ;;  %3610 = vmatprep.subr.bf16.mxu0 %v4382_v7  ;;  %v1626_v56 = vmul.f32 0.044715, %v5676_v62  ;;  %v5706_v5 = vadd.f32 %v5624_v20, %v5115_v32 }
 0x1e7   :  { %6869 = vst [vmem:[#allocation18_spill] sm:$0xff] %v5695_v52  ;;  %v2306_v39 = vadd.f32 1.0, %v4549_v61  ;;  %v1955_v53 = vadd.f32 %v5585_v48, %v5519_v49  ;;  %v2075_v25 = vmul.f32 0.7978846, %v1947_v9  ;;  %v5711_v37 = vmul.f32 %v1746_v57, %v5648_v33  ;;  %v4383_v48 = vld [vmem:[#allocation8 + $0x230] ss:$8 sps:$4 sm:$0xff]  }
 0x1e8   :  { %3535 = vmatprep.mubr.bf16.mxu0 %v2547_v47  ;;  %v1418_v7 = vmul.f32 0.5, %v5423_v1  ;;  %v1426_v18 = vmul.f32 0.5, %v5452_v51  ;;  %v1747_v2 = vmul.f32 %v1619_v27, %v5668_v4  ;;  %v2426_v34 = vmul.f32 %v2298_v45, %v1402_v38  ;;  %v4386_v33 = vld [vmem:[#allocation8 + $0x240] ss:$8 sps:$4 sm:$0xff]  }
 0x1e9   :  { %6870 = vst [vmem:[#allocation19_spill] sm:$0xff] %v5711_v37  ;;  %v2434_v61 = vmul.f32 %v2306_v39, %v1410_v30  ;;  %3611 = vmatpush1.bf16.msra.mxu0 %v4380_v43  ;;  %v2083_v20 = vmul.f32 0.7978846, %v1955_v53  ;;  %4558 = vtanh.f32 %v2075_v25  ;;  %v1754_v57 = vmul.f32 %v1626_v56, %v5676_v62  ;;  %v4388_v43 = vld [vmem:[#allocation8 + $0x244] ss:$8 sps:$4 sm:$0xff]  }
 0x1ea   :  { %v5716_v44 = vpop.f32.mrb[68].mxu1  ;;  %3612 = vmatprep.subr.bf16.mxu0 %v4385_v28  ;;  %v5722_v9 = vmul.f32 0.5, %v5476_v55  ;;  %v1946_v1 = vadd.f32 %v5529_v26, %v5467_v35  ;;  %v1954_v51 = vadd.f32 %v5550_v11, %v5501_v13  ;;  %v1627_v47 = vmul.f32 0.044715, %v5706_v5 }
 0x1eb   :  { %v5718_v52 = vpop.f32.mrb[69].mxu1  ;;  %v4551_v30 = vpop.eup %4550  ;;  %v2546_v27 = vpack.c.bf16 %v2434_v61, %v2426_v34  ;;  %4560 = vtanh.f32 %v2083_v20  ;;  %v270_v45 = vsub.s32 4, %v5029_v16  ;;  %v5735_v39 = vmul.f32 0.5, %v5519_v49  ;;  %v5741_v61 = vld [vmem:[#allocation7] sm:$0xff] }
 0x1ec   :  { %v5728_v38 = vpop.f32.mrb[70].mxu1  ;;  %v4553_v55 = vpop.eup %4552  ;;  %v2315_v56 = vadd.f32 1.0, %v4551_v30  ;;  %v2074_v26 = vmul.f32 0.7978846, %v1946_v1  ;;  %v2082_v53 = vmul.f32 0.7978846, %v1954_v51  ;;  %v5739_v34 = vadd.f32 %v5634_v19, %v5102_v15 }
 0x1ed   :  { %v5732_v28 = vpop.f32.mrb[71].mxu1  ;;  %v4555_v11 = vpop.eup %4554  ;;  %3536 = vmatmul.mubr.bf16.gmra.mrb[4].mxu0 %v2546_v27  ;;  %v2323_v25 = vadd.f32 1.0, %v4553_v55  ;;  %6871 = vst [vmem:[#allocation20_spill] sm:$0xff] %v5741_v61  ;;  %v5744_v20 = vrot.slane %v5741_v61, %v270_v45  ;;  %v274_v37 = vsub.s32 5, %v5029_v16  ;;  %v5748_v1 = vmul.f32 %v1747_v2, %v5668_v4  ;;  %v4391_v45 = vld [vmem:[#allocation8 + $0x254] ss:$8 sps:$4 sm:$0xff]  }
 0x1ee   :  { %v4557_v30 = vpop.eup %4556  ;;  %3613 = vmatpush1.bf16.msra.mxu0 %v4383_v48  ;;  %v2314_v49 = vadd.f32 1.0, %v4555_v11  ;;  %4562 = vtanh.f32 %v2074_v26  ;;  %v5752_v51 = vadd.f32 %v5641_v24, %v5115_v32  ;;  %v2443_v15 = vmul.f32 %v2315_v56, %v5684_v46 }
 0x1ef   :  { %v2451_v19 = vmul.f32 %v2323_v25, %v1427_v21  ;;  %v2322_v27 = vadd.f32 1.0, %v4557_v30  ;;  %3614 = vmatprep.subr.bf16.mxu0 %v4388_v43  ;;  %4564 = vtanh.f32 %v2082_v53  ;;  %v5756_v55 = vmul.f32 %v1754_v57, %v5676_v62  ;;  %v4389_v43 = vld [vmem:[#allocation8 + $0x250] ss:$8 sps:$4 sm:$0xff]  }
 0x1f0   :  { %v1755_v48 = vmul.f32 %v1627_v47, %v5706_v5  ;;  %v5761_v2 = vadd.f32 %v5670_v40, %v5744_v20  ;;  %v5764_v26 = vrot.slane %v5741_v61, %v274_v37  ;;  %v2442_v46 = vmul.f32 %v2314_v49, %v1418_v7 }
 0x1f1   :  { %6872 = vst [vmem:[#allocation21_spill] sm:$0xff] %v5756_v55  ;;  %v2555_v24 = vpack.c.bf16 %v2451_v19, %v2443_v15  ;;  %v2450_v21 = vmul.f32 %v2322_v27, %v1426_v18  ;;  %v1634_v56 = vmul.f32 0.044715, %v5739_v34  ;;  %v1635_v57 = vmul.f32 0.044715, %v5752_v51 }
 0x1f2   :  { %v5766_v32 = vpop.f32.mrb[72].mxu1  ;;  %3615 = vmatpush1.bf16.msra.mxu0 %v4386_v33  ;;  %v1516_v47 = vmul.f32 0.044715, %v5761_v2  ;;  %v5775_v40 = vadd.f32 %v5673_v12, %v5764_v26  ;;  %v1963_v37 = vadd.f32 %v5591_v50, %v5532_v42  ;;  %v1434_v25 = vmul.f32 0.5, %v5467_v35  ;;  %v4394_v33 = vld [vmem:[#allocation8 + $0x264] ss:$8 sps:$4 sm:$0xff]  }
 0x1f3   :  { %v5769_v53 = vpop.f32.mrb[73].mxu1  ;;  %v4559_v7 = vpop.eup %4558  ;;  %3545 = vmatprep.mubr.bf16.mxu0 %v2555_v24  ;;  %v2554_v18 = vpack.c.bf16 %v2450_v21, %v2442_v46  ;;  %3616 = vmatprep.subr.bf16.mxu0 %v4391_v45  ;;  %v1971_v30 = vadd.f32 %v5627_v6, %v5557_v10  ;;  %v5786_v49 = vadd.f32 %v5678_v17, %v5744_v20  ;;  %v1442_v50 = vmul.f32 0.5, %v5501_v13  ;;  %v4392_v21 = vld [vmem:[#allocation8 + $0x260] ss:$8 sps:$4 sm:$0xff]  }
 0x1f4   :  { %v5779_v11 = vpop.f32.mrb[74].mxu1  ;;  %v2331_v15 = vadd.f32 1.0, %v4559_v7  ;;  %v1644_v19 = vmul.f32 %v1516_v47, %v5761_v2  ;;  %v2091_v27 = vmul.f32 0.7978846, %v1963_v37  ;;  %v5793_v35 = vmul.f32 %v1755_v48, %v5706_v5  ;;  %v4397_v37 = vld [vmem:[#allocation8 + $0x274] ss:$8 sps:$4 sm:$0xff]  }
 0x1f5   :  { %v5788_v12 = vpop.f32.mrb[75].mxu1  ;;  %v4561_v24 = vpop.eup %4560  ;;  %3546 = vmatmul.mubr.bf16.gmra.mrb[8].mxu0 %v2554_v18  ;;  %v1762_v45 = vmul.f32 %v1634_v56, %v5739_v34  ;;  %v2099_v6 = vmul.f32 0.7978846, %v1971_v30  ;;  %v1524_v46 = vmul.f32 0.044715, %v5786_v49  ;;  %v1763_v7 = vmul.f32 %v1635_v57, %v5752_v51 }
 0x1f6   :  { %3617 = vmatpush1.bf16.msra.mxu0 %v4389_v43  ;;  %v2339_v17 = vadd.f32 1.0, %v4561_v24  ;;  %v1772_v13 = vmul.f32 %v1644_v19, %v5761_v2  ;;  %v1517_v47 = vmul.f32 0.044715, %v5775_v40  ;;  %4566 = vtanh.f32 %v2091_v27 }
 0x1f7   :  { %3618 = vmatprep.subr.bf16.mxu0 %v4394_v33  ;;  %v1652_v48 = vmul.f32 %v1524_v46, %v5786_v49  ;;  %v1962_v56 = vadd.f32 %v5588_v29, %v5523_v63  ;;  %v1970_v18 = vadd.f32 %v5622_v14, %v5553_v3  ;;  %v2459_v30 = vmul.f32 %v2331_v15, %v5722_v9 }
 0x1f8   :  { %v4563_v43 = vpop.eup %4562  ;;  %v2467_v57 = vmul.f32 %v2339_v17, %v5735_v39  ;;  %v1900_v19 = vadd.f32 %v1772_v13, %v5761_v2  ;;  %4568 = vtanh.f32 %v2099_v6  ;;  %v5814_v14 = vmul.f32 %v1762_v45, %v5739_v34  ;;  %v4395_v39 = vld [vmem:[#allocation8 + $0x270] ss:$8 sps:$4 sm:$0xff]   ;;  %v4400_v45 = vld [vmem:[#allocation8 + $0x284] ss:$8 sps:$4 sm:$0xff]  }
 0x1f9   :  { %v4565_v33 = vpop.eup %4564  ;;  %v2330_v27 = vadd.f32 1.0, %v4563_v43  ;;  %v1780_v46 = vmul.f32 %v1652_v48, %v5786_v49  ;;  %v2090_v61 = vmul.f32 0.7978846, %v1962_v56  ;;  %v2098_v16 = vmul.f32 0.7978846, %v1970_v18 }
 0x1fa   :  { %v5808_v24 = vpop.f32.mrb[76].mxu1  ;;  %v2563_v55 = vpack.c.bf16 %v2467_v57, %v2459_v30  ;;  %v2338_v9 = vadd.f32 1.0, %v4565_v33  ;;  %3619 = vmatpush1.bf16.msra.mxu0 %v4392_v21  ;;  %v5818_v15 = vadd.f32 %v5687_v60, %v5764_v26  ;;  %v5823_v17 = vmul.f32 %v1763_v7, %v5752_v51 }
 0x1fb   :  { %v5811_v29 = vpop.f32.mrb[77].mxu1  ;;  %3620 = vmatprep.subr.bf16.mxu0 %v4397_v37  ;;  %v1451_v13 = vmul.f32 0.5, %v5532_v42  ;;  %v1908_v48 = vadd.f32 %v1780_v46, %v5786_v49  ;;  %4570 = vtanh.f32 %v2090_v61  ;;  %v2458_v21 = vmul.f32 %v2330_v27, %v1434_v25  ;;  %v4398_v25 = vld [vmem:[#allocation8 + $0x280] ss:$8 sps:$4 sm:$0xff]  }
 0x1fc   :  { %v5820_v6 = vpop.f32.mrb[78].mxu1  ;;  %3555 = vmatprep.mubr.bf16.mxu0 %v2563_v55  ;;  %v2466_v18 = vmul.f32 %v2338_v9, %v1442_v50  ;;  %v1645_v60 = vmul.f32 %v1517_v47, %v5775_v40  ;;  %v5832_v43 = vadd.f32 %v5716_v44, %v5744_v20  ;;  %v2028_v7 = vmul.f32 0.7978846, %v1900_v19 }
 0x1fd   :  { %v5827_v56 = vpop.f32.mrb[79].mxu1  ;;  %v1459_v37 = vmul.f32 0.5, %v5557_v10  ;;  %4572 = vtanh.f32 %v2098_v16  ;;  %v1525_v42 = vmul.f32 0.044715, %v5818_v15  ;;  %v5837_v61 = vmul.f32 0.5, %v5761_v2 }
 0x1fe   :  { %6873 = vst [vmem:[#allocation22_spill] sm:$0xff] %v5832_v43  ;;  %v2562_v30 = vpack.c.bf16 %v2466_v18, %v2458_v21  ;;  %3621 = vmatpush1.bf16.msra.mxu0 %v4395_v39  ;;  %v2036_v55 = vmul.f32 0.7978846, %v1908_v48  ;;  %v5841_v50 = vadd.f32 %v5718_v52, %v5764_v26  ;;  %v5844_v44 = vmul.f32 0.5, %v5786_v49  ;;  %v4403_v16 = vld [vmem:[#allocation8 + $0x294] ss:$8 sps:$4 sm:$0xff]  }
 0x1ff   :  { %v5847_v47 = vmul.f32 0.5, %v5523_v63  ;;  %3622 = vmatprep.subr.bf16.mxu0 %v4400_v45  ;;  %v1979_v10 = vadd.f32 %v5651_v58, %v5580_v54  ;;  %v1987_v2 = vadd.f32 %v5692_v59, %v5613_v8  ;;  %v5854_v57 = vmul.f32 %v1645_v60, %v5775_v40 }
 0x200   :  { %3556 = vmatmul.mubr.bf16.gmra.mrb[12].mxu0 %v2562_v30  ;;  %v1458_v52 = vmul.f32 0.5, %v5553_v3  ;;  %v1532_v49 = vmul.f32 0.044715, %v5832_v43  ;;  %v5860_v63 = vadd.f32 %v5728_v38, %v5744_v20  ;;  %v4567_v33 = vpop.eup %4566  ;;  %4574 = vtanh.f32 %v2028_v7  ;;  %v4401_v3 = vld [vmem:[#allocation8 + $0x290] ss:$8 sps:$4 sm:$0xff]   ;;  %v6874_v38 = vld [vmem:[#allocation16_spill] sm:$0xff] }
 0x201   :  { %v1653_v58 = vmul.f32 %v1525_v42, %v5818_v15  ;;  %v2107_v27 = vmul.f32 0.7978846, %v1979_v10  ;;  %v2115_v59 = vmul.f32 0.7978846, %v1987_v2  ;;  %v2347_v39 = vadd.f32 1.0, %v4567_v33 }
 0x202   :  { %v5862_v19 = vpop.f32.mrb[80].mxu1  ;;  %v4569_v9 = vpop.eup %4568  ;;  %4576 = vtanh.f32 %v2036_v55  ;;  %3623 = vmatpush1.bf16.msra.mxu0 %v4398_v25  ;;  %v1533_v48 = vmul.f32 0.044715, %v5841_v50  ;;  %v1978_v45 = vadd.f32 %v6874_v38, %v5573_v23  ;;  %v1986_v60 = vadd.f32 %v5681_v31, %v5605_v36  ;;  %v4406_v7 = vld [vmem:[#allocation8 + $0x2a4] ss:$8 sps:$4 sm:$0xff]  }
 0x203   :  { %v5865_v46 = vpop.f32.mrb[81].mxu1  ;;  %v2355_v18 = vadd.f32 1.0, %v4569_v9  ;;  %3624 = vmatprep.subr.bf16.mxu0 %v4403_v16  ;;  %4578 = vtanh.f32 %v2107_v27  ;;  %v5876_v42 = vadd.f32 %v5732_v28, %v5764_v26  ;;  %v1660_v55 = vmul.f32 %v1532_v49, %v5832_v43  ;;  %v4404_v49 = vld [vmem:[#allocation8 + $0x2a0] ss:$8 sps:$4 sm:$0xff]  }
 0x204   :  { %v5870_v21 = vpop.f32.mrb[82].mxu1  ;;  %4580 = vtanh.f32 %v2115_v59  ;;  %v1540_v25 = vmul.f32 0.044715, %v5860_v63  ;;  %v2106_v10 = vmul.f32 0.7978846, %v1978_v45  ;;  %v2475_v33 = vmul.f32 %v2347_v39, %v1451_v13 }
 0x205   :  { %v5878_v30 = vpop.f32.mrb[83].mxu1  ;;  %v4571_v2 = vpop.eup %4570  ;;  %v2483_v16 = vmul.f32 %v2355_v18, %v1459_v37  ;;  %v2114_v27 = vmul.f32 0.7978846, %v1986_v60  ;;  %v5884_v31 = vadd.f32 %v5766_v32, %v5744_v20  ;;  %v5887_v28 = vmul.f32 0.5, %v5580_v54  ;;  %v4409_v32 = vld [vmem:[#allocation8 + $0x2b4] ss:$8 sps:$4 sm:$0xff]  }
 0x206   :  { %v2346_v9 = vadd.f32 1.0, %v4571_v2  ;;  %3625 = vmatpush1.bf16.msra.mxu0 %v4401_v3  ;;  %v5890_v38 = vmul.f32 0.5, %v5613_v8  ;;  %4582 = vtanh.f32 %v2106_v10  ;;  %v1661_v13 = vmul.f32 %v1533_v48, %v5841_v50 }
 0x207   :  { %v4573_v59 = vpop.eup %4572  ;;  %v2571_v45 = vpack.c.bf16 %v2483_v16, %v2475_v33  ;;  %4584 = vtanh.f32 %v2114_v27  ;;  %3626 = vmatprep.subr.bf16.mxu0 %v4406_v7  ;;  %v1541_v37 = vmul.f32 0.044715, %v5876_v42  ;;  %v5895_v3 = vmul.f32 %v1653_v58, %v5818_v15 }
 0x208   :  { %v2354_v39 = vadd.f32 1.0, %v4573_v59  ;;  %v5898_v54 = vmul.f32 0.5, %v5573_v23  ;;  %v5902_v8 = vadd.f32 %v5769_v53, %v5764_v26  ;;  %v5907_v48 = vmul.f32 %v1660_v55, %v5832_v43  ;;  %v4407_v53 = vld [vmem:[#allocation8 + $0x2b0] ss:$8 sps:$4 sm:$0xff]  }
 0x209   :  { %3565 = vmatprep.mubr.bf16.mxu0 %v2571_v45  ;;  %v1668_v60 = vmul.f32 %v1540_v25, %v5860_v63  ;;  %v1548_v7 = vmul.f32 0.044715, %v5884_v31  ;;  %v1995_v58 = vadd.f32 %v5701_v41, %v5619_v0  ;;  %v2474_v23 = vmul.f32 %v2346_v9, %v5847_v47  ;;  %v4412_v9 = vld [vmem:[#allocation8 + $0x2c4] ss:$8 sps:$4 sm:$0xff]  }
 0x20a   :  { %v5904_v18 = vpop.f32.mrb[84].mxu1  ;;  %6875 = vst [vmem:[#allocation16_spill] sm:$0xff] %v5907_v48  ;;  %v2482_v2 = vmul.f32 %v2354_v39, %v1458_v52  ;;  %3627 = vmatpush1.bf16.msra.mxu0 %v4404_v49  ;;  %v2003_v33 = vadd.f32 %v5748_v1, %v5668_v4  ;;  %v5920_v55 = vadd.f32 %v5779_v11, %v5744_v20  ;;  %v5924_v16 = vpop.eup %4574  ;;  %v1474_v27 = vmul.f32 0.5, %v5605_v36  ;;  %v6880_v36 = vld [vmem:[#allocation18_spill] sm:$0xff] }
 0x20b   :  { %v5913_v10 = vpop.f32.mrb[85].mxu1  ;;  %v5927_v41 = vmul.f32 %v1661_v13, %v5841_v50  ;;  %v1669_v47 = vmul.f32 %v1541_v37, %v5876_v42  ;;  %3628 = vmatprep.subr.bf16.mxu0 %v4409_v32  ;;  %v2123_v52 = vmul.f32 0.7978846, %v1995_v58  ;;  %v1549_v59 = vmul.f32 0.044715, %v5902_v8  ;;  %v6881_v32 = vld [vmem:[#allocation17_spill] sm:$0xff] }
 0x20c   :  { %v5922_v25 = vpop.f32.mrb[86].mxu1  ;;  %v5933_v1 = vpop.eup %4576  ;;  %v2570_v11 = vpack.c.bf16 %v2482_v2, %v2474_v23  ;;  %v2131_v45 = vmul.f32 0.7978846, %v2003_v33  ;;  %v1556_v39 = vmul.f32 0.044715, %v5920_v55  ;;  %v5938_v13 = vmul.f32 %v1668_v60, %v5860_v63  ;;  %v6882_v58 = vld [vmem:[#allocation19_spill] sm:$0xff] }
 0x20d   :  { %6876 = vst [vmem:[#allocation23_spill] sm:$0xff] %v5922_v25  ;;  %6877 = vst [vmem:[#allocation24_spill] sm:$0xff] %v5927_v41  ;;  %v5931_v49 = vpop.f32.mrb[87].mxu1  ;;  %v4579_v48 = vpop.eup %4578  ;;  %4586 = vtanh.f32 %v2123_v52  ;;  %v1994_v37 = vadd.f32 %v6880_v36, %v5616_v22  ;;  %v2002_v43 = vadd.f32 %v6882_v58, %v6881_v32  ;;  %v1676_v23 = vmul.f32 %v1548_v7, %v5884_v31  ;;  %v4410_v33 = vld [vmem:[#allocation8 + $0x2c0] ss:$8 sps:$4 sm:$0xff]  }
 0x20e   :  { %6878 = vst [vmem:[#allocation25_spill] sm:$0xff] %v5931_v49  ;;  %6879 = vst [vmem:[#allocation26_spill] sm:$0xff] %v5938_v13  ;;  %v4581_v49 = vpop.eup %4580  ;;  %3566 = vmatmul.mubr.bf16.gmra.mrb[16].mxu0 %v2570_v11  ;;  %v2363_v25 = vadd.f32 1.0, %v4579_v48  ;;  %v5946_v2 = vmul.f32 0.5, %v5619_v0  ;;  %4588 = vtanh.f32 %v2131_v45  ;;  %v5950_v36 = vadd.f32 %v5788_v12, %v5764_v26  ;;  %v4415_v0 = vld [vmem:[#allocation8 + $0x2d4] ss:$8 sps:$4 sm:$0xff]  }
 0x20f   :  { %v2371_v41 = vadd.f32 1.0, %v4581_v49  ;;  %3629 = vmatpush1.bf16.msra.mxu0 %v4407_v53  ;;  %v2122_v60 = vmul.f32 0.7978846, %v1994_v37  ;;  %v2130_v52 = vmul.f32 0.7978846, %v2002_v43  ;;  %v5953_v58 = vmul.f32 %v1669_v47, %v5876_v42 }
 0x210   :  { %v4583_v13 = vpop.eup %4582  ;;  %v1677_v48 = vmul.f32 %v1549_v59, %v5902_v8  ;;  %v1684_v7 = vmul.f32 %v1556_v39, %v5920_v55  ;;  %3630 = vmatprep.subr.bf16.mxu0 %v4412_v9  ;;  %v5959_v49 = vadd.f32 %v5808_v24, %v5744_v20  ;;  %v2491_v12 = vmul.f32 %v2363_v25, %v5887_v28  ;;  %v4413_v25 = vld [vmem:[#allocation8 + $0x2d0] ss:$8 sps:$4 sm:$0xff]  }
 0x211   :  { %v4585_v43 = vpop.eup %4584  ;;  %v2499_v11 = vmul.f32 %v2371_v41, %v5890_v38  ;;  %v2362_v45 = vadd.f32 1.0, %v4583_v13  ;;  %4590 = vtanh.f32 %v2122_v60  ;;  %v1491_v39 = vmul.f32 0.5, %v5668_v4 }
 0x212   :  { %v5961_v53 = vpop.f32.mrb[88].mxu1  ;;  %v2370_v59 = vadd.f32 1.0, %v4585_v43  ;;  %4592 = vtanh.f32 %v2130_v52  ;;  %v5970_v9 = vadd.f32 %v5811_v29, %v5764_v26  ;;  %v5978_v28 = vmul.f32 0.5, %v5616_v22  ;;  %v6884_v43 = vld [vmem:[#allocation21_spill] sm:$0xff] }
 0x213   :  { %6883 = vst [vmem:[#allocation18_spill] sm:$0xff] %v5961_v53  ;;  %v5965_v47 = vpop.f32.mrb[89].mxu1  ;;  %v2579_v37 = vpack.c.bf16 %v2499_v11, %v2491_v12  ;;  %v5975_v53 = vmul.f32 %v1676_v23, %v5884_v31  ;;  %v1557_v38 = vmul.f32 0.044715, %v5950_v36  ;;  %3631 = vmatpush1.bf16.msra.mxu0 %v4410_v33  ;;  %v2490_v4 = vmul.f32 %v2362_v45, %v5898_v54  ;;  %v4418_v23 = vld [vmem:[#allocation8 + $0x2e4] ss:$8 sps:$4 sm:$0xff]  }
 0x214   :  { %v5972_v24 = vpop.f32.mrb[90].mxu1  ;;  %v2498_v13 = vmul.f32 %v2370_v59, %v1474_v27  ;;  %v5985_v29 = vmul.f32 0.5, %v6881_v32  ;;  %3632 = vmatprep.subr.bf16.mxu0 %v4415_v0  ;;  %v1564_v60 = vmul.f32 0.044715, %v5959_v49  ;;  %v5989_v22 = vmul.f32 %v1677_v48, %v5902_v8 }
 0x215   :  { %v5981_v41 = vpop.f32.mrb[91].mxu1  ;;  %3575 = vmatprep.mubr.bf16.mxu0 %v2579_v37  ;;  %v5992_v52 = vmul.f32 %v1684_v7, %v5920_v55  ;;  %v2011_v33 = vadd.f32 %v5793_v35, %v5706_v5  ;;  %v2019_v54 = vadd.f32 %v5823_v17, %v5752_v51  ;;  %v1565_v32 = vmul.f32 0.044715, %v5970_v9  ;;  %v4416_v17 = vld [vmem:[#allocation8 + $0x2e0] ss:$8 sps:$4 sm:$0xff]  }
 0x216   :  { %v2578_v27 = vpack.c.bf16 %v2498_v13, %v2490_v4  ;;  %v6001_v0 = vadd.f32 %v5820_v6, %v5744_v20  ;;  %v2010_v48 = vadd.f32 %v6884_v43, %v5676_v62  ;;  %v1685_v7 = vmul.f32 %v1557_v38, %v5950_v36  ;;  %v4421_v43 = vld [vmem:[#allocation8 + $0x2f4] ss:$8 sps:$4 sm:$0xff]  }
 0x217   :  { %v4587_v12 = vpop.eup %4586  ;;  %3633 = vmatpush1.bf16.msra.mxu0 %v4413_v25  ;;  %v2139_v11 = vmul.f32 0.7978846, %v2011_v33  ;;  %v2147_v45 = vmul.f32 0.7978846, %v2019_v54  ;;  %v2018_v35 = vadd.f32 %v5814_v14, %v5739_v34  ;;  %v1692_v4 = vmul.f32 %v1564_v60, %v5959_v49 }
 0x218   :  { %v4589_v59 = vpop.eup %4588  ;;  %3576 = vmatmul.mubr.bf16.gmra.mrb[20].mxu0 %v2578_v27  ;;  %v2379_v37 = vadd.f32 1.0, %v4587_v12  ;;  %v2138_v6 = vmul.f32 0.7978846, %v2010_v48  ;;  %3634 = vmatprep.subr.bf16.mxu0 %v4418_v23  ;;  %v6011_v13 = vadd.f32 %v5827_v56, %v5764_v26  ;;  %v6017_v14 = vadd.f32 %v5862_v19, %v5744_v20  ;;  %v4419_v19 = vld [vmem:[#allocation8 + $0x2f0] ss:$8 sps:$4 sm:$0xff]  }
 0x219   :  { %v2387_v25 = vadd.f32 1.0, %v4589_v59  ;;  %4594 = vtanh.f32 %v2139_v11  ;;  %v2146_v33 = vmul.f32 0.7978846, %v2018_v35  ;;  %v1693_v60 = vmul.f32 %v1565_v32, %v5970_v9 }
 0x21a   :  { %v6013_v38 = vpop.f32.mrb[92].mxu1  ;;  %v6023_v23 = vmul.f32 0.5, %v5706_v5  ;;  %4596 = vtanh.f32 %v2147_v45  ;;  %v1572_v56 = vmul.f32 0.044715, %v6001_v0  ;;  %v2507_v12 = vmul.f32 %v2379_v37, %v5946_v2 }
 0x21b   :  { %v6019_v54 = vpop.f32.mrb[93].mxu1  ;;  %v4591_v48 = vpop.eup %4590  ;;  %v2515_v11 = vmul.f32 %v2387_v25, %v1491_v39  ;;  %v6030_v35 = vmul.f32 %v1685_v7, %v5950_v36  ;;  %4598 = vtanh.f32 %v2138_v6  ;;  %3635 = vmatpush1.bf16.msra.mxu0 %v4416_v17  ;;  %v6035_v45 = vmul.f32 %v1692_v4, %v5959_v49 }
 0x21c   :  { %6885 = vst [vmem:[#allocation17_spill] sm:$0xff] %v6019_v54  ;;  %v6026_v27 = vpop.f32.mrb[94].mxu1  ;;  %v4593_v32 = vpop.eup %4592  ;;  %v2378_v5 = vadd.f32 1.0, %v4591_v48  ;;  %v1507_v54 = vmul.f32 0.5, %v5752_v51  ;;  %4600 = vtanh.f32 %v2146_v33  ;;  %3636 = vmatprep.subr.bf16.mxu0 %v4421_v43  ;;  %v1573_v7 = vmul.f32 0.044715, %v6011_v13 }
 0x21d   :  { %6886 = vst [vmem:[#allocation19_spill] sm:$0xff] %v6026_v27  ;;  %v6032_v59 = vpop.f32.mrb[95].mxu1  ;;  %v4424_v27 = vld [vmem:[#allocation8 + $0x304] ss:$8 sps:$4 sm:$0xff]   ;;  %v2587_v2 = vpack.c.bf16 %v2515_v11, %v2507_v12  ;;  %v2386_v39 = vadd.f32 1.0, %v4593_v32  ;;  %v6041_v17 = vmul.f32 %v1693_v60, %v5970_v9  ;;  %v1700_v6 = vmul.f32 %v1572_v56, %v6001_v0 }
 0x21e   :  { %v1580_v37 = vmul.f32 0.044715, %v6017_v14  ;;  %v1498_v25 = vmul.f32 0.5, %v5676_v62  ;;  %v6047_v4 = vadd.f32 %v5865_v46, %v5764_v26  ;;  %v2506_v51 = vmul.f32 %v2378_v5, %v5978_v28 }
 0x21f   :  { %3585 = vmatprep.mubr.bf16.mxu0 %v2587_v2  ;;  %v2514_v43 = vmul.f32 %v2386_v39, %v5985_v29  ;;  %3637 = vmatpush1.bf16.msra.mxu0 %v4419_v19  ;;  %v1901_v33 = vadd.f32 %v5854_v57, %v5775_v40  ;;  %v2284_v60 = vadd.f32 1.0, %v5924_v16  ;;  %v1506_v48 = vmul.f32 0.5, %v5739_v34 }
 0x220   :  { %v1909_v62 = vadd.f32 %v5895_v3, %v5818_v15  ;;  %v6059_v46 = vadd.f32 %v5870_v21, %v5744_v20  ;;  %v2292_v56 = vadd.f32 1.0, %v5933_v1  ;;  %3719 = vmatprep.subr.bf16.mxu0 %v4424_v27  ;;  %v1701_v12 = vmul.f32 %v1573_v7, %v6011_v13 }
 0x221   :  { %v2586_v29 = vpack.c.bf16 %v2514_v43, %v2506_v51  ;;  %v1708_v57 = vmul.f32 %v1580_v37, %v6017_v14  ;;  %v2029_v16 = vmul.f32 0.7978846, %v1901_v33  ;;  %v1581_v34 = vmul.f32 0.044715, %v6047_v4 }
 0x222   :  { %v6062_v28 = vpop.f32.mrb[96].mxu1  ;;  %v2037_v3 = vmul.f32 0.7978846, %v1909_v62  ;;  %v6070_v19 = vmul.f32 %v2284_v60, %v5837_v61  ;;  %v6073_v21 = vmul.f32 %v2292_v56, %v5844_v44  ;;  %v6076_v27 = vmul.f32 %v1700_v6, %v6001_v0 }
 0x223   :  { %v6066_v11 = vpop.f32.mrb[97].mxu1  ;;  %v4595_v1 = vpop.eup %4594  ;;  %3586 = vmatmul.mubr.bf16.gmra.mrb[24].mxu0 %v2586_v29  ;;  %4602 = vtanh.f32 %v2029_v16  ;;  %v1588_v32 = vmul.f32 0.044715, %v6059_v46  ;;  %v6081_v5 = vadd.f32 %v5878_v30, %v5764_v26  ;;  %v6089_v7 = vadd.f32 %v5904_v18, %v5744_v20 }
 0x224   :  { %v6083_v2 = vpop.f32.mrb[98].mxu1  ;;  %v4597_v39 = vpop.eup %4596  ;;  %v2395_v61 = vadd.f32 1.0, %v4595_v1  ;;  %4604 = vtanh.f32 %v2037_v3  ;;  %v6094_v43 = vmul.f32 %v1701_v12, %v6011_v13  ;;  %v1389_v30 = vmul.f32 0.5, %v5775_v40 }
 0x225   :  { %v6091_v37 = vpop.f32.mrb[99].mxu1  ;;  %v4599_v6 = vpop.eup %4598  ;;  %v2403_v51 = vadd.f32 1.0, %v4597_v39  ;;  %v6099_v33 = vadd.f32 %v5913_v10, %v5764_v26  ;;  %v6102_v56 = vmul.f32 %v1708_v57, %v6017_v14  ;;  %v1709_v18 = vmul.f32 %v1581_v34, %v6047_v4  ;;  %v6889_v39 = vld [vmem:[#allocation24_spill] sm:$0xff] }
 0x226   :  { %6887 = vst [vmem:[#allocation21_spill] sm:$0xff] %v6091_v37  ;;  %v4601_v60 = vpop.eup %4600  ;;  %v2394_v62 = vadd.f32 1.0, %v4599_v6  ;;  %v1397_v29 = vmul.f32 0.5, %v5818_v15  ;;  %v2523_v16 = vmul.f32 %v2395_v61, %v6023_v23  ;;  %v1589_v1 = vmul.f32 0.044715, %v6081_v5 }
 0x227   :  { %6888 = vst [vmem:[#allocation27_spill] sm:$0xff] %v6102_v56  ;;  %v2531_v3 = vmul.f32 %v2403_v51, %v1507_v54  ;;  %v2402_v12 = vadd.f32 1.0, %v4601_v60  ;;  %v1716_v40 = vmul.f32 %v1588_v32, %v6059_v46  ;;  %v1596_v10 = vmul.f32 0.044715, %v6089_v7  ;;  %v6891_v60 = vld [vmem:[#allocation23_spill] sm:$0xff] }
 0x228   :  { %v1917_v6 = vadd.f32 %v6889_v39, %v5841_v50  ;;  %v1925_v57 = vadd.f32 %v5953_v58, %v5876_v42  ;;  %v2522_v15 = vmul.f32 %v2394_v62, %v1498_v25  ;;  %v1597_v54 = vmul.f32 0.044715, %v6099_v33  ;;  %v6893_v62 = vld [vmem:[#allocation22_spill] sm:$0xff] }
 0x229   :  { %v2595_v34 = vpack.c.bf16 %v2531_v3, %v2523_v16  ;;  %v2530_v37 = vmul.f32 %v2402_v12, %v1506_v48  ;;  %v6120_v61 = vmul.f32 %v1709_v18, %v6047_v4  ;;  %v6124_v39 = vadd.f32 %v6891_v60, %v5744_v20  ;;  %v6894_v16 = vld [vmem:[#allocation16_spill] sm:$0xff]  ;;  %v6896_v12 = vld [vmem:[#allocation26_spill] sm:$0xff] }
 0x22a   :  { %v6114_v44 = vpop.f32.mrb[100].mxu1  ;;  %v2045_v32 = vmul.f32 0.7978846, %v1917_v6  ;;  %v2053_v51 = vmul.f32 0.7978846, %v1925_v57  ;;  %v1717_v25 = vmul.f32 %v1589_v1, %v6081_v5  ;;  %v6130_v48 = vmul.f32 0.5, %v5841_v50 }
 0x22b   :  { %v6117_v23 = vpop.f32.mrb[101].mxu1  ;;  %3595 = vmatprep.mubr.bf16.mxu0 %v2595_v34  ;;  %v2594_v58 = vpack.c.bf16 %v2530_v37, %v2522_v15  ;;  %v1916_v3 = vadd.f32 %v6894_v16, %v6893_v62  ;;  %v1924_v6 = vadd.f32 %v6896_v12, %v5860_v63  ;;  %v6897_v57 = vld [vmem:[#allocation25_spill] sm:$0xff]  ;;  %v6898_v37 = vld [vmem:[#allocation18_spill] sm:$0xff]  ;;  %v6147_v50 = vmul.f32 %v1716_v40, %v6059_v46 }
 0x22c   :  { %6890 = vst [vmem:[#allocation24_spill] sm:$0xff] %v6117_v23  ;;  %v6126_v56 = vpop.f32.mrb[102].mxu1  ;;  %4606 = vtanh.f32 %v2045_v32  ;;  %v6140_v60 = vadd.f32 %v6897_v57, %v5764_v26  ;;  %v6144_v34 = vadd.f32 %v6898_v37, %v5744_v20  ;;  %v1724_v15 = vmul.f32 %v1596_v10, %v6089_v7 }
 0x22d   :  { %6892 = vst [vmem:[#allocation23_spill] sm:$0xff] %v6126_v56  ;;  %v6134_v18 = vpop.f32.mrb[103].mxu1  ;;  %v4603_v1 = vpop.eup %4602  ;;  %3596 = vmatmul.mubr.bf16.gmra.mrb[28].mxu0 %v2594_v58  ;;  %4608 = vtanh.f32 %v2053_v51  ;;  %v2044_v32 = vmul.f32 0.7978846, %v1916_v3  ;;  %v1725_v12 = vmul.f32 %v1597_v54, %v6099_v33  ;;  %v1604_v57 = vmul.f32 0.044715, %v6124_v39 }
 0x22e   :  { %6895 = vst [vmem:[#allocation22_spill] sm:$0xff] %v6134_v18  ;;  %v4605_v16 = vpop.eup %4604  ;;  %v2285_v18 = vadd.f32 1.0, %v4603_v1  ;;  %v2052_v56 = vmul.f32 0.7978846, %v1924_v6  ;;  %v1413_v37 = vmul.f32 0.5, %v5876_v42  ;;  %v6155_v58 = vadd.f32 %v5965_v47, %v5764_v26 }
 0x22f   :  { %v2293_v23 = vadd.f32 1.0, %v4605_v16  ;;  %4610 = vtanh.f32 %v2044_v32  ;;  %v6158_v40 = vmul.f32 %v1717_v25, %v6081_v5  ;;  %v1605_v10 = vmul.f32 0.044715, %v6140_v60  ;;  %v4422_v32 = vld [vmem:[#allocation8 + $0x300] ss:$8 sps:$4 sm:$0xff]  }
 0x230   :  { %4612 = vtanh.f32 %v2052_v56  ;;  %v1612_v51 = vmul.f32 0.044715, %v6144_v34  ;;  %v2413_v3 = vmul.f32 %v2285_v18, %v1389_v30  ;;  %v6165_v1 = vmul.f32 %v1724_v15, %v6089_v7 }
 0x231   :  { %v2421_v6 = vmul.f32 %v2293_v23, %v1397_v29  ;;  %v1933_v42 = vadd.f32 %v5989_v22, %v5902_v8  ;;  %v6172_v25 = vmul.f32 %v1725_v12, %v6099_v33  ;;  %v1732_v56 = vmul.f32 %v1604_v57, %v6124_v39  ;;  %v4427_v12 = vld [vmem:[#allocation8 + $0x314] ss:$8 sps:$4 sm:$0xff]  }
 0x232   :  { %v6162_v54 = vpop.f32.mrb[104].mxu1  ;;  %6900 = vst [vmem:[#allocation26_spill] sm:$0xff] %v6165_v1  ;;  %v1941_v16 = vadd.f32 %v6030_v35, %v5950_v36  ;;  %v6179_v30 = vadd.f32 %v5972_v24, %v5744_v20  ;;  %v1404_v22 = vmul.f32 0.5, %v6893_v62  ;;  %v1613_v18 = vmul.f32 0.044715, %v6155_v58 }
 0x233   :  { %6899 = vst [vmem:[#allocation16_spill] sm:$0xff] %v6162_v54  ;;  %v6169_v47 = vpop.f32.mrb[105].mxu1  ;;  %v2541_v23 = vpack.c.bf16 %v2421_v6, %v2413_v3  ;;  %v2061_v15 = vmul.f32 0.7978846, %v1933_v42  ;;  %v1412_v57 = vmul.f32 0.5, %v5860_v63  ;;  %v1733_v54 = vmul.f32 %v1605_v10, %v6140_v60 }
 0x234   :  { %6901 = vst [vmem:[#allocation25_spill] sm:$0xff] %v6169_v47  ;;  %v6181_v29 = vpop.f32.mrb[106].mxu1  ;;  %v1740_v35 = vmul.f32 %v1612_v51, %v6144_v34  ;;  %v2069_v1 = vmul.f32 0.7978846, %v1941_v16  ;;  %v1620_v24 = vmul.f32 0.044715, %v6179_v30  ;;  %v1932_v62 = vadd.f32 %v5975_v53, %v5884_v31 }
 0x235   :  { %v6185_v47 = vpop.f32.mrb[107].mxu1  ;;  %3638 = vmatprep.mubr.bf16.mxu0 %v2541_v23  ;;  %4614 = vtanh.f32 %v2061_v15  ;;  %v1940_v3 = vadd.f32 %v5992_v52, %v5920_v55  ;;  %v6903_v42 = vpack.c.bf16 %v6073_v21, %v6070_v19  ;;  %v4425_v63 = vld [vmem:[#allocation8 + $0x310] ss:$8 sps:$4 sm:$0xff]   ;;  %v6199_v10 = vmul.f32 %v1732_v56, %v6124_v39  ;;  %v4430_v21 = vld [vmem:[#allocation8 + $0x324] ss:$8 sps:$4 sm:$0xff]  }
 0x236   :  { %6902 = vst [vmem:[#allocation18_spill] sm:$0xff] %v6185_v47  ;;  %v4607_v6 = vpop.eup %4606  ;;  %v6202_v51 = vmul.f32 0.5, %v5902_v8  ;;  %v6205_v16 = vmul.f32 0.5, %v5950_v36  ;;  %4616 = vtanh.f32 %v2069_v1  ;;  %v1741_v52 = vmul.f32 %v1613_v18, %v6155_v58 }
 0x237   :  { %3639 = vmatmul.mubr.bf16.vlgmr.msra.gmra.mrb[0].mxu0 %v6903_v42  ;;  %v4609_v53 = vpop.eup %4608  ;;  %v2301_v23 = vadd.f32 1.0, %v4607_v6  ;;  %v2060_v15 = vmul.f32 0.7978846, %v1932_v62  ;;  %v2068_v47 = vmul.f32 0.7978846, %v1940_v3  ;;  %v6209_v56 = vmul.f32 %v1733_v54, %v6140_v60  ;;  %v6905_v54 = vld [vmem:[#allocation17_spill] sm:$0xff] }
 0x238   :  { %3720 = vmatpush1.bf16.msra.mxu0 %v4422_v32  ;;  %v2309_v19 = vadd.f32 1.0, %v4609_v53  ;;  %v6213_v8 = vadd.f32 %v5981_v41, %v5764_v26  ;;  %v6217_v36 = vadd.f32 %v6013_v38, %v5744_v20  ;;  %v6222_v18 = vmul.f32 %v1740_v35, %v6144_v34 }
 0x239   :  { %3721 = vmatprep.subr.bf16.mxu0 %v4427_v12  ;;  %v4611_v32 = vpop.eup %4610  ;;  %v1748_v12 = vmul.f32 %v1620_v24, %v6179_v30  ;;  %4618 = vtanh.f32 %v2060_v15  ;;  %v6227_v62 = vadd.f32 %v6905_v54, %v5764_v26  ;;  %v2429_v6 = vmul.f32 %v2301_v23, %v6130_v48 }
 0x23a   :  { %v6219_v1 = vpop.f32.mrb[108].mxu1  ;;  %v4613_v41 = vpop.eup %4612  ;;  %v2437_v38 = vmul.f32 %v2309_v19, %v1413_v37  ;;  %v2300_v42 = vadd.f32 1.0, %v4611_v32  ;;  %4620 = vtanh.f32 %v2068_v47  ;;  %v6235_v24 = vmul.f32 %v1741_v52, %v6155_v58  ;;  %v4433_v37 = vld [vmem:[#allocation8 + $0x334] ss:$8 sps:$4 sm:$0xff]  }
 0x23b   :  { %6904 = vst [vmem:[#allocation28_spill] sm:$0xff] %v6219_v1  ;;  %v6229_v3 = vpop.f32.mrb[109].mxu1  ;;  %v2308_v35 = vadd.f32 1.0, %v4613_v41  ;;  %v4428_v1 = vld [vmem:[#allocation8 + $0x320] ss:$8 sps:$4 sm:$0xff]   ;;  %v6238_v15 = vmul.f32 0.5, %v5884_v31  ;;  %v1949_v54 = vadd.f32 %v6041_v17, %v5970_v9  ;;  %v1957_v23 = vadd.f32 %v6094_v43, %v6011_v13 }
 0x23c   :  { %6906 = vst [vmem:[#allocation17_spill] sm:$0xff] %v6229_v3  ;;  %v6232_v53 = vpop.f32.mrb[110].mxu1  ;;  %3722 = vmatpush1.bf16.msra.mxu0 %v4425_v63  ;;  %v2549_v48 = vpack.c.bf16 %v2437_v38, %v2429_v6  ;;  %v1621_v47 = vmul.f32 0.044715, %v6213_v8  ;;  %v1628_v63 = vmul.f32 0.044715, %v6217_v36  ;;  %v2428_v52 = vmul.f32 %v2300_v42, %v1404_v22 }
 0x23d   :  { %6907 = vst [vmem:[#allocation29_spill] sm:$0xff] %v6232_v53  ;;  %v6242_v3 = vpop.f32.mrb[111].mxu1  ;;  %3723 = vmatprep.subr.bf16.mxu0 %v4430_v21  ;;  %v2436_v19 = vmul.f32 %v2308_v35, %v1412_v57  ;;  %v1428_v31 = vmul.f32 0.5, %v5920_v55  ;;  %v2077_v32 = vmul.f32 0.7978846, %v1949_v54  ;;  %v6250_v17 = vmul.f32 %v1748_v12, %v6179_v30 }
 0x23e   :  { %6908 = vst [vmem:[#allocation30_spill] sm:$0xff] %v6242_v3  ;;  %3648 = vmatprep.mubr.bf16.mxu0 %v2549_v48  ;;  %v1629_v41 = vmul.f32 0.044715, %v6227_v62  ;;  %v6254_v21 = vmul.f32 0.5, %v5970_v9  ;;  %v2085_v6 = vmul.f32 0.7978846, %v1957_v23  ;;  %v1948_v43 = vadd.f32 %v6035_v45, %v5959_v49 }
 0x23f   :  { %v4615_v38 = vpop.eup %4614  ;;  %v2548_v3 = vpack.c.bf16 %v2436_v19, %v2428_v52  ;;  %v4431_v53 = vld [vmem:[#allocation8 + $0x330] ss:$8 sps:$4 sm:$0xff]   ;;  %4622 = vtanh.f32 %v2077_v32  ;;  %v1956_v55 = vadd.f32 %v6076_v27, %v6001_v0  ;;  %v4436_v12 = vld [vmem:[#allocation8 + $0x344] ss:$8 sps:$4 sm:$0xff]   ;;  %v1749_v42 = vmul.f32 %v1621_v47, %v6213_v8 }
 0x240   :  { %3724 = vmatpush1.bf16.msra.mxu0 %v4428_v1  ;;  %v4617_v22 = vpop.eup %4616  ;;  %v2317_v57 = vadd.f32 1.0, %v4615_v38  ;;  %v1756_v9 = vmul.f32 %v1628_v63, %v6217_v36  ;;  %4624 = vtanh.f32 %v2085_v6  ;;  %v2076_v54 = vmul.f32 0.7978846, %v1948_v43  ;;  %v6909_v23 = vld [vmem:[#allocation15_spill] sm:$0xff] }
 0x241   :  { %3725 = vmatprep.subr.bf16.mxu0 %v4433_v37  ;;  %3649 = vmatmul.mubr.bf16.gmra.mrb[4].mxu0 %v2548_v3  ;;  %v2325_v1 = vadd.f32 1.0, %v4617_v22  ;;  %v2084_v48 = vmul.f32 0.7978846, %v1956_v55  ;;  %v278_v45 = vsub.s32 6, %v6909_v23  ;;  %v1757_v52 = vmul.f32 %v1629_v41, %v6227_v62  ;;  %v6910_v27 = vld [vmem:[#allocation19_spill] sm:$0xff]  ;;  %v6911_v41 = vld [vmem:[#allocation20_spill] sm:$0xff] }
 0x242   :  { %v6262_v35 = vpop.f32.mrb[112].mxu1  ;;  %v6268_v37 = vadd.f32 %v6910_v27, %v5744_v20  ;;  %v6272_v47 = vadd.f32 %v6032_v59, %v5764_v26  ;;  %v282_v63 = vsub.s32 7, %v6909_v23  ;;  %v2445_v32 = vmul.f32 %v2317_v57, %v6202_v51  ;;  %v4434_v38 = vld [vmem:[#allocation8 + $0x340] ss:$8 sps:$4 sm:$0xff]   ;;  %v4439_v22 = vld [vmem:[#allocation8 + $0x354] ss:$8 sps:$4 sm:$0xff]  }
 0x243   :  { %v6275_v19 = vpop.f32.mrb[113].mxu1  ;;  %v4619_v3 = vpop.eup %4618  ;;  %v2453_v6 = vmul.f32 %v2325_v1, %v6205_v16  ;;  %4626 = vtanh.f32 %v2076_v54  ;;  %v6280_v43 = vrot.slane %v6911_v41, %v278_v45  ;;  %v6285_v59 = vmul.f32 %v1749_v42, %v6213_v8  ;;  %v4727_v54 = vld [vmem:[#allocation7] sm:$0xff] }
 0x244   :  { %3726 = vmatpush1.bf16.msra.mxu0 %v4431_v53  ;;  %v6282_v20 = vpop.f32.mrb[114].mxu1  ;;  %v4621_v55 = vpop.eup %4620  ;;  %v2316_v26 = vadd.f32 1.0, %v4619_v3  ;;  %v1445_v53 = vmul.f32 0.5, %v6011_v13  ;;  %4628 = vtanh.f32 %v2084_v48  ;;  %v6294_v45 = vrot.slane %v4727_v54, %v282_v63 }
 0x245   :  { %6912 = vst [vmem:[#allocation19_spill] sm:$0xff] %v6282_v20  ;;  %3727 = vmatprep.subr.bf16.mxu0 %v4436_v12  ;;  %v6288_v51 = vpop.f32.mrb[115].mxu1  ;;  %v2557_v16 = vpack.c.bf16 %v2453_v6, %v2445_v32  ;;  %v2324_v57 = vadd.f32 1.0, %v4621_v55  ;;  %v6292_v1 = vadd.f32 %v6062_v28, %v6280_v43  ;;  %v6297_v12 = vmul.f32 %v1756_v9, %v6217_v36  ;;  %v4437_v32 = vld [vmem:[#allocation8 + $0x350] ss:$8 sps:$4 sm:$0xff]  }
 0x246   :  { %6913 = vst [vmem:[#allocation20_spill] sm:$0xff] %v6288_v51  ;;  %v6300_v42 = vmul.f32 %v1757_v52, %v6227_v62  ;;  %v1636_v13 = vmul.f32 0.044715, %v6268_v37  ;;  %v1965_v48 = vadd.f32 %v6120_v61, %v6047_v4  ;;  %v2444_v27 = vmul.f32 %v2316_v26, %v6238_v15  ;;  %v4442_v26 = vld [vmem:[#allocation8 + $0x364] ss:$8 sps:$4 sm:$0xff]  }
 0x247   :  { %3658 = vmatprep.mubr.bf16.mxu0 %v2557_v16  ;;  %v2452_v3 = vmul.f32 %v2324_v57, %v1428_v31  ;;  %v1637_v28 = vmul.f32 0.044715, %v6272_v47  ;;  %v1518_v63 = vmul.f32 0.044715, %v6292_v1  ;;  %v6310_v9 = vadd.f32 %v6066_v11, %v6294_v45 }
 0x248   :  { %3728 = vmatpush1.bf16.msra.mxu0 %v4434_v38  ;;  %v1973_v52 = vadd.f32 %v6158_v40, %v6081_v5  ;;  %v2093_v6 = vmul.f32 0.7978846, %v1965_v48  ;;  %v6316_v61 = vadd.f32 %v6083_v2, %v6280_v43  ;;  %v1436_v41 = vmul.f32 0.5, %v5959_v49 }
 0x249   :  { %3729 = vmatprep.subr.bf16.mxu0 %v4439_v22  ;;  %v4623_v31 = vpop.eup %4622  ;;  %v2556_v38 = vpack.c.bf16 %v2452_v3, %v2444_v27  ;;  %v1444_v55 = vmul.f32 0.5, %v6001_v0  ;;  %v1646_v11 = vmul.f32 %v1518_v63, %v6292_v1  ;;  %v1764_v57 = vmul.f32 %v1636_v13, %v6268_v37  ;;  %v4440_v63 = vld [vmem:[#allocation8 + $0x360] ss:$8 sps:$4 sm:$0xff]  }
 0x24a   :  { %v6318_v15 = vpop.f32.mrb[116].mxu1  ;;  %v4625_v16 = vpop.eup %4624  ;;  %v2333_v40 = vadd.f32 1.0, %v4623_v31  ;;  %v2101_v54 = vmul.f32 0.7978846, %v1973_v52  ;;  %4630 = vtanh.f32 %v2093_v6  ;;  %v1765_v27 = vmul.f32 %v1637_v28, %v6272_v47  ;;  %v6918_v13 = vld [vmem:[#allocation27_spill] sm:$0xff] }
 0x24b   :  { %6914 = vst [vmem:[#allocation31_spill] sm:$0xff] %v6318_v15  ;;  %v6323_v22 = vpop.f32.mrb[117].mxu1  ;;  %3659 = vmatmul.mubr.bf16.gmra.mrb[8].mxu0 %v2556_v38  ;;  %v2341_v48 = vadd.f32 1.0, %v4625_v16  ;;  %v1774_v49 = vmul.f32 %v1646_v11, %v6292_v1  ;;  %v1526_v0 = vmul.f32 0.044715, %v6316_v61  ;;  %v1964_v52 = vadd.f32 %v6918_v13, %v6017_v14  ;;  %v6919_v15 = vld [vmem:[#allocation21_spill] sm:$0xff] }
 0x24c   :  { %6915 = vst [vmem:[#allocation32_spill] sm:$0xff] %v6323_v22  ;;  %v6326_v2 = vpop.f32.mrb[118].mxu1  ;;  %3730 = vmatpush1.bf16.msra.mxu0 %v4437_v32  ;;  %v1519_v31 = vmul.f32 0.044715, %v6310_v9  ;;  %4632 = vtanh.f32 %v2101_v54  ;;  %v1972_v6 = vadd.f32 %v6147_v50, %v6059_v46  ;;  %v2461_v28 = vmul.f32 %v2333_v40, %v6254_v21  ;;  %v4445_v11 = vld [vmem:[#allocation8 + $0x374] ss:$8 sps:$4 sm:$0xff]  }
 0x24d   :  { %6916 = vst [vmem:[#allocation33_spill] sm:$0xff] %v6326_v2  ;;  %v6331_v3 = vpop.f32.mrb[119].mxu1  ;;  %v4627_v38 = vpop.eup %4626  ;;  %v2469_v16 = vmul.f32 %v2341_v48, %v1445_v53  ;;  %3731 = vmatprep.subr.bf16.mxu0 %v4442_v26  ;;  %v1902_v23 = vadd.f32 %v1774_v49, %v6292_v1  ;;  %v1654_v32 = vmul.f32 %v1526_v0, %v6316_v61  ;;  %v2092_v22 = vmul.f32 0.7978846, %v1964_v52  ;;  %v4443_v40 = vld [vmem:[#allocation8 + $0x370] ss:$8 sps:$4 sm:$0xff]  }
 0x24e   :  { %6917 = vst [vmem:[#allocation34_spill] sm:$0xff] %v6331_v3  ;;  %v4629_v3 = vpop.eup %4628  ;;  %v2332_v2 = vadd.f32 1.0, %v4627_v38  ;;  %v2100_v54 = vmul.f32 0.7978846, %v1972_v6  ;;  %v6343_v13 = vadd.f32 %v6919_v15, %v6294_v45  ;;  %v1453_v20 = vmul.f32 0.5, %v6047_v4 }
 0x24f   :  { %v2565_v51 = vpack.c.bf16 %v2469_v16, %v2461_v28  ;;  %v2340_v50 = vadd.f32 1.0, %v4629_v3  ;;  %v1782_v21 = vmul.f32 %v1654_v32, %v6316_v61  ;;  %v6348_v53 = vmul.f32 %v1764_v57, %v6268_v37  ;;  %v4448_v52 = vld [vmem:[#allocation8 + $0x384] ss:$8 sps:$4 sm:$0xff]   ;;  %v4446_v38 = vld [vmem:[#allocation8 + $0x380] ss:$8 sps:$4 sm:$0xff]  }
 0x250   :  { %v6351_v26 = vmul.f32 %v1765_v27, %v6272_v47  ;;  %3732 = vmatpush1.bf16.msra.mxu0 %v4440_v63  ;;  %v1461_v48 = vmul.f32 0.5, %v6081_v5  ;;  %4634 = vtanh.f32 %v2092_v22  ;;  %v2460_v15 = vmul.f32 %v2332_v2, %v1436_v41  ;;  %v6921_v22 = vld [vmem:[#allocation24_spill] sm:$0xff]  ;;  %v4451_v32 = vld [vmem:[#allocation8 + $0x394] ss:$8 sps:$4 sm:$0xff]  }
 0x251   :  { %3668 = vmatprep.mubr.bf16.mxu0 %v2565_v51  ;;  %v2468_v0 = vmul.f32 %v2340_v50, %v1444_v55  ;;  %3733 = vmatprep.subr.bf16.mxu0 %v4445_v11  ;;  %v2030_v4 = vmul.f32 0.7978846, %v1902_v23  ;;  %v1647_v3 = vmul.f32 %v1519_v31, %v6310_v9  ;;  %v6360_v27 = vmul.f32 0.5, %v6292_v1 }
 0x252   :  { %v6354_v49 = vpop.f32.mrb[120].mxu1  ;;  %4636 = vtanh.f32 %v2100_v54  ;;  %v1527_v63 = vmul.f32 0.044715, %v6343_v13  ;;  %v6365_v5 = vadd.f32 %v6114_v44, %v6280_v43  ;;  %v1910_v23 = vadd.f32 %v1782_v21, %v6316_v61 }
 0x253   :  { %v6357_v57 = vpop.f32.mrb[121].mxu1  ;;  %v2564_v41 = vpack.c.bf16 %v2468_v0, %v2460_v15  ;;  %v6371_v55 = vmul.f32 0.5, %v6017_v14  ;;  %v6375_v2 = vadd.f32 %v6921_v22, %v6294_v45  ;;  %v6380_v6 = vmul.f32 0.5, %v6316_v61  ;;  %v6923_v61 = vld [vmem:[#allocation23_spill] sm:$0xff] }
 0x254   :  { %v6367_v51 = vpop.f32.mrb[122].mxu1  ;;  %v4631_v31 = vpop.eup %4630  ;;  %3734 = vmatpush1.bf16.msra.mxu0 %v4443_v40  ;;  %v6383_v44 = vmul.f32 0.5, %v6059_v46  ;;  %v1981_v28 = vadd.f32 %v6172_v25, %v6099_v33  ;;  %v1989_v14 = vadd.f32 %v6209_v56, %v6140_v60  ;;  %4638 = vtanh.f32 %v2030_v4 }
 0x255   :  { %6920 = vst [vmem:[#allocation27_spill] sm:$0xff] %v6367_v51  ;;  %v6377_v1 = vpop.f32.mrb[123].mxu1  ;;  %3669 = vmatmul.mubr.bf16.gmra.mrb[12].mxu0 %v2564_v41  ;;  %v6390_v16 = vmul.f32 %v1647_v3, %v6310_v9  ;;  %v2349_v11 = vadd.f32 1.0, %v4631_v31  ;;  %3735 = vmatprep.subr.bf16.mxu0 %v4448_v52  ;;  %v6394_v54 = vadd.f32 %v6923_v61, %v6280_v43  ;;  %v1534_v25 = vmul.f32 0.044715, %v6365_v5  ;;  %v6924_v41 = vld [vmem:[#allocation26_spill] sm:$0xff] }
 0x256   :  { %6922 = vst [vmem:[#allocation21_spill] sm:$0xff] %v6377_v1  ;;  %v4633_v46 = vpop.eup %4632  ;;  %v1655_v50 = vmul.f32 %v1527_v63, %v6343_v13  ;;  %v2109_v21 = vmul.f32 0.7978846, %v1981_v28  ;;  %v2117_v40 = vmul.f32 0.7978846, %v1989_v14  ;;  %v6400_v4 = vmul.f32 0.5, %v6099_v33 }
 0x257   :  { %v2357_v56 = vadd.f32 1.0, %v4633_v46  ;;  %v2038_v15 = vmul.f32 0.7978846, %v1910_v23  ;;  %v1535_v0 = vmul.f32 0.044715, %v6375_v2  ;;  %v1980_v22 = vadd.f32 %v6924_v41, %v6089_v7  ;;  %v6926_v33 = vld [vmem:[#allocation22_spill] sm:$0xff] }
 0x258   :  { %3736 = vmatpush1.bf16.msra.mxu0 %v4446_v38  ;;  %v4449_v3 = vld [vmem:[#allocation8 + $0x390] ss:$8 sps:$4 sm:$0xff]   ;;  %4640 = vtanh.f32 %v2109_v21  ;;  %v1542_v52 = vmul.f32 0.044715, %v6394_v54  ;;  %v1988_v63 = vadd.f32 %v6199_v10, %v6124_v39  ;;  %v2477_v28 = vmul.f32 %v2349_v11, %v1453_v20  ;;  %v4454_v14 = vld [vmem:[#allocation8 + $0x3a4] ss:$8 sps:$4 sm:$0xff]  }
 0x259   :  { %v2485_v23 = vmul.f32 %v2357_v56, %v1461_v48  ;;  %3737 = vmatprep.subr.bf16.mxu0 %v4451_v32  ;;  %4642 = vtanh.f32 %v2117_v40  ;;  %v6411_v38 = vadd.f32 %v6926_v33, %v6294_v45  ;;  %v1662_v21 = vmul.f32 %v1534_v25, %v6365_v5  ;;  %v6928_v10 = vld [vmem:[#allocation16_spill] sm:$0xff] }
 0x25a   :  { %v6407_v31 = vpop.f32.mrb[124].mxu1  ;;  %v4635_v46 = vpop.eup %4634  ;;  %v2108_v41 = vmul.f32 0.7978846, %v1980_v22  ;;  %v2116_v1 = vmul.f32 0.7978846, %v1988_v63  ;;  %v6418_v51 = vadd.f32 %v6928_v10, %v6280_v43  ;;  %4644 = vtanh.f32 %v2038_v15 }
 0x25b   :  { %6925 = vst [vmem:[#allocation24_spill] sm:$0xff] %v6407_v31  ;;  %v6413_v61 = vpop.f32.mrb[125].mxu1  ;;  %v2573_v48 = vpack.c.bf16 %v2485_v23, %v2477_v28  ;;  %v2348_v11 = vadd.f32 1.0, %v4635_v46  ;;  %v6423_v32 = vmul.f32 0.5, %v6140_v60  ;;  %v6428_v33 = vmul.f32 %v1655_v50, %v6343_v13  ;;  %v4452_v63 = vld [vmem:[#allocation8 + $0x3a0] ss:$8 sps:$4 sm:$0xff]  }
 0x25c   :  { %6927 = vst [vmem:[#allocation23_spill] sm:$0xff] %v6413_v61  ;;  %v6420_v20 = vpop.f32.mrb[126].mxu1  ;;  %v4637_v56 = vpop.eup %4636  ;;  %3738 = vmatpush1.bf16.msra.mxu0 %v4449_v3  ;;  %v1663_v25 = vmul.f32 %v1535_v0, %v6375_v2  ;;  %v1670_v22 = vmul.f32 %v1542_v52, %v6394_v54  ;;  %4646 = vtanh.f32 %v2108_v41  ;;  %v1543_v60 = vmul.f32 0.044715, %v6411_v38  ;;  %v4457_v15 = vld [vmem:[#allocation8 + $0x3b4] ss:$8 sps:$4 sm:$0xff]  }
 0x25d   :  { %6929 = vst [vmem:[#allocation26_spill] sm:$0xff] %v6420_v20  ;;  %v6425_v40 = vpop.f32.mrb[127].mxu1  ;;  %3678 = vmatprep.mubr.bf16.mxu0 %v2573_v48  ;;  %v2356_v28 = vadd.f32 1.0, %v4637_v56  ;;  %4648 = vtanh.f32 %v2116_v1  ;;  %3739 = vmatprep.subr.bf16.mxu0 %v4454_v14  ;;  %v6931_v23 = vld [vmem:[#allocation25_spill] sm:$0xff]  ;;  %v6438_v50 = vmul.f32 %v1662_v21, %v6365_v5  ;;  %v6441_v0 = vmul.f32 0.5, %v6089_v7 }
 0x25e   :  { %6930 = vst [vmem:[#allocation22_spill] sm:$0xff] %v6425_v40  ;;  %v6435_v46 = vadd.f32 %v6931_v23, %v6294_v45  ;;  %v1550_v3 = vmul.f32 0.044715, %v6418_v51  ;;  %v1997_v52 = vadd.f32 %v6235_v24, %v6155_v58  ;;  %v6446_v1 = vpop.eup %4638  ;;  %v2476_v14 = vmul.f32 %v2348_v11, %v6371_v55  ;;  %v4455_v56 = vld [vmem:[#allocation8 + $0x3b0] ss:$8 sps:$4 sm:$0xff]  }
 0x25f   :  { %v2484_v41 = vmul.f32 %v2356_v28, %v6383_v44  ;;  %v2005_v10 = vadd.f32 %v6285_v59, %v6213_v8  ;;  %v6454_v21 = vadd.f32 %v6181_v29, %v6280_v43  ;;  %v6457_v7 = vmul.f32 %v1663_v25, %v6375_v2  ;;  %v4460_v29 = vld [vmem:[#allocation8 + $0x3c4] ss:$8 sps:$4 sm:$0xff]  }
 0x260   :  { %v6460_v48 = vmul.f32 %v1670_v22, %v6394_v54  ;;  %v1476_v24 = vmul.f32 0.5, %v6124_v39  ;;  %3740 = vmatpush1.bf16.msra.mxu0 %v4452_v63  ;;  %v2125_v55 = vmul.f32 0.7978846, %v1997_v52  ;;  %v1671_v44 = vmul.f32 %v1543_v60, %v6411_v38 }
 0x261   :  { %v2572_v11 = vpack.c.bf16 %v2484_v41, %v2476_v14  ;;  %3741 = vmatprep.subr.bf16.mxu0 %v4457_v15  ;;  %v1551_v59 = vmul.f32 0.044715, %v6435_v46  ;;  %v2133_v28 = vmul.f32 0.7978846, %v2005_v10  ;;  %v1678_v25 = vmul.f32 %v1550_v3, %v6418_v51  ;;  %v4458_v15 = vld [vmem:[#allocation8 + $0x3c0] ss:$8 sps:$4 sm:$0xff]  }
 0x262   :  { %v4641_v23 = vpop.eup %4640  ;;  %4650 = vtanh.f32 %v2125_v55  ;;  %v1996_v22 = vadd.f32 %v6222_v18, %v6144_v34  ;;  %v2004_v39 = vadd.f32 %v6250_v17, %v6179_v30  ;;  %v1558_v60 = vmul.f32 0.044715, %v6454_v21  ;;  %v6932_v14 = vld [vmem:[#allocation18_spill] sm:$0xff]  ;;  %v6933_v18 = vld [vmem:[#allocation28_spill] sm:$0xff] }
 0x263   :  { %v4643_v63 = vpop.eup %4642  ;;  %3679 = vmatmul.mubr.bf16.gmra.mrb[16].mxu0 %v2572_v11  ;;  %v2365_v52 = vadd.f32 1.0, %v4641_v23  ;;  %4652 = vtanh.f32 %v2133_v28  ;;  %v6473_v41 = vadd.f32 %v6932_v14, %v6294_v45  ;;  %v6477_v40 = vadd.f32 %v6933_v18, %v6280_v43  ;;  %v6934_v18 = vld [vmem:[#allocation17_spill] sm:$0xff] }
 0x264   :  { %v2373_v10 = vadd.f32 1.0, %v4643_v63  ;;  %3742 = vmatpush1.bf16.msra.mxu0 %v4455_v56  ;;  %v2124_v3 = vmul.f32 0.7978846, %v1996_v22  ;;  %v2132_v55 = vmul.f32 0.7978846, %v2004_v39  ;;  %v6479_v17 = vpop.eup %4644  ;;  %v6482_v11 = vmul.f32 %v1671_v44, %v6411_v38 }
 0x265   :  { %v1679_v28 = vmul.f32 %v1551_v59, %v6435_v46  ;;  %v1485_v23 = vmul.f32 0.5, %v6155_v58  ;;  %v1493_v14 = vmul.f32 0.5, %v6213_v8  ;;  %3743 = vmatprep.subr.bf16.mxu0 %v4460_v29  ;;  %v4463_v63 = vld [vmem:[#allocation8 + $0x3d4] ss:$8 sps:$4 sm:$0xff]   ;;  %v2493_v22 = vmul.f32 %v2365_v52, %v6400_v4  ;;  %v4461_v4 = vld [vmem:[#allocation8 + $0x3d0] ss:$8 sps:$4 sm:$0xff]  }
 0x266   :  { %v4647_v56 = vpop.eup %4646  ;;  %v2501_v39 = vmul.f32 %v2373_v10, %v6423_v32  ;;  %4654 = vtanh.f32 %v2124_v3  ;;  %v6491_v20 = vadd.f32 %v6934_v18, %v6294_v45  ;;  %v1686_v59 = vmul.f32 %v1558_v60, %v6454_v21  ;;  %v4464_v18 = vld [vmem:[#allocation8 + $0x3e0] ss:$8 sps:$4 sm:$0xff]  }
 0x267   :  { %v4649_v44 = vpop.eup %4648  ;;  %v2364_v61 = vadd.f32 1.0, %v4647_v56  ;;  %4656 = vtanh.f32 %v2132_v55  ;;  %v1559_v58 = vmul.f32 0.044715, %v6473_v41  ;;  %v6496_v31 = vmul.f32 %v1678_v25, %v6418_v51  ;;  %v4466_v55 = vld [vmem:[#allocation8 + $0x3e4] ss:$8 sps:$4 sm:$0xff]  }
 0x268   :  { %v2581_v8 = vpack.c.bf16 %v2501_v39, %v2493_v22  ;;  %v2372_v29 = vadd.f32 1.0, %v4649_v44  ;;  %3744 = vmatpush1.bf16.msra.mxu0 %v4458_v15  ;;  %v1566_v32 = vmul.f32 0.044715, %v6477_v40  ;;  %v6500_v52 = vmul.f32 %v1679_v28, %v6435_v46 }
 0x269   :  { %v1484_v10 = vmul.f32 0.5, %v6144_v34  ;;  %v1492_v3 = vmul.f32 0.5, %v6179_v30  ;;  %3745 = vmatprep.subr.bf16.mxu0 %v4463_v63  ;;  %v2013_v60 = vadd.f32 %v6300_v42, %v6227_v62  ;;  %v2492_v25 = vmul.f32 %v2364_v61, %v6441_v0 }
 0x26a   :  { %3688 = vmatprep.mubr.bf16.mxu0 %v2581_v8  ;;  %v2500_v56 = vmul.f32 %v2372_v29, %v1476_v24  ;;  %v1567_v15 = vmul.f32 0.044715, %v6491_v20  ;;  %v2021_v22 = vadd.f32 %v6351_v26, %v6272_v47  ;;  %v6511_v28 = vmul.f32 %v1686_v59, %v6454_v21  ;;  %v6935_v59 = vld [vmem:[#allocation29_spill] sm:$0xff] }
 0x26b   :  { %v1687_v34 = vmul.f32 %v1559_v58, %v6473_v41  ;;  %v2141_v30 = vmul.f32 0.7978846, %v2013_v60  ;;  %v2012_v63 = vadd.f32 %v6297_v12, %v6217_v36  ;;  %v1694_v61 = vmul.f32 %v1566_v32, %v6477_v40  ;;  %v4469_v12 = vld [vmem:[#allocation8 + $0x3f4] ss:$8 sps:$4 sm:$0xff]  }
 0x26c   :  { %v4651_v42 = vpop.eup %4650  ;;  %v2580_v39 = vpack.c.bf16 %v2500_v56, %v2492_v25  ;;  %3746 = vmatpush1.bf16.msra.mxu0 %v4461_v4  ;;  %v2149_v0 = vmul.f32 0.7978846, %v2021_v22  ;;  %v2020_v24 = vadd.f32 %v6348_v53, %v6268_v37  ;;  %v6521_v58 = vadd.f32 %v6935_v59, %v6280_v43  ;;  %v6936_v53 = vld [vmem:[#allocation30_spill] sm:$0xff] }
 0x26d   :  { %v4653_v26 = vpop.eup %4652  ;;  %v2381_v44 = vadd.f32 1.0, %v4651_v42  ;;  %4658 = vtanh.f32 %v2141_v30  ;;  %v2140_v8 = vmul.f32 0.7978846, %v2012_v63  ;;  %3747 = vmatprep.subr.bf16.mxu0 %v4466_v55  ;;  %v1695_v4 = vmul.f32 %v1567_v15, %v6491_v20  ;;  %v4467_v15 = vld [vmem:[#allocation8 + $0x3f0] ss:$8 sps:$4 sm:$0xff]  }
 0x26e   :  { %3689 = vmatmul.mubr.bf16.gmra.mrb[20].mxu0 %v2580_v39  ;;  %v2389_v29 = vadd.f32 1.0, %v4653_v26  ;;  %4660 = vtanh.f32 %v2149_v0  ;;  %v2148_v32 = vmul.f32 0.7978846, %v2020_v24  ;;  %v1501_v60 = vmul.f32 0.5, %v6227_v62 }
 0x26f   :  { %4662 = vtanh.f32 %v2140_v8  ;;  %v6527_v25 = vadd.f32 %v6936_v53, %v6294_v45  ;;  %v6531_v56 = vadd.f32 %v6262_v35, %v6280_v43  ;;  %v2509_v55 = vmul.f32 %v2381_v44, %v1485_v23 }
 0x270   :  { %v4655_v22 = vpop.eup %4654  ;;  %v2517_v30 = vmul.f32 %v2389_v29, %v1493_v14  ;;  %v1509_v63 = vmul.f32 0.5, %v6272_v47  ;;  %4664 = vtanh.f32 %v2148_v32  ;;  %3748 = vmatpush1.bf16.msra.mxu0 %v4464_v18  ;;  %v6535_v62 = vmul.f32 %v1687_v34, %v6473_v41 }
 0x271   :  { %v4657_v42 = vpop.eup %4656  ;;  %v2380_v39 = vadd.f32 1.0, %v4655_v22  ;;  %v1574_v0 = vmul.f32 0.044715, %v6521_v58  ;;  %3749 = vmatprep.subr.bf16.mxu0 %v4469_v12  ;;  %v6540_v35 = vadd.f32 %v6275_v19, %v6294_v45  ;;  %v6543_v14 = vmul.f32 %v1694_v61, %v6477_v40 }
 0x272   :  { %v2589_v24 = vpack.c.bf16 %v2517_v30, %v2509_v55  ;;  %v2388_v23 = vadd.f32 1.0, %v4657_v42  ;;  %v6546_v47 = vmul.f32 %v1695_v4, %v6491_v20  ;;  %v1500_v18 = vmul.f32 0.5, %v6217_v36  ;;  %v6938_v55 = vld [vmem:[#allocation20_spill] sm:$0xff] }
 0x273   :  { %v1575_v34 = vmul.f32 0.044715, %v6527_v25  ;;  %v1582_v26 = vmul.f32 0.044715, %v6531_v56  ;;  %v1903_v44 = vadd.f32 %v6390_v16, %v6310_v9  ;;  %v2508_v19 = vmul.f32 %v2380_v39, %v1484_v10  ;;  %v6937_v10 = vld [vmem:[#allocation19_spill] sm:$0xff] }
 0x274   :  { %3698 = vmatprep.mubr.bf16.mxu0 %v2589_v24  ;;  %v2516_v59 = vmul.f32 %v2388_v23, %v1492_v3  ;;  %3750 = vmatpush1.bf16.msra.mxu0 %v4467_v15  ;;  %v1911_v61 = vadd.f32 %v6428_v33, %v6343_v13  ;;  %v2286_v8 = vadd.f32 1.0, %v6446_v1  ;;  %v1702_v12 = vmul.f32 %v1574_v0, %v6521_v58 }
 0x275   :  { %v1583_v36 = vmul.f32 0.044715, %v6540_v35  ;;  %v2031_v29 = vmul.f32 0.7978846, %v1903_v44  ;;  %v2294_v4 = vadd.f32 1.0, %v6479_v17  ;;  %v1508_v53 = vmul.f32 0.5, %v6268_v37 }
 0x276   :  { %v2588_v32 = vpack.c.bf16 %v2516_v59, %v2508_v19  ;;  %v2039_v16 = vmul.f32 0.7978846, %v1911_v61  ;;  %v6562_v3 = vadd.f32 %v6937_v10, %v6280_v43  ;;  %v6565_v33 = vmul.f32 %v2286_v8, %v6360_v27  ;;  %v6939_v59 = vld [vmem:[#allocation31_spill] sm:$0xff] }
 0x277   :  { %v4659_v22 = vpop.eup %4658  ;;  %4666 = vtanh.f32 %v2031_v29  ;;  %v6568_v1 = vmul.f32 %v2294_v4, %v6380_v6  ;;  %v6572_v30 = vadd.f32 %v6938_v55, %v6294_v45  ;;  %v1703_v15 = vmul.f32 %v1575_v34, %v6527_v25 }
 0x278   :  { %v4661_v17 = vpop.eup %4660  ;;  %3699 = vmatmul.mubr.bf16.gmra.mrb[24].mxu0 %v2588_v32  ;;  %v2397_v37 = vadd.f32 1.0, %v4659_v22  ;;  %v1710_v42 = vmul.f32 %v1582_v26, %v6531_v56  ;;  %4668 = vtanh.f32 %v2039_v16  ;;  %v6577_v27 = vmul.f32 %v1702_v12, %v6521_v58  ;;  %v6940_v26 = vld [vmem:[#allocation32_spill] sm:$0xff] }
 0x279   :  { %v4663_v39 = vpop.eup %4662  ;;  %v2405_v0 = vadd.f32 1.0, %v4661_v17  ;;  %v1711_v6 = vmul.f32 %v1583_v36, %v6540_v35  ;;  %v2542_v24 = vpack.c.bf16 %v6568_v1, %v6565_v33  ;;  %v1590_v19 = vmul.f32 0.044715, %v6562_v3  ;;  %v6945_v33 = vld [vmem:[#allocation21_spill] sm:$0xff] }
 0x27a   :  { %v4665_v23 = vpop.eup %4664  ;;  %v2396_v44 = vadd.f32 1.0, %v4663_v39  ;;  %v6585_v34 = vadd.f32 %v6939_v59, %v6280_v43  ;;  %v6589_v61 = vadd.f32 %v6940_v26, %v6294_v45  ;;  %v2525_v8 = vmul.f32 %v2397_v37, %v1501_v60 }
 0x27b   :  { %v2533_v12 = vmul.f32 %v2405_v0, %v1509_v63  ;;  %v2404_v29 = vadd.f32 1.0, %v4665_v23  ;;  %v1591_v36 = vmul.f32 0.044715, %v6572_v30  ;;  %v6593_v4 = vmul.f32 %v1703_v15, %v6527_v25 }
 0x27c   :  { %v6596_v32 = vmul.f32 %v1710_v42, %v6531_v56  ;;  %v1391_v16 = vmul.f32 0.5, %v6310_v9  ;;  %v1399_v10 = vmul.f32 0.5, %v6343_v13  ;;  %v2524_v55 = vmul.f32 %v2396_v44, %v1500_v18 }
 0x27d   :  { %v2597_v22 = vpack.c.bf16 %v2533_v12, %v2525_v8  ;;  %v2532_v17 = vmul.f32 %v2404_v29, %v1508_v53  ;;  %v6601_v39 = vmul.f32 %v1711_v6, %v6540_v35  ;;  %v1718_v60 = vmul.f32 %v1590_v19, %v6562_v3  ;;  %v6941_v53 = vld [vmem:[#allocation33_spill] sm:$0xff]  ;;  %v6942_v19 = vld [vmem:[#allocation34_spill] sm:$0xff] }
 0x27e   :  { %v1598_v63 = vmul.f32 0.044715, %v6585_v34  ;;  %v1919_v37 = vadd.f32 %v6457_v7, %v6375_v2  ;;  %v1927_v15 = vadd.f32 %v6482_v11, %v6411_v38  ;;  %v1719_v13 = vmul.f32 %v1591_v36, %v6572_v30 }
 0x27f   :  { %3708 = vmatprep.mubr.bf16.mxu0 %v2597_v22  ;;  %v2596_v9 = vpack.c.bf16 %v2532_v17, %v2524_v55  ;;  %v1599_v18 = vmul.f32 0.044715, %v6589_v61  ;;  %v6613_v42 = vadd.f32 %v6941_v53, %v6280_v43  ;;  %v1918_v23 = vadd.f32 %v6438_v50, %v6365_v5 }
 0x280   :  { %v2047_v0 = vmul.f32 0.7978846, %v1919_v37  ;;  %v2055_v6 = vmul.f32 0.7978846, %v1927_v15  ;;  %v1926_v7 = vadd.f32 %v6460_v48, %v6394_v54  ;;  %v6622_v59 = vadd.f32 %v6942_v19, %v6294_v45 }
 0x281   :  { %v4667_v44 = vpop.eup %4666  ;;  %3709 = vmatmul.mubr.bf16.gmra.mrb[28].mxu0 %v2596_v9  ;;  %v1606_v11 = vmul.f32 0.044715, %v6613_v42  ;;  %v6626_v26 = vadd.f32 %v6354_v49, %v6280_v43  ;;  %v6630_v8 = vadd.f32 %v6357_v57, %v6294_v45  ;;  %v2046_v48 = vmul.f32 0.7978846, %v1918_v23 }
 0x282   :  { %v4669_v50 = vpop.eup %4668  ;;  %v2287_v12 = vadd.f32 1.0, %v4667_v44  ;;  %4670 = vtanh.f32 %v2047_v0  ;;  %v2054_v29 = vmul.f32 0.7978846, %v1926_v7  ;;  %v6633_v22 = vmul.f32 %v1718_v60, %v6562_v3 }
 0x283   :  { %v2295_v36 = vadd.f32 1.0, %v4669_v50  ;;  %v1726_v55 = vmul.f32 %v1598_v63, %v6585_v34  ;;  %4672 = vtanh.f32 %v2055_v6  ;;  %v1727_v17 = vmul.f32 %v1599_v18, %v6589_v61 }
 0x284   :  { %v1407_v49 = vmul.f32 0.5, %v6375_v2  ;;  %v1734_v37 = vmul.f32 %v1606_v11, %v6613_v42  ;;  %4674 = vtanh.f32 %v2046_v48  ;;  %v2415_v57 = vmul.f32 %v2287_v12, %v1391_v16  ;;  %v6944_v12 = vld [vmem:[#allocation27_spill] sm:$0xff] }
 0x285   :  { %v2423_v15 = vmul.f32 %v2295_v36, %v1399_v10  ;;  %4676 = vtanh.f32 %v2054_v29  ;;  %v1607_v9 = vmul.f32 0.044715, %v6622_v59  ;;  %v6641_v53 = vmul.f32 %v1719_v13, %v6572_v30 }
 0x286   :  { %v1415_v60 = vmul.f32 0.5, %v6411_v38  ;;  %v1614_v63 = vmul.f32 0.044715, %v6626_v26  ;;  %v1615_v0 = vmul.f32 0.044715, %v6630_v8  ;;  %v6647_v2 = vmul.f32 %v1726_v55, %v6585_v34 }
 0x287   :  { %v2543_v18 = vpack.c.bf16 %v2423_v15, %v2415_v57  ;;  %v1935_v16 = vadd.f32 %v6500_v52, %v6435_v46  ;;  %v1943_v10 = vadd.f32 %v6535_v62, %v6473_v41  ;;  %v6654_v6 = vmul.f32 %v1727_v17, %v6589_v61  ;;  %v6946_v57 = vld [vmem:[#allocation23_spill] sm:$0xff] }
 0x288   :  { %v6657_v13 = vmul.f32 %v1734_v37, %v6613_v42  ;;  %v1406_v38 = vmul.f32 0.5, %v6365_v5  ;;  %v1414_v23 = vmul.f32 0.5, %v6394_v54  ;;  %v1735_v7 = vmul.f32 %v1607_v9, %v6622_v59  ;;  %v6943_v54 = vld [vmem:[#allocation24_spill] sm:$0xff] }
 0x289   :  { %3751 = vmatprep.mubr.bf16.mxu0 %v2543_v18  ;;  %v2063_v44 = vmul.f32 0.7978846, %v1935_v16  ;;  %v2071_v11 = vmul.f32 0.7978846, %v1943_v10  ;;  %v1934_v52 = vadd.f32 %v6496_v31, %v6418_v51  ;;  %v1742_v62 = vmul.f32 %v1614_v63, %v6626_v26 }
 0x28a   :  { %3752 = vmatmul.mubr.bf16.vlgmr.msra.gmra.mrb[0].mxu0 %v2542_v24  ;;  %v1743_v19 = vmul.f32 %v1615_v0, %v6630_v8  ;;  %v1942_v5 = vadd.f32 %v6511_v28, %v6454_v21  ;;  %v6673_v50 = vadd.f32 %v6943_v54, %v6280_v43  ;;  %v6677_v48 = vadd.f32 %v6944_v12, %v6280_v43 }
 0x28b   :  { %4678 = vtanh.f32 %v2063_v44  ;;  %v2062_v31 = vmul.f32 0.7978846, %v1934_v52  ;;  %v6681_v1 = vadd.f32 %v6945_v33, %v6294_v45  ;;  %v1423_v29 = vmul.f32 0.5, %v6435_v46 }
 0x28c   :  { %v4671_v24 = vpop.eup %4670  ;;  %v1431_v36 = vmul.f32 0.5, %v6473_v41  ;;  %4680 = vtanh.f32 %v2071_v11  ;;  %v2070_v28 = vmul.f32 0.7978846, %v1942_v5  ;;  %v6686_v37 = vmul.f32 %v1735_v7, %v6622_v59 }
 0x28d   :  { %v4673_v55 = vpop.eup %4672  ;;  %v2303_v17 = vadd.f32 1.0, %v4671_v24  ;;  %4682 = vtanh.f32 %v2062_v31  ;;  %v6690_v15 = vadd.f32 %v6946_v57, %v6294_v45  ;;  %v6693_v0 = vmul.f32 %v1742_v62, %v6626_v26  ;;  %v6947_v24 = vld [vmem:[#allocation26_spill] sm:$0xff] }
 0x28e   :  { %v4675_v9 = vpop.eup %4674  ;;  %v2311_v63 = vadd.f32 1.0, %v4673_v55  ;;  %v6696_v46 = vmul.f32 %v1743_v19, %v6630_v8  ;;  %4684 = vtanh.f32 %v2070_v28  ;;  %v1622_v16 = vmul.f32 0.044715, %v6677_v48 }
 0x28f   :  { %v4677_v41 = vpop.eup %4676  ;;  %v2302_v18 = vadd.f32 1.0, %v4675_v9  ;;  %v1422_v10 = vmul.f32 0.5, %v6418_v51  ;;  %v1623_v7 = vmul.f32 0.044715, %v6681_v1  ;;  %v2431_v44 = vmul.f32 %v2303_v17, %v1407_v49 }
 0x290   :  { %v2439_v11 = vmul.f32 %v2311_v63, %v1415_v60  ;;  %v2310_v52 = vadd.f32 1.0, %v4677_v41  ;;  %v1630_v5 = vmul.f32 0.044715, %v6673_v50  ;;  %v1430_v62 = vmul.f32 0.5, %v6454_v21 }
 0x291   :  { %v2430_v54 = vmul.f32 %v2302_v18, %v1406_v38  ;;  %v1631_v19 = vmul.f32 0.044715, %v6690_v15  ;;  %v1951_v12 = vadd.f32 %v6546_v47, %v6491_v20  ;;  %v1959_v51 = vadd.f32 %v6593_v4, %v6527_v25  ;;  %v6948_v18 = vld [vmem:[#allocation22_spill] sm:$0xff] }
 0x292   :  { %v2551_v31 = vpack.c.bf16 %v2439_v11, %v2431_v44  ;;  %v2438_v33 = vmul.f32 %v2310_v52, %v1414_v23  ;;  %v6710_v49 = vadd.f32 %v6947_v24, %v6280_v43  ;;  %v1750_v60 = vmul.f32 %v1622_v16, %v6677_v48 }
 0x293   :  { %v1751_v38 = vmul.f32 %v1623_v7, %v6681_v1  ;;  %v2079_v28 = vmul.f32 0.7978846, %v1951_v12  ;;  %v1950_v21 = vadd.f32 %v6543_v14, %v6477_v40  ;;  %v1758_v47 = vmul.f32 %v1630_v5, %v6673_v50 }
 0x294   :  { %3761 = vmatprep.mubr.bf16.mxu0 %v2551_v31  ;;  %v2550_v55 = vpack.c.bf16 %v2438_v33, %v2430_v54  ;;  %v2087_v23 = vmul.f32 0.7978846, %v1959_v51  ;;  %v1958_v4 = vadd.f32 %v6577_v27, %v6521_v58  ;;  %v1759_v43 = vmul.f32 %v1631_v19, %v6690_v15 }
 0x295   :  { %v4679_v17 = vpop.eup %4678  ;;  %v6721_v57 = vmul.f32 0.5, %v6491_v20  ;;  %4686 = vtanh.f32 %v2079_v28  ;;  %v2078_v9 = vmul.f32 0.7978846, %v1950_v21  ;;  %v6725_v16 = vadd.f32 %v6948_v18, %v6294_v45 }
 0x296   :  { %v4681_v63 = vpop.eup %4680  ;;  %3762 = vmatmul.mubr.bf16.gmra.mrb[4].mxu0 %v2550_v55  ;;  %v2319_v41 = vadd.f32 1.0, %v4679_v17  ;;  %4688 = vtanh.f32 %v2087_v23  ;;  %v2086_v14 = vmul.f32 0.7978846, %v1958_v4  ;;  %v6728_v27 = vmul.f32 %v1750_v60, %v6677_v48 }
 0x297   :  { %v4683_v7 = vpop.eup %4682  ;;  %v2327_v44 = vadd.f32 1.0, %v4681_v63  ;;  %v1879_v11 = vmul.f32 %v1751_v38, %v6681_v1  ;;  %4690 = vtanh.f32 %v2078_v9  ;;  %v6732_v5 = vmul.f32 %v1758_v47, %v6673_v50 }
 0x298   :  { %v4685_v20 = vpop.eup %4684  ;;  %v2318_v52 = vadd.f32 1.0, %v4683_v7  ;;  %v1447_v54 = vmul.f32 0.5, %v6527_v25  ;;  %4692 = vtanh.f32 %v2086_v14  ;;  %v2447_v19 = vmul.f32 %v2319_v41, %v1423_v29 }
 0x299   :  { %v2455_v12 = vmul.f32 %v2327_v44, %v1431_v36  ;;  %v2326_v45 = vadd.f32 1.0, %v4685_v20  ;;  %v1967_v31 = vadd.f32 %v6601_v39, %v6540_v35  ;;  %v6738_v33 = vmul.f32 %v1759_v43, %v6690_v15 }
 0x29a   :  { %v1438_v51 = vmul.f32 0.5, %v6477_v40  ;;  %v1639_v24 = vmul.f32 0.044715, %v6725_v16  ;;  %v1975_v60 = vadd.f32 %v6641_v53, %v6572_v30  ;;  %v2446_v28 = vmul.f32 %v2318_v52, %v1422_v10 }
 0x29b   :  { %v2559_v38 = vpack.c.bf16 %v2455_v12, %v2447_v19  ;;  %v2454_v25 = vmul.f32 %v2326_v45, %v1430_v62  ;;  %v2095_v21 = vmul.f32 0.7978846, %v1967_v31  ;;  %v1446_v29 = vmul.f32 0.5, %v6521_v58 }
 0x29c   :  { %v2103_v36 = vmul.f32 0.7978846, %v1975_v60  ;;  %v1966_v39 = vadd.f32 %v6596_v32, %v6531_v56  ;;  %v1974_v55 = vadd.f32 %v6633_v22, %v6562_v3  ;;  %v1638_v47 = vmul.f32 0.044715, %v6710_v49 }
 0x29d   :  { %3771 = vmatprep.mubr.bf16.mxu0 %v2559_v38  ;;  %v2558_v40 = vpack.c.bf16 %v2454_v25, %v2446_v28  ;;  %4694 = vtanh.f32 %v2095_v21  ;;  %v1983_v53 = vadd.f32 %v6654_v6, %v6589_v61  ;;  %v1991_v58 = vadd.f32 %v6686_v37, %v6622_v59 }
 0x29e   :  { %4696 = vtanh.f32 %v2103_v36  ;;  %v2094_v10 = vmul.f32 0.7978846, %v1966_v39  ;;  %v2102_v62 = vmul.f32 0.7978846, %v1974_v55  ;;  %v1767_v32 = vmul.f32 %v1639_v24, %v6725_v16 }
 0x29f   :  { %v4687_v23 = vpop.eup %4686  ;;  %3772 = vmatmul.mubr.bf16.gmra.mrb[8].mxu0 %v2558_v40  ;;  %v1455_v22 = vmul.f32 0.5, %v6540_v35  ;;  %v2111_v4 = vmul.f32 0.7978846, %v1983_v53  ;;  %v1982_v17 = vadd.f32 %v6647_v2, %v6585_v34  ;;  %v2119_v6 = vmul.f32 0.7978846, %v1991_v58 }
 0x2a0   :  { %v4689_v43 = vpop.eup %4688  ;;  %v2335_v9 = vadd.f32 1.0, %v4687_v23  ;;  %4698 = vtanh.f32 %v2094_v10  ;;  %v1990_v63 = vadd.f32 %v6657_v13, %v6613_v42  ;;  %v1766_v37 = vmul.f32 %v1638_v47, %v6710_v49 }
 0x2a1   :  { %v4691_v41 = vpop.eup %4690  ;;  %v2343_v14 = vadd.f32 1.0, %v4689_v43  ;;  %4700 = vtanh.f32 %v2102_v62  ;;  %v2110_v18 = vmul.f32 0.7978846, %v1982_v17  ;;  %v1463_v35 = vmul.f32 0.5, %v6572_v30 }
 0x2a2   :  { %v4693_v7 = vpop.eup %4692  ;;  %v2334_v44 = vadd.f32 1.0, %v4691_v41  ;;  %4702 = vtanh.f32 %v2111_v4  ;;  %v2118_v20 = vmul.f32 0.7978846, %v1990_v63  ;;  %v2463_v2 = vmul.f32 %v2335_v9, %v6721_v57 }
 0x2a3   :  { %v2471_v52 = vmul.f32 %v2343_v14, %v1447_v54  ;;  %v2342_v19 = vadd.f32 1.0, %v4693_v7  ;;  %4704 = vtanh.f32 %v2119_v6  ;;  %v1895_v12 = vmul.f32 %v1767_v32, %v6725_v16 }
 0x2a4   :  { %4706 = vtanh.f32 %v2110_v18  ;;  %v1999_v13 = vadd.f32 %v6696_v46, %v6630_v8  ;;  %v2007_v45 = vadd.f32 %v1879_v11, %v6681_v1  ;;  %v2462_v24 = vmul.f32 %v2334_v44, %v1438_v51 }
 0x2a5   :  { %v2567_v31 = vpack.c.bf16 %v2471_v52, %v2463_v2  ;;  %v2470_v60 = vmul.f32 %v2342_v19, %v1446_v29  ;;  %4708 = vtanh.f32 %v2118_v20  ;;  %v1894_v30 = vmul.f32 %v1766_v37, %v6710_v49 }
 0x2a6   :  { %v2127_v38 = vmul.f32 0.7978846, %v1999_v13  ;;  %v2135_v28 = vmul.f32 0.7978846, %v2007_v45  ;;  %v1998_v57 = vadd.f32 %v6693_v0, %v6626_v26  ;;  %v1454_v21 = vmul.f32 0.5, %v6531_v56 }
 0x2a7   :  { %v4695_v54 = vpop.eup %4694  ;;  %3781 = vmatprep.mubr.bf16.mxu0 %v2567_v31  ;;  %v2566_v25 = vpack.c.bf16 %v2470_v60, %v2462_v24  ;;  %v1462_v46 = vmul.f32 0.5, %v6562_v3  ;;  %v2006_v11 = vadd.f32 %v6728_v27, %v6677_v48  ;;  %v2015_v39 = vadd.f32 %v6738_v33, %v6690_v15 }
 0x2a8   :  { %v4697_v51 = vpop.eup %4696  ;;  %v2351_v29 = vadd.f32 1.0, %v4695_v54  ;;  %4710 = vtanh.f32 %v2127_v38  ;;  %v2126_v36 = vmul.f32 0.7978846, %v1998_v57  ;;  %v2023_v40 = vadd.f32 %v1895_v12, %v6725_v16 }
 0x2a9   :  { %3782 = vmatmul.mubr.bf16.gmra.mrb[12].mxu0 %v2566_v25  ;;  %v2359_v55 = vadd.f32 1.0, %v4697_v51  ;;  %4712 = vtanh.f32 %v2135_v28  ;;  %v2134_v0 = vmul.f32 0.7978846, %v2006_v11  ;;  %v1471_v3 = vmul.f32 0.5, %v6589_v61 }
 0x2aa   :  { %v4699_v47 = vpop.eup %4698  ;;  %v2479_v56 = vmul.f32 %v2351_v29, %v1455_v22  ;;  %4714 = vtanh.f32 %v2126_v36  ;;  %v2143_v53 = vmul.f32 0.7978846, %v2015_v39  ;;  %v2151_v58 = vmul.f32 0.7978846, %v2023_v40 }
 0x2ab   :  { %v4701_v27 = vpop.eup %4700  ;;  %v2487_v10 = vmul.f32 %v2359_v55, %v1463_v35  ;;  %v2350_v62 = vadd.f32 1.0, %v4699_v47  ;;  %4716 = vtanh.f32 %v2134_v0  ;;  %v1479_v33 = vmul.f32 0.5, %v6622_v59 }
 0x2ac   :  { %v4703_v23 = vpop.eup %4702  ;;  %v2358_v32 = vadd.f32 1.0, %v4701_v27  ;;  %4718 = vtanh.f32 %v2143_v53  ;;  %v2014_v4 = vadd.f32 %v6732_v5, %v6673_v50  ;;  %v2022_v41 = vadd.f32 %v1894_v30, %v6710_v49 }
 0x2ad   :  { %v4705_v17 = vpop.eup %4704  ;;  %v2575_v43 = vpack.c.bf16 %v2487_v10, %v2479_v56  ;;  %v2478_v22 = vmul.f32 %v2350_v62, %v1454_v21  ;;  %v2367_v9 = vadd.f32 1.0, %v4703_v23  ;;  %4720 = vtanh.f32 %v2151_v58  ;;  %v2728_v23 = vld [vmem:[%s6854_s4] sm:$0x3]  ;;  %s4856_s4 = smov [#allocation10]  }
 0x2ae   :  { %v4707_v61 = vpop.eup %4706  ;;  %v2486_v6 = vmul.f32 %v2358_v32, %v1462_v46  ;;  %v2375_v63 = vadd.f32 1.0, %v4705_v17  ;;  %v2142_v14 = vmul.f32 0.7978846, %v2014_v4  ;;  %v1470_v59 = vmul.f32 0.5, %v6585_v34  ;;  %v6949_v32 = vld [vmem:[#allocation15_spill] sm:$0xff]  ;;  %s3869_s21 = sshll.u32 %s4856_s4, 4  ;;  %s3870_s21 = int_to_ptr.vmem [resolvable:$true] %s3869_s21 }
 0x2af   :  { %v4709_v37 = vpop.eup %4708  ;;  %3791 = vmatprep.mubr.bf16.mxu0 %v2575_v43  ;;  %v2495_v18 = vmul.f32 %v2367_v9, %v1471_v3  ;;  %v1478_v7 = vmul.f32 0.5, %v6613_v42  ;;  %v2366_v44 = vadd.f32 1.0, %v4707_v61  ;;  %v2150_v2 = vmul.f32 0.7978846, %v2022_v41  ;;  %s4816_s22 = scalar_lea.vmem %s3870_s21, 4096  ;;  %p4821_p5 = scmp.lt.s32.totalorder %s3870_s21, %s3870_s21 }
 0x2b0   :  { %v2574_v5 = vpack.c.bf16 %v2486_v6, %v2478_v22  ;;  %v2503_v35 = vmul.f32 %v2375_v63, %v1479_v33  ;;  %v2374_v20 = vadd.f32 1.0, %v4709_v37  ;;  %4722 = vtanh.f32 %v2142_v14  ;;  %p4817_p4 = scmp.ne.s32.totalorder %s3870_s21, %s4816_s22  ;;  %p4822_p6 = scmp.lt.s32.totalorder %s4816_s22, %s4816_s22 }
 0x2b1   :  { %v2494_v12 = vmul.f32 %v2366_v44, %v1470_v59  ;;  %4724 = vtanh.f32 %v2150_v2  ;;  %v1487_v34 = vmul.f32 0.5, %v6630_v8  ;;  %v1495_v42 = vmul.f32 0.5, %v6681_v1 }
 0x2b2   :  { %v4711_v52 = vpop.eup %4710  ;;  %3792 = vmatmul.mubr.bf16.gmra.mrb[16].mxu0 %v2574_v5  ;;  %v2583_v19 = vpack.c.bf16 %v2503_v35, %v2495_v18  ;;  %v2502_v13 = vmul.f32 %v2374_v20, %v1478_v7  ;;  %v1486_v28 = vmul.f32 0.5, %v6626_v26  ;;  %v1494_v46 = vmul.f32 0.5, %v6677_v48  ;;  %p4823_p7 = por %p4822_p6, %p4821_p5 }
 0x2b3   :  { %v4713_v45 = vpop.eup %4712  ;;  %v2383_v31 = vadd.f32 1.0, %v4711_v52  ;;  %v1503_v29 = vmul.f32 0.5, %v6690_v15  ;;  %v1511_v36 = vmul.f32 0.5, %v6725_v16  ;;  %v1502_v27 = vmul.f32 0.5, %v6673_v50 }
 0x2b4   :  { %v4715_v24 = vpop.eup %4714  ;;  %3801 = vmatprep.mubr.bf16.mxu0 %v2583_v19  ;;  %v2582_v60 = vpack.c.bf16 %v2502_v13, %v2494_v12  ;;  %v2391_v30 = vadd.f32 1.0, %v4713_v45  ;;  %v1510_v15 = vmul.f32 0.5, %v6710_v49  ;;  %v6950_v33 = vsub.s32 0, %v6949_v32  ;;  %p4824_p8 = pnand %p4823_p7, %p4817_p4 }
 0x2b5   :  { %v4717_v38 = vpop.eup %4716  ;;  %v2382_v57 = vadd.f32 1.0, %v4715_v24  ;;  %v2511_v25 = vmul.f32 %v2383_v31, %v1487_v34  ;;  %v6951_v17 = vsub.s32 1, %v6949_v32 }
 0x2b6   :  { %v4719_v54 = vpop.eup %4718  ;;  %v2519_v21 = vmul.f32 %v2391_v30, %v1495_v42  ;;  %v2390_v11 = vadd.f32 1.0, %v4717_v38  ;;  %v6797_v4 = vrot.slane %v2728_v23, %v6950_v33 }
 0x2b7   :  { %v4721_v51 = vpop.eup %4720  ;;  %v2399_v39 = vadd.f32 1.0, %v4719_v54  ;;  %v2510_v55 = vmul.f32 %v2382_v57, %v1486_v28  ;;  %v6801_v50 = vrot.slane %v2728_v23, %v6951_v17 }
 0x2b8   :  { %v2591_v8 = vpack.c.bf16 %v2519_v21, %v2511_v25  ;;  %v2518_v1 = vmul.f32 %v2390_v11, %v1494_v46  ;;  %v2407_v0 = vadd.f32 1.0, %v4721_v51 }
 0x2b9   :  { %v2527_v26 = vmul.f32 %v2399_v39, %v1503_v29 }
 0x2ba   :  { %3802 = vmatmul.mubr.bf16.gmra.mrb[20].mxu0 %v2582_v60  ;;  %v2590_v40 = vpack.c.bf16 %v2518_v1, %v2510_v55  ;;  %v2535_v47 = vmul.f32 %v2407_v0, %v1511_v36  ;;  %v4723_v56 = vpop.eup %4722 }
 0x2bb   :  { %3811 = vmatprep.mubr.bf16.mxu0 %v2591_v8  ;;  %v4725_v3 = vpop.eup %4724  ;;  %v2398_v48 = vadd.f32 1.0, %v4723_v56 }
 0x2bc   :  { %v2599_v53 = vpack.c.bf16 %v2535_v47, %v2527_v26  ;;  %v2406_v10 = vadd.f32 1.0, %v4725_v3 }
 0x2bd   :  { %v2526_v16 = vmul.f32 %v2398_v48, %v1502_v27 }
 0x2be   :  { %v2534_v62 = vmul.f32 %v2406_v10, %v1510_v15 }
 0x2c0   :  { %v2598_v58 = vpack.c.bf16 %v2534_v62, %v2526_v16 }
 0x2c2   :  { %3812 = vmatmul.mubr.bf16.gmra.mrb[24].mxu0 %v2590_v40 }
 0x2c3   :  { %3821 = vmatprep.mubr.bf16.mxu0 %v2599_v53 }
 0x2ca   :  { %3822 = vmatmul.mubr.bf16.gmra.mrb[28].mxu0 %v2598_v58 }
 0x35d   :  { %v3753_v49 = vpop.f32.mrb[0].mxu0 }
 0x35e   :  { %v4139_v43 = vadd.f32 %v3753_v49, %v6797_v4  ;;  %v3755_v22 = vpop.f32.mrb[1].mxu0 }
 0x35f   :  { %v4140_v9 = vadd.f32 %v3755_v22, %v6801_v50  ;;  %v3757_v61 = vpop.f32.mrb[2].mxu0 }
 0x360   :  { %3832 = vst [vmem:[#allocation10] sm:$0xff] %v4139_v43  ;;  %v4141_v6 = vadd.f32 %v3757_v61, %v6797_v4  ;;  %v3759_v63 = vpop.f32.mrb[3].mxu0 }
 0x361   :  { %3833 = vst [vmem:[#allocation10 + $0x8] sm:$0xff] %v4140_v9  ;;  %v4142_v41 = vadd.f32 %v3759_v63, %v6801_v50 }
 0x362   :  { %3834 = vst [vmem:[#allocation10 + $0x10] sm:$0xff] %v4141_v6 }
 0x363   :  { %3835 = vst [vmem:[#allocation10 + $0x18] sm:$0xff] %v4142_v41 }
 0x369   :  { %v3763_v14 = vpop.f32.mrb[4].mxu0 }
 0x36a   :  { %v4143_v37 = vadd.f32 %v3763_v14, %v6797_v4  ;;  %v3765_v18 = vpop.f32.mrb[5].mxu0 }
 0x36b   :  { %v4144_v59 = vadd.f32 %v3765_v18, %v6801_v50  ;;  %v3767_v7 = vpop.f32.mrb[6].mxu0 }
 0x36c   :  { %3836 = vst [vmem:[#allocation10 + $0x20] sm:$0xff] %v4143_v37  ;;  %v4145_v44 = vadd.f32 %v3767_v7, %v6797_v4  ;;  %v3769_v5 = vpop.f32.mrb[7].mxu0 }
 0x36d   :  { %3837 = vst [vmem:[#allocation10 + $0x28] sm:$0xff] %v4144_v59  ;;  %v4146_v35 = vadd.f32 %v3769_v5, %v6801_v50 }
 0x36e   :  { %3838 = vst [vmem:[#allocation10 + $0x30] sm:$0xff] %v4145_v44 }
 0x36f   :  { %3839 = vst [vmem:[#allocation10 + $0x38] sm:$0xff] %v4146_v35 }
 0x372   :  { %v3773_v20 = vpop.f32.mrb[8].mxu0 }
 0x373   :  { %v4147_v2 = vadd.f32 %v3773_v20, %v6797_v4  ;;  %v3775_v52 = vpop.f32.mrb[9].mxu0 }
 0x374   :  { %v4148_v19 = vadd.f32 %v3775_v52, %v6801_v50  ;;  %v3777_v12 = vpop.f32.mrb[10].mxu0 }
 0x375   :  { %3840 = vst [vmem:[#allocation10 + $0x40] sm:$0xff] %v4147_v2  ;;  %v4149_v13 = vadd.f32 %v3777_v12, %v6797_v4  ;;  %v3779_v45 = vpop.f32.mrb[11].mxu0 }
 0x376   :  { %3841 = vst [vmem:[#allocation10 + $0x48] sm:$0xff] %v4148_v19  ;;  %v4150_v31 = vadd.f32 %v3779_v45, %v6801_v50 }
 0x377   :  { %3842 = vst [vmem:[#allocation10 + $0x50] sm:$0xff] %v4149_v13 }
 0x378   :  { %3843 = vst [vmem:[#allocation10 + $0x58] sm:$0xff] %v4150_v31 }
 0x37c   :  { %v3783_v24 = vpop.f32.mrb[12].mxu0 }
 0x37d   :  { %v4151_v60 = vadd.f32 %v3783_v24, %v6797_v4  ;;  %v3785_v34 = vpop.f32.mrb[13].mxu0 }
 0x37e   :  { %v4152_v42 = vadd.f32 %v3785_v34, %v6801_v50  ;;  %v3787_v30 = vpop.f32.mrb[14].mxu0 }
 0x37f   :  { %3844 = vst [vmem:[#allocation10 + $0x60] sm:$0xff] %v4151_v60  ;;  %v4153_v38 = vadd.f32 %v3787_v30, %v6797_v4  ;;  %v3789_v28 = vpop.f32.mrb[15].mxu0 }
 0x380   :  { %3845 = vst [vmem:[#allocation10 + $0x68] sm:$0xff] %v4152_v42  ;;  %v4154_v57 = vadd.f32 %v3789_v28, %v6801_v50 }
 0x381   :  { %3846 = vst [vmem:[#allocation10 + $0x70] sm:$0xff] %v4153_v38 }
 0x382   :  { %3847 = vst [vmem:[#allocation10 + $0x78] sm:$0xff] %v4154_v57 }
 0x385   :  { %v3793_v54 = vpop.f32.mrb[16].mxu0 }
 0x386   :  { %v4155_v25 = vadd.f32 %v3793_v54, %v6797_v4  ;;  %v3795_v21 = vpop.f32.mrb[17].mxu0 }
 0x387   :  { %v4156_v46 = vadd.f32 %v3795_v21, %v6801_v50  ;;  %v3797_v11 = vpop.f32.mrb[18].mxu0 }
 0x388   :  { %3848 = vst [vmem:[#allocation10 + $0x80] sm:$0xff] %v4155_v25  ;;  %v4157_v51 = vadd.f32 %v3797_v11, %v6797_v4  ;;  %v3799_v29 = vpop.f32.mrb[19].mxu0 }
 0x389   :  { %3849 = vst [vmem:[#allocation10 + $0x88] sm:$0xff] %v4156_v46  ;;  %v4158_v36 = vadd.f32 %v3799_v29, %v6801_v50 }
 0x38a   :  { %3850 = vst [vmem:[#allocation10 + $0x90] sm:$0xff] %v4157_v51 }
 0x38b   :  { %3851 = vst [vmem:[#allocation10 + $0x98] sm:$0xff] %v4158_v36 }
 0x38d   :  { %v3803_v39 = vpop.f32.mrb[20].mxu0 }
 0x38e   :  { %v4159_v8 = vadd.f32 %v3803_v39, %v6797_v4  ;;  %v3805_v55 = vpop.f32.mrb[21].mxu0 }
 0x38f   :  { %v4160_v1 = vadd.f32 %v3805_v55, %v6801_v50  ;;  %v3807_v0 = vpop.f32.mrb[22].mxu0 }
 0x390   :  { %3852 = vst [vmem:[#allocation10 + $0xa0] sm:$0xff] %v4159_v8  ;;  %v4161_v40 = vadd.f32 %v3807_v0, %v6797_v4  ;;  %v3809_v26 = vpop.f32.mrb[23].mxu0 }
 0x391   :  { %3853 = vst [vmem:[#allocation10 + $0xa8] sm:$0xff] %v4160_v1  ;;  %v4162_v47 = vadd.f32 %v3809_v26, %v6801_v50 }
 0x392   :  { %3854 = vst [vmem:[#allocation10 + $0xb0] sm:$0xff] %v4161_v40 }
 0x393   :  { %3855 = vst [vmem:[#allocation10 + $0xb8] sm:$0xff] %v4162_v47 }
 0x395   :  { %v3813_v56 = vpop.f32.mrb[24].mxu0 }
 0x396   :  { %v4163_v3 = vadd.f32 %v3813_v56, %v6797_v4  ;;  %v3815_v53 = vpop.f32.mrb[25].mxu0 }
 0x397   :  { %v4164_v48 = vadd.f32 %v3815_v53, %v6801_v50  ;;  %v3817_v27 = vpop.f32.mrb[26].mxu0 }
 0x398   :  { %3856 = vst [vmem:[#allocation10 + $0xc0] sm:$0xff] %v4163_v3  ;;  %v4165_v15 = vadd.f32 %v3817_v27, %v6797_v4  ;;  %v3819_v10 = vpop.f32.mrb[27].mxu0 }
 0x399   :  { %3857 = vst [vmem:[#allocation10 + $0xc8] sm:$0xff] %v4164_v48  ;;  %v4166_v16 = vadd.f32 %v3819_v10, %v6801_v50 }
 0x39a   :  { %3858 = vst [vmem:[#allocation10 + $0xd0] sm:$0xff] %v4165_v15 }
 0x39b   :  { %3859 = vst [vmem:[#allocation10 + $0xd8] sm:$0xff] %v4166_v16 }
 0x39d   :  { %v3823_v62 = vpop.f32.mrb[28].mxu0 }
 0x39e   :  { %v4167_v58 = vadd.f32 %v3823_v62, %v6797_v4  ;;  %v3825_v23 = vpop.f32.mrb[29].mxu0 }
 0x39f   :  { %v4168_v32 = vadd.f32 %v3825_v23, %v6801_v50  ;;  %v3827_v33 = vpop.f32.mrb[30].mxu0 }
 0x3a0   :  { %3860 = vst [vmem:[#allocation10 + $0xe0] sm:$0xff] %v4167_v58  ;;  %v4169_v17 = vadd.f32 %v3827_v33, %v6797_v4  ;;  %v3829_v49 = vpop.f32.mrb[31].mxu0 }
 0x3a1   :  { %3861 = vst [vmem:[#allocation10 + $0xe8] sm:$0xff] %v4168_v32  ;;  %v4170_v43 = vadd.f32 %v3829_v49, %v6801_v50 }
 0x3a2   :  { %3862 = vst [vmem:[#allocation10 + $0xf0] sm:$0xff] %v4169_v17 }
 0x3a3   :  { %3863 = vst [vmem:[#allocation10 + $0xf8] sm:$0xff] %v4170_v43 }
 0x3a4   :  { %4827 = shalt.err (!%p4824_p8)
}
 0x3a5   :  { %s4828_s25 = scalar_lea.hbm %s6855_s5, 4096 }
 0x3a6   :  { %p4829_p9 = scmp.ne.s32.totalorder %s6855_s5, %s4828_s25  ;;  %p4832_p10 = scmp.lt.u32.totalorder %s4828_s25, %s6855_s5 }
 0x3a8   :  { %p4834_p11 = pnand %p4832_p10, %p4829_p9 }
 0x3aa   :  { %4837 = shalt.err (!%p4834_p11)
}
 0x3ab   :  { %3875 = dma.vmem_to_hbm [thread:$0]  %s3870_s21, 4096, %s6855_s5, [#allocation4], %s4850_s1, %s4850_s1, %s4851_s17  }
 0x3ac   :  { %4844 = dma.done.wait [#allocation4], 4096  }
 0x3ad   :  { %4845 = vsyncadd [#allocation4], 4294963200 }
 0x3ae   :  { %3879 = vsyncpa [#allocation3], 1 }
 0x3af   :  { %3880 = vsyncpa [#allocation6], 1 }
 0x3b0   :  { %3881 = vsyncpa [#allocation9], 1 }
 0x3b1   :  { %3882 = vsyncpa [#allocation4], 1 }

</bundles_post_ra>
